<compile_context>
chip_gen: v5e
topology: v5e:2x2
jax: 0.10.0
libtpu: 0.0.40
codegen_flags: <defaults>
</compile_context>

<pallas_src>
import math
import numpy as np
import jax
import jax.numpy as jnp
from jax.experimental import pallas as pl
from jax.experimental.pallas import tpu as pltpu

SAMPLE_RATE = 48000
N_FFT = 1024
WIN_LENGTH = 1024
HOP_LENGTH = 128
N_MELS = 128
N_FREQS = N_FFT // 2 + 1           # 513 (onesided)
F_PAD = 640                        # 513 padded up to a multiple of 128 (zero columns/rows)
PAD = (N_FFT - HOP_LENGTH) // 2    # 448
CLAMP_MIN = 1e-5
CHUNKS_PER_FRAME = N_FFT // HOP_LENGTH   # 8


# ------------------------------------------------------------------ parameters

def _hz_to_mel_slaney(f):
    f = np.asarray(f, dtype=np.float64)
    f_sp = 200.0 / 3
    mels = f / f_sp
    min_log_hz = 1000.0
    min_log_mel = min_log_hz / f_sp
    logstep = math.log(6.4) / 27.0
    return np.where(
        f >= min_log_hz,
        min_log_mel + np.log(np.maximum(f, min_log_hz) / min_log_hz) / logstep,
        mels,
    )


def _mel_to_hz_slaney(m):
    m = np.asarray(m, dtype=np.float64)
    f_sp = 200.0 / 3
    freqs = m * f_sp
    min_log_hz = 1000.0
    min_log_mel = min_log_hz / f_sp
    logstep = math.log(6.4) / 27.0
    return np.where(
        m >= min_log_mel,
        min_log_hz * np.exp(logstep * (m - min_log_mel)),
        freqs,
    )


def mel_filterbank():
    """Replicates torchaudio melscale_fbanks(513, 0, 24000, 128, 48000,
    norm='slaney', mel_scale='slaney'). Returns (n_freqs, n_mels) float32."""
    all_freqs = np.linspace(0.0, SAMPLE_RATE / 2, N_FREQS)
    m_min = _hz_to_mel_slaney(0.0)
    m_max = _hz_to_mel_slaney(SAMPLE_RATE / 2)
    m_pts = np.linspace(m_min, m_max, N_MELS + 2)
    f_pts = _mel_to_hz_slaney(m_pts)
    f_diff = f_pts[1:] - f_pts[:-1]                 # (n_mels+1,)
    slopes = f_pts[None, :] - all_freqs[:, None]    # (n_freqs, n_mels+2)
    down = -slopes[:, :-2] / f_diff[:-1]
    up = slopes[:, 2:] / f_diff[1:]
    fb = np.maximum(0.0, np.minimum(down, up))
    enorm = 2.0 / (f_pts[2:N_MELS + 2] - f_pts[:N_MELS])   # slaney norm
    fb = fb * enorm[None, :]
    return fb.astype(np.float32)


def hann_window():
    # torch.hann_window(1024), default periodic=True
    n = np.arange(N_FFT)
    return (0.5 * (1.0 - np.cos(2.0 * np.pi * n / WIN_LENGTH))).astype(np.float32)


def dft_basis():
    """Fused window+DFT basis: (N_FFT, 2*F_PAD) float32.

    Columns [0, 513)          = win[:,None] *  cos(2*pi*n*k/N)
    Columns [F_PAD, F_PAD+513) = win[:,None] * -sin(2*pi*n*k/N)  (true rfft imag part)
    Remaining columns are zero padding (to lane multiples of 128)."""
    n = np.arange(N_FFT)
    k = np.arange(N_FREQS)
    ang = 2.0 * np.pi * np.outer(n, k) / N_FFT
    win = hann_window()[:, None].astype(np.float64)
    basis = np.zeros((N_FFT, 2 * F_PAD), dtype=np.float32)
    basis[:, :N_FREQS] = (win * np.cos(ang)).astype(np.float32)
    basis[:, F_PAD:F_PAD + N_FREQS] = (-win * np.sin(ang)).astype(np.float32)
    return basis


# ------------------------------------------------------------------ kernel

def logmel_kernel(frames_ref, basis_ref, fb_ref, out_ref):
    # frames: (TM, N_FFT)   basis: (N_FFT, 2*F_PAD)   fb: (F_PAD, N_MELS)
    f = frames_ref[...]
    # Single MXU matmul produces [re | im] (window already folded into basis).
    reim = jnp.dot(f, basis_ref[...], preferred_element_type=jnp.float32)  # (TM, 2*F_PAD)
    re = reim[:, :F_PAD]
    im = reim[:, F_PAD:]
    mag = jnp.sqrt(re * re + im * im)                                      # |STFT|, power=1.0
    mel = jnp.dot(mag, fb_ref[...], preferred_element_type=jnp.float32)    # MXU
    out_ref[...] = jnp.log(jnp.maximum(mel, CLAMP_MIN))


# ------------------------------------------------------------------ wrapper

def log_mel_spectrogram(wav, *, tile_m=256):
    """wav: (B, T) float32  ->  (B, N_MELS, n_frames) float32."""
    B, T = wav.shape
    wav_p = jnp.pad(wav, ((0, 0), (PAD, PAD)), mode="reflect")
    L = T + 2 * PAD
    n_frames = (L - N_FFT) // HOP_LENGTH + 1

    # Framing: non-overlapping hop chunks + 8 shifted slices (cheap XLA copies,
    # avoids an integer gather).  frames[b, f, :] = wav_p[b, f*HOP : f*HOP + N_FFT].
    n_chunks = n_frames + CHUNKS_PER_FRAME - 1
    chunks = wav_p[:, :n_chunks * HOP_LENGTH].reshape(B, n_chunks, HOP_LENGTH)
    frames = jnp.concatenate(
        [chunks[:, k:k + n_frames, :] for k in range(CHUNKS_PER_FRAME)], axis=-1)
    frames = frames.reshape(B * n_frames, N_FFT)

    N = B * n_frames
    # Pick the largest row tile <= tile_m that is a multiple of 8 and not (much)
    # larger than the actual number of frame rows.
    tile = min(tile_m, ((N + 7) // 8) * 8)
    tile = max(8, (tile // 8) * 8)
    Np = ((N + tile - 1) // tile) * tile
    if Np != N:
        frames = jnp.pad(frames, ((0, Np - N), (0, 0)))

    basis = jnp.asarray(dft_basis())                                     # (1024, 1280)
    fb_np = mel_filterbank()                                             # (513, 128)
    fb_pad = jnp.asarray(np.pad(fb_np, ((0, F_PAD - N_FREQS), (0, 0))))  # (640, 128)

    grid = (Np // tile,)
    out = pl.pallas_call(
        logmel_kernel,
        out_shape=jax.ShapeDtypeStruct((Np, N_MELS), jnp.float32),
        grid_spec=pltpu.PrefetchScalarGridSpec(
            num_scalar_prefetch=0,
            grid=grid,
            in_specs=[
                pl.BlockSpec((tile, N_FFT), lambda i: (i, 0)),
                pl.BlockSpec((N_FFT, 2 * F_PAD), lambda i: (0, 0)),
                pl.BlockSpec((F_PAD, N_MELS), lambda i: (0, 0)),
            ],
            out_specs=pl.BlockSpec((tile, N_MELS), lambda i: (i, 0)),
        ),
        compiler_params=pltpu.CompilerParams(
            dimension_semantics=("parallel",),   # independent output tiles -> megacore
            vmem_limit_bytes=40 << 20,           # ~16 MiB used at tile=256; <64 MiB v7x
        ),
    )(frames, basis, fb_pad)

    out = out[:N].reshape(B, n_frames, N_MELS)
    return jnp.transpose(out, (0, 2, 1))   # (B, n_mels, n_frames)


# ------------------------------------------------------------------ main

if __name__ == "__main__":
    key = jax.random.PRNGKey(0)
    B, T = 2, 2048
    wav = jax.random.normal(key, (B, T), dtype=jnp.float32)

    logmel = jax.block_until_ready(log_mel_spectrogram(wav))

    # numpy reference (exact FFT path) for a sanity check
    wav_np = np.asarray(wav)
    wav_pad = np.pad(wav_np, ((0, 0), (PAD, PAD)), mode="reflect")
    n_frames = (wav_pad.shape[1] - N_FFT) // HOP_LENGTH + 1
    idx = np.arange(n_frames)[:, None] * HOP_LENGTH + np.arange(N_FFT)[None, :]
    fr = wav_pad[:, idx] * hann_window()[None, None, :]
    spec = np.abs(np.fft.rfft(fr, axis=-1))                    # (B, frames, 513)
    mel_ref = spec @ mel_filterbank()                          # (B, frames, 128)
    ref = np.log(np.maximum(mel_ref, CLAMP_MIN)).transpose(0, 2, 1)

    assert logmel.shape == (B, N_MELS, n_frames), logmel.shape
    max_err = float(np.max(np.abs(np.asarray(logmel) - ref)))
    assert max_err < 5e-2, f"max abs log-mel error {max_err}"

    print("KERNEL_OK")
</pallas_src>

<mosaic_0001>
module attributes {stable_mosaic.version = 11 : i64} {
  func.func @logmel_kernel(%arg0: i32, %arg1: memref<32x1024xf32, #tpu.memory_space<vmem>>, %arg2: memref<1024x1280xf32, #tpu.memory_space<vmem>>, %arg3: memref<640x128xf32, #tpu.memory_space<vmem>>, %arg4: memref<32x128xf32, #tpu.memory_space<vmem>>) attributes {dimension_semantics = [#tpu.dimension_semantics<parallel>], iteration_bounds = array<i64: 1>, scalar_prefetch = 0 : i64, scratch_operands = 0 : i64, tpu.core_type = #tpu.core_type<tc>, window_params = [{transform_indices = @transform_0, window_bounds = array<i64: 32, 1024>}, {pipeline_mode = #tpu.pipeline_mode<synchronous>, transform_indices = @transform_1, window_bounds = array<i64: 1024, 1280>}, {pipeline_mode = #tpu.pipeline_mode<synchronous>, transform_indices = @transform_2, window_bounds = array<i64: 640, 128>}, {transform_indices = @transform_3, window_bounds = array<i64: 32, 128>}]} {
    %c0 = arith.constant 0 : index
    %c0_0 = arith.constant 0 : index
    %0 = vector.load %arg1[%c0, %c0_0] : memref<32x1024xf32, #tpu.memory_space<vmem>>, vector<32x1024xf32>
    %c0_1 = arith.constant 0 : index
    %c0_2 = arith.constant 0 : index
    %1 = vector.load %arg2[%c0_1, %c0_2] : memref<1024x1280xf32, #tpu.memory_space<vmem>>, vector<1024x1280xf32>
    %cst = arith.constant dense<0.000000e+00> : vector<32x1280xf32>
    %2 = tpu.matmul %0, %1, %cst {dimension_numbers = #tpu.dot_dimension_numbers<[1], [0], [0], [1], [0, 0, 1, 1], [], []>} : vector<32x1024xf32>, vector<1024x1280xf32>, vector<32x1280xf32> -> vector<32x1280xf32>
    %3 = vector.extract_strided_slice %2 {offsets = [0, 0], sizes = [32, 640], strides = [1, 1]} : vector<32x1280xf32> to vector<32x640xf32>
    %4 = vector.extract_strided_slice %2 {offsets = [0, 640], sizes = [32, 640], strides = [1, 1]} : vector<32x1280xf32> to vector<32x640xf32>
    %5 = arith.mulf %3, %3 : vector<32x640xf32>
    %6 = arith.mulf %4, %4 : vector<32x640xf32>
    %7 = arith.addf %5, %6 : vector<32x640xf32>
    %8 = math.sqrt %7 : vector<32x640xf32>
    %c0_3 = arith.constant 0 : index
    %c0_4 = arith.constant 0 : index
    %9 = vector.load %arg3[%c0_3, %c0_4] : memref<640x128xf32, #tpu.memory_space<vmem>>, vector<640x128xf32>
    %cst_5 = arith.constant dense<0.000000e+00> : vector<32x128xf32>
    %10 = tpu.matmul %8, %9, %cst_5 {dimension_numbers = #tpu.dot_dimension_numbers<[1], [0], [0], [1], [0, 0, 1, 1], [], []>} : vector<32x640xf32>, vector<640x128xf32>, vector<32x128xf32> -> vector<32x128xf32>
    %cst_6 = arith.constant 9.99999974E-6 : f32
    %11 = vector.broadcast %cst_6 : f32 to vector<32x128xf32>
    %12 = arith.maximumf %10, %11 : vector<32x128xf32>
    %13 = math.log %12 : vector<32x128xf32>
    %c0_7 = arith.constant 0 : index
    %c0_8 = arith.constant 0 : index
    %14 = vector.load %arg4[%c0_7, %c0_8] : memref<32x128xf32, #tpu.memory_space<vmem>>, vector<32x128xf32>
    tpu.vector_store %arg4[%c0_7, %c0_8], %13 {strides = array<i32>} : memref<32x128xf32, #tpu.memory_space<vmem>>, vector<32x128xf32>,
    return
  }
  func.func @transform_0(%arg0: i32) -> (i32, i32) {
    %c0_i32 = arith.constant 0 : i32
    %c0_i32_0 = arith.constant 0 : i32
    return %arg0, %c0_i32 : i32, i32
  }
  func.func @transform_1(%arg0: i32) -> (i32, i32) {
    %c0_i32 = arith.constant 0 : i32
    %c0_i32_0 = arith.constant 0 : i32
    %c0_i32_1 = arith.constant 0 : i32
    return %c0_i32, %c0_i32_0 : i32, i32
  }
  func.func @transform_2(%arg0: i32) -> (i32, i32) {
    %c0_i32 = arith.constant 0 : i32
    %c0_i32_0 = arith.constant 0 : i32
    %c0_i32_1 = arith.constant 0 : i32
    return %c0_i32, %c0_i32_0 : i32, i32
  }
  func.func @transform_3(%arg0: i32) -> (i32, i32) {
    %c0_i32 = arith.constant 0 : i32
    %c0_i32_0 = arith.constant 0 : i32
    return %arg0, %c0_i32 : i32, i32
  }
}

</mosaic_0001>

<bundles_post_ra>
// kernel: tpu_custom_call.1
= control target key start
LH: loop header
LB: loop body
LE: loop exit
PB: predicated region body
PF: predicated region fallthrough
CT: control target
= control target key end

     0   :  { %8 = vsyncpa [#allocation3], 0  ;;  %s6323_s0 = inlined_call_operand.hbm [shape: f32[32,1024], index: 0, kind: input, shape index: {}]   ;;  %s6324_s1 = inlined_call_operand.hbm [shape: f32[1024,1280], index: 1, kind: input, shape index: {}]   ;;  %s6325_s2 = inlined_call_operand.hbm [shape: f32[640,128], index: 2, kind: input, shape index: {}]   ;;  %s6326_s3 = inlined_call_operand.hbm [shape: f32[32,128], index: 3, kind: output, shape index: {}]  }
   0x1   :  { %9 = vsyncpa [#allocation6], 0  ;;  %s28_s14 = sshll.u32 %s6324_s1, 4  ;;  %s29_s14 = int_to_ptr.hbm [resolvable:$true] %s28_s14 }
   0x2   :  { %10 = vsyncpa [#allocation4], 0  ;;  %s4603_s15 = smov [#allocation5]   ;;  %s15_s19 = sshll.u32 %s6323_s0, 4  ;;  %s16_s19 = int_to_ptr.hbm [resolvable:$true] %s15_s19 }
   0x3   :  { %s30_s16 = sshll.u32 %s4603_s15, 4  ;;  %s4604_s20 = smov 1280   ;;  %s31_s16 = int_to_ptr.vmem [resolvable:$true] %s30_s16 }
   0x4   :  { %s4605_s21 = smov 80   ;;  %s4606_s22 = smov [#allocation2]  }
   0x5   :  { %36 = dma.hbm_to_vmem [thread:$0]  %s29_s14, 163840, %s31_s16, [#allocation6], %s4604_s20, %s4604_s20, %s4605_s21  }
   0x6   :  { %s17_s23 = sshll.u32 %s4606_s22, 4  ;;  %s4607_s24 = smov 1024   ;;  %s18_s23 = int_to_ptr.vmem [resolvable:$true] %s17_s23 }
   0x7   :  { %s4608_s25 = smov 64   ;;  %s41_s27 = sshll.u32 %s6325_s2, 4  ;;  %s42_s27 = int_to_ptr.hbm [resolvable:$true] %s41_s27 }
   0x8   :  { %23 = dma.hbm_to_vmem [thread:$0]  %s16_s19, 4096, %s18_s23, [#allocation3], %s4607_s24, %s4607_s24, %s4608_s25  }
   0x9   :  { %s4609_s28 = smov [#allocation7]   ;;  %s4610_s30 = smov 128  }
   0xa   :  { %s43_s29 = sshll.u32 %s4609_s28, 4  ;;  %s4611_s0 = smov 8   ;;  %s44_s29 = int_to_ptr.vmem [resolvable:$true] %s43_s29 }
   0xb   :  { %49 = dma.hbm_to_vmem [thread:$0]  %s42_s27, 10240, %s44_s29, [#allocation6], %s4610_s30, %s4610_s30, %s4611_s0  }
   0xc   :  { %4597 = dma.done.wait [#allocation3], 4096  }
   0xd   :  { %4598 = vsyncadd [#allocation3], 4294963200 }
   0xe   :  { %4599 = dma.done.wait [#allocation6], 174080  }
   0xf   :  { %4600 = vsyncadd [#allocation6], 4294793216  ;;  %v244_v0 = vld [vmem:[#allocation5 + $0x4b0] sm:$0xff]  ;;  %v234_v3 = vld [vmem:[#allocation5 + $0x460] sm:$0xff]  ;;  %s4612_s2 = smov [#allocation8]   ;;  %s4241_s7 = sshll.u32 %s6326_s3, 4  ;;  %s4242_s7 = int_to_ptr.hbm [resolvable:$true] %s4241_s7 }
  0x10   :  { %v404_v1 = vld [vmem:[#allocation5 + $0x9b0] sm:$0xff]  ;;  %1374 = vmatpush.msra.mxu0 %v244_v0  ;;  %v394_v4 = vld [vmem:[#allocation5 + $0x960] sm:$0xff]  ;;  %v4647_v0 = vld [vmem:[#allocation2 + $0x8] sm:$0xff]  ;;  %s4239_s4 = sshll.u32 %s4612_s2, 4  ;;  %s4240_s4 = int_to_ptr.vmem [resolvable:$true] %s4239_s4 }
  0x11   :  { %v564_v2 = vld [vmem:[#allocation5 + $0xeb0] sm:$0xff]  ;;  %1403 = vmatpush.msra.mxu1 %v404_v1  ;;  %v554_v5 = vld [vmem:[#allocation5 + $0xe60] sm:$0xff] }
  0x12   :  { %1432 = vmatpush.msra.mxu2 %v564_v2  ;;  %v724_v6 = vld [vmem:[#allocation5 + $0x13b0] sm:$0xff]  ;;  %1375 = vmatpush.msra.mxu0 %v234_v3  ;;  %v714_v10 = vld [vmem:[#allocation5 + $0x1360] sm:$0xff] }
  0x13   :  { %v224_v7 = vld [vmem:[#allocation5 + $0x410] sm:$0xff]  ;;  %1404 = vmatpush.msra.mxu1 %v394_v4  ;;  %1461 = vmatpush.msra.mxu3 %v724_v6  ;;  %v214_v11 = vld [vmem:[#allocation5 + $0x3c0] sm:$0xff]  ;;  %v4653_v6 = vld [vmem:[#allocation2 + $0x18] sm:$0xff] }
  0x14   :  { %v384_v8 = vld [vmem:[#allocation5 + $0x910] sm:$0xff]  ;;  %1433 = vmatpush.msra.mxu2 %v554_v5  ;;  %v374_v12 = vld [vmem:[#allocation5 + $0x8c0] sm:$0xff]  ;;  %1376 = vmatpush.msra.mxu0 %v224_v7 }
  0x15   :  { %v544_v9 = vld [vmem:[#allocation5 + $0xe10] sm:$0xff]  ;;  %1405 = vmatpush.msra.mxu1 %v384_v8  ;;  %v534_v13 = vld [vmem:[#allocation5 + $0xdc0] sm:$0xff]  ;;  %1462 = vmatpush.msra.mxu3 %v714_v10 }
  0x16   :  { %v704_v14 = vld [vmem:[#allocation5 + $0x1310] sm:$0xff]  ;;  %1434 = vmatpush.msra.mxu2 %v544_v9  ;;  %1377 = vmatpush.msra.mxu0 %v214_v11  ;;  %v694_v18 = vld [vmem:[#allocation5 + $0x12c0] sm:$0xff] }
  0x17   :  { %v204_v15 = vld [vmem:[#allocation5 + $0x370] sm:$0xff]  ;;  %1406 = vmatpush.msra.mxu1 %v374_v12  ;;  %1463 = vmatpush.msra.mxu3 %v704_v14  ;;  %v194_v19 = vld [vmem:[#allocation5 + $0x320] sm:$0xff] }
  0x18   :  { %v364_v16 = vld [vmem:[#allocation5 + $0x870] sm:$0xff]  ;;  %1435 = vmatpush.msra.mxu2 %v534_v13  ;;  %v354_v20 = vld [vmem:[#allocation5 + $0x820] sm:$0xff]  ;;  %1378 = vmatpush.msra.mxu0 %v204_v15 }
  0x19   :  { %v524_v17 = vld [vmem:[#allocation5 + $0xd70] sm:$0xff]  ;;  %1407 = vmatpush.msra.mxu1 %v364_v16  ;;  %v514_v21 = vld [vmem:[#allocation5 + $0xd20] sm:$0xff]  ;;  %1464 = vmatpush.msra.mxu3 %v694_v18 }
  0x1a   :  { %v684_v22 = vld [vmem:[#allocation5 + $0x1270] sm:$0xff]  ;;  %1436 = vmatpush.msra.mxu2 %v524_v17  ;;  %1379 = vmatpush.msra.mxu0 %v194_v19  ;;  %v674_v26 = vld [vmem:[#allocation5 + $0x1220] sm:$0xff] }
  0x1b   :  { %v184_v23 = vld [vmem:[#allocation5 + $0x2d0] sm:$0xff]  ;;  %1408 = vmatpush.msra.mxu1 %v354_v20  ;;  %1465 = vmatpush.msra.mxu3 %v684_v22  ;;  %v174_v27 = vld [vmem:[#allocation5 + $0x280] sm:$0xff]  ;;  %v4659_v20 = vld [vmem:[#allocation2 + $0x48] sm:$0xff] }
  0x1c   :  { %v344_v24 = vld [vmem:[#allocation5 + $0x7d0] sm:$0xff]  ;;  %1437 = vmatpush.msra.mxu2 %v514_v21  ;;  %v334_v28 = vld [vmem:[#allocation5 + $0x780] sm:$0xff]  ;;  %1380 = vmatpush.msra.mxu0 %v184_v23 }
  0x1d   :  { %v504_v25 = vld [vmem:[#allocation5 + $0xcd0] sm:$0xff]  ;;  %1409 = vmatpush.msra.mxu1 %v344_v24  ;;  %v494_v29 = vld [vmem:[#allocation5 + $0xc80] sm:$0xff]  ;;  %1466 = vmatpush.msra.mxu3 %v674_v26  ;;  %v4665_v26 = vld [vmem:[#allocation2 + $0x58] sm:$0xff] }
  0x1e   :  { %v664_v30 = vld [vmem:[#allocation5 + $0x11d0] sm:$0xff]  ;;  %1438 = vmatpush.msra.mxu2 %v504_v25  ;;  %1381 = vmatpush.msra.mxu0 %v174_v27  ;;  %v654_v34 = vld [vmem:[#allocation5 + $0x1180] sm:$0xff] }
  0x1f   :  { %v164_v31 = vld [vmem:[#allocation5 + $0x230] sm:$0xff]  ;;  %1410 = vmatpush.msra.mxu1 %v334_v28  ;;  %1467 = vmatpush.msra.mxu3 %v664_v30  ;;  %v154_v35 = vld [vmem:[#allocation5 + $0x1e0] sm:$0xff] }
  0x20   :  { %v324_v32 = vld [vmem:[#allocation5 + $0x730] sm:$0xff]  ;;  %1439 = vmatpush.msra.mxu2 %v494_v29  ;;  %v314_v36 = vld [vmem:[#allocation5 + $0x6e0] sm:$0xff]  ;;  %1382 = vmatpush.msra.mxu0 %v164_v31 }
  0x21   :  { %v484_v33 = vld [vmem:[#allocation5 + $0xc30] sm:$0xff]  ;;  %1411 = vmatpush.msra.mxu1 %v324_v32  ;;  %v474_v37 = vld [vmem:[#allocation5 + $0xbe0] sm:$0xff]  ;;  %1468 = vmatpush.msra.mxu3 %v654_v34 }
  0x22   :  { %v644_v38 = vld [vmem:[#allocation5 + $0x1130] sm:$0xff]  ;;  %1440 = vmatpush.msra.mxu2 %v484_v33  ;;  %1383 = vmatpush.msra.mxu0 %v154_v35  ;;  %v634_v42 = vld [vmem:[#allocation5 + $0x10e0] sm:$0xff] }
  0x23   :  { %v144_v39 = vld [vmem:[#allocation5 + $0x190] sm:$0xff]  ;;  %1412 = vmatpush.msra.mxu1 %v314_v36  ;;  %1469 = vmatpush.msra.mxu3 %v644_v38  ;;  %v134_v43 = vld [vmem:[#allocation5 + $0x140] sm:$0xff] }
  0x24   :  { %v304_v40 = vld [vmem:[#allocation5 + $0x690] sm:$0xff]  ;;  %1441 = vmatpush.msra.mxu2 %v474_v37  ;;  %v294_v44 = vld [vmem:[#allocation5 + $0x640] sm:$0xff]  ;;  %1384 = vmatpush.msra.mxu0 %v144_v39 }
  0x25   :  { %v464_v41 = vld [vmem:[#allocation5 + $0xb90] sm:$0xff]  ;;  %1413 = vmatpush.msra.mxu1 %v304_v40  ;;  %v454_v45 = vld [vmem:[#allocation5 + $0xb40] sm:$0xff]  ;;  %1470 = vmatpush.msra.mxu3 %v634_v42  ;;  %v4671_v40 = vld [vmem:[#allocation2 + $0x88] sm:$0xff] }
  0x26   :  { %v624_v46 = vld [vmem:[#allocation5 + $0x1090] sm:$0xff]  ;;  %1442 = vmatpush.msra.mxu2 %v464_v41  ;;  %1385 = vmatpush.msra.mxu0 %v134_v43  ;;  %v614_v50 = vld [vmem:[#allocation5 + $0x1040] sm:$0xff] }
  0x27   :  { %v124_v47 = vld [vmem:[#allocation5 + $0xf0] sm:$0xff]  ;;  %1414 = vmatpush.msra.mxu1 %v294_v44  ;;  %1471 = vmatpush.msra.mxu3 %v624_v46  ;;  %v114_v51 = vld [vmem:[#allocation5 + $0xa0] sm:$0xff]  ;;  %v4677_v46 = vld [vmem:[#allocation2 + $0x98] sm:$0xff] }
  0x28   :  { %v284_v48 = vld [vmem:[#allocation5 + $0x5f0] sm:$0xff]  ;;  %1443 = vmatpush.msra.mxu2 %v454_v45  ;;  %v274_v52 = vld [vmem:[#allocation5 + $0x5a0] sm:$0xff]  ;;  %1386 = vmatpush.msra.mxu0 %v124_v47 }
  0x29   :  { %v444_v49 = vld [vmem:[#allocation5 + $0xaf0] sm:$0xff]  ;;  %1415 = vmatpush.msra.mxu1 %v284_v48  ;;  %v434_v53 = vld [vmem:[#allocation5 + $0xaa0] sm:$0xff]  ;;  %1472 = vmatpush.msra.mxu3 %v614_v50 }
  0x2a   :  { %v604_v54 = vld [vmem:[#allocation5 + $0xff0] sm:$0xff]  ;;  %1444 = vmatpush.msra.mxu2 %v444_v49  ;;  %1387 = vmatpush.msra.mxu0 %v114_v51  ;;  %v594_v58 = vld [vmem:[#allocation5 + $0xfa0] sm:$0xff] }
  0x2b   :  { %v104_v55 = vld [vmem:[#allocation5 + $0x50] sm:$0xff]  ;;  %1416 = vmatpush.msra.mxu1 %v274_v52  ;;  %1473 = vmatpush.msra.mxu3 %v604_v54  ;;  %v94_v59 = vld [vmem:[#allocation5] sm:$0xff] }
  0x2c   :  { %v264_v56 = vld [vmem:[#allocation5 + $0x550] sm:$0xff]  ;;  %1445 = vmatpush.msra.mxu2 %v434_v53  ;;  %v254_v60 = vld [vmem:[#allocation5 + $0x500] sm:$0xff]  ;;  %1388 = vmatpush.msra.mxu0 %v104_v55 }
  0x2d   :  { %v424_v57 = vld [vmem:[#allocation5 + $0xa50] sm:$0xff]  ;;  %1417 = vmatpush.msra.mxu1 %v264_v56  ;;  %v414_v61 = vld [vmem:[#allocation5 + $0xa00] sm:$0xff]  ;;  %1474 = vmatpush.msra.mxu3 %v594_v58 }
  0x2e   :  { %v584_v62 = vld [vmem:[#allocation5 + $0xf50] sm:$0xff]  ;;  %1446 = vmatpush.msra.mxu2 %v424_v57  ;;  %v4645_v63 = vld [vmem:[#allocation2] sm:$0xff]  ;;  %1389 = vmatpush.msra.mxu0 %v94_v59 }
  0x2f   :  { %1418 = vmatpush.msra.mxu1 %v254_v60  ;;  %v4649_v1 = vld [vmem:[#allocation2 + $0x10] sm:$0xff]  ;;  %v574_v2 = vld [vmem:[#allocation5 + $0xf00] sm:$0xff]  ;;  %1475 = vmatpush.msra.mxu3 %v584_v62  ;;  %v4683_v60 = vld [vmem:[#allocation2 + $0xc8] sm:$0xff] }
  0x30   :  { %1447 = vmatpush.msra.mxu2 %v414_v61  ;;  %v1204_v3 = vld [vmem:[#allocation5 + $0x22b0] sm:$0xff]  ;;  %1390 = vmatmul.f32.vlgmr.msra.gmra.mxu0 %v4645_v63  ;;  %v1194_v7 = vld [vmem:[#allocation5 + $0x2260] sm:$0xff] }
  0x31   :  { %v884_v4 = vld [vmem:[#allocation5 + $0x18b0] sm:$0xff]  ;;  %1419 = vmatmul.f32.vlgmr.msra.gmra.mxu1 %v4647_v0  ;;  %1448 = vmatmul.f32.vlgmr.msra.gmra.mxu2 %v4649_v1  ;;  %v874_v9 = vld [vmem:[#allocation5 + $0x1860] sm:$0xff] }
  0x32   :  { %v1044_v5 = vld [vmem:[#allocation5 + $0x1db0] sm:$0xff]  ;;  %1476 = vmatpush.msra.mxu3 %v574_v2  ;;  %1548 = vmatpush.msrb.mxu2 %v1204_v3  ;;  %v1034_v10 = vld [vmem:[#allocation5 + $0x1d60] sm:$0xff] }
  0x33   :  { %v1364_v8 = vld [vmem:[#allocation5 + $0x27b0] sm:$0xff]  ;;  %1490 = vmatpush.msrb.mxu0 %v884_v4  ;;  %1519 = vmatpush.msrb.mxu1 %v1044_v5  ;;  %v1354_v12 = vld [vmem:[#allocation5 + $0x2760] sm:$0xff]  ;;  %v4689_v5 = vld [vmem:[#allocation2 + $0xd8] sm:$0xff] }
  0x34   :  { %1477 = vmatmul.f32.vlgmr.msra.gmra.mxu3 %v4653_v6  ;;  %v1184_v11 = vld [vmem:[#allocation5 + $0x2210] sm:$0xff]  ;;  %1549 = vmatpush.msrb.mxu2 %v1194_v7  ;;  %v1174_v15 = vld [vmem:[#allocation5 + $0x21c0] sm:$0xff] }
  0x35   :  { %1577 = vmatpush.msrb.mxu3 %v1364_v8  ;;  %v864_v13 = vld [vmem:[#allocation5 + $0x1810] sm:$0xff]  ;;  %1491 = vmatpush.msrb.mxu0 %v874_v9  ;;  %v854_v17 = vld [vmem:[#allocation5 + $0x17c0] sm:$0xff] }
  0x36   :  { %v1024_v14 = vld [vmem:[#allocation5 + $0x1d10] sm:$0xff]  ;;  %1520 = vmatpush.msrb.mxu1 %v1034_v10  ;;  %1550 = vmatpush.msrb.mxu2 %v1184_v11  ;;  %v1014_v18 = vld [vmem:[#allocation5 + $0x1cc0] sm:$0xff] }
  0x37   :  { %v1344_v16 = vld [vmem:[#allocation5 + $0x2710] sm:$0xff]  ;;  %1578 = vmatpush.msrb.mxu3 %v1354_v12  ;;  %1492 = vmatpush.msrb.mxu0 %v864_v13  ;;  %v4657_v19 = vld [vmem:[#allocation2 + $0x40] sm:$0xff] }
  0x38   :  { %1521 = vmatpush.msrb.mxu1 %v1024_v14  ;;  %1551 = vmatpush.msrb.mxu2 %v1174_v15  ;;  %v4661_v21 = vld [vmem:[#allocation2 + $0x50] sm:$0xff]  ;;  %v1334_v22 = vld [vmem:[#allocation5 + $0x26c0] sm:$0xff] }
  0x39   :  { %1579 = vmatpush.msrb.mxu3 %v1344_v16  ;;  %1493 = vmatpush.msrb.mxu0 %v854_v17  ;;  %v1164_v23 = vld [vmem:[#allocation5 + $0x2170] sm:$0xff]  ;;  %v1154_v27 = vld [vmem:[#allocation5 + $0x2120] sm:$0xff] }
  0x3a   :  { %1522 = vmatpush.msrb.mxu1 %v1014_v18  ;;  %v844_v24 = vld [vmem:[#allocation5 + $0x1770] sm:$0xff]  ;;  %1393 = vmatmul.f32.gmra.mxu0 %v4657_v19  ;;  %v834_v29 = vld [vmem:[#allocation5 + $0x1720] sm:$0xff] }
  0x3b   :  { %1422 = vmatmul.f32.gmra.mxu1 %v4659_v20  ;;  %v1004_v25 = vld [vmem:[#allocation5 + $0x1c70] sm:$0xff]  ;;  %1451 = vmatmul.f32.gmra.mxu2 %v4661_v21  ;;  %v994_v30 = vld [vmem:[#allocation5 + $0x1c20] sm:$0xff] }
  0x3c   :  { %1580 = vmatpush.msrb.mxu3 %v1334_v22  ;;  %v1324_v28 = vld [vmem:[#allocation5 + $0x2670] sm:$0xff]  ;;  %1552 = vmatpush.msrb.mxu2 %v1164_v23  ;;  %v1314_v32 = vld [vmem:[#allocation5 + $0x2620] sm:$0xff]  ;;  %v4695_v23 = vld [vmem:[#allocation2 + $0x28] sm:$0xff] }
  0x3d   :  { %1494 = vmatpush.msrb.mxu0 %v844_v24  ;;  %1523 = vmatpush.msrb.mxu1 %v1004_v25  ;;  %v1144_v31 = vld [vmem:[#allocation5 + $0x20d0] sm:$0xff]  ;;  %v1134_v35 = vld [vmem:[#allocation5 + $0x2080] sm:$0xff] }
  0x3e   :  { %1480 = vmatmul.f32.gmra.mxu3 %v4665_v26  ;;  %1553 = vmatpush.msrb.mxu2 %v1154_v27  ;;  %v824_v33 = vld [vmem:[#allocation5 + $0x16d0] sm:$0xff]  ;;  %v814_v37 = vld [vmem:[#allocation5 + $0x1680] sm:$0xff]  ;;  %v565_v27 = vld [vmem:[#allocation5 + $0xeb8] sm:$0xff] }
  0x3f   :  { %1581 = vmatpush.msrb.mxu3 %v1324_v28  ;;  %v984_v34 = vld [vmem:[#allocation5 + $0x1bd0] sm:$0xff]  ;;  %1495 = vmatpush.msrb.mxu0 %v834_v29  ;;  %v974_v38 = vld [vmem:[#allocation5 + $0x1b80] sm:$0xff]  ;;  %v245_v28 = vld [vmem:[#allocation5 + $0x4b8] sm:$0xff] }
  0x40   :  { %1524 = vmatpush.msrb.mxu1 %v994_v30  ;;  %v1304_v36 = vld [vmem:[#allocation5 + $0x25d0] sm:$0xff]  ;;  %1554 = vmatpush.msrb.mxu2 %v1144_v31  ;;  %v4669_v39 = vld [vmem:[#allocation2 + $0x80] sm:$0xff]  ;;  %v405_v29 = vld [vmem:[#allocation5 + $0x9b8] sm:$0xff] }
  0x41   :  { %1582 = vmatpush.msrb.mxu3 %v1314_v32  ;;  %1496 = vmatpush.msrb.mxu0 %v824_v33  ;;  %v4673_v41 = vld [vmem:[#allocation2 + $0x90] sm:$0xff]  ;;  %v1294_v42 = vld [vmem:[#allocation5 + $0x2580] sm:$0xff]  ;;  %v4701_v30 = vld [vmem:[#allocation2 + $0x38] sm:$0xff] }
  0x42   :  { %1525 = vmatpush.msrb.mxu1 %v984_v34  ;;  %1555 = vmatpush.msrb.mxu2 %v1134_v35  ;;  %v1124_v43 = vld [vmem:[#allocation5 + $0x2030] sm:$0xff]  ;;  %v1114_v47 = vld [vmem:[#allocation5 + $0x1fe0] sm:$0xff]  ;;  %v555_v31 = vld [vmem:[#allocation5 + $0xe68] sm:$0xff] }
  0x43   :  { %1583 = vmatpush.msrb.mxu3 %v1304_v36  ;;  %1497 = vmatpush.msrb.mxu0 %v814_v37  ;;  %v804_v44 = vld [vmem:[#allocation5 + $0x1630] sm:$0xff]  ;;  %v794_v49 = vld [vmem:[#allocation5 + $0x15e0] sm:$0xff]  ;;  %v725_v32 = vld [vmem:[#allocation5 + $0x13b8] sm:$0xff] }
  0x44   :  { %1526 = vmatpush.msrb.mxu1 %v974_v38  ;;  %1396 = vmatmul.f32.gmra.mxu0 %v4669_v39  ;;  %v964_v45 = vld [vmem:[#allocation5 + $0x1b30] sm:$0xff]  ;;  %v954_v50 = vld [vmem:[#allocation5 + $0x1ae0] sm:$0xff]  ;;  %v235_v33 = vld [vmem:[#allocation5 + $0x468] sm:$0xff] }
  0x45   :  { %1425 = vmatmul.f32.gmra.mxu1 %v4671_v40  ;;  %1454 = vmatmul.f32.gmra.mxu2 %v4673_v41  ;;  %v1284_v48 = vld [vmem:[#allocation5 + $0x2530] sm:$0xff]  ;;  %v1274_v52 = vld [vmem:[#allocation5 + $0x24e0] sm:$0xff]  ;;  %v395_v34 = vld [vmem:[#allocation5 + $0x968] sm:$0xff] }
  0x46   :  { %1584 = vmatpush.msrb.mxu3 %v1294_v42  ;;  %1556 = vmatpush.msrb.mxu2 %v1124_v43  ;;  %v1104_v51 = vld [vmem:[#allocation5 + $0x1f90] sm:$0xff]  ;;  %v1094_v55 = vld [vmem:[#allocation5 + $0x1f40] sm:$0xff]  ;;  %v545_v35 = vld [vmem:[#allocation5 + $0xe18] sm:$0xff] }
  0x47   :  { %1498 = vmatpush.msrb.mxu0 %v804_v44  ;;  %1527 = vmatpush.msrb.mxu1 %v964_v45  ;;  %v784_v53 = vld [vmem:[#allocation5 + $0x1590] sm:$0xff]  ;;  %v774_v57 = vld [vmem:[#allocation5 + $0x1540] sm:$0xff]  ;;  %v715_v36 = vld [vmem:[#allocation5 + $0x1368] sm:$0xff] }
  0x48   :  { %1483 = vmatmul.f32.gmra.mxu3 %v4677_v46  ;;  %1557 = vmatpush.msrb.mxu2 %v1114_v47  ;;  %v944_v54 = vld [vmem:[#allocation5 + $0x1a90] sm:$0xff]  ;;  %v934_v58 = vld [vmem:[#allocation5 + $0x1a40] sm:$0xff]  ;;  %v225_v37 = vld [vmem:[#allocation5 + $0x418] sm:$0xff] }
  0x49   :  { %1585 = vmatpush.msrb.mxu3 %v1284_v48  ;;  %1499 = vmatpush.msrb.mxu0 %v794_v49  ;;  %v1264_v56 = vld [vmem:[#allocation5 + $0x2490] sm:$0xff]  ;;  %v4681_v59 = vld [vmem:[#allocation2 + $0xc0] sm:$0xff]  ;;  %v385_v38 = vld [vmem:[#allocation5 + $0x918] sm:$0xff] }
  0x4a   :  { %1528 = vmatpush.msrb.mxu1 %v954_v50  ;;  %1558 = vmatpush.msrb.mxu2 %v1104_v51  ;;  %v4685_v61 = vld [vmem:[#allocation2 + $0xd0] sm:$0xff]  ;;  %v1254_v62 = vld [vmem:[#allocation5 + $0x2440] sm:$0xff]  ;;  %v535_v42 = vld [vmem:[#allocation5 + $0xdc8] sm:$0xff] }
  0x4b   :  { %1586 = vmatpush.msrb.mxu3 %v1274_v52  ;;  %1500 = vmatpush.msrb.mxu0 %v784_v53  ;;  %v1084_v2 = vld [vmem:[#allocation5 + $0x1ef0] sm:$0xff]  ;;  %v1074_v7 = vld [vmem:[#allocation5 + $0x1ea0] sm:$0xff]  ;;  %v705_v43 = vld [vmem:[#allocation5 + $0x1318] sm:$0xff] }
  0x4c   :  { %1529 = vmatpush.msrb.mxu1 %v944_v54  ;;  %1559 = vmatpush.msrb.mxu2 %v1094_v55  ;;  %v764_v3 = vld [vmem:[#allocation5 + $0x14f0] sm:$0xff]  ;;  %v754_v9 = vld [vmem:[#allocation5 + $0x14a0] sm:$0xff]  ;;  %v215_v44 = vld [vmem:[#allocation5 + $0x3c8] sm:$0xff] }
  0x4d   :  { %1587 = vmatpush.msrb.mxu3 %v1264_v56  ;;  %1501 = vmatpush.msrb.mxu0 %v774_v57  ;;  %v924_v4 = vld [vmem:[#allocation5 + $0x19f0] sm:$0xff]  ;;  %v914_v10 = vld [vmem:[#allocation5 + $0x19a0] sm:$0xff]  ;;  %v375_v45 = vld [vmem:[#allocation5 + $0x8c8] sm:$0xff] }
  0x4e   :  { %1530 = vmatpush.msrb.mxu1 %v934_v58  ;;  %1399 = vmatmul.f32.gmra.mxu0 %v4681_v59  ;;  %v1244_v8 = vld [vmem:[#allocation5 + $0x23f0] sm:$0xff]  ;;  %v1234_v12 = vld [vmem:[#allocation5 + $0x23a0] sm:$0xff]  ;;  %v4707_v48 = vld [vmem:[#allocation2 + $0x68] sm:$0xff] }
  0x4f   :  { %1428 = vmatmul.f32.gmra.mxu1 %v4683_v60  ;;  %1457 = vmatmul.f32.gmra.mxu2 %v4685_v61  ;;  %v1064_v11 = vld [vmem:[#allocation5 + $0x1e50] sm:$0xff]  ;;  %v1054_v15 = vld [vmem:[#allocation5 + $0x1e00] sm:$0xff]  ;;  %v695_v50 = vld [vmem:[#allocation5 + $0x12c8] sm:$0xff] }
  0x50   :  { %1588 = vmatpush.msrb.mxu3 %v1254_v62  ;;  %1560 = vmatpush.msrb.mxu2 %v1084_v2  ;;  %v744_v13 = vld [vmem:[#allocation5 + $0x1450] sm:$0xff]  ;;  %v734_v17 = vld [vmem:[#allocation5 + $0x1400] sm:$0xff]  ;;  %v525_v51 = vld [vmem:[#allocation5 + $0xd78] sm:$0xff] }
  0x51   :  { %1502 = vmatpush.msrb.mxu0 %v764_v3  ;;  %1531 = vmatpush.msrb.mxu1 %v924_v4  ;;  %v904_v14 = vld [vmem:[#allocation5 + $0x1950] sm:$0xff]  ;;  %v894_v18 = vld [vmem:[#allocation5 + $0x1900] sm:$0xff]  ;;  %v205_v52 = vld [vmem:[#allocation5 + $0x378] sm:$0xff] }
  0x52   :  { %1486 = vmatmul.f32.gmra.mxu3 %v4689_v5  ;;  %1561 = vmatpush.msrb.mxu2 %v1074_v7  ;;  %v1224_v16 = vld [vmem:[#allocation5 + $0x2350] sm:$0xff]  ;;  %v4693_v22 = vld [vmem:[#allocation2 + $0x20] sm:$0xff]  ;;  %v365_v53 = vld [vmem:[#allocation5 + $0x878] sm:$0xff] }
  0x53   :  { %1589 = vmatpush.msrb.mxu3 %v1244_v8  ;;  %1503 = vmatpush.msrb.mxu0 %v754_v9  ;;  %v4697_v24 = vld [vmem:[#allocation2 + $0x30] sm:$0xff]  ;;  %v1214_v25 = vld [vmem:[#allocation5 + $0x2300] sm:$0xff]  ;;  %v4713_v54 = vld [vmem:[#allocation2 + $0x78] sm:$0xff] }
  0x54   :  { %1532 = vmatpush.msrb.mxu1 %v914_v10  ;;  %1562 = vmatpush.msrb.mxu2 %v1064_v11  ;;  %v4705_v47 = vld [vmem:[#allocation2 + $0x60] sm:$0xff]  ;;  %v4709_v49 = vld [vmem:[#allocation2 + $0x70] sm:$0xff]  ;;  %v515_v55 = vld [vmem:[#allocation5 + $0xd28] sm:$0xff] }
  0x55   :  { %1590 = vmatpush.msrb.mxu3 %v1234_v12  ;;  %1504 = vmatpush.msrb.mxu0 %v744_v13  ;;  %v685_v56 = vld [vmem:[#allocation5 + $0x1278] sm:$0xff]  ;;  %v195_v57 = vld [vmem:[#allocation5 + $0x328] sm:$0xff]  ;;  %v4717_v11 = vld [vmem:[#allocation2 + $0xa0] sm:$0xff] }
  0x56   :  { %1533 = vmatpush.msrb.mxu1 %v904_v14  ;;  %1563 = vmatpush.msrb.mxu2 %v1054_v15  ;;  %v355_v58 = vld [vmem:[#allocation5 + $0x828] sm:$0xff]  ;;  %v505_v62 = vld [vmem:[#allocation5 + $0xcd8] sm:$0xff]  ;;  %v4721_v13 = vld [vmem:[#allocation2 + $0xb0] sm:$0xff] }
  0x57   :  { %1591 = vmatpush.msrb.mxu3 %v1224_v16  ;;  %1505 = vmatpush.msrb.mxu0 %v734_v17  ;;  %v675_v2 = vld [vmem:[#allocation5 + $0x1228] sm:$0xff]  ;;  %v185_v3 = vld [vmem:[#allocation5 + $0x2d8] sm:$0xff] }
  0x58   :  { %1534 = vmatpush.msrb.mxu1 %v894_v18  ;;  %1506 = vmatmul.f32.vlgmr.msrb.gmra.mxu0 %v4693_v22  ;;  %v345_v4 = vld [vmem:[#allocation5 + $0x7d8] sm:$0xff]  ;;  %v495_v7 = vld [vmem:[#allocation5 + $0xc88] sm:$0xff] }
  0x59   :  { %1535 = vmatmul.f32.vlgmr.msrb.gmra.mxu1 %v4695_v23  ;;  %1564 = vmatmul.f32.vlgmr.msrb.gmra.mxu2 %v4697_v24  ;;  %v665_v8 = vld [vmem:[#allocation5 + $0x11d8] sm:$0xff]  ;;  %v175_v9 = vld [vmem:[#allocation5 + $0x288] sm:$0xff] }
  0x5a   :  { %1592 = vmatpush.msrb.mxu3 %v1214_v25  ;;  %1664 = vmatpush.msra.mxu2 %v565_v27  ;;  %v335_v10 = vld [vmem:[#allocation5 + $0x788] sm:$0xff]  ;;  %v485_v15 = vld [vmem:[#allocation5 + $0xc38] sm:$0xff] }
  0x5b   :  { %1606 = vmatpush.msra.mxu0 %v245_v28  ;;  %1635 = vmatpush.msra.mxu1 %v405_v29  ;;  %v4719_v12 = vld [vmem:[#allocation2 + $0xa8] sm:$0xff]  ;;  %v165_v16 = vld [vmem:[#allocation5 + $0x238] sm:$0xff] }
  0x5c   :  { %1593 = vmatmul.f32.vlgmr.msrb.gmra.mxu3 %v4701_v30  ;;  %1665 = vmatpush.msra.mxu2 %v555_v31  ;;  %v655_v14 = vld [vmem:[#allocation5 + $0x1188] sm:$0xff]  ;;  %v325_v17 = vld [vmem:[#allocation5 + $0x738] sm:$0xff] }
  0x5d   :  { %1693 = vmatpush.msra.mxu3 %v725_v32  ;;  %1607 = vmatpush.msra.mxu0 %v235_v33  ;;  %v4725_v18 = vld [vmem:[#allocation2 + $0xb8] sm:$0xff]  ;;  %v475_v25 = vld [vmem:[#allocation5 + $0xbe8] sm:$0xff] }
  0x5e   :  { %1636 = vmatpush.msra.mxu1 %v395_v34  ;;  %1666 = vmatpush.msra.mxu2 %v545_v35  ;;  %v645_v27 = vld [vmem:[#allocation5 + $0x1138] sm:$0xff]  ;;  %v155_v28 = vld [vmem:[#allocation5 + $0x1e8] sm:$0xff] }
  0x5f   :  { %1694 = vmatpush.msra.mxu3 %v715_v36  ;;  %1608 = vmatpush.msra.mxu0 %v225_v37  ;;  %v315_v29 = vld [vmem:[#allocation5 + $0x6e8] sm:$0xff]  ;;  %v465_v31 = vld [vmem:[#allocation5 + $0xb98] sm:$0xff] }
  0x60   :  { %1637 = vmatpush.msra.mxu1 %v385_v38  ;;  %1667 = vmatpush.msra.mxu2 %v535_v42  ;;  %v635_v32 = vld [vmem:[#allocation5 + $0x10e8] sm:$0xff]  ;;  %v145_v33 = vld [vmem:[#allocation5 + $0x198] sm:$0xff]  ;;  %v4729_v42 = vld [vmem:[#allocation2 + $0xe0] sm:$0xff] }
  0x61   :  { %1695 = vmatpush.msra.mxu3 %v705_v43  ;;  %1609 = vmatpush.msra.mxu0 %v215_v44  ;;  %v305_v34 = vld [vmem:[#allocation5 + $0x698] sm:$0xff]  ;;  %v455_v35 = vld [vmem:[#allocation5 + $0xb48] sm:$0xff]  ;;  %v4733_v44 = vld [vmem:[#allocation2 + $0xf0] sm:$0xff] }
  0x62   :  { %1638 = vmatpush.msra.mxu1 %v375_v45  ;;  %1509 = vmatmul.f32.gmra.mxu0 %v4705_v47  ;;  %v625_v36 = vld [vmem:[#allocation5 + $0x1098] sm:$0xff]  ;;  %v135_v37 = vld [vmem:[#allocation5 + $0x148] sm:$0xff] }
  0x63   :  { %1538 = vmatmul.f32.gmra.mxu1 %v4707_v48  ;;  %1567 = vmatmul.f32.gmra.mxu2 %v4709_v49  ;;  %v295_v38 = vld [vmem:[#allocation5 + $0x648] sm:$0xff] }
  0x64   :  { %1696 = vmatpush.msra.mxu3 %v695_v50  ;;  %1668 = vmatpush.msra.mxu2 %v525_v51  ;;  %v4731_v43 = vld [vmem:[#allocation2 + $0xe8] sm:$0xff]  ;;  %v445_v50 = vld [vmem:[#allocation5 + $0xaf8] sm:$0xff] }
  0x65   :  { %1610 = vmatpush.msra.mxu0 %v205_v52  ;;  %1639 = vmatpush.msra.mxu1 %v365_v53  ;;  %v615_v45 = vld [vmem:[#allocation5 + $0x1048] sm:$0xff]  ;;  %v125_v51 = vld [vmem:[#allocation5 + $0xf8] sm:$0xff] }
  0x66   :  { %1596 = vmatmul.f32.gmra.mxu3 %v4713_v54  ;;  %1669 = vmatpush.msra.mxu2 %v515_v55  ;;  %v285_v52 = vld [vmem:[#allocation5 + $0x5f8] sm:$0xff]  ;;  %v435_v55 = vld [vmem:[#allocation5 + $0xaa8] sm:$0xff] }
  0x67   :  { %1697 = vmatpush.msra.mxu3 %v685_v56  ;;  %1611 = vmatpush.msra.mxu0 %v195_v57  ;;  %v4737_v53 = vld [vmem:[#allocation2 + $0xf8] sm:$0xff]  ;;  %v115_v57 = vld [vmem:[#allocation5 + $0xa8] sm:$0xff] }
  0x68   :  { %1640 = vmatpush.msra.mxu1 %v355_v58  ;;  %1670 = vmatpush.msra.mxu2 %v505_v62  ;;  %v605_v56 = vld [vmem:[#allocation5 + $0xff8] sm:$0xff]  ;;  %v275_v58 = vld [vmem:[#allocation5 + $0x5a8] sm:$0xff] }
  0x69   :  { %1698 = vmatpush.msra.mxu3 %v675_v2  ;;  %1612 = vmatpush.msra.mxu0 %v185_v3  ;;  %v425_v62 = vld [vmem:[#allocation5 + $0xa58] sm:$0xff]  ;;  %v595_v2 = vld [vmem:[#allocation5 + $0xfa8] sm:$0xff] }
  0x6a   :  { %1641 = vmatpush.msra.mxu1 %v345_v4  ;;  %1671 = vmatpush.msra.mxu2 %v495_v7  ;;  %v105_v3 = vld [vmem:[#allocation5 + $0x58] sm:$0xff]  ;;  %v415_v7 = vld [vmem:[#allocation5 + $0xa08] sm:$0xff] }
  0x6b   :  { %1699 = vmatpush.msra.mxu3 %v665_v8  ;;  %1613 = vmatpush.msra.mxu0 %v175_v9  ;;  %v265_v4 = vld [vmem:[#allocation5 + $0x558] sm:$0xff]  ;;  %v95_v9 = vld [vmem:[#allocation5 + $0x8] sm:$0xff] }
  0x6c   :  { %1642 = vmatpush.msra.mxu1 %v335_v10  ;;  %1512 = vmatmul.f32.gmra.mxu0 %v4717_v11  ;;  %v585_v8 = vld [vmem:[#allocation5 + $0xf58] sm:$0xff]  ;;  %v255_v10 = vld [vmem:[#allocation5 + $0x508] sm:$0xff] }
  0x6d   :  { %1541 = vmatmul.f32.gmra.mxu1 %v4719_v12  ;;  %1570 = vmatmul.f32.gmra.mxu2 %v4721_v13 }
  0x6e   :  { %1700 = vmatpush.msra.mxu3 %v655_v14  ;;  %1672 = vmatpush.msra.mxu2 %v485_v15  ;;  %v575_v14 = vld [vmem:[#allocation5 + $0xf08] sm:$0xff]  ;;  %v1205_v15 = vld [vmem:[#allocation5 + $0x22b8] sm:$0xff] }
  0x6f   :  { %1614 = vmatpush.msra.mxu0 %v165_v16  ;;  %1643 = vmatpush.msra.mxu1 %v325_v17  ;;  %v885_v16 = vld [vmem:[#allocation5 + $0x18b8] sm:$0xff] }
  0x70   :  { %1599 = vmatmul.f32.gmra.mxu3 %v4725_v18  ;;  %1673 = vmatpush.msra.mxu2 %v475_v25  ;;  %v1045_v17 = vld [vmem:[#allocation5 + $0x1db8] sm:$0xff]  ;;  %v1195_v25 = vld [vmem:[#allocation5 + $0x2268] sm:$0xff] }
  0x71   :  { %1701 = vmatpush.msra.mxu3 %v645_v27  ;;  %1615 = vmatpush.msra.mxu0 %v155_v28  ;;  %v1365_v27 = vld [vmem:[#allocation5 + $0x27b8] sm:$0xff]  ;;  %v875_v28 = vld [vmem:[#allocation5 + $0x1868] sm:$0xff] }
  0x72   :  { %1644 = vmatpush.msra.mxu1 %v315_v29  ;;  %1674 = vmatpush.msra.mxu2 %v465_v31  ;;  %v1035_v29 = vld [vmem:[#allocation5 + $0x1d68] sm:$0xff]  ;;  %v1185_v31 = vld [vmem:[#allocation5 + $0x2218] sm:$0xff] }
  0x73   :  { %1702 = vmatpush.msra.mxu3 %v635_v32  ;;  %1616 = vmatpush.msra.mxu0 %v145_v33  ;;  %v1355_v32 = vld [vmem:[#allocation5 + $0x2768] sm:$0xff]  ;;  %v1025_v33 = vld [vmem:[#allocation5 + $0x1d18] sm:$0xff] }
  0x74   :  { %1645 = vmatpush.msra.mxu1 %v305_v34  ;;  %1675 = vmatpush.msra.mxu2 %v455_v35  ;;  %v855_v34 = vld [vmem:[#allocation5 + $0x17c8] sm:$0xff] }
  0x75   :  { %1703 = vmatpush.msra.mxu3 %v625_v36  ;;  %1617 = vmatpush.msra.mxu0 %v135_v37  ;;  %v1015_v35 = vld [vmem:[#allocation5 + $0x1cc8] sm:$0xff]  ;;  %v845_v37 = vld [vmem:[#allocation5 + $0x1778] sm:$0xff] }
  0x76   :  { %1646 = vmatpush.msra.mxu1 %v295_v38  ;;  %1515 = vmatmul.f32.gmra.mxu0 %v4729_v42  ;;  %v1335_v36 = vld [vmem:[#allocation5 + $0x26c8] sm:$0xff]  ;;  %v1005_v38 = vld [vmem:[#allocation5 + $0x1c78] sm:$0xff] }
  0x77   :  { %1544 = vmatmul.f32.gmra.mxu1 %v4731_v43  ;;  %1573 = vmatmul.f32.gmra.mxu2 %v4733_v44 }
  0x78   :  { %1704 = vmatpush.msra.mxu3 %v615_v45  ;;  %1676 = vmatpush.msra.mxu2 %v445_v50  ;;  %v1155_v45 = vld [vmem:[#allocation5 + $0x2128] sm:$0xff]  ;;  %v1325_v50 = vld [vmem:[#allocation5 + $0x2678] sm:$0xff] }
  0x79   :  { %1618 = vmatpush.msra.mxu0 %v125_v51  ;;  %1647 = vmatpush.msra.mxu1 %v285_v52  ;;  %v835_v51 = vld [vmem:[#allocation5 + $0x1728] sm:$0xff] }
  0x7a   :  { %1602 = vmatmul.f32.gmra.mxu3 %v4737_v53  ;;  %1677 = vmatpush.msra.mxu2 %v435_v55  ;;  %v995_v52 = vld [vmem:[#allocation5 + $0x1c28] sm:$0xff]  ;;  %v1145_v55 = vld [vmem:[#allocation5 + $0x20d8] sm:$0xff] }
  0x7b   :  { %1705 = vmatpush.msra.mxu3 %v605_v56  ;;  %1619 = vmatpush.msra.mxu0 %v115_v57  ;;  %v1315_v56 = vld [vmem:[#allocation5 + $0x2628] sm:$0xff]  ;;  %v985_v57 = vld [vmem:[#allocation5 + $0x1bd8] sm:$0xff] }
  0x7c   :  { %1648 = vmatpush.msra.mxu1 %v275_v58  ;;  %1678 = vmatpush.msra.mxu2 %v425_v62  ;;  %v815_v58 = vld [vmem:[#allocation5 + $0x1688] sm:$0xff] }
  0x7d   :  { %1706 = vmatpush.msra.mxu3 %v595_v2  ;;  %1620 = vmatpush.msra.mxu0 %v105_v3  ;;  %v975_v62 = vld [vmem:[#allocation5 + $0x1b88] sm:$0xff]  ;;  %v805_v3 = vld [vmem:[#allocation5 + $0x1638] sm:$0xff] }
  0x7e   :  { %1649 = vmatpush.msra.mxu1 %v265_v4  ;;  %1679 = vmatpush.msra.mxu2 %v415_v7  ;;  %v1295_v2 = vld [vmem:[#allocation5 + $0x2588] sm:$0xff]  ;;  %v965_v4 = vld [vmem:[#allocation5 + $0x1b38] sm:$0xff] }
  0x7f   :  { %1707 = vmatpush.msra.mxu3 %v585_v8  ;;  %1621 = vmatpush.msra.mxu0 %v95_v9  ;;  %v1115_v7 = vld [vmem:[#allocation5 + $0x1fe8] sm:$0xff]  ;;  %v1285_v8 = vld [vmem:[#allocation5 + $0x2538] sm:$0xff] }
  0x80   :  { %1650 = vmatpush.msra.mxu1 %v255_v10  ;;  %1622 = vmatmul.f32.vlgmr.msra.gmra.mxu0 %v4645_v63  ;;  %v865_v63 = vld [vmem:[#allocation5 + $0x1818] sm:$0xff]  ;;  %v795_v9 = vld [vmem:[#allocation5 + $0x15e8] sm:$0xff] }
  0x81   :  { %1651 = vmatmul.f32.vlgmr.msra.gmra.mxu1 %v4647_v0  ;;  %1680 = vmatmul.f32.vlgmr.msra.gmra.mxu2 %v4649_v1  ;;  %v1175_v0 = vld [vmem:[#allocation5 + $0x21c8] sm:$0xff]  ;;  %v1345_v1 = vld [vmem:[#allocation5 + $0x2718] sm:$0xff] }
  0x82   :  { %1708 = vmatpush.msra.mxu3 %v575_v14  ;;  %1780 = vmatpush.msrb.mxu2 %v1205_v15  ;;  %v955_v10 = vld [vmem:[#allocation5 + $0x1ae8] sm:$0xff]  ;;  %v1105_v14 = vld [vmem:[#allocation5 + $0x1f98] sm:$0xff] }
  0x83   :  { %1722 = vmatpush.msrb.mxu0 %v885_v16  ;;  %1751 = vmatpush.msrb.mxu1 %v1045_v17  ;;  %v1275_v15 = vld [vmem:[#allocation5 + $0x24e8] sm:$0xff]  ;;  %v945_v16 = vld [vmem:[#allocation5 + $0x1a98] sm:$0xff] }
  0x84   :  { %1709 = vmatmul.f32.vlgmr.msra.gmra.mxu3 %v4653_v6  ;;  %1781 = vmatpush.msrb.mxu2 %v1195_v25  ;;  %v1165_v6 = vld [vmem:[#allocation5 + $0x2178] sm:$0xff]  ;;  %v775_v17 = vld [vmem:[#allocation5 + $0x1548] sm:$0xff] }
  0x85   :  { %1809 = vmatpush.msrb.mxu3 %v1365_v27  ;;  %1723 = vmatpush.msrb.mxu0 %v875_v28  ;;  %v935_v25 = vld [vmem:[#allocation5 + $0x1a48] sm:$0xff]  ;;  %v765_v28 = vld [vmem:[#allocation5 + $0x14f8] sm:$0xff] }
  0x86   :  { %1752 = vmatpush.msrb.mxu1 %v1035_v29  ;;  %1782 = vmatpush.msrb.mxu2 %v1185_v31  ;;  %v1255_v27 = vld [vmem:[#allocation5 + $0x2448] sm:$0xff]  ;;  %v925_v29 = vld [vmem:[#allocation5 + $0x19f8] sm:$0xff] }
  0x87   :  { %1810 = vmatpush.msrb.mxu3 %v1355_v32  ;;  %1724 = vmatpush.msrb.mxu0 %v865_v63  ;;  %v1075_v31 = vld [vmem:[#allocation5 + $0x1ea8] sm:$0xff]  ;;  %v1245_v32 = vld [vmem:[#allocation5 + $0x23f8] sm:$0xff] }
  0x88   :  { %1753 = vmatpush.msrb.mxu1 %v1025_v33  ;;  %1783 = vmatpush.msrb.mxu2 %v1175_v0  ;;  %v755_v63 = vld [vmem:[#allocation5 + $0x14a8] sm:$0xff]  ;;  %v1065_v0 = vld [vmem:[#allocation5 + $0x1e58] sm:$0xff] }
  0x89   :  { %1811 = vmatpush.msrb.mxu3 %v1345_v1  ;;  %1725 = vmatpush.msrb.mxu0 %v855_v34  ;;  %v915_v33 = vld [vmem:[#allocation5 + $0x19a8] sm:$0xff]  ;;  %v905_v34 = vld [vmem:[#allocation5 + $0x1958] sm:$0xff] }
  0x8a   :  { %1754 = vmatpush.msrb.mxu1 %v1015_v35  ;;  %1625 = vmatmul.f32.gmra.mxu0 %v4657_v19  ;;  %v825_v19 = vld [vmem:[#allocation5 + $0x16d8] sm:$0xff]  ;;  %v1235_v1 = vld [vmem:[#allocation5 + $0x23a8] sm:$0xff] }
  0x8b   :  { %1654 = vmatmul.f32.gmra.mxu1 %v4659_v20  ;;  %1683 = vmatmul.f32.gmra.mxu2 %v4661_v21  ;;  %v1135_v20 = vld [vmem:[#allocation5 + $0x2088] sm:$0xff]  ;;  %v1305_v21 = vld [vmem:[#allocation5 + $0x25d8] sm:$0xff] }
  0x8c   :  { %1812 = vmatpush.msrb.mxu3 %v1335_v36  ;;  %1784 = vmatpush.msrb.mxu2 %v1165_v6  ;;  %v735_v35 = vld [vmem:[#allocation5 + $0x1408] sm:$0xff] }
  0x8d   :  { %1726 = vmatpush.msrb.mxu0 %v845_v37  ;;  %1755 = vmatpush.msrb.mxu1 %v1005_v38  ;;  %v895_v36 = vld [vmem:[#allocation5 + $0x1908] sm:$0xff]  ;;  %v246_v37 = vld [vmem:[#allocation5 + $0x4c0] sm:$0xff] }
  0x8e   :  { %1712 = vmatmul.f32.gmra.mxu3 %v4665_v26  ;;  %1785 = vmatpush.msrb.mxu2 %v1155_v45  ;;  %v1125_v26 = vld [vmem:[#allocation5 + $0x2038] sm:$0xff]  ;;  %v1215_v6 = vld [vmem:[#allocation5 + $0x2308] sm:$0xff]  ;;  %v406_v38 = vld [vmem:[#allocation5 + $0x9c0] sm:$0xff] }
  0x8f   :  { %1813 = vmatpush.msrb.mxu3 %v1325_v50  ;;  %1727 = vmatpush.msrb.mxu0 %v835_v51  ;;  %v556_v45 = vld [vmem:[#allocation5 + $0xe70] sm:$0xff]  ;;  %v726_v50 = vld [vmem:[#allocation5 + $0x13c0] sm:$0xff] }
  0x90   :  { %1756 = vmatpush.msrb.mxu1 %v995_v52  ;;  %1786 = vmatpush.msrb.mxu2 %v1145_v55  ;;  %v236_v51 = vld [vmem:[#allocation5 + $0x470] sm:$0xff]  ;;  %v546_v55 = vld [vmem:[#allocation5 + $0xe20] sm:$0xff] }
  0x91   :  { %1814 = vmatpush.msrb.mxu3 %v1315_v56  ;;  %1728 = vmatpush.msrb.mxu0 %v825_v19  ;;  %v396_v52 = vld [vmem:[#allocation5 + $0x970] sm:$0xff]  ;;  %v386_v19 = vld [vmem:[#allocation5 + $0x920] sm:$0xff] }
  0x92   :  { %1757 = vmatpush.msrb.mxu1 %v985_v57  ;;  %1787 = vmatpush.msrb.mxu2 %v1135_v20  ;;  %v716_v56 = vld [vmem:[#allocation5 + $0x1370] sm:$0xff] }
  0x93   :  { %1815 = vmatpush.msrb.mxu3 %v1305_v21  ;;  %1729 = vmatpush.msrb.mxu0 %v815_v58  ;;  %v216_v20 = vld [vmem:[#allocation5 + $0x3d0] sm:$0xff] }
  0x94   :  { %1758 = vmatpush.msrb.mxu1 %v975_v62  ;;  %1628 = vmatmul.f32.gmra.mxu0 %v4669_v39  ;;  %v785_v39 = vld [vmem:[#allocation5 + $0x1598] sm:$0xff]  ;;  %v376_v21 = vld [vmem:[#allocation5 + $0x8d0] sm:$0xff]  ;;  %v526_v62 = vld [vmem:[#allocation5 + $0xd80] sm:$0xff] }
  0x95   :  { %1657 = vmatmul.f32.gmra.mxu1 %v4671_v40  ;;  %1686 = vmatmul.f32.gmra.mxu2 %v4673_v41  ;;  %v1095_v40 = vld [vmem:[#allocation5 + $0x1f48] sm:$0xff]  ;;  %v1265_v41 = vld [vmem:[#allocation5 + $0x2498] sm:$0xff] }
  0x96   :  { %1816 = vmatpush.msrb.mxu3 %v1295_v2  ;;  %1788 = vmatpush.msrb.mxu2 %v1125_v26  ;;  %v206_v2 = vld [vmem:[#allocation5 + $0x380] sm:$0xff] }
  0x97   :  { %1730 = vmatpush.msrb.mxu0 %v805_v3  ;;  %1759 = vmatpush.msrb.mxu1 %v965_v4  ;;  %v366_v26 = vld [vmem:[#allocation5 + $0x880] sm:$0xff]  ;;  %v516_v3 = vld [vmem:[#allocation5 + $0xd30] sm:$0xff] }
  0x98   :  { %1715 = vmatmul.f32.gmra.mxu3 %v4677_v46  ;;  %1789 = vmatpush.msrb.mxu2 %v1115_v7  ;;  %v1085_v46 = vld [vmem:[#allocation5 + $0x1ef8] sm:$0xff]  ;;  %v686_v4 = vld [vmem:[#allocation5 + $0x1280] sm:$0xff]  ;;  %v196_v7 = vld [vmem:[#allocation5 + $0x330] sm:$0xff] }
  0x99   :  { %1817 = vmatpush.msrb.mxu3 %v1285_v8  ;;  %1731 = vmatpush.msrb.mxu0 %v795_v9  ;;  %v356_v8 = vld [vmem:[#allocation5 + $0x830] sm:$0xff] }
  0x9a   :  { %1760 = vmatpush.msrb.mxu1 %v955_v10  ;;  %1790 = vmatpush.msrb.mxu2 %v1105_v14  ;;  %v506_v10 = vld [vmem:[#allocation5 + $0xce0] sm:$0xff]  ;;  %v676_v14 = vld [vmem:[#allocation5 + $0x1230] sm:$0xff] }
  0x9b   :  { %1818 = vmatpush.msrb.mxu3 %v1275_v15  ;;  %1732 = vmatpush.msrb.mxu0 %v785_v39  ;;  %v666_v39 = vld [vmem:[#allocation5 + $0x11e0] sm:$0xff] }
  0x9c   :  { %1761 = vmatpush.msrb.mxu1 %v945_v16  ;;  %1791 = vmatpush.msrb.mxu2 %v1095_v40  ;;  %v176_v40 = vld [vmem:[#allocation5 + $0x290] sm:$0xff] }
  0x9d   :  { %1819 = vmatpush.msrb.mxu3 %v1265_v41  ;;  %1733 = vmatpush.msrb.mxu0 %v775_v17  ;;  %v336_v41 = vld [vmem:[#allocation5 + $0x790] sm:$0xff] }
  0x9e   :  { %1762 = vmatpush.msrb.mxu1 %v935_v25  ;;  %1631 = vmatmul.f32.gmra.mxu0 %v4681_v59  ;;  %v745_v59 = vld [vmem:[#allocation5 + $0x1458] sm:$0xff]  ;;  %v656_v17 = vld [vmem:[#allocation5 + $0x1190] sm:$0xff]  ;;  %v486_v25 = vld [vmem:[#allocation5 + $0xc40] sm:$0xff] }
  0x9f   :  { %1660 = vmatmul.f32.gmra.mxu1 %v4683_v60  ;;  %1689 = vmatmul.f32.gmra.mxu2 %v4685_v61  ;;  %v1055_v60 = vld [vmem:[#allocation5 + $0x1e08] sm:$0xff]  ;;  %v1225_v61 = vld [vmem:[#allocation5 + $0x2358] sm:$0xff] }
  0xa0   :  { %1820 = vmatpush.msrb.mxu3 %v1255_v27  ;;  %1792 = vmatpush.msrb.mxu2 %v1085_v46  ;;  %v166_v27 = vld [vmem:[#allocation5 + $0x240] sm:$0xff] }
  0xa1   :  { %1734 = vmatpush.msrb.mxu0 %v765_v28  ;;  %1763 = vmatpush.msrb.mxu1 %v925_v29  ;;  %v326_v46 = vld [vmem:[#allocation5 + $0x740] sm:$0xff]  ;;  %v476_v28 = vld [vmem:[#allocation5 + $0xbf0] sm:$0xff] }
  0xa2   :  { %1718 = vmatmul.f32.gmra.mxu3 %v4689_v5  ;;  %1793 = vmatpush.msrb.mxu2 %v1075_v31  ;;  %v566_v5 = vld [vmem:[#allocation5 + $0xec0] sm:$0xff]  ;;  %v156_v31 = vld [vmem:[#allocation5 + $0x1f0] sm:$0xff] }
  0xa3   :  { %1821 = vmatpush.msrb.mxu3 %v1245_v32  ;;  %1735 = vmatpush.msrb.mxu0 %v755_v63  ;;  %v646_v29 = vld [vmem:[#allocation5 + $0x1140] sm:$0xff]  ;;  %v316_v32 = vld [vmem:[#allocation5 + $0x6f0] sm:$0xff] }
  0xa4   :  { %1764 = vmatpush.msrb.mxu1 %v915_v33  ;;  %1794 = vmatpush.msrb.mxu2 %v1065_v0  ;;  %v466_v33 = vld [vmem:[#allocation5 + $0xba0] sm:$0xff]  ;;  %v636_v0 = vld [vmem:[#allocation5 + $0x10f0] sm:$0xff] }
  0xa5   :  { %1822 = vmatpush.msrb.mxu3 %v1235_v1  ;;  %1736 = vmatpush.msrb.mxu0 %v745_v59  ;;  %v626_v59 = vld [vmem:[#allocation5 + $0x10a0] sm:$0xff] }
  0xa6   :  { %1765 = vmatpush.msrb.mxu1 %v905_v34  ;;  %1795 = vmatpush.msrb.mxu2 %v1055_v60  ;;  %v136_v60 = vld [vmem:[#allocation5 + $0x150] sm:$0xff] }
  0xa7   :  { %1823 = vmatpush.msrb.mxu3 %v1225_v61  ;;  %1737 = vmatpush.msrb.mxu0 %v735_v35  ;;  %v296_v61 = vld [vmem:[#allocation5 + $0x650] sm:$0xff] }
  0xa8   :  { %1766 = vmatpush.msrb.mxu1 %v895_v36  ;;  %1738 = vmatmul.f32.vlgmr.msrb.gmra.mxu0 %v4693_v22  ;;  %v226_v22 = vld [vmem:[#allocation5 + $0x420] sm:$0xff]  ;;  %v616_v35 = vld [vmem:[#allocation5 + $0x1050] sm:$0xff] }
  0xa9   :  { %1767 = vmatmul.f32.vlgmr.msrb.gmra.mxu1 %v4695_v23  ;;  %1796 = vmatmul.f32.vlgmr.msrb.gmra.mxu2 %v4697_v24  ;;  %v536_v23 = vld [vmem:[#allocation5 + $0xdd0] sm:$0xff]  ;;  %v706_v24 = vld [vmem:[#allocation5 + $0x1320] sm:$0xff] }
  0xaa   :  { %1824 = vmatpush.msrb.mxu3 %v1215_v6  ;;  %1896 = vmatpush.msra.mxu2 %v566_v5  ;;  %v446_v36 = vld [vmem:[#allocation5 + $0xb00] sm:$0xff] }
  0xab   :  { %1838 = vmatpush.msra.mxu0 %v246_v37  ;;  %1867 = vmatpush.msra.mxu1 %v406_v38  ;;  %v126_v6 = vld [vmem:[#allocation5 + $0x100] sm:$0xff]  ;;  %v436_v37 = vld [vmem:[#allocation5 + $0xab0] sm:$0xff] }
  0xac   :  { %1825 = vmatmul.f32.vlgmr.msrb.gmra.mxu3 %v4701_v30  ;;  %1897 = vmatpush.msra.mxu2 %v556_v45  ;;  %v696_v30 = vld [vmem:[#allocation5 + $0x12d0] sm:$0xff]  ;;  %v286_v5 = vld [vmem:[#allocation5 + $0x600] sm:$0xff] }
  0xad   :  { %1925 = vmatpush.msra.mxu3 %v726_v50  ;;  %1839 = vmatpush.msra.mxu0 %v236_v51  ;;  %v4761_v57 = vpop.f32.mrf.mxu0  ;;  %v606_v38 = vld [vmem:[#allocation5 + $0x1000] sm:$0xff]  ;;  %v116_v45 = vld [vmem:[#allocation5 + $0xb0] sm:$0xff] }
  0xae   :  { %1868 = vmatpush.msra.mxu1 %v396_v52  ;;  %1898 = vmatpush.msra.mxu2 %v546_v55  ;;  %v4763_v58 = vpop.f32.mrf.mxu1  ;;  %v276_v50 = vld [vmem:[#allocation5 + $0x5b0] sm:$0xff]  ;;  %v426_v52 = vld [vmem:[#allocation5 + $0xa60] sm:$0xff] }
  0xaf   :  { %1926 = vmatpush.msra.mxu3 %v716_v56  ;;  %1840 = vmatpush.msra.mxu0 %v226_v22  ;;  %v596_v55 = vld [vmem:[#allocation5 + $0xfb0] sm:$0xff]  ;;  %v586_v22 = vld [vmem:[#allocation5 + $0xf60] sm:$0xff] }
  0xb0   :  { %1869 = vmatpush.msra.mxu1 %v386_v19  ;;  %1899 = vmatpush.msra.mxu2 %v536_v23  ;;  %v96_v23 = vld [vmem:[#allocation5 + $0x10] sm:$0xff] }
  0xb1   :  { %1927 = vmatpush.msra.mxu3 %v706_v24  ;;  %1841 = vmatpush.msra.mxu0 %v216_v20  ;;  %v256_v24 = vld [vmem:[#allocation5 + $0x510] sm:$0xff] }
  0xb2   :  { %1870 = vmatpush.msra.mxu1 %v376_v21  ;;  %1741 = vmatmul.f32.gmra.mxu0 %v4705_v47  ;;  %v186_v47 = vld [vmem:[#allocation5 + $0x2e0] sm:$0xff]  ;;  %v576_v20 = vld [vmem:[#allocation5 + $0xf10] sm:$0xff] }
  0xb3   :  { %1770 = vmatmul.f32.gmra.mxu1 %v4707_v48  ;;  %1799 = vmatmul.f32.gmra.mxu2 %v4709_v49  ;;  %v346_v48 = vld [vmem:[#allocation5 + $0x7e0] sm:$0xff]  ;;  %v496_v49 = vld [vmem:[#allocation5 + $0xc90] sm:$0xff] }
  0xb4   :  { %1928 = vmatpush.msra.mxu3 %v696_v30  ;;  %1900 = vmatpush.msra.mxu2 %v526_v62  ;;  %v4768_v9 = vpop.f32.mrf.mxu2  ;;  %v1206_v21 = vld [vmem:[#allocation5 + $0x22c0] sm:$0xff] }
  0xb5   :  { %1842 = vmatpush.msra.mxu0 %v206_v2  ;;  %1871 = vmatpush.msra.mxu1 %v366_v26  ;;  %v886_v30 = vld [vmem:[#allocation5 + $0x18c0] sm:$0xff]  ;;  %v4804_v2 = vld [vmem:[#allocation2 + $0x8] sm:$0xff] }
  0xb6   :  { %1828 = vmatmul.f32.gmra.mxu3 %v4713_v54  ;;  %1901 = vmatpush.msra.mxu2 %v516_v3  ;;  %v4801_v62 = vld [vmem:[#allocation2] sm:$0xff]  ;;  %v4807_v3 = vld [vmem:[#allocation2 + $0x10] sm:$0xff] }
  0xb7   :  { %1929 = vmatpush.msra.mxu3 %v686_v4  ;;  %v4771_v15 = vpop.f32.mrf.mxu3  ;;  %1843 = vmatpush.msra.mxu0 %v196_v7  ;;  %v4773_v16 = vpop.f32.mrf.mxu0  ;;  %v1046_v26 = vld [vmem:[#allocation5 + $0x1dc0] sm:$0xff]  ;;  %v1196_v4 = vld [vmem:[#allocation5 + $0x2270] sm:$0xff] }
  0xb8   :  { %1872 = vmatpush.msra.mxu1 %v356_v8  ;;  %1902 = vmatpush.msra.mxu2 %v506_v10  ;;  %v4775_v54 = vpop.f32.mrf.mxu1  ;;  %v1366_v7 = vld [vmem:[#allocation5 + $0x27c0] sm:$0xff]  ;;  %v876_v8 = vld [vmem:[#allocation5 + $0x1870] sm:$0xff] }
  0xb9   :  { %1930 = vmatpush.msra.mxu3 %v676_v14  ;;  %1844 = vmatpush.msra.mxu0 %v186_v47  ;;  %v1036_v10 = vld [vmem:[#allocation5 + $0x1d70] sm:$0xff]  ;;  %v4812_v47 = vld [vmem:[#allocation2 + $0x18] sm:$0xff] }
  0xba   :  { %1873 = vmatpush.msra.mxu1 %v346_v48  ;;  %1903 = vmatpush.msra.mxu2 %v496_v49  ;;  %v1186_v48 = vld [vmem:[#allocation5 + $0x2220] sm:$0xff]  ;;  %v1356_v49 = vld [vmem:[#allocation5 + $0x2770] sm:$0xff] }
  0xbb   :  { %1931 = vmatpush.msra.mxu3 %v666_v39  ;;  %1845 = vmatpush.msra.mxu0 %v176_v40  ;;  %v866_v39 = vld [vmem:[#allocation5 + $0x1820] sm:$0xff] }
  0xbc   :  { %1874 = vmatpush.msra.mxu1 %v336_v41  ;;  %1744 = vmatmul.f32.gmra.mxu0 %v4717_v11  ;;  %v146_v11 = vld [vmem:[#allocation5 + $0x1a0] sm:$0xff] }
  0xbd   :  { %1773 = vmatmul.f32.gmra.mxu1 %v4719_v12  ;;  %1802 = vmatmul.f32.gmra.mxu2 %v4721_v13  ;;  %v306_v12 = vld [vmem:[#allocation5 + $0x6a0] sm:$0xff]  ;;  %v456_v13 = vld [vmem:[#allocation5 + $0xb50] sm:$0xff] }
  0xbe   :  { %1932 = vmatpush.msra.mxu3 %v656_v17  ;;  %1904 = vmatpush.msra.mxu2 %v486_v25  ;;  %v4780_v63 = vpop.f32.mrf.mxu2  ;;  %v1026_v40 = vld [vmem:[#allocation5 + $0x1d20] sm:$0xff]  ;;  %v1176_v17 = vld [vmem:[#allocation5 + $0x21d0] sm:$0xff] }
  0xbf   :  { %1846 = vmatpush.msra.mxu0 %v166_v27  ;;  %1875 = vmatpush.msra.mxu1 %v326_v46  ;;  %v1346_v25 = vld [vmem:[#allocation5 + $0x2720] sm:$0xff]  ;;  %v856_v46 = vld [vmem:[#allocation5 + $0x17d0] sm:$0xff] }
  0xc0   :  { %1831 = vmatmul.f32.gmra.mxu3 %v4725_v18  ;;  %1905 = vmatpush.msra.mxu2 %v476_v28  ;;  %v1016_v28 = vld [vmem:[#allocation5 + $0x1cd0] sm:$0xff] }
  0xc1   :  { %1933 = vmatpush.msra.mxu3 %v646_v29  ;;  %v4783_v1 = vpop.f32.mrf.mxu3  ;;  %1847 = vmatpush.msra.mxu0 %v156_v31  ;;  %v4785_v34 = vpop.f32.mrf.mxu0  ;;  %v1336_v31 = vld [vmem:[#allocation5 + $0x26d0] sm:$0xff] }
  0xc2   :  { %1876 = vmatpush.msra.mxu1 %v316_v32  ;;  %1906 = vmatpush.msra.mxu2 %v466_v33  ;;  %v4787_v18 = vpop.f32.mrf.mxu1  ;;  %v1166_v32 = vld [vmem:[#allocation5 + $0x2180] sm:$0xff] }
  0xc3   :  { %1934 = vmatpush.msra.mxu3 %v636_v0  ;;  %1848 = vmatpush.msra.mxu0 %v146_v11  ;;  %v846_v33 = vld [vmem:[#allocation5 + $0x1780] sm:$0xff]  ;;  %v4824_v11 = vld [vmem:[#allocation2 + $0x48] sm:$0xff] }
  0xc4   :  { %1877 = vmatpush.msra.mxu1 %v306_v12  ;;  %1907 = vmatpush.msra.mxu2 %v456_v13  ;;  %v4821_v0 = vld [vmem:[#allocation2 + $0x40] sm:$0xff]  ;;  %v4827_v13 = vld [vmem:[#allocation2 + $0x50] sm:$0xff] }
  0xc5   :  { %1935 = vmatpush.msra.mxu3 %v626_v59  ;;  %1849 = vmatpush.msra.mxu0 %v136_v60  ;;  %v1006_v12 = vld [vmem:[#allocation5 + $0x1c80] sm:$0xff]  ;;  %v1156_v59 = vld [vmem:[#allocation5 + $0x2130] sm:$0xff] }
  0xc6   :  { %1878 = vmatpush.msra.mxu1 %v296_v61  ;;  %1747 = vmatmul.f32.gmra.mxu0 %v4729_v42  ;;  %v106_v42 = vld [vmem:[#allocation5 + $0x60] sm:$0xff]  ;;  %v836_v61 = vld [vmem:[#allocation5 + $0x1730] sm:$0xff] }
  0xc7   :  { %1776 = vmatmul.f32.gmra.mxu1 %v4731_v43  ;;  %1805 = vmatmul.f32.gmra.mxu2 %v4733_v44  ;;  %v266_v43 = vld [vmem:[#allocation5 + $0x560] sm:$0xff]  ;;  %v416_v44 = vld [vmem:[#allocation5 + $0xa10] sm:$0xff] }
  0xc8   :  { %1936 = vmatpush.msra.mxu3 %v616_v35  ;;  %1908 = vmatpush.msra.mxu2 %v446_v36  ;;  %v4792_v51 = vpop.f32.mrf.mxu2  ;;  %v1326_v60 = vld [vmem:[#allocation5 + $0x2680] sm:$0xff]  ;;  %v996_v35 = vld [vmem:[#allocation5 + $0x1c30] sm:$0xff] }
  0xc9   :  { %1850 = vmatpush.msra.mxu0 %v126_v6  ;;  %1879 = vmatpush.msra.mxu1 %v286_v5  ;;  %v4832_v6 = vld [vmem:[#allocation2 + $0x58] sm:$0xff]  ;;  %v1146_v5 = vld [vmem:[#allocation5 + $0x20e0] sm:$0xff] }
  0xca   :  { %1834 = vmatmul.f32.gmra.mxu3 %v4737_v53  ;;  %1909 = vmatpush.msra.mxu2 %v436_v37  ;;  %v1316_v37 = vld [vmem:[#allocation5 + $0x2630] sm:$0xff] }
  0xcb   :  { %1937 = vmatpush.msra.mxu3 %v606_v38  ;;  %v4795_v56 = vpop.f32.mrf.mxu3  ;;  %1851 = vmatpush.msra.mxu0 %v116_v45  ;;  %v4797_v19 = vpop.f32.mrf.mxu0  ;;  %v826_v38 = vld [vmem:[#allocation5 + $0x16e0] sm:$0xff] }
  0xcc   :  { %1880 = vmatpush.msra.mxu1 %v276_v50  ;;  %1910 = vmatpush.msra.mxu2 %v426_v52  ;;  %v4799_v53 = vpop.f32.mrf.mxu1  ;;  %v986_v45 = vld [vmem:[#allocation5 + $0x1be0] sm:$0xff]  ;;  %v1136_v52 = vld [vmem:[#allocation5 + $0x2090] sm:$0xff] }
  0xcd   :  { %1938 = vmatpush.msra.mxu3 %v596_v55  ;;  %1852 = vmatpush.msra.mxu0 %v106_v42  ;;  %v1306_v55 = vld [vmem:[#allocation5 + $0x25e0] sm:$0xff] }
  0xce   :  { %1881 = vmatpush.msra.mxu1 %v266_v43  ;;  %1911 = vmatpush.msra.mxu2 %v416_v44  ;;  %v816_v43 = vld [vmem:[#allocation5 + $0x1690] sm:$0xff] }
  0xcf   :  { %1939 = vmatpush.msra.mxu3 %v586_v22  ;;  %1853 = vmatpush.msra.mxu0 %v96_v23  ;;  %v976_v44 = vld [vmem:[#allocation5 + $0x1b90] sm:$0xff] }
  0xd0   :  { %1882 = vmatpush.msra.mxu1 %v256_v24  ;;  %1854 = vmatmul.f32.vlgmr.msra.gmra.mxu0 %v4801_v62  ;;  %v1296_v23 = vld [vmem:[#allocation5 + $0x2590] sm:$0xff]  ;;  %v1126_v24 = vld [vmem:[#allocation5 + $0x2040] sm:$0xff] }
  0xd1   :  { %1883 = vmatmul.f32.vlgmr.msra.gmra.mxu1 %v4804_v2  ;;  %1912 = vmatmul.f32.vlgmr.msra.gmra.mxu2 %v4807_v3 }
  0xd2   :  { %1940 = vmatpush.msra.mxu3 %v576_v20  ;;  %2012 = vmatpush.msrb.mxu2 %v1206_v21  ;;  %v4810_v14 = vpop.f32.mrf.mxu2  ;;  %v806_v20 = vld [vmem:[#allocation5 + $0x1640] sm:$0xff] }
  0xd3   :  { %1954 = vmatpush.msrb.mxu0 %v886_v30  ;;  %1983 = vmatpush.msrb.mxu1 %v1046_v26  ;;  %v4841_v21 = vld [vmem:[#allocation2 + $0x80] sm:$0xff]  ;;  %v4844_v30 = vld [vmem:[#allocation2 + $0x88] sm:$0xff] }
  0xd4   :  { %1941 = vmatmul.f32.vlgmr.msra.gmra.mxu3 %v4812_v47  ;;  %2013 = vmatpush.msrb.mxu2 %v1196_v4  ;;  %v966_v26 = vld [vmem:[#allocation5 + $0x1b40] sm:$0xff]  ;;  %v4847_v4 = vld [vmem:[#allocation2 + $0x90] sm:$0xff] }
  0xd5   :  { %2041 = vmatpush.msrb.mxu3 %v1366_v7  ;;  %v4815_v41 = vpop.f32.mrf.mxu3  ;;  %1955 = vmatpush.msrb.mxu0 %v876_v8  ;;  %v4817_v27 = vpop.f32.mrf.mxu0  ;;  %v1116_v7 = vld [vmem:[#allocation5 + $0x1ff0] sm:$0xff]  ;;  %v1286_v8 = vld [vmem:[#allocation5 + $0x2540] sm:$0xff] }
  0xd6   :  { %6336 = vst [vmem:[#allocation12_spill] sm:$0xff] %v4815_v41  ;;  %1984 = vmatpush.msrb.mxu1 %v1036_v10  ;;  %2014 = vmatpush.msrb.mxu2 %v1186_v48  ;;  %v4819_v29 = vpop.f32.mrf.mxu1  ;;  %v796_v10 = vld [vmem:[#allocation5 + $0x15f0] sm:$0xff]  ;;  %v307_v41 = vld [vmem:[#allocation5 + $0x6a8] sm:$0xff] }
  0xd7   :  { %2042 = vmatpush.msrb.mxu3 %v1356_v49  ;;  %1956 = vmatpush.msrb.mxu0 %v866_v39  ;;  %6337 = vst [vmem:[#allocation13_spill] sm:$0xff] %v4819_v29  ;;  %v956_v48 = vld [vmem:[#allocation5 + $0x1af0] sm:$0xff]  ;;  %v4852_v39 = vld [vmem:[#allocation2 + $0x98] sm:$0xff]  ;;  %v147_v29 = vld [vmem:[#allocation5 + $0x1a8] sm:$0xff] }
  0xd8   :  { %1985 = vmatpush.msrb.mxu1 %v1026_v40  ;;  %2015 = vmatpush.msrb.mxu2 %v1176_v17  ;;  %v1106_v40 = vld [vmem:[#allocation5 + $0x1fa0] sm:$0xff]  ;;  %v1276_v17 = vld [vmem:[#allocation5 + $0x24f0] sm:$0xff] }
  0xd9   :  { %2043 = vmatpush.msrb.mxu3 %v1346_v25  ;;  %1957 = vmatpush.msrb.mxu0 %v856_v46  ;;  %v786_v25 = vld [vmem:[#allocation5 + $0x15a0] sm:$0xff] }
  0xda   :  { %1986 = vmatpush.msrb.mxu1 %v1016_v28  ;;  %1857 = vmatmul.f32.gmra.mxu0 %v4821_v0  ;;  %v946_v46 = vld [vmem:[#allocation5 + $0x1aa0] sm:$0xff] }
  0xdb   :  { %1886 = vmatmul.f32.gmra.mxu1 %v4824_v11  ;;  %1915 = vmatmul.f32.gmra.mxu2 %v4827_v13 }
  0xdc   :  { %2044 = vmatpush.msrb.mxu3 %v1336_v31  ;;  %2016 = vmatpush.msrb.mxu2 %v1166_v32  ;;  %v4830_v36 = vpop.f32.mrf.mxu2  ;;  %v1096_v31 = vld [vmem:[#allocation5 + $0x1f50] sm:$0xff]  ;;  %v1266_v32 = vld [vmem:[#allocation5 + $0x24a0] sm:$0xff] }
  0xdd   :  { %1958 = vmatpush.msrb.mxu0 %v846_v33  ;;  %6338 = vst [vmem:[#allocation14_spill] sm:$0xff] %v4830_v36  ;;  %1987 = vmatpush.msrb.mxu1 %v1006_v12  ;;  %v776_v12 = vld [vmem:[#allocation5 + $0x1550] sm:$0xff] }
  0xde   :  { %1944 = vmatmul.f32.gmra.mxu3 %v4832_v6  ;;  %2017 = vmatpush.msrb.mxu2 %v1156_v59  ;;  %v936_v59 = vld [vmem:[#allocation5 + $0x1a50] sm:$0xff] }
  0xdf   :  { %2045 = vmatpush.msrb.mxu3 %v1326_v60  ;;  %v4835_v50 = vpop.f32.mrf.mxu3  ;;  %1959 = vmatpush.msrb.mxu0 %v836_v61  ;;  %v4837_v42 = vpop.f32.mrf.mxu0  ;;  %v1256_v61 = vld [vmem:[#allocation5 + $0x2450] sm:$0xff] }
  0xe0   :  { %6339 = vst [vmem:[#allocation15_spill] sm:$0xff] %v4835_v50  ;;  %1988 = vmatpush.msrb.mxu1 %v996_v35  ;;  %2018 = vmatpush.msrb.mxu2 %v1146_v5  ;;  %v4839_v22 = vpop.f32.mrf.mxu1  ;;  %v1086_v35 = vld [vmem:[#allocation5 + $0x1f00] sm:$0xff]  ;;  %v677_v50 = vld [vmem:[#allocation5 + $0x1238] sm:$0xff] }
  0xe1   :  { %6340 = vst [vmem:[#allocation16_spill] sm:$0xff] %v4837_v42  ;;  %2046 = vmatpush.msrb.mxu3 %v1316_v37  ;;  %1960 = vmatpush.msrb.mxu0 %v826_v38  ;;  %v766_v5 = vld [vmem:[#allocation5 + $0x1500] sm:$0xff]  ;;  %v4864_v38 = vld [vmem:[#allocation2 + $0xc8] sm:$0xff] }
  0xe2   :  { %1989 = vmatpush.msrb.mxu1 %v986_v45  ;;  %6341 = vst [vmem:[#allocation17_spill] sm:$0xff] %v4839_v22  ;;  %2019 = vmatpush.msrb.mxu2 %v1136_v52  ;;  %v4861_v37 = vld [vmem:[#allocation2 + $0xc0] sm:$0xff]  ;;  %v4867_v52 = vld [vmem:[#allocation2 + $0xd0] sm:$0xff]  ;;  %v637_v22 = vld [vmem:[#allocation5 + $0x10f8] sm:$0xff] }
  0xe3   :  { %2047 = vmatpush.msrb.mxu3 %v1306_v55  ;;  %1961 = vmatpush.msrb.mxu0 %v816_v43  ;;  %v926_v45 = vld [vmem:[#allocation5 + $0x1a00] sm:$0xff]  ;;  %v1076_v55 = vld [vmem:[#allocation5 + $0x1eb0] sm:$0xff] }
  0xe4   :  { %1990 = vmatpush.msrb.mxu1 %v976_v44  ;;  %1860 = vmatmul.f32.gmra.mxu0 %v4841_v21  ;;  %v1246_v43 = vld [vmem:[#allocation5 + $0x2400] sm:$0xff]  ;;  %v756_v44 = vld [vmem:[#allocation5 + $0x14b0] sm:$0xff] }
  0xe5   :  { %1889 = vmatmul.f32.gmra.mxu1 %v4844_v30  ;;  %1918 = vmatmul.f32.gmra.mxu2 %v4847_v4 }
  0xe6   :  { %2048 = vmatpush.msrb.mxu3 %v1296_v23  ;;  %2020 = vmatpush.msrb.mxu2 %v1126_v24  ;;  %v4850_v49 = vpop.f32.mrf.mxu2  ;;  %v916_v23 = vld [vmem:[#allocation5 + $0x19b0] sm:$0xff] }
  0xe7   :  { %1962 = vmatpush.msrb.mxu0 %v806_v20  ;;  %6342 = vst [vmem:[#allocation18_spill] sm:$0xff] %v4850_v49  ;;  %1991 = vmatpush.msrb.mxu1 %v966_v26  ;;  %v4872_v20 = vld [vmem:[#allocation2 + $0xd8] sm:$0xff]  ;;  %v1066_v26 = vld [vmem:[#allocation5 + $0x1e60] sm:$0xff] }
  0xe8   :  { %1947 = vmatmul.f32.gmra.mxu3 %v4852_v39  ;;  %2021 = vmatpush.msrb.mxu2 %v1116_v7  ;;  %v1236_v7 = vld [vmem:[#allocation5 + $0x23b0] sm:$0xff] }
  0xe9   :  { %2049 = vmatpush.msrb.mxu3 %v1286_v8  ;;  %v4855_v28 = vpop.f32.mrf.mxu3  ;;  %1963 = vmatpush.msrb.mxu0 %v796_v10  ;;  %v4857_v33 = vpop.f32.mrf.mxu0  ;;  %v746_v8 = vld [vmem:[#allocation5 + $0x1460] sm:$0xff] }
  0xea   :  { %6343 = vst [vmem:[#allocation19_spill] sm:$0xff] %v4855_v28  ;;  %1992 = vmatpush.msrb.mxu1 %v956_v48  ;;  %2022 = vmatpush.msrb.mxu2 %v1106_v40  ;;  %v4859_v60 = vpop.f32.mrf.mxu1  ;;  %v906_v10 = vld [vmem:[#allocation5 + $0x1960] sm:$0xff]  ;;  %v1056_v40 = vld [vmem:[#allocation5 + $0x1e10] sm:$0xff]  ;;  %v507_v28 = vld [vmem:[#allocation5 + $0xce8] sm:$0xff] }
  0xeb   :  { %6344 = vst [vmem:[#allocation20_spill] sm:$0xff] %v4857_v33  ;;  %2050 = vmatpush.msrb.mxu3 %v1276_v17  ;;  %1964 = vmatpush.msrb.mxu0 %v786_v25  ;;  %v1226_v17 = vld [vmem:[#allocation5 + $0x2360] sm:$0xff]  ;;  %v267_v33 = vld [vmem:[#allocation5 + $0x568] sm:$0xff] }
  0xec   :  { %1993 = vmatpush.msrb.mxu1 %v946_v46  ;;  %6345 = vst [vmem:[#allocation21_spill] sm:$0xff] %v4859_v60  ;;  %2023 = vmatpush.msrb.mxu2 %v1096_v31  ;;  %v736_v46 = vld [vmem:[#allocation5 + $0x1410] sm:$0xff]  ;;  %v467_v60 = vld [vmem:[#allocation5 + $0xba8] sm:$0xff] }
  0xed   :  { %2051 = vmatpush.msrb.mxu3 %v1266_v32  ;;  %1965 = vmatpush.msrb.mxu0 %v776_v12  ;;  %v896_v31 = vld [vmem:[#allocation5 + $0x1910] sm:$0xff] }
  0xee   :  { %1994 = vmatpush.msrb.mxu1 %v936_v59  ;;  %1863 = vmatmul.f32.gmra.mxu0 %v4861_v37  ;;  %v1216_v12 = vld [vmem:[#allocation5 + $0x2310] sm:$0xff]  ;;  %v567_v59 = vld [vmem:[#allocation5 + $0xec8] sm:$0xff] }
  0xef   :  { %1892 = vmatmul.f32.gmra.mxu1 %v4864_v38  ;;  %1921 = vmatmul.f32.gmra.mxu2 %v4867_v52 }
  0xf0   :  { %2052 = vmatpush.msrb.mxu3 %v1256_v61  ;;  %2024 = vmatpush.msrb.mxu2 %v1086_v35  ;;  %v4870_v24 = vpop.f32.mrf.mxu2  ;;  %v247_v61 = vld [vmem:[#allocation5 + $0x4c8] sm:$0xff]  ;;  %v4881_v35 = vld [vmem:[#allocation2 + $0x20] sm:$0xff] }
  0xf1   :  { %1966 = vmatpush.msrb.mxu0 %v766_v5  ;;  %6346 = vst [vmem:[#allocation22_spill] sm:$0xff] %v4870_v24  ;;  %1995 = vmatpush.msrb.mxu1 %v926_v45  ;;  %v4884_v5 = vld [vmem:[#allocation2 + $0x28] sm:$0xff] }
  0xf2   :  { %1950 = vmatmul.f32.gmra.mxu3 %v4872_v20  ;;  %2025 = vmatpush.msrb.mxu2 %v1076_v55  ;;  %v407_v45 = vld [vmem:[#allocation5 + $0x9c8] sm:$0xff]  ;;  %v4887_v55 = vld [vmem:[#allocation2 + $0x30] sm:$0xff] }
  0xf3   :  { %2053 = vmatpush.msrb.mxu3 %v1246_v43  ;;  %v4875_v48 = vpop.f32.mrf.mxu3  ;;  %1967 = vmatpush.msrb.mxu0 %v756_v44  ;;  %v4877_v25 = vpop.f32.mrf.mxu0  ;;  %v557_v43 = vld [vmem:[#allocation5 + $0xe78] sm:$0xff]  ;;  %v727_v44 = vld [vmem:[#allocation5 + $0x13c8] sm:$0xff] }
  0xf4   :  { %6347 = vst [vmem:[#allocation23_spill] sm:$0xff] %v4875_v48  ;;  %1996 = vmatpush.msrb.mxu1 %v916_v23  ;;  %2026 = vmatpush.msrb.mxu2 %v1066_v26  ;;  %v4879_v32 = vpop.f32.mrf.mxu1  ;;  %v237_v23 = vld [vmem:[#allocation5 + $0x478] sm:$0xff]  ;;  %v347_v24 = vld [vmem:[#allocation5 + $0x7e8] sm:$0xff] }
  0xf5   :  { %6348 = vst [vmem:[#allocation24_spill] sm:$0xff] %v4877_v25  ;;  %2054 = vmatpush.msrb.mxu3 %v1236_v7  ;;  %1968 = vmatpush.msrb.mxu0 %v746_v8  ;;  %v397_v26 = vld [vmem:[#allocation5 + $0x978] sm:$0xff] }
  0xf6   :  { %1997 = vmatpush.msrb.mxu1 %v906_v10  ;;  %6349 = vst [vmem:[#allocation25_spill] sm:$0xff] %v4879_v32  ;;  %2027 = vmatpush.msrb.mxu2 %v1056_v40  ;;  %v4892_v8 = vld [vmem:[#allocation2 + $0x38] sm:$0xff]  ;;  %v547_v10 = vld [vmem:[#allocation5 + $0xe28] sm:$0xff] }
  0xf7   :  { %2055 = vmatpush.msrb.mxu3 %v1226_v17  ;;  %1969 = vmatpush.msrb.mxu0 %v736_v46  ;;  %v717_v40 = vld [vmem:[#allocation5 + $0x1378] sm:$0xff]  ;;  %v227_v17 = vld [vmem:[#allocation5 + $0x428] sm:$0xff] }
  0xf8   :  { %1998 = vmatpush.msrb.mxu1 %v896_v31  ;;  %1970 = vmatmul.f32.vlgmr.msrb.gmra.mxu0 %v4881_v35  ;;  %v387_v46 = vld [vmem:[#allocation5 + $0x928] sm:$0xff]  ;;  %v337_v25 = vld [vmem:[#allocation5 + $0x798] sm:$0xff] }
  0xf9   :  { %1999 = vmatmul.f32.vlgmr.msrb.gmra.mxu1 %v4884_v5  ;;  %2028 = vmatmul.f32.vlgmr.msrb.gmra.mxu2 %v4887_v55  ;;  %v187_v32 = vld [vmem:[#allocation5 + $0x2e8] sm:$0xff] }
  0xfa   :  { %2056 = vmatpush.msrb.mxu3 %v1216_v12  ;;  %2128 = vmatpush.msra.mxu2 %v567_v59  ;;  %v4890_v7 = vpop.f32.mrf.mxu2  ;;  %v537_v12 = vld [vmem:[#allocation5 + $0xdd8] sm:$0xff]  ;;  %v707_v59 = vld [vmem:[#allocation5 + $0x1328] sm:$0xff] }
  0xfb   :  { %2070 = vmatpush.msra.mxu0 %v247_v61  ;;  %6350 = vst [vmem:[#allocation26_spill] sm:$0xff] %v4890_v7  ;;  %2099 = vmatpush.msra.mxu1 %v407_v45  ;;  %v217_v45 = vld [vmem:[#allocation5 + $0x3d8] sm:$0xff] }
  0xfc   :  { %2057 = vmatmul.f32.vlgmr.msrb.gmra.mxu3 %v4892_v8  ;;  %2129 = vmatpush.msra.mxu2 %v557_v43  ;;  %v377_v7 = vld [vmem:[#allocation5 + $0x8d8] sm:$0xff] }
  0xfd   :  { %2157 = vmatpush.msra.mxu3 %v727_v44  ;;  %v4895_v31 = vpop.f32.mrf.mxu3  ;;  %2071 = vmatpush.msra.mxu0 %v237_v23  ;;  %v4897_v61 = vpop.f32.mrf.mxu0  ;;  %v697_v43 = vld [vmem:[#allocation5 + $0x12d8] sm:$0xff]  ;;  %v527_v44 = vld [vmem:[#allocation5 + $0xd88] sm:$0xff] }
  0xfe   :  { %6351 = vst [vmem:[#allocation27_spill] sm:$0xff] %v4895_v31  ;;  %2100 = vmatpush.msra.mxu1 %v397_v26  ;;  %2130 = vmatpush.msra.mxu2 %v547_v10  ;;  %v4899_v48 = vpop.f32.mrf.mxu1  ;;  %v207_v23 = vld [vmem:[#allocation5 + $0x388] sm:$0xff]  ;;  %v4901_v26 = vld [vmem:[#allocation2 + $0x60] sm:$0xff] }
  0xff   :  { %2158 = vmatpush.msra.mxu3 %v717_v40  ;;  %2072 = vmatpush.msra.mxu0 %v227_v17  ;;  %6352 = vst [vmem:[#allocation28_spill] sm:$0xff] %v4899_v48  ;;  %v4904_v31 = vld [vmem:[#allocation2 + $0x68] sm:$0xff]  ;;  %v4907_v40 = vld [vmem:[#allocation2 + $0x70] sm:$0xff]  ;;  %v517_v17 = vld [vmem:[#allocation5 + $0xd38] sm:$0xff] }
 0x100   :  { %2101 = vmatpush.msra.mxu1 %v387_v46  ;;  %2131 = vmatpush.msra.mxu2 %v537_v12  ;;  %v367_v10 = vld [vmem:[#allocation5 + $0x888] sm:$0xff]  ;;  %v357_v12 = vld [vmem:[#allocation5 + $0x838] sm:$0xff] }
 0x101   :  { %2159 = vmatpush.msra.mxu3 %v707_v59  ;;  %2073 = vmatpush.msra.mxu0 %v217_v45  ;;  %v687_v46 = vld [vmem:[#allocation5 + $0x1288] sm:$0xff]  ;;  %v4912_v45 = vld [vmem:[#allocation2 + $0x78] sm:$0xff] }
 0x102   :  { %2102 = vmatpush.msra.mxu1 %v377_v7  ;;  %1973 = vmatmul.f32.gmra.mxu0 %v4901_v26  ;;  %v197_v7 = vld [vmem:[#allocation5 + $0x338] sm:$0xff] }
 0x103   :  { %2002 = vmatmul.f32.gmra.mxu1 %v4904_v31  ;;  %2031 = vmatmul.f32.gmra.mxu2 %v4907_v40 }
 0x104   :  { %2160 = vmatpush.msra.mxu3 %v697_v43  ;;  %2132 = vmatpush.msra.mxu2 %v527_v44  ;;  %v4910_v59 = vpop.f32.mrf.mxu2  ;;  %v497_v44 = vld [vmem:[#allocation5 + $0xc98] sm:$0xff] }
 0x105   :  { %2074 = vmatpush.msra.mxu0 %v207_v23  ;;  %6353 = vst [vmem:[#allocation29_spill] sm:$0xff] %v4910_v59  ;;  %2103 = vmatpush.msra.mxu1 %v367_v10  ;;  %v667_v23 = vld [vmem:[#allocation5 + $0x11e8] sm:$0xff]  ;;  %v177_v10 = vld [vmem:[#allocation5 + $0x298] sm:$0xff] }
 0x106   :  { %2060 = vmatmul.f32.gmra.mxu3 %v4912_v45  ;;  %2133 = vmatpush.msra.mxu2 %v517_v17  ;;  %v657_v17 = vld [vmem:[#allocation5 + $0x1198] sm:$0xff] }
 0x107   :  { %2161 = vmatpush.msra.mxu3 %v687_v46  ;;  %v4915_v43 = vpop.f32.mrf.mxu3  ;;  %2075 = vmatpush.msra.mxu0 %v197_v7  ;;  %v4917_v49 = vpop.f32.mrf.mxu0  ;;  %v487_v46 = vld [vmem:[#allocation5 + $0xc48] sm:$0xff] }
 0x108   :  { %6354 = vst [vmem:[#allocation30_spill] sm:$0xff] %v4915_v43  ;;  %2104 = vmatpush.msra.mxu1 %v357_v12  ;;  %2134 = vmatpush.msra.mxu2 %v507_v28  ;;  %v4919_v36 = vpop.f32.mrf.mxu1  ;;  %v167_v7 = vld [vmem:[#allocation5 + $0x248] sm:$0xff]  ;;  %v4921_v12 = vld [vmem:[#allocation2 + $0xa0] sm:$0xff]  ;;  %v4927_v28 = vld [vmem:[#allocation2 + $0xb0] sm:$0xff] }
 0x109   :  { %6355 = vst [vmem:[#allocation31_spill] sm:$0xff] %v4917_v49  ;;  %2162 = vmatpush.msra.mxu3 %v677_v50  ;;  %2076 = vmatpush.msra.mxu0 %v187_v32  ;;  %v4924_v43 = vld [vmem:[#allocation2 + $0xa8] sm:$0xff] }
 0x10a   :  { %2105 = vmatpush.msra.mxu1 %v347_v24  ;;  %6356 = vst [vmem:[#allocation32_spill] sm:$0xff] %v4919_v36  ;;  %2135 = vmatpush.msra.mxu2 %v497_v44  ;;  %v327_v50 = vld [vmem:[#allocation5 + $0x748] sm:$0xff]  ;;  %v477_v24 = vld [vmem:[#allocation5 + $0xbf8] sm:$0xff] }
 0x10b   :  { %2163 = vmatpush.msra.mxu3 %v667_v23  ;;  %2077 = vmatpush.msra.mxu0 %v177_v10  ;;  %v647_v32 = vld [vmem:[#allocation5 + $0x1148] sm:$0xff]  ;;  %v317_v44 = vld [vmem:[#allocation5 + $0x6f8] sm:$0xff] }
 0x10c   :  { %2106 = vmatpush.msra.mxu1 %v337_v25  ;;  %1976 = vmatmul.f32.gmra.mxu0 %v4921_v12  ;;  %v157_v25 = vld [vmem:[#allocation5 + $0x1f8] sm:$0xff]  ;;  %v107_v49 = vld [vmem:[#allocation5 + $0x68] sm:$0xff] }
 0x10d   :  { %2005 = vmatmul.f32.gmra.mxu1 %v4924_v43  ;;  %2034 = vmatmul.f32.gmra.mxu2 %v4927_v28  ;;  %v4932_v10 = vld [vmem:[#allocation2 + $0xb8] sm:$0xff] }
 0x10e   :  { %2164 = vmatpush.msra.mxu3 %v657_v17  ;;  %2136 = vmatpush.msra.mxu2 %v487_v46  ;;  %v4930_v23 = vpop.f32.mrf.mxu2  ;;  %v457_v46 = vld [vmem:[#allocation5 + $0xb58] sm:$0xff] }
 0x10f   :  { %2078 = vmatpush.msra.mxu0 %v167_v7  ;;  %6357 = vst [vmem:[#allocation33_spill] sm:$0xff] %v4930_v23  ;;  %2107 = vmatpush.msra.mxu1 %v327_v50  ;;  %v627_v7 = vld [vmem:[#allocation5 + $0x10a8] sm:$0xff]  ;;  %v137_v50 = vld [vmem:[#allocation5 + $0x158] sm:$0xff] }
 0x110   :  { %2063 = vmatmul.f32.gmra.mxu3 %v4932_v10  ;;  %2137 = vmatpush.msra.mxu2 %v477_v24  ;;  %v297_v23 = vld [vmem:[#allocation5 + $0x658] sm:$0xff] }
 0x111   :  { %2165 = vmatpush.msra.mxu3 %v647_v32  ;;  %v4935_v17 = vpop.f32.mrf.mxu3  ;;  %2079 = vmatpush.msra.mxu0 %v157_v25  ;;  %v4937_v59 = vpop.f32.mrf.mxu0  ;;  %v617_v24 = vld [vmem:[#allocation5 + $0x1058] sm:$0xff]  ;;  %v447_v32 = vld [vmem:[#allocation5 + $0xb08] sm:$0xff] }
 0x112   :  { %6358 = vst [vmem:[#allocation34_spill] sm:$0xff] %v4935_v17  ;;  %2108 = vmatpush.msra.mxu1 %v317_v44  ;;  %2138 = vmatpush.msra.mxu2 %v467_v60  ;;  %v4939_v36 = vpop.f32.mrf.mxu1  ;;  %v127_v25 = vld [vmem:[#allocation5 + $0x108] sm:$0xff]  ;;  %v4941_v44 = vld [vmem:[#allocation2 + $0xe0] sm:$0xff] }
 0x113   :  { %6359 = vst [vmem:[#allocation35_spill] sm:$0xff] %v4937_v59  ;;  %2166 = vmatpush.msra.mxu3 %v637_v22  ;;  %2080 = vmatpush.msra.mxu0 %v147_v29  ;;  %v4944_v17 = vld [vmem:[#allocation2 + $0xe8] sm:$0xff]  ;;  %v4947_v29 = vld [vmem:[#allocation2 + $0xf0] sm:$0xff]  ;;  %v597_v59 = vld [vmem:[#allocation5 + $0xfb8] sm:$0xff] }
 0x114   :  { %2109 = vmatpush.msra.mxu1 %v307_v41  ;;  %6360 = vst [vmem:[#allocation36_spill] sm:$0xff] %v4939_v36  ;;  %2139 = vmatpush.msra.mxu2 %v457_v46  ;;  %v287_v22 = vld [vmem:[#allocation5 + $0x608] sm:$0xff]  ;;  %v437_v41 = vld [vmem:[#allocation5 + $0xab8] sm:$0xff] }
 0x115   :  { %2167 = vmatpush.msra.mxu3 %v627_v7  ;;  %2081 = vmatpush.msra.mxu0 %v137_v50  ;;  %v607_v60 = vld [vmem:[#allocation5 + $0x1008] sm:$0xff]  ;;  %v277_v46 = vld [vmem:[#allocation5 + $0x5b8] sm:$0xff] }
 0x116   :  { %2110 = vmatpush.msra.mxu1 %v297_v23  ;;  %1979 = vmatmul.f32.gmra.mxu0 %v4941_v44  ;;  %v117_v23 = vld [vmem:[#allocation5 + $0xb8] sm:$0xff]  ;;  %v427_v36 = vld [vmem:[#allocation5 + $0xa68] sm:$0xff] }
 0x117   :  { %2008 = vmatmul.f32.gmra.mxu1 %v4944_v17  ;;  %2037 = vmatmul.f32.gmra.mxu2 %v4947_v29  ;;  %v4952_v50 = vld [vmem:[#allocation2 + $0xf8] sm:$0xff] }
 0x118   :  { %2168 = vmatpush.msra.mxu3 %v617_v24  ;;  %2140 = vmatpush.msra.mxu2 %v447_v32  ;;  %v4950_v7 = vpop.f32.mrf.mxu2  ;;  %v417_v32 = vld [vmem:[#allocation5 + $0xa18] sm:$0xff] }
 0x119   :  { %2082 = vmatpush.msra.mxu0 %v127_v25  ;;  %6361 = vst [vmem:[#allocation37_spill] sm:$0xff] %v4950_v7  ;;  %2111 = vmatpush.msra.mxu1 %v287_v22  ;;  %v587_v25 = vld [vmem:[#allocation5 + $0xf68] sm:$0xff]  ;;  %v97_v22 = vld [vmem:[#allocation5 + $0x18] sm:$0xff] }
 0x11a   :  { %2066 = vmatmul.f32.gmra.mxu3 %v4952_v50  ;;  %2141 = vmatpush.msra.mxu2 %v437_v41  ;;  %v257_v7 = vld [vmem:[#allocation5 + $0x518] sm:$0xff] }
 0x11b   :  { %2169 = vmatpush.msra.mxu3 %v607_v60  ;;  %v4955_v24 = vpop.f32.mrf.mxu3  ;;  %2083 = vmatpush.msra.mxu0 %v117_v23  ;;  %v4957_v42 = vpop.f32.mrf.mxu0  ;;  %v577_v41 = vld [vmem:[#allocation5 + $0xf18] sm:$0xff]  ;;  %v1207_v60 = vld [vmem:[#allocation5 + $0x22c8] sm:$0xff] }
 0x11c   :  { %6362 = vst [vmem:[#allocation38_spill] sm:$0xff] %v4955_v24  ;;  %2112 = vmatpush.msra.mxu1 %v277_v46  ;;  %2142 = vmatpush.msra.mxu2 %v427_v36  ;;  %v4959_v48 = vpop.f32.mrf.mxu1  ;;  %v887_v23 = vld [vmem:[#allocation5 + $0x18c8] sm:$0xff]  ;;  %v1197_v36 = vld [vmem:[#allocation5 + $0x2278] sm:$0xff] }
 0x11d   :  { %6363 = vst [vmem:[#allocation39_spill] sm:$0xff] %v4957_v42  ;;  %2170 = vmatpush.msra.mxu3 %v597_v59  ;;  %2084 = vmatpush.msra.mxu0 %v107_v49  ;;  %v1047_v46 = vld [vmem:[#allocation5 + $0x1dc8] sm:$0xff]  ;;  %v1037_v59 = vld [vmem:[#allocation5 + $0x1d78] sm:$0xff] }
 0x11e   :  { %2113 = vmatpush.msra.mxu1 %v267_v33  ;;  %6364 = vst [vmem:[#allocation40_spill] sm:$0xff] %v4959_v48  ;;  %2143 = vmatpush.msra.mxu2 %v417_v32  ;;  %v1367_v49 = vld [vmem:[#allocation5 + $0x27c8] sm:$0xff]  ;;  %v877_v33 = vld [vmem:[#allocation5 + $0x1878] sm:$0xff] }
 0x11f   :  { %2171 = vmatpush.msra.mxu3 %v587_v25  ;;  %2085 = vmatpush.msra.mxu0 %v97_v22  ;;  %v1357_v25 = vld [vmem:[#allocation5 + $0x2778] sm:$0xff] }
 0x120   :  { %2114 = vmatpush.msra.mxu1 %v257_v7  ;;  %2086 = vmatmul.f32.vlgmr.msra.gmra.mxu0 %v4801_v62  ;;  %v1187_v7 = vld [vmem:[#allocation5 + $0x2228] sm:$0xff]  ;;  %v149_v42 = vld [vmem:[#allocation5 + $0x1b8] sm:$0xff] }
 0x121   :  { %2115 = vmatmul.f32.vlgmr.msra.gmra.mxu1 %v4804_v2  ;;  %2144 = vmatmul.f32.vlgmr.msra.gmra.mxu2 %v4807_v3  ;;  %v867_v62 = vld [vmem:[#allocation5 + $0x1828] sm:$0xff]  ;;  %v1177_v3 = vld [vmem:[#allocation5 + $0x21d8] sm:$0xff] }
 0x122   :  { %2172 = vmatpush.msra.mxu3 %v577_v41  ;;  %2244 = vmatpush.msrb.mxu2 %v1207_v60  ;;  %v4964_v32 = vpop.f32.mrf.mxu2  ;;  %v1027_v2 = vld [vmem:[#allocation5 + $0x1d28] sm:$0xff] }
 0x123   :  { %2186 = vmatpush.msrb.mxu0 %v887_v23  ;;  %6365 = vst [vmem:[#allocation41_spill] sm:$0xff] %v4964_v32  ;;  %2215 = vmatpush.msrb.mxu1 %v1047_v46  ;;  %v1347_v41 = vld [vmem:[#allocation5 + $0x2728] sm:$0xff]  ;;  %v857_v23 = vld [vmem:[#allocation5 + $0x17d8] sm:$0xff] }
 0x124   :  { %2173 = vmatmul.f32.vlgmr.msra.gmra.mxu3 %v4812_v47  ;;  %2245 = vmatpush.msrb.mxu2 %v1197_v36  ;;  %v1017_v46 = vld [vmem:[#allocation5 + $0x1cd8] sm:$0xff] }
 0x125   :  { %2273 = vmatpush.msrb.mxu3 %v1367_v49  ;;  %v4967_v22 = vpop.f32.mrf.mxu3  ;;  %2187 = vmatpush.msrb.mxu0 %v877_v33  ;;  %v4969_v60 = vpop.f32.mrf.mxu0  ;;  %v1337_v36 = vld [vmem:[#allocation5 + $0x26d8] sm:$0xff]  ;;  %v1167_v49 = vld [vmem:[#allocation5 + $0x2188] sm:$0xff] }
 0x126   :  { %6366 = vst [vmem:[#allocation42_spill] sm:$0xff] %v4967_v22  ;;  %2216 = vmatpush.msrb.mxu1 %v1037_v59  ;;  %2246 = vmatpush.msrb.mxu2 %v1187_v7  ;;  %v4971_v47 = vpop.f32.mrf.mxu1  ;;  %v847_v33 = vld [vmem:[#allocation5 + $0x1788] sm:$0xff]  ;;  %v1157_v7 = vld [vmem:[#allocation5 + $0x2138] sm:$0xff] }
 0x127   :  { %6367 = vst [vmem:[#allocation43_spill] sm:$0xff] %v4969_v60  ;;  %2274 = vmatpush.msrb.mxu3 %v1357_v25  ;;  %2188 = vmatpush.msrb.mxu0 %v867_v62  ;;  %v1007_v59 = vld [vmem:[#allocation5 + $0x1c88] sm:$0xff]  ;;  %v837_v62 = vld [vmem:[#allocation5 + $0x1738] sm:$0xff] }
 0x128   :  { %2217 = vmatpush.msrb.mxu1 %v1027_v2  ;;  %6368 = vst [vmem:[#allocation44_spill] sm:$0xff] %v4971_v47  ;;  %2247 = vmatpush.msrb.mxu2 %v1177_v3  ;;  %v1327_v25 = vld [vmem:[#allocation5 + $0x2688] sm:$0xff]  ;;  %v997_v2 = vld [vmem:[#allocation5 + $0x1c38] sm:$0xff] }
 0x129   :  { %2275 = vmatpush.msrb.mxu3 %v1347_v41  ;;  %2189 = vmatpush.msrb.mxu0 %v857_v23  ;;  %v1147_v41 = vld [vmem:[#allocation5 + $0x20e8] sm:$0xff]  ;;  %v1317_v23 = vld [vmem:[#allocation5 + $0x2638] sm:$0xff] }
 0x12a   :  { %2218 = vmatpush.msrb.mxu1 %v1017_v46  ;;  %2089 = vmatmul.f32.gmra.mxu0 %v4821_v0  ;;  %v827_v0 = vld [vmem:[#allocation5 + $0x16e8] sm:$0xff]  ;;  %v349_v32 = vld [vmem:[#allocation5 + $0x7f8] sm:$0xff] }
 0x12b   :  { %2118 = vmatmul.f32.gmra.mxu1 %v4824_v11  ;;  %2147 = vmatmul.f32.gmra.mxu2 %v4827_v13  ;;  %v987_v11 = vld [vmem:[#allocation5 + $0x1be8] sm:$0xff]  ;;  %v1137_v13 = vld [vmem:[#allocation5 + $0x2098] sm:$0xff] }
 0x12c   :  { %2276 = vmatpush.msrb.mxu3 %v1337_v36  ;;  %2248 = vmatpush.msrb.mxu2 %v1167_v49  ;;  %v4976_v3 = vpop.f32.mrf.mxu2  ;;  %v1307_v36 = vld [vmem:[#allocation5 + $0x25e8] sm:$0xff] }
 0x12d   :  { %2190 = vmatpush.msrb.mxu0 %v847_v33  ;;  %6369 = vst [vmem:[#allocation45_spill] sm:$0xff] %v4976_v3  ;;  %2219 = vmatpush.msrb.mxu1 %v1007_v59  ;;  %v817_v33 = vld [vmem:[#allocation5 + $0x1698] sm:$0xff] }
 0x12e   :  { %2176 = vmatmul.f32.gmra.mxu3 %v4832_v6  ;;  %2249 = vmatpush.msrb.mxu2 %v1157_v7  ;;  %v977_v59 = vld [vmem:[#allocation5 + $0x1b98] sm:$0xff] }
 0x12f   :  { %2277 = vmatpush.msrb.mxu3 %v1327_v25  ;;  %v4979_v46 = vpop.f32.mrf.mxu3  ;;  %2191 = vmatpush.msrb.mxu0 %v837_v62  ;;  %v4981_v49 = vpop.f32.mrf.mxu0  ;;  %v1297_v7 = vld [vmem:[#allocation5 + $0x2598] sm:$0xff]  ;;  %v1127_v25 = vld [vmem:[#allocation5 + $0x2048] sm:$0xff] }
 0x130   :  { %6370 = vst [vmem:[#allocation46_spill] sm:$0xff] %v4979_v46  ;;  %2220 = vmatpush.msrb.mxu1 %v997_v2  ;;  %2250 = vmatpush.msrb.mxu2 %v1147_v41  ;;  %v4983_v6 = vpop.f32.mrf.mxu1  ;;  %v807_v62 = vld [vmem:[#allocation5 + $0x1648] sm:$0xff]  ;;  %v1117_v41 = vld [vmem:[#allocation5 + $0x1ff8] sm:$0xff]  ;;  %v948_v46 = vld [vmem:[#allocation5 + $0x1ab0] sm:$0xff] }
 0x131   :  { %6371 = vst [vmem:[#allocation47_spill] sm:$0xff] %v4981_v49  ;;  %2278 = vmatpush.msrb.mxu3 %v1317_v23  ;;  %2192 = vmatpush.msrb.mxu0 %v827_v0  ;;  %v967_v2 = vld [vmem:[#allocation5 + $0x1b48] sm:$0xff]  ;;  %v797_v0 = vld [vmem:[#allocation5 + $0x15f8] sm:$0xff] }
 0x132   :  { %2221 = vmatpush.msrb.mxu1 %v987_v11  ;;  %6372 = vst [vmem:[#allocation48_spill] sm:$0xff] %v4983_v6  ;;  %2251 = vmatpush.msrb.mxu2 %v1137_v13  ;;  %v1287_v23 = vld [vmem:[#allocation5 + $0x2548] sm:$0xff]  ;;  %v957_v11 = vld [vmem:[#allocation5 + $0x1af8] sm:$0xff] }
 0x133   :  { %2279 = vmatpush.msrb.mxu3 %v1307_v36  ;;  %2193 = vmatpush.msrb.mxu0 %v817_v33  ;;  %v1107_v36 = vld [vmem:[#allocation5 + $0x1fa8] sm:$0xff]  ;;  %v1277_v33 = vld [vmem:[#allocation5 + $0x24f8] sm:$0xff] }
 0x134   :  { %2222 = vmatpush.msrb.mxu1 %v977_v59  ;;  %2092 = vmatmul.f32.gmra.mxu0 %v4841_v21  ;;  %v787_v21 = vld [vmem:[#allocation5 + $0x15a8] sm:$0xff]  ;;  %v389_v3 = vld [vmem:[#allocation5 + $0x938] sm:$0xff] }
 0x135   :  { %2121 = vmatmul.f32.gmra.mxu1 %v4844_v30  ;;  %2150 = vmatmul.f32.gmra.mxu2 %v4847_v4  ;;  %v947_v30 = vld [vmem:[#allocation5 + $0x1aa8] sm:$0xff]  ;;  %v1097_v4 = vld [vmem:[#allocation5 + $0x1f58] sm:$0xff] }
 0x136   :  { %2280 = vmatpush.msrb.mxu3 %v1297_v7  ;;  %2252 = vmatpush.msrb.mxu2 %v1127_v25  ;;  %v4988_v13 = vpop.f32.mrf.mxu2  ;;  %v1267_v7 = vld [vmem:[#allocation5 + $0x24a8] sm:$0xff]  ;;  %v189_v6 = vld [vmem:[#allocation5 + $0x2f8] sm:$0xff] }
 0x137   :  { %2194 = vmatpush.msrb.mxu0 %v807_v62  ;;  %6373 = vst [vmem:[#allocation49_spill] sm:$0xff] %v4988_v13  ;;  %2223 = vmatpush.msrb.mxu1 %v967_v2  ;;  %v777_v62 = vld [vmem:[#allocation5 + $0x1558] sm:$0xff] }
 0x138   :  { %2179 = vmatmul.f32.gmra.mxu3 %v4852_v39  ;;  %2253 = vmatpush.msrb.mxu2 %v1117_v41  ;;  %v937_v2 = vld [vmem:[#allocation5 + $0x1a58] sm:$0xff] }
 0x139   :  { %2281 = vmatpush.msrb.mxu3 %v1287_v23  ;;  %v4991_v59 = vpop.f32.mrf.mxu3  ;;  %2195 = vmatpush.msrb.mxu0 %v797_v0  ;;  %v4993_v25 = vpop.f32.mrf.mxu0  ;;  %v1257_v41 = vld [vmem:[#allocation5 + $0x2458] sm:$0xff]  ;;  %v1087_v23 = vld [vmem:[#allocation5 + $0x1f08] sm:$0xff] }
 0x13a   :  { %6374 = vst [vmem:[#allocation50_spill] sm:$0xff] %v4991_v59  ;;  %2224 = vmatpush.msrb.mxu1 %v957_v11  ;;  %2254 = vmatpush.msrb.mxu2 %v1107_v36  ;;  %v4995_v39 = vpop.f32.mrf.mxu1  ;;  %v767_v0 = vld [vmem:[#allocation5 + $0x1508] sm:$0xff]  ;;  %v1077_v36 = vld [vmem:[#allocation5 + $0x1eb8] sm:$0xff]  ;;  %v788_v59 = vld [vmem:[#allocation5 + $0x15b0] sm:$0xff] }
 0x13b   :  { %6375 = vst [vmem:[#allocation51_spill] sm:$0xff] %v4993_v25  ;;  %2282 = vmatpush.msrb.mxu3 %v1277_v33  ;;  %2196 = vmatpush.msrb.mxu0 %v787_v21  ;;  %v927_v11 = vld [vmem:[#allocation5 + $0x1a08] sm:$0xff]  ;;  %v757_v21 = vld [vmem:[#allocation5 + $0x14b8] sm:$0xff] }
 0x13c   :  { %2225 = vmatpush.msrb.mxu1 %v947_v30  ;;  %6376 = vst [vmem:[#allocation52_spill] sm:$0xff] %v4995_v39  ;;  %2255 = vmatpush.msrb.mxu2 %v1097_v4  ;;  %v1247_v33 = vld [vmem:[#allocation5 + $0x2408] sm:$0xff]  ;;  %v917_v30 = vld [vmem:[#allocation5 + $0x19b8] sm:$0xff] }
 0x13d   :  { %2283 = vmatpush.msrb.mxu3 %v1267_v7  ;;  %2197 = vmatpush.msrb.mxu0 %v777_v62  ;;  %v1067_v7 = vld [vmem:[#allocation5 + $0x1e68] sm:$0xff]  ;;  %v1237_v62 = vld [vmem:[#allocation5 + $0x23b8] sm:$0xff] }
 0x13e   :  { %2226 = vmatpush.msrb.mxu1 %v937_v2  ;;  %2095 = vmatmul.f32.gmra.mxu0 %v4861_v37  ;;  %v747_v37 = vld [vmem:[#allocation5 + $0x1468] sm:$0xff]  ;;  %v229_v39 = vld [vmem:[#allocation5 + $0x438] sm:$0xff] }
 0x13f   :  { %2124 = vmatmul.f32.gmra.mxu1 %v4864_v38  ;;  %2153 = vmatmul.f32.gmra.mxu2 %v4867_v52  ;;  %v907_v38 = vld [vmem:[#allocation5 + $0x1968] sm:$0xff]  ;;  %v1057_v52 = vld [vmem:[#allocation5 + $0x1e18] sm:$0xff] }
 0x140   :  { %2284 = vmatpush.msrb.mxu3 %v1257_v41  ;;  %2256 = vmatpush.msrb.mxu2 %v1087_v23  ;;  %v5000_v4 = vpop.f32.mrf.mxu2  ;;  %v1227_v41 = vld [vmem:[#allocation5 + $0x2368] sm:$0xff] }
 0x141   :  { %2198 = vmatpush.msrb.mxu0 %v767_v0  ;;  %6377 = vst [vmem:[#allocation53_spill] sm:$0xff] %v5000_v4  ;;  %2227 = vmatpush.msrb.mxu1 %v927_v11  ;;  %v737_v0 = vld [vmem:[#allocation5 + $0x1418] sm:$0xff]  ;;  %v748_v4 = vld [vmem:[#allocation5 + $0x1470] sm:$0xff] }
 0x142   :  { %2182 = vmatmul.f32.gmra.mxu3 %v4872_v20  ;;  %2257 = vmatpush.msrb.mxu2 %v1077_v36  ;;  %v897_v11 = vld [vmem:[#allocation5 + $0x1918] sm:$0xff] }
 0x143   :  { %2285 = vmatpush.msrb.mxu3 %v1247_v33  ;;  %v5003_v2 = vpop.f32.mrf.mxu3  ;;  %2199 = vmatpush.msrb.mxu0 %v757_v21  ;;  %v5005_v23 = vpop.f32.mrf.mxu0  ;;  %v1217_v36 = vld [vmem:[#allocation5 + $0x2318] sm:$0xff]  ;;  %v568_v33 = vld [vmem:[#allocation5 + $0xed0] sm:$0xff] }
 0x144   :  { %6378 = vst [vmem:[#allocation54_spill] sm:$0xff] %v5003_v2  ;;  %2228 = vmatpush.msrb.mxu1 %v917_v30  ;;  %2258 = vmatpush.msrb.mxu2 %v1067_v7  ;;  %v5007_v20 = vpop.f32.mrf.mxu1  ;;  %v248_v21 = vld [vmem:[#allocation5 + $0x4d0] sm:$0xff]  ;;  %v558_v7 = vld [vmem:[#allocation5 + $0xe80] sm:$0xff] }
 0x145   :  { %6379 = vst [vmem:[#allocation55_spill] sm:$0xff] %v5005_v23  ;;  %2286 = vmatpush.msrb.mxu3 %v1237_v62  ;;  %2200 = vmatpush.msrb.mxu0 %v747_v37  ;;  %v408_v30 = vld [vmem:[#allocation5 + $0x9d0] sm:$0xff]  ;;  %v238_v37 = vld [vmem:[#allocation5 + $0x480] sm:$0xff] }
 0x146   :  { %2229 = vmatpush.msrb.mxu1 %v907_v38  ;;  %6380 = vst [vmem:[#allocation56_spill] sm:$0xff] %v5007_v20  ;;  %2259 = vmatpush.msrb.mxu2 %v1057_v52  ;;  %v728_v62 = vld [vmem:[#allocation5 + $0x13d0] sm:$0xff]  ;;  %v398_v38 = vld [vmem:[#allocation5 + $0x980] sm:$0xff] }
 0x147   :  { %2287 = vmatpush.msrb.mxu3 %v1227_v41  ;;  %2201 = vmatpush.msrb.mxu0 %v737_v0  ;;  %v548_v41 = vld [vmem:[#allocation5 + $0xe30] sm:$0xff]  ;;  %v718_v0 = vld [vmem:[#allocation5 + $0x1380] sm:$0xff] }
 0x148   :  { %2230 = vmatpush.msrb.mxu1 %v897_v11  ;;  %2202 = vmatmul.f32.vlgmr.msrb.gmra.mxu0 %v4881_v35  ;;  %v228_v35 = vld [vmem:[#allocation5 + $0x430] sm:$0xff]  ;;  %v1358_v20 = vld [vmem:[#allocation5 + $0x2780] sm:$0xff] }
 0x149   :  { %2231 = vmatmul.f32.vlgmr.msrb.gmra.mxu1 %v4884_v5  ;;  %2260 = vmatmul.f32.vlgmr.msrb.gmra.mxu2 %v4887_v55  ;;  %v388_v5 = vld [vmem:[#allocation5 + $0x930] sm:$0xff]  ;;  %v538_v55 = vld [vmem:[#allocation5 + $0xde0] sm:$0xff] }
 0x14a   :  { %2288 = vmatpush.msrb.mxu3 %v1217_v36  ;;  %2360 = vmatpush.msra.mxu2 %v568_v33  ;;  %v5012_v52 = vpop.f32.mrf.mxu2  ;;  %v708_v36 = vld [vmem:[#allocation5 + $0x1330] sm:$0xff] }
 0x14b   :  { %2302 = vmatpush.msra.mxu0 %v248_v21  ;;  %6381 = vst [vmem:[#allocation57_spill] sm:$0xff] %v5012_v52  ;;  %2331 = vmatpush.msra.mxu1 %v408_v30  ;;  %v218_v21 = vld [vmem:[#allocation5 + $0x3e0] sm:$0xff]  ;;  %v1188_v52 = vld [vmem:[#allocation5 + $0x2230] sm:$0xff] }
 0x14c   :  { %2289 = vmatmul.f32.vlgmr.msrb.gmra.mxu3 %v4892_v8  ;;  %2361 = vmatpush.msra.mxu2 %v558_v7  ;;  %v378_v30 = vld [vmem:[#allocation5 + $0x8e0] sm:$0xff]  ;;  %v1028_v23 = vld [vmem:[#allocation5 + $0x1d30] sm:$0xff] }
 0x14d   :  { %2389 = vmatpush.msra.mxu3 %v728_v62  ;;  %v5015_v11 = vpop.f32.mrf.mxu3  ;;  %2303 = vmatpush.msra.mxu0 %v238_v37  ;;  %v5017_v33 = vpop.f32.mrf.mxu0  ;;  %v698_v7 = vld [vmem:[#allocation5 + $0x12e0] sm:$0xff]  ;;  %v528_v62 = vld [vmem:[#allocation5 + $0xd90] sm:$0xff] }
 0x14e   :  { %6382 = vst [vmem:[#allocation58_spill] sm:$0xff] %v5015_v11  ;;  %2332 = vmatpush.msra.mxu1 %v398_v38  ;;  %2362 = vmatpush.msra.mxu2 %v548_v41  ;;  %v5019_v8 = vpop.f32.mrf.mxu1  ;;  %v208_v37 = vld [vmem:[#allocation5 + $0x390] sm:$0xff]  ;;  %v518_v41 = vld [vmem:[#allocation5 + $0xd40] sm:$0xff]  ;;  %v5060_v11 = vld [vmem:[#allocation2 + $0x8] sm:$0xff] }
 0x14f   :  { %6383 = vst [vmem:[#allocation59_spill] sm:$0xff] %v5017_v33  ;;  %2390 = vmatpush.msra.mxu3 %v718_v0  ;;  %2304 = vmatpush.msra.mxu0 %v228_v35  ;;  %v368_v38 = vld [vmem:[#allocation5 + $0x890] sm:$0xff]  ;;  %v198_v35 = vld [vmem:[#allocation5 + $0x340] sm:$0xff]  ;;  %v269_v33 = vld [vmem:[#allocation5 + $0x578] sm:$0xff] }
 0x150   :  { %2333 = vmatpush.msra.mxu1 %v388_v5  ;;  %6384 = vst [vmem:[#allocation60_spill] sm:$0xff] %v5019_v8  ;;  %2363 = vmatpush.msra.mxu2 %v538_v55  ;;  %v688_v0 = vld [vmem:[#allocation5 + $0x1290] sm:$0xff]  ;;  %v358_v5 = vld [vmem:[#allocation5 + $0x840] sm:$0xff]  ;;  %v109_v8 = vld [vmem:[#allocation5 + $0x78] sm:$0xff] }
 0x151   :  { %2391 = vmatpush.msra.mxu3 %v708_v36  ;;  %2305 = vmatpush.msra.mxu0 %v218_v21  ;;  %v508_v36 = vld [vmem:[#allocation5 + $0xcf0] sm:$0xff]  ;;  %v678_v21 = vld [vmem:[#allocation5 + $0x1240] sm:$0xff] }
 0x152   :  { %2334 = vmatpush.msra.mxu1 %v378_v30  ;;  %2205 = vmatmul.f32.gmra.mxu0 %v4901_v26  ;;  %v348_v26 = vld [vmem:[#allocation5 + $0x7f0] sm:$0xff] }
 0x153   :  { %2234 = vmatmul.f32.gmra.mxu1 %v4904_v31  ;;  %2263 = vmatmul.f32.gmra.mxu2 %v4907_v40  ;;  %v188_v31 = vld [vmem:[#allocation5 + $0x2f0] sm:$0xff]  ;;  %v498_v40 = vld [vmem:[#allocation5 + $0xca0] sm:$0xff] }
 0x154   :  { %2392 = vmatpush.msra.mxu3 %v698_v7  ;;  %2364 = vmatpush.msra.mxu2 %v528_v62  ;;  %v5024_v55 = vpop.f32.mrf.mxu2  ;;  %v668_v7 = vld [vmem:[#allocation5 + $0x11f0] sm:$0xff] }
 0x155   :  { %2306 = vmatpush.msra.mxu0 %v208_v37  ;;  %6385 = vst [vmem:[#allocation61_spill] sm:$0xff] %v5024_v55  ;;  %2335 = vmatpush.msra.mxu1 %v368_v38  ;;  %v178_v37 = vld [vmem:[#allocation5 + $0x2a0] sm:$0xff]  ;;  %v309_v55 = vld [vmem:[#allocation5 + $0x6b8] sm:$0xff] }
 0x156   :  { %2292 = vmatmul.f32.gmra.mxu3 %v4912_v45  ;;  %2365 = vmatpush.msra.mxu2 %v518_v41  ;;  %v338_v38 = vld [vmem:[#allocation5 + $0x7a0] sm:$0xff] }
 0x157   :  { %2393 = vmatpush.msra.mxu3 %v688_v0  ;;  %v5027_v30 = vpop.f32.mrf.mxu3  ;;  %2307 = vmatpush.msra.mxu0 %v198_v35  ;;  %v5029_v62 = vpop.f32.mrf.mxu0  ;;  %v658_v41 = vld [vmem:[#allocation5 + $0x11a0] sm:$0xff]  ;;  %v488_v0 = vld [vmem:[#allocation5 + $0xc50] sm:$0xff] }
 0x158   :  { %6386 = vst [vmem:[#allocation62_spill] sm:$0xff] %v5027_v30  ;;  %2336 = vmatpush.msra.mxu1 %v358_v5  ;;  %2366 = vmatpush.msra.mxu2 %v508_v36  ;;  %v5031_v45 = vpop.f32.mrf.mxu1  ;;  %v168_v35 = vld [vmem:[#allocation5 + $0x250] sm:$0xff]  ;;  %v478_v36 = vld [vmem:[#allocation5 + $0xc00] sm:$0xff] }
 0x159   :  { %6387 = vst [vmem:[#allocation63_spill] sm:$0xff] %v5029_v62  ;;  %2394 = vmatpush.msra.mxu3 %v678_v21  ;;  %2308 = vmatpush.msra.mxu0 %v188_v31  ;;  %v328_v5 = vld [vmem:[#allocation5 + $0x750] sm:$0xff]  ;;  %v158_v31 = vld [vmem:[#allocation5 + $0x200] sm:$0xff] }
 0x15a   :  { %2337 = vmatpush.msra.mxu1 %v348_v26  ;;  %6388 = vst [vmem:[#allocation64_spill] sm:$0xff] %v5031_v45  ;;  %2367 = vmatpush.msra.mxu2 %v498_v40  ;;  %v648_v21 = vld [vmem:[#allocation5 + $0x1150] sm:$0xff]  ;;  %v318_v26 = vld [vmem:[#allocation5 + $0x700] sm:$0xff] }
 0x15b   :  { %2395 = vmatpush.msra.mxu3 %v668_v7  ;;  %2309 = vmatpush.msra.mxu0 %v178_v37  ;;  %v468_v7 = vld [vmem:[#allocation5 + $0xbb0] sm:$0xff]  ;;  %v638_v37 = vld [vmem:[#allocation5 + $0x1100] sm:$0xff] }
 0x15c   :  { %2338 = vmatpush.msra.mxu1 %v338_v38  ;;  %2208 = vmatmul.f32.gmra.mxu0 %v4921_v12  ;;  %v308_v12 = vld [vmem:[#allocation5 + $0x6b0] sm:$0xff] }
 0x15d   :  { %2237 = vmatmul.f32.gmra.mxu1 %v4924_v43  ;;  %2266 = vmatmul.f32.gmra.mxu2 %v4927_v28  ;;  %v148_v43 = vld [vmem:[#allocation5 + $0x1b0] sm:$0xff]  ;;  %v458_v28 = vld [vmem:[#allocation5 + $0xb60] sm:$0xff] }
 0x15e   :  { %2396 = vmatpush.msra.mxu3 %v658_v41  ;;  %2368 = vmatpush.msra.mxu2 %v488_v0  ;;  %v5036_v40 = vpop.f32.mrf.mxu2  ;;  %v628_v41 = vld [vmem:[#allocation5 + $0x10b0] sm:$0xff] }
 0x15f   :  { %2310 = vmatpush.msra.mxu0 %v168_v35  ;;  %6389 = vst [vmem:[#allocation65_spill] sm:$0xff] %v5036_v40  ;;  %2339 = vmatpush.msra.mxu1 %v328_v5  ;;  %v138_v35 = vld [vmem:[#allocation5 + $0x160] sm:$0xff]  ;;  %v908_v40 = vld [vmem:[#allocation5 + $0x1970] sm:$0xff] }
 0x160   :  { %2295 = vmatmul.f32.gmra.mxu3 %v4932_v10  ;;  %2369 = vmatpush.msra.mxu2 %v478_v36  ;;  %v298_v5 = vld [vmem:[#allocation5 + $0x660] sm:$0xff] }
 0x161   :  { %2397 = vmatpush.msra.mxu3 %v648_v21  ;;  %v5039_v38 = vpop.f32.mrf.mxu3  ;;  %2311 = vmatpush.msra.mxu0 %v158_v31  ;;  %v5041_v0 = vpop.f32.mrf.mxu0  ;;  %v618_v36 = vld [vmem:[#allocation5 + $0x1060] sm:$0xff]  ;;  %v448_v21 = vld [vmem:[#allocation5 + $0xb10] sm:$0xff] }
 0x162   :  { %6390 = vst [vmem:[#allocation66_spill] sm:$0xff] %v5039_v38  ;;  %2340 = vmatpush.msra.mxu1 %v318_v26  ;;  %2370 = vmatpush.msra.mxu2 %v468_v7  ;;  %v5043_v10 = vpop.f32.mrf.mxu1  ;;  %v128_v31 = vld [vmem:[#allocation5 + $0x110] sm:$0xff]  ;;  %v438_v7 = vld [vmem:[#allocation5 + $0xac0] sm:$0xff] }
 0x163   :  { %6391 = vst [vmem:[#allocation67_spill] sm:$0xff] %v5041_v0  ;;  %2398 = vmatpush.msra.mxu3 %v638_v37  ;;  %2312 = vmatpush.msra.mxu0 %v148_v43  ;;  %v288_v26 = vld [vmem:[#allocation5 + $0x610] sm:$0xff]  ;;  %v118_v43 = vld [vmem:[#allocation5 + $0xc0] sm:$0xff] }
 0x164   :  { %2341 = vmatpush.msra.mxu1 %v308_v12  ;;  %6392 = vst [vmem:[#allocation68_spill] sm:$0xff] %v5043_v10  ;;  %2371 = vmatpush.msra.mxu2 %v458_v28  ;;  %v608_v37 = vld [vmem:[#allocation5 + $0x1010] sm:$0xff]  ;;  %v278_v12 = vld [vmem:[#allocation5 + $0x5c0] sm:$0xff] }
 0x165   :  { %2399 = vmatpush.msra.mxu3 %v628_v41  ;;  %2313 = vmatpush.msra.mxu0 %v138_v35  ;;  %v428_v41 = vld [vmem:[#allocation5 + $0xa70] sm:$0xff]  ;;  %v598_v35 = vld [vmem:[#allocation5 + $0xfc0] sm:$0xff] }
 0x166   :  { %2342 = vmatpush.msra.mxu1 %v298_v5  ;;  %2211 = vmatmul.f32.gmra.mxu0 %v4941_v44  ;;  %v268_v44 = vld [vmem:[#allocation5 + $0x570] sm:$0xff]  ;;  %v1318_v10 = vld [vmem:[#allocation5 + $0x2640] sm:$0xff] }
 0x167   :  { %2240 = vmatmul.f32.gmra.mxu1 %v4944_v17  ;;  %2269 = vmatmul.f32.gmra.mxu2 %v4947_v29  ;;  %v108_v17 = vld [vmem:[#allocation5 + $0x70] sm:$0xff]  ;;  %v418_v29 = vld [vmem:[#allocation5 + $0xa20] sm:$0xff] }
 0x168   :  { %2400 = vmatpush.msra.mxu3 %v618_v36  ;;  %2372 = vmatpush.msra.mxu2 %v448_v21  ;;  %v5048_v28 = vpop.f32.mrf.mxu2  ;;  %v588_v36 = vld [vmem:[#allocation5 + $0xf70] sm:$0xff] }
 0x169   :  { %2314 = vmatpush.msra.mxu0 %v128_v31  ;;  %6393 = vst [vmem:[#allocation69_spill] sm:$0xff] %v5048_v28  ;;  %2343 = vmatpush.msra.mxu1 %v288_v26  ;;  %v98_v31 = vld [vmem:[#allocation5 + $0x20] sm:$0xff]  ;;  %v1148_v28 = vld [vmem:[#allocation5 + $0x20f0] sm:$0xff] }
 0x16a   :  { %2298 = vmatmul.f32.gmra.mxu3 %v4952_v50  ;;  %2373 = vmatpush.msra.mxu2 %v438_v7  ;;  %v258_v26 = vld [vmem:[#allocation5 + $0x520] sm:$0xff]  ;;  %v828_v0 = vld [vmem:[#allocation5 + $0x16f0] sm:$0xff] }
 0x16b   :  { %2401 = vmatpush.msra.mxu3 %v608_v37  ;;  %v5051_v5 = vpop.f32.mrf.mxu3  ;;  %2315 = vmatpush.msra.mxu0 %v118_v43  ;;  %v5053_v21 = vpop.f32.mrf.mxu0  ;;  %v578_v7 = vld [vmem:[#allocation5 + $0xf20] sm:$0xff]  ;;  %v1208_v37 = vld [vmem:[#allocation5 + $0x22d0] sm:$0xff] }
 0x16c   :  { %6394 = vst [vmem:[#allocation70_spill] sm:$0xff] %v5051_v5  ;;  %2344 = vmatpush.msra.mxu1 %v278_v12  ;;  %2374 = vmatpush.msra.mxu2 %v428_v41  ;;  %v5055_v50 = vpop.f32.mrf.mxu1  ;;  %v888_v43 = vld [vmem:[#allocation5 + $0x18d0] sm:$0xff]  ;;  %v5057_v12 = vld [vmem:[#allocation2] sm:$0xff] }
 0x16d   :  { %6395 = vst [vmem:[#allocation71_spill] sm:$0xff] %v5053_v21  ;;  %2402 = vmatpush.msra.mxu3 %v598_v35  ;;  %2316 = vmatpush.msra.mxu0 %v108_v17  ;;  %v1048_v41 = vld [vmem:[#allocation5 + $0x1dd0] sm:$0xff]  ;;  %v1198_v17 = vld [vmem:[#allocation5 + $0x2280] sm:$0xff] }
 0x16e   :  { %2345 = vmatpush.msra.mxu1 %v268_v44  ;;  %6396 = vst [vmem:[#allocation72_spill] sm:$0xff] %v5055_v50  ;;  %2375 = vmatpush.msra.mxu2 %v418_v29  ;;  %v5063_v35 = vld [vmem:[#allocation2 + $0x10] sm:$0xff]  ;;  %v878_v29 = vld [vmem:[#allocation5 + $0x1880] sm:$0xff] }
 0x16f   :  { %2403 = vmatpush.msra.mxu3 %v588_v36  ;;  %2317 = vmatpush.msra.mxu0 %v98_v31  ;;  %v1368_v44 = vld [vmem:[#allocation5 + $0x27d0] sm:$0xff]  ;;  %v1038_v36 = vld [vmem:[#allocation5 + $0x1d80] sm:$0xff] }
 0x170   :  { %2346 = vmatpush.msra.mxu1 %v258_v26  ;;  %2318 = vmatmul.f32.vlgmr.msra.gmra.mxu0 %v5057_v12  ;;  %v5068_v26 = vld [vmem:[#allocation2 + $0x18] sm:$0xff]  ;;  %v868_v5 = vld [vmem:[#allocation5 + $0x1830] sm:$0xff] }
 0x171   :  { %2347 = vmatmul.f32.vlgmr.msra.gmra.mxu1 %v5060_v11  ;;  %2376 = vmatmul.f32.vlgmr.msra.gmra.mxu2 %v5063_v35 }
 0x172   :  { %2404 = vmatpush.msra.mxu3 %v578_v7  ;;  %2476 = vmatpush.msrb.mxu2 %v1208_v37  ;;  %v5066_v31 = vpop.f32.mrf.mxu2  ;;  %v1178_v37 = vld [vmem:[#allocation5 + $0x21e0] sm:$0xff] }
 0x173   :  { %2418 = vmatpush.msrb.mxu0 %v888_v43  ;;  %6397 = vst [vmem:[#allocation73_spill] sm:$0xff] %v5066_v31  ;;  %2447 = vmatpush.msrb.mxu1 %v1048_v41  ;;  %v1348_v43 = vld [vmem:[#allocation5 + $0x2730] sm:$0xff]  ;;  %v858_v41 = vld [vmem:[#allocation5 + $0x17e0] sm:$0xff] }
 0x174   :  { %2405 = vmatmul.f32.vlgmr.msra.gmra.mxu3 %v5068_v26  ;;  %2477 = vmatpush.msrb.mxu2 %v1198_v17  ;;  %v1018_v31 = vld [vmem:[#allocation5 + $0x1ce0] sm:$0xff] }
 0x175   :  { %2505 = vmatpush.msrb.mxu3 %v1368_v44  ;;  %v5071_v7 = vpop.f32.mrf.mxu3  ;;  %2419 = vmatpush.msrb.mxu0 %v878_v29  ;;  %v5073_v50 = vpop.f32.mrf.mxu0  ;;  %v1338_v17 = vld [vmem:[#allocation5 + $0x26e0] sm:$0xff]  ;;  %v1168_v44 = vld [vmem:[#allocation5 + $0x2190] sm:$0xff] }
 0x176   :  { %6398 = vst [vmem:[#allocation74_spill] sm:$0xff] %v5071_v7  ;;  %2448 = vmatpush.msrb.mxu1 %v1038_v36  ;;  %2478 = vmatpush.msrb.mxu2 %v1188_v52  ;;  %v5075_v21 = vpop.f32.mrf.mxu1  ;;  %v848_v29 = vld [vmem:[#allocation5 + $0x1790] sm:$0xff]  ;;  %v5077_v36 = vld [vmem:[#allocation2 + $0x40] sm:$0xff]  ;;  %v5080_v7 = vld [vmem:[#allocation2 + $0x48] sm:$0xff] }
 0x177   :  { %6399 = vst [vmem:[#allocation75_spill] sm:$0xff] %v5073_v50  ;;  %2506 = vmatpush.msrb.mxu3 %v1358_v20  ;;  %2420 = vmatpush.msrb.mxu0 %v868_v5  ;;  %v1008_v20 = vld [vmem:[#allocation5 + $0x1c90] sm:$0xff] }
 0x178   :  { %2449 = vmatpush.msrb.mxu1 %v1028_v23  ;;  %6400 = vst [vmem:[#allocation76_spill] sm:$0xff] %v5075_v21  ;;  %2479 = vmatpush.msrb.mxu2 %v1178_v37  ;;  %v5083_v52 = vld [vmem:[#allocation2 + $0x50] sm:$0xff]  ;;  %v1158_v23 = vld [vmem:[#allocation5 + $0x2140] sm:$0xff] }
 0x179   :  { %2507 = vmatpush.msrb.mxu3 %v1348_v43  ;;  %2421 = vmatpush.msrb.mxu0 %v858_v41  ;;  %v1328_v5 = vld [vmem:[#allocation5 + $0x2690] sm:$0xff]  ;;  %v998_v37 = vld [vmem:[#allocation5 + $0x1c40] sm:$0xff]  ;;  %v5088_v41 = vld [vmem:[#allocation2 + $0x58] sm:$0xff] }
 0x17a   :  { %2450 = vmatpush.msrb.mxu1 %v1018_v31  ;;  %2321 = vmatmul.f32.gmra.mxu0 %v5077_v36  ;;  %v838_v31 = vld [vmem:[#allocation5 + $0x1740] sm:$0xff]  ;;  %v988_v21 = vld [vmem:[#allocation5 + $0x1bf0] sm:$0xff] }
 0x17b   :  { %2350 = vmatmul.f32.gmra.mxu1 %v5080_v7  ;;  %2379 = vmatmul.f32.gmra.mxu2 %v5083_v52 }
 0x17c   :  { %2508 = vmatpush.msrb.mxu3 %v1338_v17  ;;  %2480 = vmatpush.msrb.mxu2 %v1168_v44  ;;  %v5086_v43 = vpop.f32.mrf.mxu2  ;;  %v1138_v44 = vld [vmem:[#allocation5 + $0x20a0] sm:$0xff] }
 0x17d   :  { %2422 = vmatpush.msrb.mxu0 %v848_v29  ;;  %6401 = vst [vmem:[#allocation77_spill] sm:$0xff] %v5086_v43  ;;  %2451 = vmatpush.msrb.mxu1 %v1008_v20  ;;  %v1308_v29 = vld [vmem:[#allocation5 + $0x25f0] sm:$0xff]  ;;  %v818_v20 = vld [vmem:[#allocation5 + $0x16a0] sm:$0xff] }
 0x17e   :  { %2408 = vmatmul.f32.gmra.mxu3 %v5088_v41  ;;  %2481 = vmatpush.msrb.mxu2 %v1158_v23  ;;  %v978_v43 = vld [vmem:[#allocation5 + $0x1ba0] sm:$0xff] }
 0x17f   :  { %2509 = vmatpush.msrb.mxu3 %v1328_v5  ;;  %v5091_v17 = vpop.f32.mrf.mxu3  ;;  %2423 = vmatpush.msrb.mxu0 %v838_v31  ;;  %v5093_v2 = vpop.f32.mrf.mxu0  ;;  %v1298_v23 = vld [vmem:[#allocation5 + $0x25a0] sm:$0xff]  ;;  %v1128_v5 = vld [vmem:[#allocation5 + $0x2050] sm:$0xff] }
 0x180   :  { %6402 = vst [vmem:[#allocation78_spill] sm:$0xff] %v5091_v17  ;;  %2452 = vmatpush.msrb.mxu1 %v998_v37  ;;  %2482 = vmatpush.msrb.mxu2 %v1148_v28  ;;  %v5095_v38 = vpop.f32.mrf.mxu1  ;;  %v808_v31 = vld [vmem:[#allocation5 + $0x1650] sm:$0xff]  ;;  %v5097_v37 = vld [vmem:[#allocation2 + $0x80] sm:$0xff]  ;;  %v5100_v17 = vld [vmem:[#allocation2 + $0x88] sm:$0xff] }
 0x181   :  { %6403 = vst [vmem:[#allocation79_spill] sm:$0xff] %v5093_v2  ;;  %2510 = vmatpush.msrb.mxu3 %v1318_v10  ;;  %2424 = vmatpush.msrb.mxu0 %v828_v0  ;;  %v968_v10 = vld [vmem:[#allocation5 + $0x1b50] sm:$0xff]  ;;  %v1118_v28 = vld [vmem:[#allocation5 + $0x2000] sm:$0xff] }
 0x182   :  { %2453 = vmatpush.msrb.mxu1 %v988_v21  ;;  %6404 = vst [vmem:[#allocation80_spill] sm:$0xff] %v5095_v38  ;;  %2483 = vmatpush.msrb.mxu2 %v1138_v44  ;;  %v5103_v0 = vld [vmem:[#allocation2 + $0x90] sm:$0xff]  ;;  %v958_v44 = vld [vmem:[#allocation5 + $0x1b00] sm:$0xff] }
 0x183   :  { %2511 = vmatpush.msrb.mxu3 %v1308_v29  ;;  %2425 = vmatpush.msrb.mxu0 %v818_v20  ;;  %v1288_v21 = vld [vmem:[#allocation5 + $0x2550] sm:$0xff]  ;;  %v5108_v20 = vld [vmem:[#allocation2 + $0x98] sm:$0xff]  ;;  %v1278_v2 = vld [vmem:[#allocation5 + $0x2500] sm:$0xff] }
 0x184   :  { %2454 = vmatpush.msrb.mxu1 %v978_v43  ;;  %2324 = vmatmul.f32.gmra.mxu0 %v5097_v37  ;;  %v798_v43 = vld [vmem:[#allocation5 + $0x1600] sm:$0xff]  ;;  %v1108_v38 = vld [vmem:[#allocation5 + $0x1fb0] sm:$0xff] }
 0x185   :  { %2353 = vmatmul.f32.gmra.mxu1 %v5100_v17  ;;  %2382 = vmatmul.f32.gmra.mxu2 %v5103_v0 }
 0x186   :  { %2512 = vmatpush.msrb.mxu3 %v1298_v23  ;;  %2484 = vmatpush.msrb.mxu2 %v1128_v5  ;;  %v5106_v29 = vpop.f32.mrf.mxu2  ;;  %v1098_v5 = vld [vmem:[#allocation5 + $0x1f60] sm:$0xff] }
 0x187   :  { %2426 = vmatpush.msrb.mxu0 %v808_v31  ;;  %6405 = vst [vmem:[#allocation81_spill] sm:$0xff] %v5106_v29  ;;  %2455 = vmatpush.msrb.mxu1 %v968_v10  ;;  %v1268_v31 = vld [vmem:[#allocation5 + $0x24b0] sm:$0xff]  ;;  %v778_v10 = vld [vmem:[#allocation5 + $0x1560] sm:$0xff] }
 0x188   :  { %2411 = vmatmul.f32.gmra.mxu3 %v5108_v20  ;;  %2485 = vmatpush.msrb.mxu2 %v1118_v28  ;;  %v938_v29 = vld [vmem:[#allocation5 + $0x1a60] sm:$0xff] }
 0x189   :  { %2513 = vmatpush.msrb.mxu3 %v1288_v21  ;;  %v5111_v23 = vpop.f32.mrf.mxu3  ;;  %2427 = vmatpush.msrb.mxu0 %v798_v43  ;;  %v5113_v22 = vpop.f32.mrf.mxu0  ;;  %v1258_v28 = vld [vmem:[#allocation5 + $0x2460] sm:$0xff]  ;;  %v1088_v21 = vld [vmem:[#allocation5 + $0x1f10] sm:$0xff] }
 0x18a   :  { %6406 = vst [vmem:[#allocation82_spill] sm:$0xff] %v5111_v23  ;;  %2456 = vmatpush.msrb.mxu1 %v958_v44  ;;  %2486 = vmatpush.msrb.mxu2 %v1108_v38  ;;  %v5115_v50 = vpop.f32.mrf.mxu1  ;;  %v768_v43 = vld [vmem:[#allocation5 + $0x1510] sm:$0xff]  ;;  %v5117_v44 = vld [vmem:[#allocation2 + $0xc0] sm:$0xff] }
 0x18b   :  { %6407 = vst [vmem:[#allocation83_spill] sm:$0xff] %v5113_v22  ;;  %2514 = vmatpush.msrb.mxu3 %v1278_v2  ;;  %2428 = vmatpush.msrb.mxu0 %v788_v59  ;;  %v5120_v22 = vld [vmem:[#allocation2 + $0xc8] sm:$0xff]  ;;  %v928_v2 = vld [vmem:[#allocation5 + $0x1a10] sm:$0xff]  ;;  %v1238_v23 = vld [vmem:[#allocation5 + $0x23c0] sm:$0xff] }
 0x18c   :  { %2457 = vmatpush.msrb.mxu1 %v948_v46  ;;  %6408 = vst [vmem:[#allocation84_spill] sm:$0xff] %v5115_v50  ;;  %2487 = vmatpush.msrb.mxu2 %v1098_v5  ;;  %v5123_v59 = vld [vmem:[#allocation2 + $0xd0] sm:$0xff]  ;;  %v1078_v46 = vld [vmem:[#allocation5 + $0x1ec0] sm:$0xff] }
 0x18d   :  { %2515 = vmatpush.msrb.mxu3 %v1268_v31  ;;  %2429 = vmatpush.msrb.mxu0 %v778_v10  ;;  %v1248_v38 = vld [vmem:[#allocation5 + $0x2410] sm:$0xff]  ;;  %v918_v5 = vld [vmem:[#allocation5 + $0x19c0] sm:$0xff]  ;;  %v5128_v10 = vld [vmem:[#allocation2 + $0xd8] sm:$0xff] }
 0x18e   :  { %2458 = vmatpush.msrb.mxu1 %v938_v29  ;;  %2327 = vmatmul.f32.gmra.mxu0 %v5117_v44  ;;  %v758_v29 = vld [vmem:[#allocation5 + $0x14c0] sm:$0xff]  ;;  %v1068_v50 = vld [vmem:[#allocation5 + $0x1e70] sm:$0xff] }
 0x18f   :  { %2356 = vmatmul.f32.gmra.mxu1 %v5120_v22  ;;  %2385 = vmatmul.f32.gmra.mxu2 %v5123_v59 }
 0x190   :  { %2516 = vmatpush.msrb.mxu3 %v1258_v28  ;;  %2488 = vmatpush.msrb.mxu2 %v1088_v21  ;;  %v5126_v31 = vpop.f32.mrf.mxu2  ;;  %v1058_v21 = vld [vmem:[#allocation5 + $0x1e20] sm:$0xff] }
 0x191   :  { %2430 = vmatpush.msrb.mxu0 %v768_v43  ;;  %6409 = vst [vmem:[#allocation85_spill] sm:$0xff] %v5126_v31  ;;  %2459 = vmatpush.msrb.mxu1 %v928_v2  ;;  %v1228_v43 = vld [vmem:[#allocation5 + $0x2370] sm:$0xff]  ;;  %v738_v2 = vld [vmem:[#allocation5 + $0x1420] sm:$0xff] }
 0x192   :  { %2414 = vmatmul.f32.gmra.mxu3 %v5128_v10  ;;  %2489 = vmatpush.msrb.mxu2 %v1078_v46  ;;  %v898_v31 = vld [vmem:[#allocation5 + $0x1920] sm:$0xff] }
 0x193   :  { %2517 = vmatpush.msrb.mxu3 %v1248_v38  ;;  %v5131_v28 = vpop.f32.mrf.mxu3  ;;  %2431 = vmatpush.msrb.mxu0 %v758_v29  ;;  %v5133_v13 = vpop.f32.mrf.mxu0  ;;  %v1218_v46 = vld [vmem:[#allocation5 + $0x2320] sm:$0xff]  ;;  %v569_v38 = vld [vmem:[#allocation5 + $0xed8] sm:$0xff] }
 0x194   :  { %6410 = vst [vmem:[#allocation86_spill] sm:$0xff] %v5131_v28  ;;  %2460 = vmatpush.msrb.mxu1 %v918_v5  ;;  %2490 = vmatpush.msrb.mxu2 %v1068_v50  ;;  %v5135_v30 = vpop.f32.mrf.mxu1  ;;  %v249_v29 = vld [vmem:[#allocation5 + $0x4d8] sm:$0xff]  ;;  %v5137_v5 = vld [vmem:[#allocation2 + $0x20] sm:$0xff]  ;;  %v5140_v28 = vld [vmem:[#allocation2 + $0x28] sm:$0xff] }
 0x195   :  { %6411 = vst [vmem:[#allocation87_spill] sm:$0xff] %v5133_v13  ;;  %2518 = vmatpush.msrb.mxu3 %v1238_v23  ;;  %2432 = vmatpush.msrb.mxu0 %v748_v4  ;;  %v409_v50 = vld [vmem:[#allocation5 + $0x9d8] sm:$0xff]  ;;  %v5143_v4 = vld [vmem:[#allocation2 + $0x30] sm:$0xff]  ;;  %v719_v13 = vld [vmem:[#allocation5 + $0x1388] sm:$0xff] }
 0x196   :  { %2461 = vmatpush.msrb.mxu1 %v908_v40  ;;  %6412 = vst [vmem:[#allocation88_spill] sm:$0xff] %v5135_v30  ;;  %2491 = vmatpush.msrb.mxu2 %v1058_v21  ;;  %v559_v40 = vld [vmem:[#allocation5 + $0xe88] sm:$0xff]  ;;  %v729_v23 = vld [vmem:[#allocation5 + $0x13d8] sm:$0xff] }
 0x197   :  { %2519 = vmatpush.msrb.mxu3 %v1228_v43  ;;  %2433 = vmatpush.msrb.mxu0 %v738_v2  ;;  %v399_v21 = vld [vmem:[#allocation5 + $0x988] sm:$0xff]  ;;  %v5148_v2 = vld [vmem:[#allocation2 + $0x38] sm:$0xff] }
 0x198   :  { %2462 = vmatpush.msrb.mxu1 %v898_v31  ;;  %2434 = vmatmul.f32.vlgmr.msrb.gmra.mxu0 %v5137_v5  ;;  %v239_v31 = vld [vmem:[#allocation5 + $0x488] sm:$0xff]  ;;  %v549_v30 = vld [vmem:[#allocation5 + $0xe38] sm:$0xff] }
 0x199   :  { %2463 = vmatmul.f32.vlgmr.msrb.gmra.mxu1 %v5140_v28  ;;  %2492 = vmatmul.f32.vlgmr.msrb.gmra.mxu2 %v5143_v4 }
 0x19a   :  { %2520 = vmatpush.msrb.mxu3 %v1218_v46  ;;  %2592 = vmatpush.msra.mxu2 %v569_v38  ;;  %v5146_v43 = vpop.f32.mrf.mxu2  ;;  %v539_v38 = vld [vmem:[#allocation5 + $0xde8] sm:$0xff] }
 0x19b   :  { %2534 = vmatpush.msra.mxu0 %v249_v29  ;;  %6413 = vst [vmem:[#allocation89_spill] sm:$0xff] %v5146_v43  ;;  %2563 = vmatpush.msra.mxu1 %v409_v50  ;;  %v709_v29 = vld [vmem:[#allocation5 + $0x1338] sm:$0xff]  ;;  %v219_v50 = vld [vmem:[#allocation5 + $0x3e8] sm:$0xff] }
 0x19c   :  { %2521 = vmatmul.f32.vlgmr.msrb.gmra.mxu3 %v5148_v2  ;;  %2593 = vmatpush.msra.mxu2 %v559_v40  ;;  %v379_v43 = vld [vmem:[#allocation5 + $0x8e8] sm:$0xff] }
 0x19d   :  { %2621 = vmatpush.msra.mxu3 %v729_v23  ;;  %v5151_v46 = vpop.f32.mrf.mxu3  ;;  %2535 = vmatpush.msra.mxu0 %v239_v31  ;;  %v5153_v45 = vpop.f32.mrf.mxu0  ;;  %v699_v40 = vld [vmem:[#allocation5 + $0x12e8] sm:$0xff]  ;;  %v529_v23 = vld [vmem:[#allocation5 + $0xd98] sm:$0xff] }
 0x19e   :  { %6414 = vst [vmem:[#allocation90_spill] sm:$0xff] %v5151_v46  ;;  %2564 = vmatpush.msra.mxu1 %v399_v21  ;;  %2594 = vmatpush.msra.mxu2 %v549_v30  ;;  %v5155_v62 = vpop.f32.mrf.mxu1  ;;  %v209_v31 = vld [vmem:[#allocation5 + $0x398] sm:$0xff]  ;;  %v5157_v21 = vld [vmem:[#allocation2 + $0x60] sm:$0xff]  ;;  %v679_v46 = vld [vmem:[#allocation5 + $0x1248] sm:$0xff] }
 0x19f   :  { %6415 = vst [vmem:[#allocation91_spill] sm:$0xff] %v5153_v45  ;;  %2622 = vmatpush.msra.mxu3 %v719_v13  ;;  %2536 = vmatpush.msra.mxu0 %v229_v39  ;;  %v5160_v45 = vld [vmem:[#allocation2 + $0x68] sm:$0xff]  ;;  %v369_v13 = vld [vmem:[#allocation5 + $0x898] sm:$0xff]  ;;  %v5163_v39 = vld [vmem:[#allocation2 + $0x70] sm:$0xff] }
 0x1a0   :  { %2565 = vmatpush.msra.mxu1 %v389_v3  ;;  %6416 = vst [vmem:[#allocation92_spill] sm:$0xff] %v5155_v62  ;;  %2595 = vmatpush.msra.mxu2 %v539_v38  ;;  %v519_v3 = vld [vmem:[#allocation5 + $0xd48] sm:$0xff]  ;;  %v689_v30 = vld [vmem:[#allocation5 + $0x1298] sm:$0xff] }
 0x1a1   :  { %2623 = vmatpush.msra.mxu3 %v709_v29  ;;  %2537 = vmatpush.msra.mxu0 %v219_v50  ;;  %v359_v38 = vld [vmem:[#allocation5 + $0x848] sm:$0xff]  ;;  %v5168_v50 = vld [vmem:[#allocation2 + $0x78] sm:$0xff] }
 0x1a2   :  { %2566 = vmatpush.msra.mxu1 %v379_v43  ;;  %2437 = vmatmul.f32.gmra.mxu0 %v5157_v21  ;;  %v199_v43 = vld [vmem:[#allocation5 + $0x348] sm:$0xff]  ;;  %v509_v62 = vld [vmem:[#allocation5 + $0xcf8] sm:$0xff] }
 0x1a3   :  { %2466 = vmatmul.f32.gmra.mxu1 %v5160_v45  ;;  %2495 = vmatmul.f32.gmra.mxu2 %v5163_v39 }
 0x1a4   :  { %2624 = vmatpush.msra.mxu3 %v699_v40  ;;  %2596 = vmatpush.msra.mxu2 %v529_v23  ;;  %v5166_v29 = vpop.f32.mrf.mxu2  ;;  %v499_v23 = vld [vmem:[#allocation5 + $0xca8] sm:$0xff] }
 0x1a5   :  { %2538 = vmatpush.msra.mxu0 %v209_v31  ;;  %6417 = vst [vmem:[#allocation93_spill] sm:$0xff] %v5166_v29  ;;  %2567 = vmatpush.msra.mxu1 %v369_v13  ;;  %v669_v31 = vld [vmem:[#allocation5 + $0x11f8] sm:$0xff]  ;;  %v179_v13 = vld [vmem:[#allocation5 + $0x2a8] sm:$0xff] }
 0x1a6   :  { %2524 = vmatmul.f32.gmra.mxu3 %v5168_v50  ;;  %2597 = vmatpush.msra.mxu2 %v519_v3  ;;  %v339_v29 = vld [vmem:[#allocation5 + $0x7a8] sm:$0xff] }
 0x1a7   :  { %2625 = vmatpush.msra.mxu3 %v689_v30  ;;  %v5171_v40 = vpop.f32.mrf.mxu3  ;;  %2539 = vmatpush.msra.mxu0 %v199_v43  ;;  %v5173_v47 = vpop.f32.mrf.mxu0  ;;  %v659_v3 = vld [vmem:[#allocation5 + $0x11a8] sm:$0xff]  ;;  %v489_v30 = vld [vmem:[#allocation5 + $0xc58] sm:$0xff] }
 0x1a8   :  { %6418 = vst [vmem:[#allocation94_spill] sm:$0xff] %v5171_v40  ;;  %2568 = vmatpush.msra.mxu1 %v359_v38  ;;  %2598 = vmatpush.msra.mxu2 %v509_v62  ;;  %v5175_v48 = vpop.f32.mrf.mxu1  ;;  %v169_v43 = vld [vmem:[#allocation5 + $0x258] sm:$0xff]  ;;  %v5177_v38 = vld [vmem:[#allocation2 + $0xa0] sm:$0xff]  ;;  %v639_v40 = vld [vmem:[#allocation5 + $0x1108] sm:$0xff] }
 0x1a9   :  { %6419 = vst [vmem:[#allocation95_spill] sm:$0xff] %v5173_v47  ;;  %2626 = vmatpush.msra.mxu3 %v679_v46  ;;  %2540 = vmatpush.msra.mxu0 %v189_v6  ;;  %v5180_v47 = vld [vmem:[#allocation2 + $0xa8] sm:$0xff]  ;;  %v329_v62 = vld [vmem:[#allocation5 + $0x758] sm:$0xff]  ;;  %v5183_v6 = vld [vmem:[#allocation2 + $0xb0] sm:$0xff] }
 0x1aa   :  { %2569 = vmatpush.msra.mxu1 %v349_v32  ;;  %6420 = vst [vmem:[#allocation96_spill] sm:$0xff] %v5175_v48  ;;  %2599 = vmatpush.msra.mxu2 %v499_v23  ;;  %v479_v32 = vld [vmem:[#allocation5 + $0xc08] sm:$0xff]  ;;  %v649_v46 = vld [vmem:[#allocation5 + $0x1158] sm:$0xff] }
 0x1ab   :  { %2627 = vmatpush.msra.mxu3 %v669_v31  ;;  %2541 = vmatpush.msra.mxu0 %v179_v13  ;;  %v319_v23 = vld [vmem:[#allocation5 + $0x708] sm:$0xff]  ;;  %v5188_v13 = vld [vmem:[#allocation2 + $0xb8] sm:$0xff] }
 0x1ac   :  { %2570 = vmatpush.msra.mxu1 %v339_v29  ;;  %2440 = vmatmul.f32.gmra.mxu0 %v5177_v38  ;;  %v159_v29 = vld [vmem:[#allocation5 + $0x208] sm:$0xff]  ;;  %v469_v48 = vld [vmem:[#allocation5 + $0xbb8] sm:$0xff] }
 0x1ad   :  { %2469 = vmatmul.f32.gmra.mxu1 %v5180_v47  ;;  %2498 = vmatmul.f32.gmra.mxu2 %v5183_v6 }
 0x1ae   :  { %2628 = vmatpush.msra.mxu3 %v659_v3  ;;  %2600 = vmatpush.msra.mxu2 %v489_v30  ;;  %v5186_v31 = vpop.f32.mrf.mxu2  ;;  %v459_v30 = vld [vmem:[#allocation5 + $0xb68] sm:$0xff] }
 0x1af   :  { %2542 = vmatpush.msra.mxu0 %v169_v43  ;;  %6421 = vst [vmem:[#allocation97_spill] sm:$0xff] %v5186_v31  ;;  %2571 = vmatpush.msra.mxu1 %v329_v62  ;;  %v629_v43 = vld [vmem:[#allocation5 + $0x10b8] sm:$0xff]  ;;  %v139_v62 = vld [vmem:[#allocation5 + $0x168] sm:$0xff] }
 0x1b0   :  { %2527 = vmatmul.f32.gmra.mxu3 %v5188_v13  ;;  %2601 = vmatpush.msra.mxu2 %v479_v32  ;;  %v299_v31 = vld [vmem:[#allocation5 + $0x668] sm:$0xff] }
 0x1b1   :  { %2629 = vmatpush.msra.mxu3 %v649_v46  ;;  %v5191_v3 = vpop.f32.mrf.mxu3  ;;  %2543 = vmatpush.msra.mxu0 %v159_v29  ;;  %v5193_v25 = vpop.f32.mrf.mxu0  ;;  %v619_v32 = vld [vmem:[#allocation5 + $0x1068] sm:$0xff]  ;;  %v449_v46 = vld [vmem:[#allocation5 + $0xb18] sm:$0xff] }
 0x1b2   :  { %6422 = vst [vmem:[#allocation98_spill] sm:$0xff] %v5191_v3  ;;  %2572 = vmatpush.msra.mxu1 %v319_v23  ;;  %2602 = vmatpush.msra.mxu2 %v469_v48  ;;  %v5195_v49 = vpop.f32.mrf.mxu1  ;;  %v129_v29 = vld [vmem:[#allocation5 + $0x118] sm:$0xff]  ;;  %v5197_v23 = vld [vmem:[#allocation2 + $0xe0] sm:$0xff]  ;;  %v599_v3 = vld [vmem:[#allocation5 + $0xfc8] sm:$0xff] }
 0x1b3   :  { %6423 = vst [vmem:[#allocation99_spill] sm:$0xff] %v5193_v25  ;;  %2630 = vmatpush.msra.mxu3 %v639_v40  ;;  %2544 = vmatpush.msra.mxu0 %v149_v42  ;;  %v5200_v25 = vld [vmem:[#allocation2 + $0xe8] sm:$0xff]  ;;  %v289_v48 = vld [vmem:[#allocation5 + $0x618] sm:$0xff]  ;;  %v5203_v42 = vld [vmem:[#allocation2 + $0xf0] sm:$0xff] }
 0x1b4   :  { %2573 = vmatpush.msra.mxu1 %v309_v55  ;;  %6424 = vst [vmem:[#allocation100_spill] sm:$0xff] %v5195_v49  ;;  %2603 = vmatpush.msra.mxu2 %v459_v30  ;;  %v439_v55 = vld [vmem:[#allocation5 + $0xac8] sm:$0xff]  ;;  %v609_v40 = vld [vmem:[#allocation5 + $0x1018] sm:$0xff] }
 0x1b5   :  { %2631 = vmatpush.msra.mxu3 %v629_v43  ;;  %2545 = vmatpush.msra.mxu0 %v139_v62  ;;  %v279_v30 = vld [vmem:[#allocation5 + $0x5c8] sm:$0xff]  ;;  %v5208_v62 = vld [vmem:[#allocation2 + $0xf8] sm:$0xff] }
 0x1b6   :  { %2574 = vmatpush.msra.mxu1 %v299_v31  ;;  %2443 = vmatmul.f32.gmra.mxu0 %v5197_v23  ;;  %v119_v31 = vld [vmem:[#allocation5 + $0xc8] sm:$0xff]  ;;  %v429_v49 = vld [vmem:[#allocation5 + $0xa78] sm:$0xff] }
 0x1b7   :  { %2472 = vmatmul.f32.gmra.mxu1 %v5200_v25  ;;  %2501 = vmatmul.f32.gmra.mxu2 %v5203_v42 }
 0x1b8   :  { %2632 = vmatpush.msra.mxu3 %v619_v32  ;;  %2604 = vmatpush.msra.mxu2 %v449_v46  ;;  %v5206_v43 = vpop.f32.mrf.mxu2  ;;  %v419_v46 = vld [vmem:[#allocation5 + $0xa28] sm:$0xff] }
 0x1b9   :  { %2546 = vmatpush.msra.mxu0 %v129_v29  ;;  %6425 = vst [vmem:[#allocation101_spill] sm:$0xff] %v5206_v43  ;;  %2575 = vmatpush.msra.mxu1 %v289_v48  ;;  %v589_v29 = vld [vmem:[#allocation5 + $0xf78] sm:$0xff]  ;;  %v99_v48 = vld [vmem:[#allocation5 + $0x28] sm:$0xff] }
 0x1ba   :  { %2530 = vmatmul.f32.gmra.mxu3 %v5208_v62  ;;  %2605 = vmatpush.msra.mxu2 %v439_v55  ;;  %v259_v43 = vld [vmem:[#allocation5 + $0x528] sm:$0xff] }
 0x1bb   :  { %2633 = vmatpush.msra.mxu3 %v609_v40  ;;  %v5211_v32 = vpop.f32.mrf.mxu3  ;;  %2547 = vmatpush.msra.mxu0 %v119_v31  ;;  %v5213_v60 = vpop.f32.mrf.mxu0  ;;  %v579_v55 = vld [vmem:[#allocation5 + $0xf28] sm:$0xff]  ;;  %v1209_v40 = vld [vmem:[#allocation5 + $0x22d8] sm:$0xff] }
 0x1bc   :  { %6426 = vst [vmem:[#allocation102_spill] sm:$0xff] %v5211_v32  ;;  %2576 = vmatpush.msra.mxu1 %v279_v30  ;;  %2606 = vmatpush.msra.mxu2 %v429_v49  ;;  %v5215_v24 = vpop.f32.mrf.mxu1  ;;  %v889_v31 = vld [vmem:[#allocation5 + $0x18d8] sm:$0xff]  ;;  %v1199_v49 = vld [vmem:[#allocation5 + $0x2288] sm:$0xff] }
 0x1bd   :  { %6427 = vst [vmem:[#allocation103_spill] sm:$0xff] %v5213_v60  ;;  %2634 = vmatpush.msra.mxu3 %v599_v3  ;;  %2548 = vmatpush.msra.mxu0 %v109_v8  ;;  %v1049_v30 = vld [vmem:[#allocation5 + $0x1dd8] sm:$0xff]  ;;  %v1039_v3 = vld [vmem:[#allocation5 + $0x1d88] sm:$0xff] }
 0x1be   :  { %2577 = vmatpush.msra.mxu1 %v269_v33  ;;  %6428 = vst [vmem:[#allocation104_spill] sm:$0xff] %v5215_v24  ;;  %2607 = vmatpush.msra.mxu2 %v419_v46  ;;  %v1369_v8 = vld [vmem:[#allocation5 + $0x27d8] sm:$0xff]  ;;  %v879_v33 = vld [vmem:[#allocation5 + $0x1888] sm:$0xff] }
 0x1bf   :  { %2635 = vmatpush.msra.mxu3 %v589_v29  ;;  %2549 = vmatpush.msra.mxu0 %v99_v48  ;;  %v1359_v29 = vld [vmem:[#allocation5 + $0x2788] sm:$0xff]  ;;  %v681_v60 = vld [vmem:[#allocation5 + $0x1258] sm:$0xff] }
 0x1c0   :  { %2578 = vmatpush.msra.mxu1 %v259_v43  ;;  %2550 = vmatmul.f32.vlgmr.msra.gmra.mxu0 %v5057_v12  ;;  %v1189_v43 = vld [vmem:[#allocation5 + $0x2238] sm:$0xff]  ;;  %v511_v24 = vld [vmem:[#allocation5 + $0xd08] sm:$0xff] }
 0x1c1   :  { %2579 = vmatmul.f32.vlgmr.msra.gmra.mxu1 %v5060_v11  ;;  %2608 = vmatmul.f32.vlgmr.msra.gmra.mxu2 %v5063_v35  ;;  %v869_v11 = vld [vmem:[#allocation5 + $0x1838] sm:$0xff]  ;;  %v1179_v35 = vld [vmem:[#allocation5 + $0x21e8] sm:$0xff] }
 0x1c2   :  { %2636 = vmatpush.msra.mxu3 %v579_v55  ;;  %2708 = vmatpush.msrb.mxu2 %v1209_v40  ;;  %v5220_v46 = vpop.f32.mrf.mxu2  ;;  %v1029_v12 = vld [vmem:[#allocation5 + $0x1d38] sm:$0xff] }
 0x1c3   :  { %2650 = vmatpush.msrb.mxu0 %v889_v31  ;;  %6429 = vst [vmem:[#allocation105_spill] sm:$0xff] %v5220_v46  ;;  %2679 = vmatpush.msrb.mxu1 %v1049_v30  ;;  %v1349_v55 = vld [vmem:[#allocation5 + $0x2738] sm:$0xff]  ;;  %v859_v31 = vld [vmem:[#allocation5 + $0x17e8] sm:$0xff] }
 0x1c4   :  { %2637 = vmatmul.f32.vlgmr.msra.gmra.mxu3 %v5068_v26  ;;  %2709 = vmatpush.msrb.mxu2 %v1199_v49  ;;  %v1019_v30 = vld [vmem:[#allocation5 + $0x1ce8] sm:$0xff] }
 0x1c5   :  { %2737 = vmatpush.msrb.mxu3 %v1369_v8  ;;  %v5223_v48 = vpop.f32.mrf.mxu3  ;;  %2651 = vmatpush.msrb.mxu0 %v879_v33  ;;  %v5225_v40 = vpop.f32.mrf.mxu0  ;;  %v1339_v49 = vld [vmem:[#allocation5 + $0x26e8] sm:$0xff]  ;;  %v1169_v8 = vld [vmem:[#allocation5 + $0x2198] sm:$0xff] }
 0x1c6   :  { %6430 = vst [vmem:[#allocation106_spill] sm:$0xff] %v5223_v48  ;;  %2680 = vmatpush.msrb.mxu1 %v1039_v3  ;;  %2710 = vmatpush.msrb.mxu2 %v1189_v43  ;;  %v5227_v26 = vpop.f32.mrf.mxu1  ;;  %v849_v33 = vld [vmem:[#allocation5 + $0x1798] sm:$0xff]  ;;  %v1159_v43 = vld [vmem:[#allocation5 + $0x2148] sm:$0xff] }
 0x1c7   :  { %6431 = vst [vmem:[#allocation107_spill] sm:$0xff] %v5225_v40  ;;  %2738 = vmatpush.msrb.mxu3 %v1359_v29  ;;  %2652 = vmatpush.msrb.mxu0 %v869_v11  ;;  %v1009_v3 = vld [vmem:[#allocation5 + $0x1c98] sm:$0xff]  ;;  %v839_v11 = vld [vmem:[#allocation5 + $0x1748] sm:$0xff] }
 0x1c8   :  { %2681 = vmatpush.msrb.mxu1 %v1029_v12  ;;  %6432 = vst [vmem:[#allocation108_spill] sm:$0xff] %v5227_v26  ;;  %2711 = vmatpush.msrb.mxu2 %v1179_v35  ;;  %v1329_v29 = vld [vmem:[#allocation5 + $0x2698] sm:$0xff]  ;;  %v999_v12 = vld [vmem:[#allocation5 + $0x1c48] sm:$0xff] }
 0x1c9   :  { %2739 = vmatpush.msrb.mxu3 %v1349_v55  ;;  %2653 = vmatpush.msrb.mxu0 %v859_v31  ;;  %v1149_v55 = vld [vmem:[#allocation5 + $0x20f8] sm:$0xff]  ;;  %v1319_v31 = vld [vmem:[#allocation5 + $0x2648] sm:$0xff] }
 0x1ca   :  { %2682 = vmatpush.msrb.mxu1 %v1019_v30  ;;  %2553 = vmatmul.f32.gmra.mxu0 %v5077_v36  ;;  %v989_v36 = vld [vmem:[#allocation5 + $0x1bf8] sm:$0xff]  ;;  %v231_v48 = vld [vmem:[#allocation5 + $0x448] sm:$0xff] }
 0x1cb   :  { %2582 = vmatmul.f32.gmra.mxu1 %v5080_v7  ;;  %2611 = vmatmul.f32.gmra.mxu2 %v5083_v52  ;;  %v829_v7 = vld [vmem:[#allocation5 + $0x16f8] sm:$0xff]  ;;  %v1139_v52 = vld [vmem:[#allocation5 + $0x20a8] sm:$0xff] }
 0x1cc   :  { %2740 = vmatpush.msrb.mxu3 %v1339_v49  ;;  %2712 = vmatpush.msrb.mxu2 %v1169_v8  ;;  %v5232_v35 = vpop.f32.mrf.mxu2  ;;  %v1309_v49 = vld [vmem:[#allocation5 + $0x25f8] sm:$0xff]  ;;  %v151_v26 = vld [vmem:[#allocation5 + $0x1c8] sm:$0xff] }
 0x1cd   :  { %2654 = vmatpush.msrb.mxu0 %v849_v33  ;;  %6433 = vst [vmem:[#allocation109_spill] sm:$0xff] %v5232_v35  ;;  %2683 = vmatpush.msrb.mxu1 %v1009_v3  ;;  %v819_v33 = vld [vmem:[#allocation5 + $0x16a8] sm:$0xff]  ;;  %v641_v35 = vld [vmem:[#allocation5 + $0x1118] sm:$0xff] }
 0x1ce   :  { %2640 = vmatmul.f32.gmra.mxu3 %v5088_v41  ;;  %2713 = vmatpush.msrb.mxu2 %v1159_v43  ;;  %v979_v3 = vld [vmem:[#allocation5 + $0x1ba8] sm:$0xff] }
 0x1cf   :  { %2741 = vmatpush.msrb.mxu3 %v1329_v29  ;;  %v5235_v30 = vpop.f32.mrf.mxu3  ;;  %2655 = vmatpush.msrb.mxu0 %v839_v11  ;;  %v5237_v8 = vpop.f32.mrf.mxu0  ;;  %v1299_v43 = vld [vmem:[#allocation5 + $0x25a8] sm:$0xff]  ;;  %v1129_v29 = vld [vmem:[#allocation5 + $0x2058] sm:$0xff] }
 0x1d0   :  { %6434 = vst [vmem:[#allocation110_spill] sm:$0xff] %v5235_v30  ;;  %2684 = vmatpush.msrb.mxu1 %v999_v12  ;;  %2714 = vmatpush.msrb.mxu2 %v1149_v55  ;;  %v5239_v41 = vpop.f32.mrf.mxu1  ;;  %v809_v11 = vld [vmem:[#allocation5 + $0x1658] sm:$0xff]  ;;  %v1119_v55 = vld [vmem:[#allocation5 + $0x2008] sm:$0xff] }
 0x1d1   :  { %6435 = vst [vmem:[#allocation111_spill] sm:$0xff] %v5237_v8  ;;  %2742 = vmatpush.msrb.mxu3 %v1319_v31  ;;  %2656 = vmatpush.msrb.mxu0 %v829_v7  ;;  %v969_v12 = vld [vmem:[#allocation5 + $0x1b58] sm:$0xff]  ;;  %v799_v7 = vld [vmem:[#allocation5 + $0x1608] sm:$0xff] }
 0x1d2   :  { %2685 = vmatpush.msrb.mxu1 %v989_v36  ;;  %6436 = vst [vmem:[#allocation112_spill] sm:$0xff] %v5239_v41  ;;  %2715 = vmatpush.msrb.mxu2 %v1139_v52  ;;  %v1289_v31 = vld [vmem:[#allocation5 + $0x2558] sm:$0xff]  ;;  %v959_v36 = vld [vmem:[#allocation5 + $0x1b08] sm:$0xff] }
 0x1d3   :  { %2743 = vmatpush.msrb.mxu3 %v1309_v49  ;;  %2657 = vmatpush.msrb.mxu0 %v819_v33  ;;  %v1109_v49 = vld [vmem:[#allocation5 + $0x1fb8] sm:$0xff]  ;;  %v1279_v33 = vld [vmem:[#allocation5 + $0x2508] sm:$0xff] }
 0x1d4   :  { %2686 = vmatpush.msrb.mxu1 %v979_v3  ;;  %2556 = vmatmul.f32.gmra.mxu0 %v5097_v37  ;;  %v949_v37 = vld [vmem:[#allocation5 + $0x1ab8] sm:$0xff]  ;;  %v5436_v8 = vld [vmem:[#allocation2 + $0xa8] sm:$0xff] }
 0x1d5   :  { %2585 = vmatmul.f32.gmra.mxu1 %v5100_v17  ;;  %2614 = vmatmul.f32.gmra.mxu2 %v5103_v0  ;;  %v789_v17 = vld [vmem:[#allocation5 + $0x15b8] sm:$0xff]  ;;  %v1099_v0 = vld [vmem:[#allocation5 + $0x1f68] sm:$0xff] }
 0x1d6   :  { %2744 = vmatpush.msrb.mxu3 %v1299_v43  ;;  %2716 = vmatpush.msrb.mxu2 %v1129_v29  ;;  %v5244_v52 = vpop.f32.mrf.mxu2  ;;  %v1269_v43 = vld [vmem:[#allocation5 + $0x24b8] sm:$0xff]  ;;  %v471_v30 = vld [vmem:[#allocation5 + $0xbc8] sm:$0xff] }
 0x1d7   :  { %2658 = vmatpush.msrb.mxu0 %v809_v11  ;;  %6437 = vst [vmem:[#allocation113_spill] sm:$0xff] %v5244_v52  ;;  %2687 = vmatpush.msrb.mxu1 %v969_v12  ;;  %v779_v11 = vld [vmem:[#allocation5 + $0x1568] sm:$0xff]  ;;  %v341_v52 = vld [vmem:[#allocation5 + $0x7b8] sm:$0xff] }
 0x1d8   :  { %2643 = vmatmul.f32.gmra.mxu3 %v5108_v20  ;;  %2717 = vmatpush.msrb.mxu2 %v1119_v55  ;;  %v939_v12 = vld [vmem:[#allocation5 + $0x1a68] sm:$0xff] }
 0x1d9   :  { %2745 = vmatpush.msrb.mxu3 %v1289_v31  ;;  %v5247_v3 = vpop.f32.mrf.mxu3  ;;  %2659 = vmatpush.msrb.mxu0 %v799_v7  ;;  %v5249_v29 = vpop.f32.mrf.mxu0  ;;  %v1259_v55 = vld [vmem:[#allocation5 + $0x2468] sm:$0xff]  ;;  %v1089_v31 = vld [vmem:[#allocation5 + $0x1f18] sm:$0xff] }
 0x1da   :  { %6438 = vst [vmem:[#allocation114_spill] sm:$0xff] %v5247_v3  ;;  %2688 = vmatpush.msrb.mxu1 %v959_v36  ;;  %2718 = vmatpush.msrb.mxu2 %v1109_v49  ;;  %v5251_v20 = vpop.f32.mrf.mxu1  ;;  %v769_v7 = vld [vmem:[#allocation5 + $0x1518] sm:$0xff]  ;;  %v1079_v49 = vld [vmem:[#allocation5 + $0x1ec8] sm:$0xff] }
 0x1db   :  { %6439 = vst [vmem:[#allocation115_spill] sm:$0xff] %v5249_v29  ;;  %2746 = vmatpush.msrb.mxu3 %v1279_v33  ;;  %2660 = vmatpush.msrb.mxu0 %v789_v17  ;;  %v929_v36 = vld [vmem:[#allocation5 + $0x1a18] sm:$0xff]  ;;  %v759_v17 = vld [vmem:[#allocation5 + $0x14c8] sm:$0xff] }
 0x1dc   :  { %2689 = vmatpush.msrb.mxu1 %v949_v37  ;;  %6440 = vst [vmem:[#allocation116_spill] sm:$0xff] %v5251_v20  ;;  %2719 = vmatpush.msrb.mxu2 %v1099_v0  ;;  %v1249_v33 = vld [vmem:[#allocation5 + $0x2418] sm:$0xff]  ;;  %v919_v37 = vld [vmem:[#allocation5 + $0x19c8] sm:$0xff] }
 0x1dd   :  { %2747 = vmatpush.msrb.mxu3 %v1269_v43  ;;  %2661 = vmatpush.msrb.mxu0 %v779_v11  ;;  %v1069_v43 = vld [vmem:[#allocation5 + $0x1e78] sm:$0xff]  ;;  %v1239_v11 = vld [vmem:[#allocation5 + $0x23c8] sm:$0xff] }
 0x1de   :  { %2690 = vmatpush.msrb.mxu1 %v939_v12  ;;  %2559 = vmatmul.f32.gmra.mxu0 %v5117_v44  ;;  %v909_v44 = vld [vmem:[#allocation5 + $0x1978] sm:$0xff]  ;;  %v191_v3 = vld [vmem:[#allocation5 + $0x308] sm:$0xff] }
 0x1df   :  { %2588 = vmatmul.f32.gmra.mxu1 %v5120_v22  ;;  %2617 = vmatmul.f32.gmra.mxu2 %v5123_v59  ;;  %v749_v22 = vld [vmem:[#allocation5 + $0x1478] sm:$0xff]  ;;  %v1059_v59 = vld [vmem:[#allocation5 + $0x1e28] sm:$0xff] }
 0x1e0   :  { %2748 = vmatpush.msrb.mxu3 %v1259_v55  ;;  %2720 = vmatpush.msrb.mxu2 %v1089_v31  ;;  %v5256_v0 = vpop.f32.mrf.mxu2  ;;  %v1229_v55 = vld [vmem:[#allocation5 + $0x2378] sm:$0xff]  ;;  %v351_v29 = vld [vmem:[#allocation5 + $0x808] sm:$0xff] }
 0x1e1   :  { %2662 = vmatpush.msrb.mxu0 %v769_v7  ;;  %6441 = vst [vmem:[#allocation117_spill] sm:$0xff] %v5256_v0  ;;  %2691 = vmatpush.msrb.mxu1 %v929_v36  ;;  %v739_v7 = vld [vmem:[#allocation5 + $0x1428] sm:$0xff] }
 0x1e2   :  { %2646 = vmatmul.f32.gmra.mxu3 %v5128_v10  ;;  %2721 = vmatpush.msrb.mxu2 %v1079_v49  ;;  %v899_v36 = vld [vmem:[#allocation5 + $0x1928] sm:$0xff] }
 0x1e3   :  { %2749 = vmatpush.msrb.mxu3 %v1249_v33  ;;  %v5259_v12 = vpop.f32.mrf.mxu3  ;;  %2663 = vmatpush.msrb.mxu0 %v759_v17  ;;  %v5261_v31 = vpop.f32.mrf.mxu0  ;;  %v1219_v49 = vld [vmem:[#allocation5 + $0x2328] sm:$0xff]  ;;  %v570_v33 = vld [vmem:[#allocation5 + $0xee0] sm:$0xff] }
 0x1e4   :  { %6442 = vst [vmem:[#allocation118_spill] sm:$0xff] %v5259_v12  ;;  %2692 = vmatpush.msrb.mxu1 %v919_v37  ;;  %2722 = vmatpush.msrb.mxu2 %v1069_v43  ;;  %v5263_v10 = vpop.f32.mrf.mxu1  ;;  %v250_v17 = vld [vmem:[#allocation5 + $0x4e0] sm:$0xff]  ;;  %v560_v43 = vld [vmem:[#allocation5 + $0xe90] sm:$0xff]  ;;  %v391_v0 = vld [vmem:[#allocation5 + $0x948] sm:$0xff] }
 0x1e5   :  { %6443 = vst [vmem:[#allocation119_spill] sm:$0xff] %v5261_v31  ;;  %2750 = vmatpush.msrb.mxu3 %v1239_v11  ;;  %2664 = vmatpush.msrb.mxu0 %v749_v22  ;;  %v410_v37 = vld [vmem:[#allocation5 + $0x9e0] sm:$0xff]  ;;  %v240_v22 = vld [vmem:[#allocation5 + $0x490] sm:$0xff]  ;;  %v311_v40 = vld [vmem:[#allocation5 + $0x6c8] sm:$0xff] }
 0x1e6   :  { %2693 = vmatpush.msrb.mxu1 %v909_v44  ;;  %6444 = vst [vmem:[#allocation120_spill] sm:$0xff] %v5263_v10  ;;  %2723 = vmatpush.msrb.mxu2 %v1059_v59  ;;  %v730_v11 = vld [vmem:[#allocation5 + $0x13e0] sm:$0xff]  ;;  %v400_v44 = vld [vmem:[#allocation5 + $0x990] sm:$0xff] }
 0x1e7   :  { %2751 = vmatpush.msrb.mxu3 %v1229_v55  ;;  %2665 = vmatpush.msrb.mxu0 %v739_v7  ;;  %v550_v55 = vld [vmem:[#allocation5 + $0xe40] sm:$0xff]  ;;  %v720_v7 = vld [vmem:[#allocation5 + $0x1390] sm:$0xff] }
 0x1e8   :  { %2694 = vmatpush.msrb.mxu1 %v899_v36  ;;  %2666 = vmatmul.f32.vlgmr.msrb.gmra.mxu0 %v5137_v5  ;;  %v390_v5 = vld [vmem:[#allocation5 + $0x940] sm:$0xff] }
 0x1e9   :  { %2695 = vmatmul.f32.vlgmr.msrb.gmra.mxu1 %v5140_v28  ;;  %2724 = vmatmul.f32.vlgmr.msrb.gmra.mxu2 %v5143_v4  ;;  %v230_v28 = vld [vmem:[#allocation5 + $0x440] sm:$0xff]  ;;  %v540_v4 = vld [vmem:[#allocation5 + $0xdf0] sm:$0xff] }
 0x1ea   :  { %2752 = vmatpush.msrb.mxu3 %v1219_v49  ;;  %2824 = vmatpush.msra.mxu2 %v570_v33  ;;  %v5268_v59 = vpop.f32.mrf.mxu2  ;;  %v710_v49 = vld [vmem:[#allocation5 + $0x1340] sm:$0xff] }
 0x1eb   :  { %2766 = vmatpush.msra.mxu0 %v250_v17  ;;  %6445 = vst [vmem:[#allocation121_spill] sm:$0xff] %v5268_v59  ;;  %2795 = vmatpush.msra.mxu1 %v410_v37  ;;  %v220_v17 = vld [vmem:[#allocation5 + $0x3f0] sm:$0xff]  ;;  %v750_v59 = vld [vmem:[#allocation5 + $0x1480] sm:$0xff] }
 0x1ec   :  { %2753 = vmatmul.f32.vlgmr.msrb.gmra.mxu3 %v5148_v2  ;;  %2825 = vmatpush.msra.mxu2 %v560_v43  ;;  %v380_v37 = vld [vmem:[#allocation5 + $0x8f0] sm:$0xff]  ;;  %v910_v10 = vld [vmem:[#allocation5 + $0x1980] sm:$0xff] }
 0x1ed   :  { %2853 = vmatpush.msra.mxu3 %v730_v11  ;;  %v5271_v36 = vpop.f32.mrf.mxu3  ;;  %2767 = vmatpush.msra.mxu0 %v240_v22  ;;  %v5273_v33 = vpop.f32.mrf.mxu0  ;;  %v700_v43 = vld [vmem:[#allocation5 + $0x12f0] sm:$0xff]  ;;  %v530_v11 = vld [vmem:[#allocation5 + $0xda0] sm:$0xff] }
 0x1ee   :  { %6446 = vst [vmem:[#allocation122_spill] sm:$0xff] %v5271_v36  ;;  %2796 = vmatpush.msra.mxu1 %v400_v44  ;;  %2826 = vmatpush.msra.mxu2 %v550_v55  ;;  %v5275_v2 = vpop.f32.mrf.mxu1  ;;  %v210_v22 = vld [vmem:[#allocation5 + $0x3a0] sm:$0xff]  ;;  %v520_v55 = vld [vmem:[#allocation5 + $0xd50] sm:$0xff] }
 0x1ef   :  { %6447 = vst [vmem:[#allocation123_spill] sm:$0xff] %v5273_v33  ;;  %2854 = vmatpush.msra.mxu3 %v720_v7  ;;  %2768 = vmatpush.msra.mxu0 %v230_v28  ;;  %v370_v44 = vld [vmem:[#allocation5 + $0x8a0] sm:$0xff]  ;;  %v200_v28 = vld [vmem:[#allocation5 + $0x350] sm:$0xff] }
 0x1f0   :  { %2797 = vmatpush.msra.mxu1 %v390_v5  ;;  %6448 = vst [vmem:[#allocation124_spill] sm:$0xff] %v5275_v2  ;;  %2827 = vmatpush.msra.mxu2 %v540_v4  ;;  %v690_v7 = vld [vmem:[#allocation5 + $0x12a0] sm:$0xff]  ;;  %v360_v5 = vld [vmem:[#allocation5 + $0x850] sm:$0xff] }
 0x1f1   :  { %2855 = vmatpush.msra.mxu3 %v710_v49  ;;  %2769 = vmatpush.msra.mxu0 %v220_v17  ;;  %v510_v49 = vld [vmem:[#allocation5 + $0xd00] sm:$0xff]  ;;  %v680_v17 = vld [vmem:[#allocation5 + $0x1250] sm:$0xff] }
 0x1f2   :  { %2798 = vmatpush.msra.mxu1 %v380_v37  ;;  %2669 = vmatmul.f32.gmra.mxu0 %v5157_v21  ;;  %v350_v21 = vld [vmem:[#allocation5 + $0x800] sm:$0xff] }
 0x1f3   :  { %2698 = vmatmul.f32.gmra.mxu1 %v5160_v45  ;;  %2727 = vmatmul.f32.gmra.mxu2 %v5163_v39  ;;  %v190_v45 = vld [vmem:[#allocation5 + $0x300] sm:$0xff]  ;;  %v500_v39 = vld [vmem:[#allocation5 + $0xcb0] sm:$0xff] }
 0x1f4   :  { %2856 = vmatpush.msra.mxu3 %v700_v43  ;;  %2828 = vmatpush.msra.mxu2 %v530_v11  ;;  %v5280_v4 = vpop.f32.mrf.mxu2  ;;  %v670_v43 = vld [vmem:[#allocation5 + $0x1200] sm:$0xff] }
 0x1f5   :  { %2770 = vmatpush.msra.mxu0 %v210_v22  ;;  %6449 = vst [vmem:[#allocation125_spill] sm:$0xff] %v5280_v4  ;;  %2799 = vmatpush.msra.mxu1 %v370_v44  ;;  %v180_v22 = vld [vmem:[#allocation5 + $0x2b0] sm:$0xff]  ;;  %v790_v4 = vld [vmem:[#allocation5 + $0x15c0] sm:$0xff] }
 0x1f6   :  { %2756 = vmatmul.f32.gmra.mxu3 %v5168_v50  ;;  %2829 = vmatpush.msra.mxu2 %v520_v55  ;;  %v340_v44 = vld [vmem:[#allocation5 + $0x7b0] sm:$0xff]  ;;  %v950_v2 = vld [vmem:[#allocation5 + $0x1ac0] sm:$0xff] }
 0x1f7   :  { %2857 = vmatpush.msra.mxu3 %v690_v7  ;;  %v5283_v37 = vpop.f32.mrf.mxu3  ;;  %2771 = vmatpush.msra.mxu0 %v200_v28  ;;  %v5285_v11 = vpop.f32.mrf.mxu0  ;;  %v660_v55 = vld [vmem:[#allocation5 + $0x11b0] sm:$0xff]  ;;  %v490_v7 = vld [vmem:[#allocation5 + $0xc60] sm:$0xff] }
 0x1f8   :  { %6450 = vst [vmem:[#allocation126_spill] sm:$0xff] %v5283_v37  ;;  %2800 = vmatpush.msra.mxu1 %v360_v5  ;;  %2830 = vmatpush.msra.mxu2 %v510_v49  ;;  %v5287_v50 = vpop.f32.mrf.mxu1  ;;  %v170_v28 = vld [vmem:[#allocation5 + $0x260] sm:$0xff]  ;;  %v480_v49 = vld [vmem:[#allocation5 + $0xc10] sm:$0xff] }
 0x1f9   :  { %6451 = vst [vmem:[#allocation127_spill] sm:$0xff] %v5285_v11  ;;  %2858 = vmatpush.msra.mxu3 %v680_v17  ;;  %2772 = vmatpush.msra.mxu0 %v190_v45  ;;  %v330_v5 = vld [vmem:[#allocation5 + $0x760] sm:$0xff]  ;;  %v160_v45 = vld [vmem:[#allocation5 + $0x210] sm:$0xff] }
 0x1fa   :  { %2801 = vmatpush.msra.mxu1 %v350_v21  ;;  %6452 = vst [vmem:[#allocation128_spill] sm:$0xff] %v5287_v50  ;;  %2831 = vmatpush.msra.mxu2 %v500_v39  ;;  %v650_v17 = vld [vmem:[#allocation5 + $0x1160] sm:$0xff]  ;;  %v320_v21 = vld [vmem:[#allocation5 + $0x710] sm:$0xff] }
 0x1fb   :  { %2859 = vmatpush.msra.mxu3 %v670_v43  ;;  %2773 = vmatpush.msra.mxu0 %v180_v22  ;;  %v470_v43 = vld [vmem:[#allocation5 + $0xbc0] sm:$0xff]  ;;  %v640_v22 = vld [vmem:[#allocation5 + $0x1110] sm:$0xff] }
 0x1fc   :  { %2802 = vmatpush.msra.mxu1 %v340_v44  ;;  %2672 = vmatmul.f32.gmra.mxu0 %v5177_v38  ;;  %v310_v38 = vld [vmem:[#allocation5 + $0x6c0] sm:$0xff] }
 0x1fd   :  { %2701 = vmatmul.f32.gmra.mxu1 %v5180_v47  ;;  %2730 = vmatmul.f32.gmra.mxu2 %v5183_v6  ;;  %v150_v47 = vld [vmem:[#allocation5 + $0x1c0] sm:$0xff]  ;;  %v460_v6 = vld [vmem:[#allocation5 + $0xb70] sm:$0xff] }
 0x1fe   :  { %2860 = vmatpush.msra.mxu3 %v660_v55  ;;  %2832 = vmatpush.msra.mxu2 %v490_v7  ;;  %v5292_v39 = vpop.f32.mrf.mxu2  ;;  %v630_v55 = vld [vmem:[#allocation5 + $0x10c0] sm:$0xff] }
 0x1ff   :  { %2774 = vmatpush.msra.mxu0 %v170_v28  ;;  %6453 = vst [vmem:[#allocation129_spill] sm:$0xff] %v5292_v39  ;;  %2803 = vmatpush.msra.mxu1 %v330_v5  ;;  %v140_v28 = vld [vmem:[#allocation5 + $0x170] sm:$0xff]  ;;  %v830_v50 = vld [vmem:[#allocation5 + $0x1700] sm:$0xff] }
 0x200   :  { %2759 = vmatmul.f32.gmra.mxu3 %v5188_v13  ;;  %2833 = vmatpush.msra.mxu2 %v480_v49  ;;  %v300_v5 = vld [vmem:[#allocation5 + $0x670] sm:$0xff]  ;;  %v990_v11 = vld [vmem:[#allocation5 + $0x1c00] sm:$0xff] }
 0x201   :  { %2861 = vmatpush.msra.mxu3 %v650_v17  ;;  %v5295_v44 = vpop.f32.mrf.mxu3  ;;  %2775 = vmatpush.msra.mxu0 %v160_v45  ;;  %v5297_v7 = vpop.f32.mrf.mxu0  ;;  %v620_v49 = vld [vmem:[#allocation5 + $0x1070] sm:$0xff]  ;;  %v450_v17 = vld [vmem:[#allocation5 + $0xb20] sm:$0xff] }
 0x202   :  { %6454 = vst [vmem:[#allocation130_spill] sm:$0xff] %v5295_v44  ;;  %2804 = vmatpush.msra.mxu1 %v320_v21  ;;  %2834 = vmatpush.msra.mxu2 %v470_v43  ;;  %v5299_v13 = vpop.f32.mrf.mxu1  ;;  %v130_v45 = vld [vmem:[#allocation5 + $0x120] sm:$0xff]  ;;  %v440_v43 = vld [vmem:[#allocation5 + $0xad0] sm:$0xff] }
 0x203   :  { %6455 = vst [vmem:[#allocation131_spill] sm:$0xff] %v5297_v7  ;;  %2862 = vmatpush.msra.mxu3 %v640_v22  ;;  %2776 = vmatpush.msra.mxu0 %v150_v47  ;;  %v290_v21 = vld [vmem:[#allocation5 + $0x620] sm:$0xff]  ;;  %v120_v47 = vld [vmem:[#allocation5 + $0xd0] sm:$0xff] }
 0x204   :  { %2805 = vmatpush.msra.mxu1 %v310_v38  ;;  %6456 = vst [vmem:[#allocation132_spill] sm:$0xff] %v5299_v13  ;;  %2835 = vmatpush.msra.mxu2 %v460_v6  ;;  %v610_v22 = vld [vmem:[#allocation5 + $0x1020] sm:$0xff]  ;;  %v280_v38 = vld [vmem:[#allocation5 + $0x5d0] sm:$0xff] }
 0x205   :  { %2863 = vmatpush.msra.mxu3 %v630_v55  ;;  %2777 = vmatpush.msra.mxu0 %v140_v28  ;;  %v430_v55 = vld [vmem:[#allocation5 + $0xa80] sm:$0xff]  ;;  %v600_v28 = vld [vmem:[#allocation5 + $0xfd0] sm:$0xff] }
 0x206   :  { %2806 = vmatpush.msra.mxu1 %v300_v5  ;;  %2675 = vmatmul.f32.gmra.mxu0 %v5197_v23  ;;  %v270_v23 = vld [vmem:[#allocation5 + $0x580] sm:$0xff]  ;;  %v1320_v39 = vld [vmem:[#allocation5 + $0x2650] sm:$0xff] }
 0x207   :  { %2704 = vmatmul.f32.gmra.mxu1 %v5200_v25  ;;  %2733 = vmatmul.f32.gmra.mxu2 %v5203_v42  ;;  %v110_v25 = vld [vmem:[#allocation5 + $0x80] sm:$0xff]  ;;  %v420_v42 = vld [vmem:[#allocation5 + $0xa30] sm:$0xff] }
 0x208   :  { %2864 = vmatpush.msra.mxu3 %v620_v49  ;;  %2836 = vmatpush.msra.mxu2 %v450_v17  ;;  %v5304_v6 = vpop.f32.mrf.mxu2  ;;  %v590_v49 = vld [vmem:[#allocation5 + $0xf80] sm:$0xff] }
 0x209   :  { %2778 = vmatpush.msra.mxu0 %v130_v45  ;;  %6457 = vst [vmem:[#allocation133_spill] sm:$0xff] %v5304_v6  ;;  %2807 = vmatpush.msra.mxu1 %v290_v21  ;;  %v100_v45 = vld [vmem:[#allocation5 + $0x30] sm:$0xff]  ;;  %v870_v6 = vld [vmem:[#allocation5 + $0x1840] sm:$0xff] }
 0x20a   :  { %2762 = vmatmul.f32.gmra.mxu3 %v5208_v62  ;;  %2837 = vmatpush.msra.mxu2 %v440_v43  ;;  %v260_v21 = vld [vmem:[#allocation5 + $0x530] sm:$0xff]  ;;  %v1030_v13 = vld [vmem:[#allocation5 + $0x1d40] sm:$0xff] }
 0x20b   :  { %2865 = vmatpush.msra.mxu3 %v610_v22  ;;  %v5307_v5 = vpop.f32.mrf.mxu3  ;;  %2779 = vmatpush.msra.mxu0 %v120_v47  ;;  %v5309_v17 = vpop.f32.mrf.mxu0  ;;  %v580_v43 = vld [vmem:[#allocation5 + $0xf30] sm:$0xff]  ;;  %v1210_v22 = vld [vmem:[#allocation5 + $0x22e0] sm:$0xff] }
 0x20c   :  { %6458 = vst [vmem:[#allocation134_spill] sm:$0xff] %v5307_v5  ;;  %2808 = vmatpush.msra.mxu1 %v280_v38  ;;  %2838 = vmatpush.msra.mxu2 %v430_v55  ;;  %v5311_v62 = vpop.f32.mrf.mxu1  ;;  %v890_v47 = vld [vmem:[#allocation5 + $0x18e0] sm:$0xff]  ;;  %v1360_v5 = vld [vmem:[#allocation5 + $0x2790] sm:$0xff] }
 0x20d   :  { %6459 = vst [vmem:[#allocation135_spill] sm:$0xff] %v5309_v17  ;;  %2866 = vmatpush.msra.mxu3 %v600_v28  ;;  %2780 = vmatpush.msra.mxu0 %v110_v25  ;;  %v5313_v38 = vld [vmem:[#allocation2] sm:$0xff]  ;;  %v5316_v17 = vld [vmem:[#allocation2 + $0x8] sm:$0xff]  ;;  %v5319_v28 = vld [vmem:[#allocation2 + $0x10] sm:$0xff] }
 0x20e   :  { %2809 = vmatpush.msra.mxu1 %v270_v23  ;;  %6460 = vst [vmem:[#allocation136_spill] sm:$0xff] %v5311_v62  ;;  %2839 = vmatpush.msra.mxu2 %v420_v42  ;;  %v1050_v55 = vld [vmem:[#allocation5 + $0x1de0] sm:$0xff]  ;;  %v1200_v25 = vld [vmem:[#allocation5 + $0x2290] sm:$0xff] }
 0x20f   :  { %2867 = vmatpush.msra.mxu3 %v590_v49  ;;  %2781 = vmatpush.msra.mxu0 %v100_v45  ;;  %v1370_v23 = vld [vmem:[#allocation5 + $0x27e0] sm:$0xff]  ;;  %v880_v42 = vld [vmem:[#allocation5 + $0x1890] sm:$0xff] }
 0x210   :  { %2810 = vmatpush.msra.mxu1 %v260_v21  ;;  %2782 = vmatmul.f32.vlgmr.msra.gmra.mxu0 %v5313_v38  ;;  %v1040_v49 = vld [vmem:[#allocation5 + $0x1d90] sm:$0xff]  ;;  %v5324_v21 = vld [vmem:[#allocation2 + $0x18] sm:$0xff]  ;;  %v1190_v62 = vld [vmem:[#allocation5 + $0x2240] sm:$0xff] }
 0x211   :  { %2811 = vmatmul.f32.vlgmr.msra.gmra.mxu1 %v5316_v17  ;;  %2840 = vmatmul.f32.vlgmr.msra.gmra.mxu2 %v5319_v28 }
 0x212   :  { %2868 = vmatpush.msra.mxu3 %v580_v43  ;;  %2940 = vmatpush.msrb.mxu2 %v1210_v22  ;;  %v5322_v45 = vpop.f32.mrf.mxu2  ;;  %v1180_v22 = vld [vmem:[#allocation5 + $0x21f0] sm:$0xff] }
 0x213   :  { %2882 = vmatpush.msrb.mxu0 %v890_v47  ;;  %6461 = vst [vmem:[#allocation137_spill] sm:$0xff] %v5322_v45  ;;  %2911 = vmatpush.msrb.mxu1 %v1050_v55  ;;  %v1350_v47 = vld [vmem:[#allocation5 + $0x2740] sm:$0xff]  ;;  %v860_v55 = vld [vmem:[#allocation5 + $0x17f0] sm:$0xff] }
 0x214   :  { %2869 = vmatmul.f32.vlgmr.msra.gmra.mxu3 %v5324_v21  ;;  %2941 = vmatpush.msrb.mxu2 %v1200_v25  ;;  %v1020_v45 = vld [vmem:[#allocation5 + $0x1cf0] sm:$0xff] }
 0x215   :  { %2969 = vmatpush.msrb.mxu3 %v1370_v23  ;;  %v5327_v43 = vpop.f32.mrf.mxu3  ;;  %2883 = vmatpush.msrb.mxu0 %v880_v42  ;;  %v5329_v7 = vpop.f32.mrf.mxu0  ;;  %v1340_v25 = vld [vmem:[#allocation5 + $0x26f0] sm:$0xff]  ;;  %v1170_v23 = vld [vmem:[#allocation5 + $0x21a0] sm:$0xff] }
 0x216   :  { %6462 = vst [vmem:[#allocation138_spill] sm:$0xff] %v5327_v43  ;;  %2912 = vmatpush.msrb.mxu1 %v1040_v49  ;;  %2942 = vmatpush.msrb.mxu2 %v1190_v62  ;;  %v5331_v44 = vpop.f32.mrf.mxu1  ;;  %v850_v42 = vld [vmem:[#allocation5 + $0x17a0] sm:$0xff]  ;;  %v5336_v43 = vld [vmem:[#allocation2 + $0x48] sm:$0xff] }
 0x217   :  { %6463 = vst [vmem:[#allocation139_spill] sm:$0xff] %v5329_v7  ;;  %2970 = vmatpush.msrb.mxu3 %v1360_v5  ;;  %2884 = vmatpush.msrb.mxu0 %v870_v6  ;;  %v5333_v49 = vld [vmem:[#allocation2 + $0x40] sm:$0xff]  ;;  %v5339_v6 = vld [vmem:[#allocation2 + $0x50] sm:$0xff] }
 0x218   :  { %2913 = vmatpush.msrb.mxu1 %v1030_v13  ;;  %6464 = vst [vmem:[#allocation140_spill] sm:$0xff] %v5331_v44  ;;  %2943 = vmatpush.msrb.mxu2 %v1180_v22  ;;  %v1010_v5 = vld [vmem:[#allocation5 + $0x1ca0] sm:$0xff]  ;;  %v1160_v13 = vld [vmem:[#allocation5 + $0x2150] sm:$0xff] }
 0x219   :  { %2971 = vmatpush.msrb.mxu3 %v1350_v47  ;;  %2885 = vmatpush.msrb.mxu0 %v860_v55  ;;  %v1330_v62 = vld [vmem:[#allocation5 + $0x26a0] sm:$0xff]  ;;  %v1000_v22 = vld [vmem:[#allocation5 + $0x1c50] sm:$0xff]  ;;  %v5344_v55 = vld [vmem:[#allocation2 + $0x58] sm:$0xff] }
 0x21a   :  { %2914 = vmatpush.msrb.mxu1 %v1020_v45  ;;  %2785 = vmatmul.f32.gmra.mxu0 %v5333_v49  ;;  %v840_v45 = vld [vmem:[#allocation5 + $0x1750] sm:$0xff]  ;;  %v1150_v44 = vld [vmem:[#allocation5 + $0x2100] sm:$0xff] }
 0x21b   :  { %2814 = vmatmul.f32.gmra.mxu1 %v5336_v43  ;;  %2843 = vmatmul.f32.gmra.mxu2 %v5339_v6 }
 0x21c   :  { %2972 = vmatpush.msrb.mxu3 %v1340_v25  ;;  %2944 = vmatpush.msrb.mxu2 %v1170_v23  ;;  %v5342_v47 = vpop.f32.mrf.mxu2  ;;  %v1140_v23 = vld [vmem:[#allocation5 + $0x20b0] sm:$0xff] }
 0x21d   :  { %2886 = vmatpush.msrb.mxu0 %v850_v42  ;;  %6465 = vst [vmem:[#allocation141_spill] sm:$0xff] %v5342_v47  ;;  %2915 = vmatpush.msrb.mxu1 %v1010_v5  ;;  %v1310_v42 = vld [vmem:[#allocation5 + $0x2600] sm:$0xff]  ;;  %v820_v5 = vld [vmem:[#allocation5 + $0x16b0] sm:$0xff] }
 0x21e   :  { %2872 = vmatmul.f32.gmra.mxu3 %v5344_v55  ;;  %2945 = vmatpush.msrb.mxu2 %v1160_v13  ;;  %v980_v47 = vld [vmem:[#allocation5 + $0x1bb0] sm:$0xff] }
 0x21f   :  { %2973 = vmatpush.msrb.mxu3 %v1330_v62  ;;  %v5347_v25 = vpop.f32.mrf.mxu3  ;;  %2887 = vmatpush.msrb.mxu0 %v840_v45  ;;  %v5349_v7 = vpop.f32.mrf.mxu0  ;;  %v1300_v13 = vld [vmem:[#allocation5 + $0x25b0] sm:$0xff]  ;;  %v1130_v62 = vld [vmem:[#allocation5 + $0x2060] sm:$0xff] }
 0x220   :  { %6466 = vst [vmem:[#allocation142_spill] sm:$0xff] %v5347_v25  ;;  %2916 = vmatpush.msrb.mxu1 %v1000_v22  ;;  %2946 = vmatpush.msrb.mxu2 %v1150_v44  ;;  %v5351_v37 = vpop.f32.mrf.mxu1  ;;  %v810_v45 = vld [vmem:[#allocation5 + $0x1660] sm:$0xff]  ;;  %v5356_v25 = vld [vmem:[#allocation2 + $0x88] sm:$0xff] }
 0x221   :  { %6467 = vst [vmem:[#allocation143_spill] sm:$0xff] %v5349_v7  ;;  %2974 = vmatpush.msrb.mxu3 %v1320_v39  ;;  %2888 = vmatpush.msrb.mxu0 %v830_v50  ;;  %v5353_v22 = vld [vmem:[#allocation2 + $0x80] sm:$0xff]  ;;  %v5359_v50 = vld [vmem:[#allocation2 + $0x90] sm:$0xff] }
 0x222   :  { %2917 = vmatpush.msrb.mxu1 %v990_v11  ;;  %6468 = vst [vmem:[#allocation144_spill] sm:$0xff] %v5351_v37  ;;  %2947 = vmatpush.msrb.mxu2 %v1140_v23  ;;  %v970_v39 = vld [vmem:[#allocation5 + $0x1b60] sm:$0xff]  ;;  %v1120_v11 = vld [vmem:[#allocation5 + $0x2010] sm:$0xff] }
 0x223   :  { %2975 = vmatpush.msrb.mxu3 %v1310_v42  ;;  %2889 = vmatpush.msrb.mxu0 %v820_v5  ;;  %v1290_v44 = vld [vmem:[#allocation5 + $0x2560] sm:$0xff]  ;;  %v960_v23 = vld [vmem:[#allocation5 + $0x1b10] sm:$0xff]  ;;  %v5364_v5 = vld [vmem:[#allocation2 + $0x98] sm:$0xff] }
 0x224   :  { %2918 = vmatpush.msrb.mxu1 %v980_v47  ;;  %2788 = vmatmul.f32.gmra.mxu0 %v5353_v22  ;;  %v800_v47 = vld [vmem:[#allocation5 + $0x1610] sm:$0xff]  ;;  %v1110_v37 = vld [vmem:[#allocation5 + $0x1fc0] sm:$0xff] }
 0x225   :  { %2817 = vmatmul.f32.gmra.mxu1 %v5356_v25  ;;  %2846 = vmatmul.f32.gmra.mxu2 %v5359_v50  ;;  %v1280_v7 = vld [vmem:[#allocation5 + $0x2510] sm:$0xff] }
 0x226   :  { %2976 = vmatpush.msrb.mxu3 %v1300_v13  ;;  %2948 = vmatpush.msrb.mxu2 %v1130_v62  ;;  %v5362_v42 = vpop.f32.mrf.mxu2  ;;  %v1100_v62 = vld [vmem:[#allocation5 + $0x1f70] sm:$0xff] }
 0x227   :  { %2890 = vmatpush.msrb.mxu0 %v810_v45  ;;  %6469 = vst [vmem:[#allocation145_spill] sm:$0xff] %v5362_v42  ;;  %2919 = vmatpush.msrb.mxu1 %v970_v39  ;;  %v1270_v45 = vld [vmem:[#allocation5 + $0x24c0] sm:$0xff]  ;;  %v780_v39 = vld [vmem:[#allocation5 + $0x1570] sm:$0xff] }
 0x228   :  { %2875 = vmatmul.f32.gmra.mxu3 %v5364_v5  ;;  %2949 = vmatpush.msrb.mxu2 %v1120_v11  ;;  %v940_v42 = vld [vmem:[#allocation5 + $0x1a70] sm:$0xff] }
 0x229   :  { %2977 = vmatpush.msrb.mxu3 %v1290_v44  ;;  %v5367_v13 = vpop.f32.mrf.mxu3  ;;  %2891 = vmatpush.msrb.mxu0 %v800_v47  ;;  %v5369_v33 = vpop.f32.mrf.mxu0  ;;  %v1260_v11 = vld [vmem:[#allocation5 + $0x2470] sm:$0xff]  ;;  %v1090_v44 = vld [vmem:[#allocation5 + $0x1f20] sm:$0xff] }
 0x22a   :  { %6470 = vst [vmem:[#allocation146_spill] sm:$0xff] %v5367_v13  ;;  %2920 = vmatpush.msrb.mxu1 %v960_v23  ;;  %2950 = vmatpush.msrb.mxu2 %v1110_v37  ;;  %v5371_v36 = vpop.f32.mrf.mxu1  ;;  %v770_v47 = vld [vmem:[#allocation5 + $0x1520] sm:$0xff]  ;;  %v5376_v13 = vld [vmem:[#allocation2 + $0xc8] sm:$0xff] }
 0x22b   :  { %6471 = vst [vmem:[#allocation147_spill] sm:$0xff] %v5369_v33  ;;  %2978 = vmatpush.msrb.mxu3 %v1280_v7  ;;  %2892 = vmatpush.msrb.mxu0 %v790_v4  ;;  %v5373_v23 = vld [vmem:[#allocation2 + $0xc0] sm:$0xff]  ;;  %v5379_v4 = vld [vmem:[#allocation2 + $0xd0] sm:$0xff] }
 0x22c   :  { %2921 = vmatpush.msrb.mxu1 %v950_v2  ;;  %6472 = vst [vmem:[#allocation148_spill] sm:$0xff] %v5371_v36  ;;  %2951 = vmatpush.msrb.mxu2 %v1100_v62  ;;  %v930_v37 = vld [vmem:[#allocation5 + $0x1a20] sm:$0xff]  ;;  %v1080_v2 = vld [vmem:[#allocation5 + $0x1ed0] sm:$0xff] }
 0x22d   :  { %2979 = vmatpush.msrb.mxu3 %v1270_v45  ;;  %2893 = vmatpush.msrb.mxu0 %v780_v39  ;;  %v1250_v7 = vld [vmem:[#allocation5 + $0x2420] sm:$0xff]  ;;  %v920_v62 = vld [vmem:[#allocation5 + $0x19d0] sm:$0xff]  ;;  %v5384_v39 = vld [vmem:[#allocation2 + $0xd8] sm:$0xff] }
 0x22e   :  { %2922 = vmatpush.msrb.mxu1 %v940_v42  ;;  %2791 = vmatmul.f32.gmra.mxu0 %v5373_v23  ;;  %v760_v42 = vld [vmem:[#allocation5 + $0x14d0] sm:$0xff]  ;;  %v1070_v36 = vld [vmem:[#allocation5 + $0x1e80] sm:$0xff] }
 0x22f   :  { %2820 = vmatmul.f32.gmra.mxu1 %v5376_v13  ;;  %2849 = vmatmul.f32.gmra.mxu2 %v5379_v4  ;;  %v1240_v33 = vld [vmem:[#allocation5 + $0x23d0] sm:$0xff] }
 0x230   :  { %2980 = vmatpush.msrb.mxu3 %v1260_v11  ;;  %2952 = vmatpush.msrb.mxu2 %v1090_v44  ;;  %v5382_v45 = vpop.f32.mrf.mxu2  ;;  %v1060_v44 = vld [vmem:[#allocation5 + $0x1e30] sm:$0xff] }
 0x231   :  { %2894 = vmatpush.msrb.mxu0 %v770_v47  ;;  %6473 = vst [vmem:[#allocation149_spill] sm:$0xff] %v5382_v45  ;;  %2923 = vmatpush.msrb.mxu1 %v930_v37  ;;  %v1230_v47 = vld [vmem:[#allocation5 + $0x2380] sm:$0xff]  ;;  %v740_v37 = vld [vmem:[#allocation5 + $0x1430] sm:$0xff] }
 0x232   :  { %2878 = vmatmul.f32.gmra.mxu3 %v5384_v39  ;;  %2953 = vmatpush.msrb.mxu2 %v1080_v2  ;;  %v900_v45 = vld [vmem:[#allocation5 + $0x1930] sm:$0xff] }
 0x233   :  { %2981 = vmatpush.msrb.mxu3 %v1250_v7  ;;  %v5387_v11 = vpop.f32.mrf.mxu3  ;;  %2895 = vmatpush.msrb.mxu0 %v760_v42  ;;  %v5389_v12 = vpop.f32.mrf.mxu0  ;;  %v1220_v2 = vld [vmem:[#allocation5 + $0x2330] sm:$0xff]  ;;  %v571_v7 = vld [vmem:[#allocation5 + $0xee8] sm:$0xff] }
 0x234   :  { %6474 = vst [vmem:[#allocation150_spill] sm:$0xff] %v5387_v11  ;;  %2924 = vmatpush.msrb.mxu1 %v920_v62  ;;  %2954 = vmatpush.msrb.mxu2 %v1070_v36  ;;  %v5391_v31 = vpop.f32.mrf.mxu1  ;;  %v251_v42 = vld [vmem:[#allocation5 + $0x4e8] sm:$0xff]  ;;  %v5393_v62 = vld [vmem:[#allocation2 + $0x20] sm:$0xff] }
 0x235   :  { %6475 = vst [vmem:[#allocation151_spill] sm:$0xff] %v5389_v12  ;;  %2982 = vmatpush.msrb.mxu3 %v1240_v33  ;;  %2896 = vmatpush.msrb.mxu0 %v750_v59  ;;  %v5396_v11 = vld [vmem:[#allocation2 + $0x28] sm:$0xff]  ;;  %v5399_v59 = vld [vmem:[#allocation2 + $0x30] sm:$0xff]  ;;  %v721_v12 = vld [vmem:[#allocation5 + $0x1398] sm:$0xff] }
 0x236   :  { %2925 = vmatpush.msrb.mxu1 %v910_v10  ;;  %6476 = vst [vmem:[#allocation152_spill] sm:$0xff] %v5391_v31  ;;  %2955 = vmatpush.msrb.mxu2 %v1060_v44  ;;  %v411_v36 = vld [vmem:[#allocation5 + $0x9e8] sm:$0xff]  ;;  %v561_v10 = vld [vmem:[#allocation5 + $0xe98] sm:$0xff] }
 0x237   :  { %2983 = vmatpush.msrb.mxu3 %v1230_v47  ;;  %2897 = vmatpush.msrb.mxu0 %v740_v37  ;;  %v731_v33 = vld [vmem:[#allocation5 + $0x13e8] sm:$0xff]  ;;  %v401_v44 = vld [vmem:[#allocation5 + $0x998] sm:$0xff] }
 0x238   :  { %2926 = vmatpush.msrb.mxu1 %v900_v45  ;;  %2898 = vmatmul.f32.vlgmr.msrb.gmra.mxu0 %v5393_v62  ;;  %v241_v45 = vld [vmem:[#allocation5 + $0x498] sm:$0xff]  ;;  %v551_v31 = vld [vmem:[#allocation5 + $0xe48] sm:$0xff] }
 0x239   :  { %2927 = vmatmul.f32.vlgmr.msrb.gmra.mxu1 %v5396_v11  ;;  %2956 = vmatmul.f32.vlgmr.msrb.gmra.mxu2 %v5399_v59  ;;  %v5404_v37 = vld [vmem:[#allocation2 + $0x38] sm:$0xff] }
 0x23a   :  { %2984 = vmatpush.msrb.mxu3 %v1220_v2  ;;  %3056 = vmatpush.msra.mxu2 %v571_v7  ;;  %v5402_v47 = vpop.f32.mrf.mxu2  ;;  %v541_v7 = vld [vmem:[#allocation5 + $0xdf8] sm:$0xff] }
 0x23b   :  { %2998 = vmatpush.msra.mxu0 %v251_v42  ;;  %6477 = vst [vmem:[#allocation153_spill] sm:$0xff] %v5402_v47  ;;  %3027 = vmatpush.msra.mxu1 %v411_v36  ;;  %v711_v42 = vld [vmem:[#allocation5 + $0x1348] sm:$0xff]  ;;  %v221_v36 = vld [vmem:[#allocation5 + $0x3f8] sm:$0xff] }
 0x23c   :  { %2985 = vmatmul.f32.vlgmr.msrb.gmra.mxu3 %v5404_v37  ;;  %3057 = vmatpush.msra.mxu2 %v561_v10  ;;  %v381_v47 = vld [vmem:[#allocation5 + $0x8f8] sm:$0xff] }
 0x23d   :  { %3085 = vmatpush.msra.mxu3 %v731_v33  ;;  %v5407_v2 = vpop.f32.mrf.mxu3  ;;  %2999 = vmatpush.msra.mxu0 %v241_v45  ;;  %v5409_v20 = vpop.f32.mrf.mxu0  ;;  %v701_v10 = vld [vmem:[#allocation5 + $0x12f8] sm:$0xff]  ;;  %v531_v33 = vld [vmem:[#allocation5 + $0xda8] sm:$0xff] }
 0x23e   :  { %6478 = vst [vmem:[#allocation154_spill] sm:$0xff] %v5407_v2  ;;  %3028 = vmatpush.msra.mxu1 %v401_v44  ;;  %3058 = vmatpush.msra.mxu2 %v551_v31  ;;  %v5411_v46 = vpop.f32.mrf.mxu1  ;;  %v211_v45 = vld [vmem:[#allocation5 + $0x3a8] sm:$0xff]  ;;  %v5413_v44 = vld [vmem:[#allocation2 + $0x60] sm:$0xff] }
 0x23f   :  { %6479 = vst [vmem:[#allocation155_spill] sm:$0xff] %v5409_v20  ;;  %3086 = vmatpush.msra.mxu3 %v721_v12  ;;  %3000 = vmatpush.msra.mxu0 %v231_v48  ;;  %v5416_v2 = vld [vmem:[#allocation2 + $0x68] sm:$0xff]  ;;  %v5419_v48 = vld [vmem:[#allocation2 + $0x70] sm:$0xff] }
 0x240   :  { %3029 = vmatpush.msra.mxu1 %v391_v0  ;;  %6480 = vst [vmem:[#allocation156_spill] sm:$0xff] %v5411_v46  ;;  %3059 = vmatpush.msra.mxu2 %v541_v7  ;;  %v371_v12 = vld [vmem:[#allocation5 + $0x8a8] sm:$0xff]  ;;  %v521_v0 = vld [vmem:[#allocation5 + $0xd58] sm:$0xff] }
 0x241   :  { %3087 = vmatpush.msra.mxu3 %v711_v42  ;;  %3001 = vmatpush.msra.mxu0 %v221_v36  ;;  %v691_v31 = vld [vmem:[#allocation5 + $0x12a8] sm:$0xff]  ;;  %v361_v7 = vld [vmem:[#allocation5 + $0x858] sm:$0xff] }
 0x242   :  { %3030 = vmatpush.msra.mxu1 %v381_v47  ;;  %2901 = vmatmul.f32.gmra.mxu0 %v5413_v44  ;;  %v201_v47 = vld [vmem:[#allocation5 + $0x358] sm:$0xff] }
 0x243   :  { %2930 = vmatmul.f32.gmra.mxu1 %v5416_v2  ;;  %2959 = vmatmul.f32.gmra.mxu2 %v5419_v48  ;;  %v5424_v36 = vld [vmem:[#allocation2 + $0x78] sm:$0xff] }
 0x244   :  { %3088 = vmatpush.msra.mxu3 %v701_v10  ;;  %3060 = vmatpush.msra.mxu2 %v531_v33  ;;  %v5422_v42 = vpop.f32.mrf.mxu2  ;;  %v501_v33 = vld [vmem:[#allocation5 + $0xcb8] sm:$0xff] }
 0x245   :  { %3002 = vmatpush.msra.mxu0 %v211_v45  ;;  %6481 = vst [vmem:[#allocation157_spill] sm:$0xff] %v5422_v42  ;;  %3031 = vmatpush.msra.mxu1 %v371_v12  ;;  %v671_v45 = vld [vmem:[#allocation5 + $0x1208] sm:$0xff]  ;;  %v181_v12 = vld [vmem:[#allocation5 + $0x2b8] sm:$0xff] }
 0x246   :  { %2988 = vmatmul.f32.gmra.mxu3 %v5424_v36  ;;  %3061 = vmatpush.msra.mxu2 %v521_v0  ;;  %v661_v0 = vld [vmem:[#allocation5 + $0x11b8] sm:$0xff]  ;;  %v271_v42 = vld [vmem:[#allocation5 + $0x588] sm:$0xff] }
 0x247   :  { %3089 = vmatpush.msra.mxu3 %v691_v31  ;;  %v5427_v10 = vpop.f32.mrf.mxu3  ;;  %3003 = vmatpush.msra.mxu0 %v201_v47  ;;  %v5429_v32 = vpop.f32.mrf.mxu0  ;;  %v491_v31 = vld [vmem:[#allocation5 + $0xc68] sm:$0xff] }
 0x248   :  { %6482 = vst [vmem:[#allocation158_spill] sm:$0xff] %v5427_v10  ;;  %3032 = vmatpush.msra.mxu1 %v361_v7  ;;  %3062 = vmatpush.msra.mxu2 %v511_v24  ;;  %v5431_v41 = vpop.f32.mrf.mxu1  ;;  %v171_v47 = vld [vmem:[#allocation5 + $0x268] sm:$0xff]  ;;  %v5433_v7 = vld [vmem:[#allocation2 + $0xa0] sm:$0xff] }
 0x249   :  { %6483 = vst [vmem:[#allocation159_spill] sm:$0xff] %v5429_v32  ;;  %3090 = vmatpush.msra.mxu3 %v681_v60  ;;  %3004 = vmatpush.msra.mxu0 %v191_v3  ;;  %v331_v24 = vld [vmem:[#allocation5 + $0x768] sm:$0xff]  ;;  %v5439_v60 = vld [vmem:[#allocation2 + $0xb0] sm:$0xff]  ;;  %v481_v3 = vld [vmem:[#allocation5 + $0xc18] sm:$0xff] }
 0x24a   :  { %3033 = vmatpush.msra.mxu1 %v351_v29  ;;  %6484 = vst [vmem:[#allocation160_spill] sm:$0xff] %v5431_v41  ;;  %3063 = vmatpush.msra.mxu2 %v501_v33  ;;  %v651_v29 = vld [vmem:[#allocation5 + $0x1168] sm:$0xff]  ;;  %v321_v33 = vld [vmem:[#allocation5 + $0x718] sm:$0xff] }
 0x24b   :  { %3091 = vmatpush.msra.mxu3 %v671_v45  ;;  %3005 = vmatpush.msra.mxu0 %v181_v12  ;;  %v5444_v12 = vld [vmem:[#allocation2 + $0xb8] sm:$0xff]  ;;  %v111_v10 = vld [vmem:[#allocation5 + $0x88] sm:$0xff] }
 0x24c   :  { %3034 = vmatpush.msra.mxu1 %v341_v52  ;;  %2904 = vmatmul.f32.gmra.mxu0 %v5433_v7  ;;  %v161_v52 = vld [vmem:[#allocation5 + $0x218] sm:$0xff] }
 0x24d   :  { %2933 = vmatmul.f32.gmra.mxu1 %v5436_v8  ;;  %2962 = vmatmul.f32.gmra.mxu2 %v5439_v60 }
 0x24e   :  { %3092 = vmatpush.msra.mxu3 %v661_v0  ;;  %3064 = vmatpush.msra.mxu2 %v491_v31  ;;  %v5442_v45 = vpop.f32.mrf.mxu2  ;;  %v461_v31 = vld [vmem:[#allocation5 + $0xb78] sm:$0xff] }
 0x24f   :  { %3006 = vmatpush.msra.mxu0 %v171_v47  ;;  %6485 = vst [vmem:[#allocation161_spill] sm:$0xff] %v5442_v45  ;;  %3035 = vmatpush.msra.mxu1 %v331_v24  ;;  %v631_v47 = vld [vmem:[#allocation5 + $0x10c8] sm:$0xff]  ;;  %v141_v24 = vld [vmem:[#allocation5 + $0x178] sm:$0xff] }
 0x250   :  { %2991 = vmatmul.f32.gmra.mxu3 %v5444_v12  ;;  %3065 = vmatpush.msra.mxu2 %v481_v3  ;;  %v301_v45 = vld [vmem:[#allocation5 + $0x678] sm:$0xff] }
 0x251   :  { %3093 = vmatpush.msra.mxu3 %v651_v29  ;;  %v5447_v0 = vpop.f32.mrf.mxu3  ;;  %3007 = vmatpush.msra.mxu0 %v161_v52  ;;  %v5449_v41 = vpop.f32.mrf.mxu0  ;;  %v621_v3 = vld [vmem:[#allocation5 + $0x1078] sm:$0xff]  ;;  %v451_v29 = vld [vmem:[#allocation5 + $0xb28] sm:$0xff] }
 0x252   :  { %6486 = vst [vmem:[#allocation162_spill] sm:$0xff] %v5447_v0  ;;  %3036 = vmatpush.msra.mxu1 %v321_v33  ;;  %3066 = vmatpush.msra.mxu2 %v471_v30  ;;  %v5451_v32 = vpop.f32.mrf.mxu1  ;;  %v131_v52 = vld [vmem:[#allocation5 + $0x128] sm:$0xff]  ;;  %v5453_v33 = vld [vmem:[#allocation2 + $0xe0] sm:$0xff] }
 0x253   :  { %6487 = vst [vmem:[#allocation163_spill] sm:$0xff] %v5449_v41  ;;  %3094 = vmatpush.msra.mxu3 %v641_v35  ;;  %3008 = vmatpush.msra.mxu0 %v151_v26  ;;  %v5456_v0 = vld [vmem:[#allocation2 + $0xe8] sm:$0xff]  ;;  %v5459_v26 = vld [vmem:[#allocation2 + $0xf0] sm:$0xff]  ;;  %v601_v41 = vld [vmem:[#allocation5 + $0xfd8] sm:$0xff] }
 0x254   :  { %3037 = vmatpush.msra.mxu1 %v311_v40  ;;  %6488 = vst [vmem:[#allocation164_spill] sm:$0xff] %v5451_v32  ;;  %3067 = vmatpush.msra.mxu2 %v461_v31  ;;  %v291_v35 = vld [vmem:[#allocation5 + $0x628] sm:$0xff]  ;;  %v441_v40 = vld [vmem:[#allocation5 + $0xad8] sm:$0xff] }
 0x255   :  { %3095 = vmatpush.msra.mxu3 %v631_v47  ;;  %3009 = vmatpush.msra.mxu0 %v141_v24  ;;  %v611_v30 = vld [vmem:[#allocation5 + $0x1028] sm:$0xff]  ;;  %v281_v31 = vld [vmem:[#allocation5 + $0x5d8] sm:$0xff] }
 0x256   :  { %3038 = vmatpush.msra.mxu1 %v301_v45  ;;  %2907 = vmatmul.f32.gmra.mxu0 %v5453_v33  ;;  %v121_v45 = vld [vmem:[#allocation5 + $0xd8] sm:$0xff]  ;;  %v431_v32 = vld [vmem:[#allocation5 + $0xa88] sm:$0xff] }
 0x257   :  { %2936 = vmatmul.f32.gmra.mxu1 %v5456_v0  ;;  %2965 = vmatmul.f32.gmra.mxu2 %v5459_v26  ;;  %v5464_v24 = vld [vmem:[#allocation2 + $0xf8] sm:$0xff] }
 0x258   :  { %3096 = vmatpush.msra.mxu3 %v621_v3  ;;  %3068 = vmatpush.msra.mxu2 %v451_v29  ;;  %v5462_v47 = vpop.f32.mrf.mxu2  ;;  %v421_v29 = vld [vmem:[#allocation5 + $0xa38] sm:$0xff] }
 0x259   :  { %3010 = vmatpush.msra.mxu0 %v131_v52  ;;  %6489 = vst [vmem:[#allocation165_spill] sm:$0xff] %v5462_v47  ;;  %3039 = vmatpush.msra.mxu1 %v291_v35  ;;  %v591_v52 = vld [vmem:[#allocation5 + $0xf88] sm:$0xff]  ;;  %v101_v35 = vld [vmem:[#allocation5 + $0x38] sm:$0xff] }
 0x25a   :  { %2994 = vmatmul.f32.gmra.mxu3 %v5464_v24  ;;  %3069 = vmatpush.msra.mxu2 %v441_v40  ;;  %v261_v47 = vld [vmem:[#allocation5 + $0x538] sm:$0xff] }
 0x25b   :  { %3097 = vmatpush.msra.mxu3 %v611_v30  ;;  %v5467_v3 = vpop.f32.mrf.mxu3  ;;  %3011 = vmatpush.msra.mxu0 %v121_v45  ;;  %v5469_v46 = vpop.f32.mrf.mxu0  ;;  %v581_v40 = vld [vmem:[#allocation5 + $0xf38] sm:$0xff]  ;;  %v1211_v30 = vld [vmem:[#allocation5 + $0x22e8] sm:$0xff] }
 0x25c   :  { %6490 = vst [vmem:[#allocation166_spill] sm:$0xff] %v5467_v3  ;;  %3040 = vmatpush.msra.mxu1 %v281_v31  ;;  %3070 = vmatpush.msra.mxu2 %v431_v32  ;;  %v5471_v20 = vpop.f32.mrf.mxu1  ;;  %v891_v45 = vld [vmem:[#allocation5 + $0x18e8] sm:$0xff]  ;;  %v1201_v32 = vld [vmem:[#allocation5 + $0x2298] sm:$0xff] }
 0x25d   :  { %3098 = vmatpush.msra.mxu3 %v601_v41  ;;  %3012 = vmatpush.msra.mxu0 %v111_v10  ;;  %v1051_v31 = vld [vmem:[#allocation5 + $0x1de8] sm:$0xff]  ;;  %v1041_v10 = vld [vmem:[#allocation5 + $0x1d98] sm:$0xff] }
 0x25e   :  { %3041 = vmatpush.msra.mxu1 %v271_v42  ;;  %3071 = vmatpush.msra.mxu2 %v421_v29  ;;  %v1371_v41 = vld [vmem:[#allocation5 + $0x27e8] sm:$0xff]  ;;  %v881_v42 = vld [vmem:[#allocation5 + $0x1898] sm:$0xff] }
 0x25f   :  { %3099 = vmatpush.msra.mxu3 %v591_v52  ;;  %3013 = vmatpush.msra.mxu0 %v101_v35  ;;  %v1361_v52 = vld [vmem:[#allocation5 + $0x2798] sm:$0xff]  ;;  %v5612_v3 = vld [vmem:[#allocation2 + $0x88] sm:$0xff] }
 0x260   :  { %3042 = vmatpush.msra.mxu1 %v261_v47  ;;  %3014 = vmatmul.f32.vlgmr.msra.gmra.mxu0 %v5313_v38  ;;  %v1191_v47 = vld [vmem:[#allocation5 + $0x2248] sm:$0xff] }
 0x261   :  { %3043 = vmatmul.f32.vlgmr.msra.gmra.mxu1 %v5316_v17  ;;  %3072 = vmatmul.f32.vlgmr.msra.gmra.mxu2 %v5319_v28  ;;  %v871_v17 = vld [vmem:[#allocation5 + $0x1848] sm:$0xff]  ;;  %v1181_v28 = vld [vmem:[#allocation5 + $0x21f8] sm:$0xff] }
 0x262   :  { %3100 = vmatpush.msra.mxu3 %v581_v40  ;;  %3172 = vmatpush.msrb.mxu2 %v1211_v30  ;;  %v5476_v29 = vpop.f32.mrf.mxu2  ;;  %v1031_v38 = vld [vmem:[#allocation5 + $0x1d48] sm:$0xff] }
 0x263   :  { %3114 = vmatpush.msrb.mxu0 %v891_v45  ;;  %6491 = vst [vmem:[#allocation167_spill] sm:$0xff] %v5476_v29  ;;  %3143 = vmatpush.msrb.mxu1 %v1051_v31  ;;  %v1351_v40 = vld [vmem:[#allocation5 + $0x2748] sm:$0xff]  ;;  %v861_v45 = vld [vmem:[#allocation5 + $0x17f8] sm:$0xff] }
 0x264   :  { %3101 = vmatmul.f32.vlgmr.msra.gmra.mxu3 %v5324_v21  ;;  %3173 = vmatpush.msrb.mxu2 %v1201_v32  ;;  %v1021_v31 = vld [vmem:[#allocation5 + $0x1cf8] sm:$0xff] }
 0x265   :  { %3201 = vmatpush.msrb.mxu3 %v1371_v41  ;;  %v5479_v35 = vpop.f32.mrf.mxu3  ;;  %3115 = vmatpush.msrb.mxu0 %v881_v42  ;;  %v5481_v30 = vpop.f32.mrf.mxu0  ;;  %v1341_v32 = vld [vmem:[#allocation5 + $0x26f8] sm:$0xff]  ;;  %v1171_v41 = vld [vmem:[#allocation5 + $0x21a8] sm:$0xff] }
 0x266   :  { %6492 = vst [vmem:[#allocation168_spill] sm:$0xff] %v5479_v35  ;;  %3144 = vmatpush.msrb.mxu1 %v1041_v10  ;;  %3174 = vmatpush.msrb.mxu2 %v1191_v47  ;;  %v5483_v21 = vpop.f32.mrf.mxu1  ;;  %v851_v42 = vld [vmem:[#allocation5 + $0x17a8] sm:$0xff]  ;;  %v1161_v47 = vld [vmem:[#allocation5 + $0x2158] sm:$0xff] }
 0x267   :  { %3202 = vmatpush.msrb.mxu3 %v1361_v52  ;;  %3116 = vmatpush.msrb.mxu0 %v871_v17  ;;  %v1011_v10 = vld [vmem:[#allocation5 + $0x1ca8] sm:$0xff]  ;;  %v841_v17 = vld [vmem:[#allocation5 + $0x1758] sm:$0xff] }
 0x268   :  { %3145 = vmatpush.msrb.mxu1 %v1031_v38  ;;  %3175 = vmatpush.msrb.mxu2 %v1181_v28  ;;  %v1331_v52 = vld [vmem:[#allocation5 + $0x26a8] sm:$0xff]  ;;  %v1001_v38 = vld [vmem:[#allocation5 + $0x1c58] sm:$0xff] }
 0x269   :  { %3203 = vmatpush.msrb.mxu3 %v1351_v40  ;;  %3117 = vmatpush.msrb.mxu0 %v861_v45  ;;  %v1151_v40 = vld [vmem:[#allocation5 + $0x2108] sm:$0xff]  ;;  %v1321_v45 = vld [vmem:[#allocation5 + $0x2658] sm:$0xff] }
 0x26a   :  { %3146 = vmatpush.msrb.mxu1 %v1021_v31  ;;  %3017 = vmatmul.f32.gmra.mxu0 %v5333_v49  ;;  %v991_v49 = vld [vmem:[#allocation5 + $0x1c08] sm:$0xff] }
 0x26b   :  { %3046 = vmatmul.f32.gmra.mxu1 %v5336_v43  ;;  %3075 = vmatmul.f32.gmra.mxu2 %v5339_v6  ;;  %v831_v43 = vld [vmem:[#allocation5 + $0x1708] sm:$0xff]  ;;  %v1141_v6 = vld [vmem:[#allocation5 + $0x20b8] sm:$0xff] }
 0x26c   :  { %3204 = vmatpush.msrb.mxu3 %v1341_v32  ;;  %3176 = vmatpush.msrb.mxu2 %v1171_v41  ;;  %v5488_v28 = vpop.f32.mrf.mxu2  ;;  %v1311_v32 = vld [vmem:[#allocation5 + $0x2608] sm:$0xff] }
 0x26d   :  { %3118 = vmatpush.msrb.mxu0 %v851_v42  ;;  %3147 = vmatpush.msrb.mxu1 %v1011_v10  ;;  %v821_v42 = vld [vmem:[#allocation5 + $0x16b8] sm:$0xff] }
 0x26e   :  { %3104 = vmatmul.f32.gmra.mxu3 %v5344_v55  ;;  %3177 = vmatpush.msrb.mxu2 %v1161_v47  ;;  %v981_v10 = vld [vmem:[#allocation5 + $0x1bb8] sm:$0xff] }
 0x26f   :  { %3205 = vmatpush.msrb.mxu3 %v1331_v52  ;;  %v5491_v31 = vpop.f32.mrf.mxu3  ;;  %3119 = vmatpush.msrb.mxu0 %v841_v17  ;;  %v5493_v41 = vpop.f32.mrf.mxu0  ;;  %v1301_v47 = vld [vmem:[#allocation5 + $0x25b8] sm:$0xff]  ;;  %v1131_v52 = vld [vmem:[#allocation5 + $0x2068] sm:$0xff] }
 0x270   :  { %3148 = vmatpush.msrb.mxu1 %v1001_v38  ;;  %6493 = vst [vmem:[#allocation169_spill] sm:$0xff] %v5493_v41  ;;  %3178 = vmatpush.msrb.mxu2 %v1151_v40  ;;  %v5495_v55 = vpop.f32.mrf.mxu1  ;;  %v811_v17 = vld [vmem:[#allocation5 + $0x1668] sm:$0xff]  ;;  %v1121_v40 = vld [vmem:[#allocation5 + $0x2018] sm:$0xff] }
 0x271   :  { %3206 = vmatpush.msrb.mxu3 %v1321_v45  ;;  %3120 = vmatpush.msrb.mxu0 %v831_v43  ;;  %6494 = vst [vmem:[#allocation170_spill] sm:$0xff] %v5495_v55  ;;  %v971_v38 = vld [vmem:[#allocation5 + $0x1b68] sm:$0xff]  ;;  %v801_v43 = vld [vmem:[#allocation5 + $0x1618] sm:$0xff]  ;;  %v792_v55 = vld [vmem:[#allocation5 + $0x15d0] sm:$0xff] }
 0x272   :  { %3149 = vmatpush.msrb.mxu1 %v991_v49  ;;  %3179 = vmatpush.msrb.mxu2 %v1141_v6  ;;  %v1291_v45 = vld [vmem:[#allocation5 + $0x2568] sm:$0xff]  ;;  %v961_v49 = vld [vmem:[#allocation5 + $0x1b18] sm:$0xff] }
 0x273   :  { %3207 = vmatpush.msrb.mxu3 %v1311_v32  ;;  %3121 = vmatpush.msrb.mxu0 %v821_v42  ;;  %v1111_v32 = vld [vmem:[#allocation5 + $0x1fc8] sm:$0xff]  ;;  %v1281_v42 = vld [vmem:[#allocation5 + $0x2518] sm:$0xff] }
 0x274   :  { %3150 = vmatpush.msrb.mxu1 %v981_v10  ;;  %3020 = vmatmul.f32.gmra.mxu0 %v5353_v22  ;;  %v951_v22 = vld [vmem:[#allocation5 + $0x1ac8] sm:$0xff]  ;;  %v6573_v41 = vld [vmem:[#allocation39_spill] sm:$0xff] }
 0x275   :  { %3049 = vmatmul.f32.gmra.mxu1 %v5356_v25  ;;  %3078 = vmatmul.f32.gmra.mxu2 %v5359_v50  ;;  %v791_v25 = vld [vmem:[#allocation5 + $0x15c8] sm:$0xff]  ;;  %v1101_v50 = vld [vmem:[#allocation5 + $0x1f78] sm:$0xff] }
 0x276   :  { %3208 = vmatpush.msrb.mxu3 %v1301_v47  ;;  %3180 = vmatpush.msrb.mxu2 %v1131_v52  ;;  %v5500_v6 = vpop.f32.mrf.mxu2  ;;  %v1271_v47 = vld [vmem:[#allocation5 + $0x24c8] sm:$0xff] }
 0x277   :  { %3122 = vmatpush.msrb.mxu0 %v811_v17  ;;  %6495 = vst [vmem:[#allocation171_spill] sm:$0xff] %v5500_v6  ;;  %3151 = vmatpush.msrb.mxu1 %v971_v38  ;;  %v781_v17 = vld [vmem:[#allocation5 + $0x1578] sm:$0xff]  ;;  %v982_v6 = vld [vmem:[#allocation5 + $0x1bc0] sm:$0xff] }
 0x278   :  { %3107 = vmatmul.f32.gmra.mxu3 %v5364_v5  ;;  %3181 = vmatpush.msrb.mxu2 %v1121_v40  ;;  %v941_v38 = vld [vmem:[#allocation5 + $0x1a78] sm:$0xff] }
 0x279   :  { %3209 = vmatpush.msrb.mxu3 %v1291_v45  ;;  %v5503_v10 = vpop.f32.mrf.mxu3  ;;  %3123 = vmatpush.msrb.mxu0 %v801_v43  ;;  %v5505_v52 = vpop.f32.mrf.mxu0  ;;  %v1261_v40 = vld [vmem:[#allocation5 + $0x2478] sm:$0xff]  ;;  %v1091_v45 = vld [vmem:[#allocation5 + $0x1f28] sm:$0xff] }
 0x27a   :  { %6496 = vst [vmem:[#allocation172_spill] sm:$0xff] %v5503_v10  ;;  %3152 = vmatpush.msrb.mxu1 %v961_v49  ;;  %3182 = vmatpush.msrb.mxu2 %v1111_v32  ;;  %v5507_v5 = vpop.f32.mrf.mxu1  ;;  %v771_v43 = vld [vmem:[#allocation5 + $0x1528] sm:$0xff]  ;;  %v1081_v32 = vld [vmem:[#allocation5 + $0x1ed8] sm:$0xff]  ;;  %v832_v10 = vld [vmem:[#allocation5 + $0x1710] sm:$0xff] }
 0x27b   :  { %6497 = vst [vmem:[#allocation173_spill] sm:$0xff] %v5505_v52  ;;  %3210 = vmatpush.msrb.mxu3 %v1281_v42  ;;  %3124 = vmatpush.msrb.mxu0 %v791_v25  ;;  %v931_v49 = vld [vmem:[#allocation5 + $0x1a28] sm:$0xff]  ;;  %v761_v25 = vld [vmem:[#allocation5 + $0x14d8] sm:$0xff] }
 0x27c   :  { %3153 = vmatpush.msrb.mxu1 %v951_v22  ;;  %6498 = vst [vmem:[#allocation174_spill] sm:$0xff] %v5507_v5  ;;  %3183 = vmatpush.msrb.mxu2 %v1101_v50  ;;  %v1251_v42 = vld [vmem:[#allocation5 + $0x2428] sm:$0xff]  ;;  %v921_v22 = vld [vmem:[#allocation5 + $0x19d8] sm:$0xff] }
 0x27d   :  { %3211 = vmatpush.msrb.mxu3 %v1271_v47  ;;  %3125 = vmatpush.msrb.mxu0 %v781_v17  ;;  %v1071_v47 = vld [vmem:[#allocation5 + $0x1e88] sm:$0xff]  ;;  %v1241_v17 = vld [vmem:[#allocation5 + $0x23d8] sm:$0xff] }
 0x27e   :  { %3154 = vmatpush.msrb.mxu1 %v941_v38  ;;  %3023 = vmatmul.f32.gmra.mxu0 %v5373_v23  ;;  %v911_v23 = vld [vmem:[#allocation5 + $0x1988] sm:$0xff] }
 0x27f   :  { %3052 = vmatmul.f32.gmra.mxu1 %v5376_v13  ;;  %3081 = vmatmul.f32.gmra.mxu2 %v5379_v4  ;;  %v751_v13 = vld [vmem:[#allocation5 + $0x1488] sm:$0xff]  ;;  %v1061_v4 = vld [vmem:[#allocation5 + $0x1e38] sm:$0xff] }
 0x280   :  { %3212 = vmatpush.msrb.mxu3 %v1261_v40  ;;  %3184 = vmatpush.msrb.mxu2 %v1091_v45  ;;  %v5512_v50 = vpop.f32.mrf.mxu2  ;;  %v1231_v40 = vld [vmem:[#allocation5 + $0x2388] sm:$0xff] }
 0x281   :  { %3126 = vmatpush.msrb.mxu0 %v771_v43  ;;  %6499 = vst [vmem:[#allocation175_spill] sm:$0xff] %v5512_v50  ;;  %3155 = vmatpush.msrb.mxu1 %v931_v49  ;;  %v741_v43 = vld [vmem:[#allocation5 + $0x1438] sm:$0xff] }
 0x282   :  { %3110 = vmatmul.f32.gmra.mxu3 %v5384_v39  ;;  %3185 = vmatpush.msrb.mxu2 %v1081_v32  ;;  %v901_v49 = vld [vmem:[#allocation5 + $0x1938] sm:$0xff] }
 0x283   :  { %3213 = vmatpush.msrb.mxu3 %v1251_v42  ;;  %v5515_v38 = vpop.f32.mrf.mxu3  ;;  %3127 = vmatpush.msrb.mxu0 %v761_v25  ;;  %v5517_v45 = vpop.f32.mrf.mxu0  ;;  %v1221_v32 = vld [vmem:[#allocation5 + $0x2338] sm:$0xff]  ;;  %v572_v42 = vld [vmem:[#allocation5 + $0xef0] sm:$0xff] }
 0x284   :  { %6500 = vst [vmem:[#allocation176_spill] sm:$0xff] %v5515_v38  ;;  %3156 = vmatpush.msrb.mxu1 %v921_v22  ;;  %3186 = vmatpush.msrb.mxu2 %v1071_v47  ;;  %v5519_v39 = vpop.f32.mrf.mxu1  ;;  %v252_v25 = vld [vmem:[#allocation5 + $0x4f0] sm:$0xff]  ;;  %v562_v47 = vld [vmem:[#allocation5 + $0xea0] sm:$0xff] }
 0x285   :  { %6501 = vst [vmem:[#allocation177_spill] sm:$0xff] %v5517_v45  ;;  %3214 = vmatpush.msrb.mxu3 %v1241_v17  ;;  %3128 = vmatpush.msrb.mxu0 %v751_v13  ;;  %v412_v22 = vld [vmem:[#allocation5 + $0x9f0] sm:$0xff]  ;;  %v242_v13 = vld [vmem:[#allocation5 + $0x4a0] sm:$0xff] }
 0x286   :  { %3157 = vmatpush.msrb.mxu1 %v911_v23  ;;  %6502 = vst [vmem:[#allocation178_spill] sm:$0xff] %v5519_v39  ;;  %3187 = vmatpush.msrb.mxu2 %v1061_v4  ;;  %v732_v17 = vld [vmem:[#allocation5 + $0x13f0] sm:$0xff]  ;;  %v402_v23 = vld [vmem:[#allocation5 + $0x9a0] sm:$0xff] }
 0x287   :  { %3215 = vmatpush.msrb.mxu3 %v1231_v40  ;;  %3129 = vmatpush.msrb.mxu0 %v741_v43  ;;  %v552_v40 = vld [vmem:[#allocation5 + $0xe50] sm:$0xff]  ;;  %v722_v43 = vld [vmem:[#allocation5 + $0x13a0] sm:$0xff] }
 0x288   :  { %3158 = vmatpush.msrb.mxu1 %v901_v49  ;;  %3130 = vmatmul.f32.vlgmr.msrb.gmra.mxu0 %v5393_v62  ;;  %v392_v62 = vld [vmem:[#allocation5 + $0x950] sm:$0xff]  ;;  %v1362_v39 = vld [vmem:[#allocation5 + $0x27a0] sm:$0xff] }
 0x289   :  { %3159 = vmatmul.f32.vlgmr.msrb.gmra.mxu1 %v5396_v11  ;;  %3188 = vmatmul.f32.vlgmr.msrb.gmra.mxu2 %v5399_v59  ;;  %v232_v11 = vld [vmem:[#allocation5 + $0x450] sm:$0xff]  ;;  %v542_v59 = vld [vmem:[#allocation5 + $0xe00] sm:$0xff] }
 0x28a   :  { %3216 = vmatpush.msrb.mxu3 %v1221_v32  ;;  %3288 = vmatpush.msra.mxu2 %v572_v42  ;;  %v5524_v4 = vpop.f32.mrf.mxu2  ;;  %v712_v32 = vld [vmem:[#allocation5 + $0x1350] sm:$0xff] }
 0x28b   :  { %3230 = vmatpush.msra.mxu0 %v252_v25  ;;  %6503 = vst [vmem:[#allocation179_spill] sm:$0xff] %v5524_v4  ;;  %3259 = vmatpush.msra.mxu1 %v412_v22  ;;  %v222_v25 = vld [vmem:[#allocation5 + $0x400] sm:$0xff]  ;;  %v1192_v4 = vld [vmem:[#allocation5 + $0x2250] sm:$0xff] }
 0x28c   :  { %3217 = vmatmul.f32.vlgmr.msrb.gmra.mxu3 %v5404_v37  ;;  %3289 = vmatpush.msra.mxu2 %v562_v47  ;;  %v382_v22 = vld [vmem:[#allocation5 + $0x900] sm:$0xff]  ;;  %v872_v38 = vld [vmem:[#allocation5 + $0x1850] sm:$0xff] }
 0x28d   :  { %3317 = vmatpush.msra.mxu3 %v732_v17  ;;  %v5527_v49 = vpop.f32.mrf.mxu3  ;;  %3231 = vmatpush.msra.mxu0 %v242_v13  ;;  %v5529_v42 = vpop.f32.mrf.mxu0  ;;  %v702_v47 = vld [vmem:[#allocation5 + $0x1300] sm:$0xff]  ;;  %v532_v17 = vld [vmem:[#allocation5 + $0xdb0] sm:$0xff] }
 0x28e   :  { %6504 = vst [vmem:[#allocation180_spill] sm:$0xff] %v5527_v49  ;;  %3260 = vmatpush.msra.mxu1 %v402_v23  ;;  %3290 = vmatpush.msra.mxu2 %v552_v40  ;;  %v5531_v37 = vpop.f32.mrf.mxu1  ;;  %v212_v13 = vld [vmem:[#allocation5 + $0x3b0] sm:$0xff]  ;;  %v522_v40 = vld [vmem:[#allocation5 + $0xd60] sm:$0xff]  ;;  %v5572_v49 = vld [vmem:[#allocation2 + $0x8] sm:$0xff] }
 0x28f   :  { %3318 = vmatpush.msra.mxu3 %v722_v43  ;;  %3232 = vmatpush.msra.mxu0 %v232_v11  ;;  %v372_v23 = vld [vmem:[#allocation5 + $0x8b0] sm:$0xff]  ;;  %v202_v11 = vld [vmem:[#allocation5 + $0x360] sm:$0xff] }
 0x290   :  { %3261 = vmatpush.msra.mxu1 %v392_v62  ;;  %3291 = vmatpush.msra.mxu2 %v542_v59  ;;  %v692_v43 = vld [vmem:[#allocation5 + $0x12b0] sm:$0xff]  ;;  %v362_v62 = vld [vmem:[#allocation5 + $0x860] sm:$0xff] }
 0x291   :  { %3319 = vmatpush.msra.mxu3 %v712_v32  ;;  %3233 = vmatpush.msra.mxu0 %v222_v25  ;;  %v512_v32 = vld [vmem:[#allocation5 + $0xd10] sm:$0xff]  ;;  %v682_v25 = vld [vmem:[#allocation5 + $0x1260] sm:$0xff] }
 0x292   :  { %3262 = vmatpush.msra.mxu1 %v382_v22  ;;  %3133 = vmatmul.f32.gmra.mxu0 %v5413_v44  ;;  %v352_v44 = vld [vmem:[#allocation5 + $0x810] sm:$0xff] }
 0x293   :  { %3162 = vmatmul.f32.gmra.mxu1 %v5416_v2  ;;  %3191 = vmatmul.f32.gmra.mxu2 %v5419_v48  ;;  %v192_v2 = vld [vmem:[#allocation5 + $0x310] sm:$0xff]  ;;  %v502_v48 = vld [vmem:[#allocation5 + $0xcc0] sm:$0xff] }
 0x294   :  { %3320 = vmatpush.msra.mxu3 %v702_v47  ;;  %3292 = vmatpush.msra.mxu2 %v532_v17  ;;  %v5536_v59 = vpop.f32.mrf.mxu2  ;;  %v672_v47 = vld [vmem:[#allocation5 + $0x1210] sm:$0xff] }
 0x295   :  { %3234 = vmatpush.msra.mxu0 %v212_v13  ;;  %3263 = vmatpush.msra.mxu1 %v372_v23  ;;  %v182_v13 = vld [vmem:[#allocation5 + $0x2c0] sm:$0xff]  ;;  %v1032_v45 = vld [vmem:[#allocation5 + $0x1d50] sm:$0xff] }
 0x296   :  { %3220 = vmatmul.f32.gmra.mxu3 %v5424_v36  ;;  %3293 = vmatpush.msra.mxu2 %v522_v40  ;;  %v342_v23 = vld [vmem:[#allocation5 + $0x7c0] sm:$0xff] }
 0x297   :  { %3321 = vmatpush.msra.mxu3 %v692_v43  ;;  %v5539_v22 = vpop.f32.mrf.mxu3  ;;  %3235 = vmatpush.msra.mxu0 %v202_v11  ;;  %v5541_v17 = vpop.f32.mrf.mxu0  ;;  %v662_v40 = vld [vmem:[#allocation5 + $0x11c0] sm:$0xff]  ;;  %v492_v43 = vld [vmem:[#allocation5 + $0xc70] sm:$0xff] }
 0x298   :  { %3264 = vmatpush.msra.mxu1 %v362_v62  ;;  %3294 = vmatpush.msra.mxu2 %v512_v32  ;;  %v5543_v36 = vpop.f32.mrf.mxu1  ;;  %v172_v11 = vld [vmem:[#allocation5 + $0x270] sm:$0xff]  ;;  %v482_v32 = vld [vmem:[#allocation5 + $0xc20] sm:$0xff] }
 0x299   :  { %3322 = vmatpush.msra.mxu3 %v682_v25  ;;  %3236 = vmatpush.msra.mxu0 %v192_v2  ;;  %v332_v62 = vld [vmem:[#allocation5 + $0x770] sm:$0xff]  ;;  %v162_v2 = vld [vmem:[#allocation5 + $0x220] sm:$0xff] }
 0x29a   :  { %3265 = vmatpush.msra.mxu1 %v352_v44  ;;  %3295 = vmatpush.msra.mxu2 %v502_v48  ;;  %v652_v25 = vld [vmem:[#allocation5 + $0x1170] sm:$0xff]  ;;  %v322_v44 = vld [vmem:[#allocation5 + $0x720] sm:$0xff] }
 0x29b   :  { %3323 = vmatpush.msra.mxu3 %v672_v47  ;;  %3237 = vmatpush.msra.mxu0 %v182_v13  ;;  %v472_v47 = vld [vmem:[#allocation5 + $0xbd0] sm:$0xff]  ;;  %v642_v13 = vld [vmem:[#allocation5 + $0x1120] sm:$0xff] }
 0x29c   :  { %3266 = vmatpush.msra.mxu1 %v342_v23  ;;  %3136 = vmatmul.f32.gmra.mxu0 %v5433_v7  ;;  %v312_v7 = vld [vmem:[#allocation5 + $0x6d0] sm:$0xff] }
 0x29d   :  { %3165 = vmatmul.f32.gmra.mxu1 %v5436_v8  ;;  %3194 = vmatmul.f32.gmra.mxu2 %v5439_v60  ;;  %v152_v8 = vld [vmem:[#allocation5 + $0x1d0] sm:$0xff]  ;;  %v462_v60 = vld [vmem:[#allocation5 + $0xb80] sm:$0xff] }
 0x29e   :  { %3324 = vmatpush.msra.mxu3 %v662_v40  ;;  %3296 = vmatpush.msra.mxu2 %v492_v43  ;;  %v5548_v48 = vpop.f32.mrf.mxu2  ;;  %v632_v40 = vld [vmem:[#allocation5 + $0x10d0] sm:$0xff] }
 0x29f   :  { %3238 = vmatpush.msra.mxu0 %v172_v11  ;;  %3267 = vmatpush.msra.mxu1 %v332_v62  ;;  %v142_v11 = vld [vmem:[#allocation5 + $0x180] sm:$0xff] }
 0x2a0   :  { %3223 = vmatmul.f32.gmra.mxu3 %v5444_v12  ;;  %3297 = vmatpush.msra.mxu2 %v482_v32  ;;  %v302_v62 = vld [vmem:[#allocation5 + $0x680] sm:$0xff] }
 0x2a1   :  { %3325 = vmatpush.msra.mxu3 %v652_v25  ;;  %v5551_v23 = vpop.f32.mrf.mxu3  ;;  %3239 = vmatpush.msra.mxu0 %v162_v2  ;;  %v5553_v43 = vpop.f32.mrf.mxu0  ;;  %v622_v32 = vld [vmem:[#allocation5 + $0x1080] sm:$0xff]  ;;  %v452_v25 = vld [vmem:[#allocation5 + $0xb30] sm:$0xff] }
 0x2a2   :  { %6505 = vst [vmem:[#allocation181_spill] sm:$0xff] %v5551_v23  ;;  %3268 = vmatpush.msra.mxu1 %v322_v44  ;;  %3298 = vmatpush.msra.mxu2 %v472_v47  ;;  %v5555_v12 = vpop.f32.mrf.mxu1  ;;  %v132_v2 = vld [vmem:[#allocation5 + $0x130] sm:$0xff]  ;;  %v442_v47 = vld [vmem:[#allocation5 + $0xae0] sm:$0xff] }
 0x2a3   :  { %6506 = vst [vmem:[#allocation182_spill] sm:$0xff] %v5553_v43  ;;  %3326 = vmatpush.msra.mxu3 %v642_v13  ;;  %3240 = vmatpush.msra.mxu0 %v152_v8  ;;  %v292_v44 = vld [vmem:[#allocation5 + $0x630] sm:$0xff]  ;;  %v122_v8 = vld [vmem:[#allocation5 + $0xe0] sm:$0xff]  ;;  %v373_v43 = vld [vmem:[#allocation5 + $0x8b8] sm:$0xff] }
 0x2a4   :  { %3269 = vmatpush.msra.mxu1 %v312_v7  ;;  %6507 = vst [vmem:[#allocation183_spill] sm:$0xff] %v5555_v12  ;;  %3299 = vmatpush.msra.mxu2 %v462_v60  ;;  %v612_v13 = vld [vmem:[#allocation5 + $0x1030] sm:$0xff]  ;;  %v282_v7 = vld [vmem:[#allocation5 + $0x5e0] sm:$0xff] }
 0x2a5   :  { %3327 = vmatpush.msra.mxu3 %v632_v40  ;;  %3241 = vmatpush.msra.mxu0 %v142_v11  ;;  %v432_v40 = vld [vmem:[#allocation5 + $0xa90] sm:$0xff]  ;;  %v602_v11 = vld [vmem:[#allocation5 + $0xfe0] sm:$0xff] }
 0x2a6   :  { %3270 = vmatpush.msra.mxu1 %v302_v62  ;;  %3139 = vmatmul.f32.gmra.mxu0 %v5453_v33  ;;  %v272_v33 = vld [vmem:[#allocation5 + $0x590] sm:$0xff] }
 0x2a7   :  { %3168 = vmatmul.f32.gmra.mxu1 %v5456_v0  ;;  %3197 = vmatmul.f32.gmra.mxu2 %v5459_v26  ;;  %v112_v0 = vld [vmem:[#allocation5 + $0x90] sm:$0xff]  ;;  %v422_v26 = vld [vmem:[#allocation5 + $0xa40] sm:$0xff] }
 0x2a8   :  { %3328 = vmatpush.msra.mxu3 %v622_v32  ;;  %3300 = vmatpush.msra.mxu2 %v452_v25  ;;  %v5560_v60 = vpop.f32.mrf.mxu2  ;;  %v592_v32 = vld [vmem:[#allocation5 + $0xf90] sm:$0xff] }
 0x2a9   :  { %3242 = vmatpush.msra.mxu0 %v132_v2  ;;  %6508 = vst [vmem:[#allocation184_spill] sm:$0xff] %v5560_v60  ;;  %3271 = vmatpush.msra.mxu1 %v292_v44  ;;  %v102_v2 = vld [vmem:[#allocation5 + $0x40] sm:$0xff]  ;;  %v4483_v23 = vld [vmem:[#allocation2 + $0xb0] sm:$0xff] }
 0x2aa   :  { %3226 = vmatmul.f32.gmra.mxu3 %v5464_v24  ;;  %3301 = vmatpush.msra.mxu2 %v442_v47  ;;  %v262_v44 = vld [vmem:[#allocation5 + $0x540] sm:$0xff] }
 0x2ab   :  { %3329 = vmatpush.msra.mxu3 %v612_v13  ;;  %v5563_v62 = vpop.f32.mrf.mxu3  ;;  %3243 = vmatpush.msra.mxu0 %v122_v8  ;;  %v5565_v25 = vpop.f32.mrf.mxu0  ;;  %v582_v47 = vld [vmem:[#allocation5 + $0xf40] sm:$0xff]  ;;  %v1212_v13 = vld [vmem:[#allocation5 + $0x22f0] sm:$0xff] }
 0x2ac   :  { %6509 = vst [vmem:[#allocation185_spill] sm:$0xff] %v5563_v62  ;;  %3272 = vmatpush.msra.mxu1 %v282_v7  ;;  %3302 = vmatpush.msra.mxu2 %v432_v40  ;;  %v5567_v24 = vpop.f32.mrf.mxu1  ;;  %v892_v8 = vld [vmem:[#allocation5 + $0x18f0] sm:$0xff]  ;;  %v5569_v7 = vld [vmem:[#allocation2] sm:$0xff] }
 0x2ad   :  { %6510 = vst [vmem:[#allocation186_spill] sm:$0xff] %v5565_v25  ;;  %3330 = vmatpush.msra.mxu3 %v602_v11  ;;  %3244 = vmatpush.msra.mxu0 %v112_v0  ;;  %v1052_v40 = vld [vmem:[#allocation5 + $0x1df0] sm:$0xff]  ;;  %v1202_v0 = vld [vmem:[#allocation5 + $0x22a0] sm:$0xff] }
 0x2ae   :  { %3273 = vmatpush.msra.mxu1 %v272_v33  ;;  %6511 = vst [vmem:[#allocation187_spill] sm:$0xff] %v5567_v24  ;;  %3303 = vmatpush.msra.mxu2 %v422_v26  ;;  %v5575_v11 = vld [vmem:[#allocation2 + $0x10] sm:$0xff]  ;;  %v882_v26 = vld [vmem:[#allocation5 + $0x18a0] sm:$0xff] }
 0x2af   :  { %3331 = vmatpush.msra.mxu3 %v592_v32  ;;  %3245 = vmatpush.msra.mxu0 %v102_v2  ;;  %v1372_v33 = vld [vmem:[#allocation5 + $0x27f0] sm:$0xff]  ;;  %v1042_v32 = vld [vmem:[#allocation5 + $0x1da0] sm:$0xff] }
 0x2b0   :  { %3274 = vmatpush.msra.mxu1 %v262_v44  ;;  %3246 = vmatmul.f32.vlgmr.msra.gmra.mxu0 %v5569_v7  ;;  %v5580_v44 = vld [vmem:[#allocation2 + $0x18] sm:$0xff]  ;;  %v1152_v24 = vld [vmem:[#allocation5 + $0x2110] sm:$0xff]  ;;  %v1322_v25 = vld [vmem:[#allocation5 + $0x2660] sm:$0xff] }
 0x2b1   :  { %3275 = vmatmul.f32.vlgmr.msra.gmra.mxu1 %v5572_v49  ;;  %3304 = vmatmul.f32.vlgmr.msra.gmra.mxu2 %v5575_v11  ;;  %v992_v62 = vld [vmem:[#allocation5 + $0x1c10] sm:$0xff]  ;;  %v1282_v60 = vld [vmem:[#allocation5 + $0x2520] sm:$0xff] }
 0x2b2   :  { %3332 = vmatpush.msra.mxu3 %v582_v47  ;;  %3404 = vmatpush.msrb.mxu2 %v1212_v13  ;;  %v5578_v2 = vpop.f32.mrf.mxu2  ;;  %v1182_v13 = vld [vmem:[#allocation5 + $0x2200] sm:$0xff] }
 0x2b3   :  { %3346 = vmatpush.msrb.mxu0 %v892_v8  ;;  %6512 = vst [vmem:[#allocation188_spill] sm:$0xff] %v5578_v2  ;;  %3375 = vmatpush.msrb.mxu1 %v1052_v40  ;;  %v1352_v8 = vld [vmem:[#allocation5 + $0x2750] sm:$0xff]  ;;  %v862_v40 = vld [vmem:[#allocation5 + $0x1800] sm:$0xff] }
 0x2b4   :  { %3333 = vmatmul.f32.vlgmr.msra.gmra.mxu3 %v5580_v44  ;;  %3405 = vmatpush.msrb.mxu2 %v1202_v0  ;;  %v1022_v2 = vld [vmem:[#allocation5 + $0x1d00] sm:$0xff] }
 0x2b5   :  { %3433 = vmatpush.msrb.mxu3 %v1372_v33  ;;  %v5583_v47 = vpop.f32.mrf.mxu3  ;;  %3347 = vmatpush.msrb.mxu0 %v882_v26  ;;  %v5585_v50 = vpop.f32.mrf.mxu0  ;;  %v1342_v0 = vld [vmem:[#allocation5 + $0x2700] sm:$0xff]  ;;  %v1172_v33 = vld [vmem:[#allocation5 + $0x21b0] sm:$0xff] }
 0x2b6   :  { %6513 = vst [vmem:[#allocation189_spill] sm:$0xff] %v5583_v47  ;;  %3376 = vmatpush.msrb.mxu1 %v1042_v32  ;;  %3406 = vmatpush.msrb.mxu2 %v1192_v4  ;;  %v5587_v5 = vpop.f32.mrf.mxu1  ;;  %v852_v26 = vld [vmem:[#allocation5 + $0x17b0] sm:$0xff]  ;;  %v5589_v32 = vld [vmem:[#allocation2 + $0x40] sm:$0xff]  ;;  %v5592_v47 = vld [vmem:[#allocation2 + $0x48] sm:$0xff] }
 0x2b7   :  { %3434 = vmatpush.msrb.mxu3 %v1362_v39  ;;  %3348 = vmatpush.msrb.mxu0 %v872_v38  ;;  %v1012_v39 = vld [vmem:[#allocation5 + $0x1cb0] sm:$0xff] }
 0x2b8   :  { %3377 = vmatpush.msrb.mxu1 %v1032_v45  ;;  %3407 = vmatpush.msrb.mxu2 %v1182_v13  ;;  %v5595_v38 = vld [vmem:[#allocation2 + $0x50] sm:$0xff]  ;;  %v1162_v45 = vld [vmem:[#allocation5 + $0x2160] sm:$0xff] }
 0x2b9   :  { %3435 = vmatpush.msrb.mxu3 %v1352_v8  ;;  %3349 = vmatpush.msrb.mxu0 %v862_v40  ;;  %v1332_v4 = vld [vmem:[#allocation5 + $0x26b0] sm:$0xff]  ;;  %v1002_v13 = vld [vmem:[#allocation5 + $0x1c60] sm:$0xff]  ;;  %v5600_v40 = vld [vmem:[#allocation2 + $0x58] sm:$0xff] }
 0x2ba   :  { %3378 = vmatpush.msrb.mxu1 %v1022_v2  ;;  %3249 = vmatmul.f32.gmra.mxu0 %v5589_v32  ;;  %v842_v2 = vld [vmem:[#allocation5 + $0x1760] sm:$0xff] }
 0x2bb   :  { %3278 = vmatmul.f32.gmra.mxu1 %v5592_v47  ;;  %3307 = vmatmul.f32.gmra.mxu2 %v5595_v38 }
 0x2bc   :  { %3436 = vmatpush.msrb.mxu3 %v1342_v0  ;;  %3408 = vmatpush.msrb.mxu2 %v1172_v33  ;;  %v5598_v8 = vpop.f32.mrf.mxu2  ;;  %v1142_v33 = vld [vmem:[#allocation5 + $0x20c0] sm:$0xff] }
 0x2bd   :  { %3350 = vmatpush.msrb.mxu0 %v852_v26  ;;  %3379 = vmatpush.msrb.mxu1 %v1012_v39  ;;  %v1312_v26 = vld [vmem:[#allocation5 + $0x2610] sm:$0xff]  ;;  %v822_v39 = vld [vmem:[#allocation5 + $0x16c0] sm:$0xff] }
 0x2be   :  { %3336 = vmatmul.f32.gmra.mxu3 %v5600_v40  ;;  %3409 = vmatpush.msrb.mxu2 %v1162_v45  ;;  %v1302_v45 = vld [vmem:[#allocation5 + $0x25c0] sm:$0xff] }
 0x2bf   :  { %3437 = vmatpush.msrb.mxu3 %v1332_v4  ;;  %v5603_v0 = vpop.f32.mrf.mxu3  ;;  %3351 = vmatpush.msrb.mxu0 %v842_v2  ;;  %v5605_v52 = vpop.f32.mrf.mxu0  ;;  %v1132_v4 = vld [vmem:[#allocation5 + $0x2070] sm:$0xff] }
 0x2c0   :  { %6514 = vst [vmem:[#allocation190_spill] sm:$0xff] %v5603_v0  ;;  %3380 = vmatpush.msrb.mxu1 %v1002_v13  ;;  %3410 = vmatpush.msrb.mxu2 %v1152_v24  ;;  %v5607_v35 = vpop.f32.mrf.mxu1  ;;  %v812_v2 = vld [vmem:[#allocation5 + $0x1670] sm:$0xff]  ;;  %v5609_v13 = vld [vmem:[#allocation2 + $0x80] sm:$0xff] }
 0x2c1   :  { %6515 = vst [vmem:[#allocation191_spill] sm:$0xff] %v5605_v52  ;;  %3438 = vmatpush.msrb.mxu3 %v1322_v25  ;;  %3352 = vmatpush.msrb.mxu0 %v832_v10  ;;  %v972_v25 = vld [vmem:[#allocation5 + $0x1b70] sm:$0xff] }
 0x2c2   :  { %3381 = vmatpush.msrb.mxu1 %v992_v62  ;;  %6516 = vst [vmem:[#allocation192_spill] sm:$0xff] %v5607_v35  ;;  %3411 = vmatpush.msrb.mxu2 %v1142_v33  ;;  %v5615_v10 = vld [vmem:[#allocation2 + $0x90] sm:$0xff]  ;;  %v1122_v62 = vld [vmem:[#allocation5 + $0x2020] sm:$0xff] }
 0x2c3   :  { %3439 = vmatpush.msrb.mxu3 %v1312_v26  ;;  %3353 = vmatpush.msrb.mxu0 %v822_v39  ;;  %v1292_v24 = vld [vmem:[#allocation5 + $0x2570] sm:$0xff]  ;;  %v962_v33 = vld [vmem:[#allocation5 + $0x1b20] sm:$0xff]  ;;  %v5620_v39 = vld [vmem:[#allocation2 + $0x98] sm:$0xff] }
 0x2c4   :  { %3382 = vmatpush.msrb.mxu1 %v982_v6  ;;  %3252 = vmatmul.f32.gmra.mxu0 %v5609_v13  ;;  %v802_v6 = vld [vmem:[#allocation5 + $0x1620] sm:$0xff]  ;;  %6518 = vst [vmem:[#allocation194_spill] sm:$0xff] %v5620_v39  ;;  %v1112_v35 = vld [vmem:[#allocation5 + $0x1fd0] sm:$0xff] }
 0x2c5   :  { %3281 = vmatmul.f32.gmra.mxu1 %v5612_v3  ;;  %3310 = vmatmul.f32.gmra.mxu2 %v5615_v10  ;;  %v952_v0 = vld [vmem:[#allocation5 + $0x1ad0] sm:$0xff] }
 0x2c6   :  { %3440 = vmatpush.msrb.mxu3 %v1302_v45  ;;  %3412 = vmatpush.msrb.mxu2 %v1132_v4  ;;  %v5618_v26 = vpop.f32.mrf.mxu2  ;;  %v1102_v4 = vld [vmem:[#allocation5 + $0x1f80] sm:$0xff] }
 0x2c7   :  { %3354 = vmatpush.msrb.mxu0 %v812_v2  ;;  %6517 = vst [vmem:[#allocation193_spill] sm:$0xff] %v5618_v26  ;;  %3383 = vmatpush.msrb.mxu1 %v972_v25  ;;  %v1272_v2 = vld [vmem:[#allocation5 + $0x24d0] sm:$0xff]  ;;  %v782_v25 = vld [vmem:[#allocation5 + $0x1580] sm:$0xff] }
 0x2c8   :  { %3339 = vmatmul.f32.gmra.mxu3 %v5620_v39  ;;  %3413 = vmatpush.msrb.mxu2 %v1122_v62  ;;  %v942_v26 = vld [vmem:[#allocation5 + $0x1a80] sm:$0xff]  ;;  %v683_v39 = vld [vmem:[#allocation5 + $0x1268] sm:$0xff] }
 0x2c9   :  { %3441 = vmatpush.msrb.mxu3 %v1292_v24  ;;  %v5623_v45 = vpop.f32.mrf.mxu3  ;;  %3355 = vmatpush.msrb.mxu0 %v802_v6  ;;  %v5625_v52 = vpop.f32.mrf.mxu0  ;;  %v1262_v62 = vld [vmem:[#allocation5 + $0x2480] sm:$0xff]  ;;  %v1092_v24 = vld [vmem:[#allocation5 + $0x1f30] sm:$0xff] }
 0x2ca   :  { %6519 = vst [vmem:[#allocation195_spill] sm:$0xff] %v5623_v45  ;;  %3384 = vmatpush.msrb.mxu1 %v962_v33  ;;  %3414 = vmatpush.msrb.mxu2 %v1112_v35  ;;  %v5627_v12 = vpop.f32.mrf.mxu1  ;;  %v772_v6 = vld [vmem:[#allocation5 + $0x1530] sm:$0xff]  ;;  %v5629_v33 = vld [vmem:[#allocation2 + $0xc0] sm:$0xff]  ;;  %v5632_v45 = vld [vmem:[#allocation2 + $0xc8] sm:$0xff] }
 0x2cb   :  { %6520 = vst [vmem:[#allocation196_spill] sm:$0xff] %v5625_v52  ;;  %3442 = vmatpush.msrb.mxu3 %v1282_v60  ;;  %3356 = vmatpush.msrb.mxu0 %v792_v55  ;;  %v932_v35 = vld [vmem:[#allocation5 + $0x1a30] sm:$0xff]  ;;  %v1082_v60 = vld [vmem:[#allocation5 + $0x1ee0] sm:$0xff] }
 0x2cc   :  { %3385 = vmatpush.msrb.mxu1 %v952_v0  ;;  %6521 = vst [vmem:[#allocation197_spill] sm:$0xff] %v5627_v12  ;;  %3415 = vmatpush.msrb.mxu2 %v1102_v4  ;;  %v5635_v55 = vld [vmem:[#allocation2 + $0xd0] sm:$0xff]  ;;  %v922_v4 = vld [vmem:[#allocation5 + $0x19e0] sm:$0xff] }
 0x2cd   :  { %3443 = vmatpush.msrb.mxu3 %v1272_v2  ;;  %3357 = vmatpush.msrb.mxu0 %v782_v25  ;;  %6522 = vst [vmem:[#allocation198_spill] sm:$0xff] %v5629_v33  ;;  %v1252_v0 = vld [vmem:[#allocation5 + $0x2430] sm:$0xff]  ;;  %v5640_v25 = vld [vmem:[#allocation2 + $0xd8] sm:$0xff]  ;;  %v1242_v52 = vld [vmem:[#allocation5 + $0x23e0] sm:$0xff] }
 0x2ce   :  { %3386 = vmatpush.msrb.mxu1 %v942_v26  ;;  %3255 = vmatmul.f32.gmra.mxu0 %v5629_v33  ;;  %6523 = vst [vmem:[#allocation199_spill] sm:$0xff] %v5632_v45  ;;  %v762_v26 = vld [vmem:[#allocation5 + $0x14e0] sm:$0xff]  ;;  %v1072_v12 = vld [vmem:[#allocation5 + $0x1e90] sm:$0xff] }
 0x2cf   :  { %3284 = vmatmul.f32.gmra.mxu1 %v5632_v45  ;;  %6524 = vst [vmem:[#allocation200_spill] sm:$0xff] %v5635_v55  ;;  %3313 = vmatmul.f32.gmra.mxu2 %v5635_v55  ;;  %v752_v45 = vld [vmem:[#allocation5 + $0x1490] sm:$0xff] }
 0x2d0   :  { %3444 = vmatpush.msrb.mxu3 %v1262_v62  ;;  %3416 = vmatpush.msrb.mxu2 %v1092_v24  ;;  %v5638_v2 = vpop.f32.mrf.mxu2  ;;  %6526 = vst [vmem:[#allocation202_spill] sm:$0xff] %v5640_v25  ;;  %v912_v55 = vld [vmem:[#allocation5 + $0x1990] sm:$0xff]  ;;  %v1062_v24 = vld [vmem:[#allocation5 + $0x1e40] sm:$0xff] }
 0x2d1   :  { %3358 = vmatpush.msrb.mxu0 %v772_v6  ;;  %6525 = vst [vmem:[#allocation201_spill] sm:$0xff] %v5638_v2  ;;  %3387 = vmatpush.msrb.mxu1 %v932_v35  ;;  %v1232_v6 = vld [vmem:[#allocation5 + $0x2390] sm:$0xff]  ;;  %v742_v35 = vld [vmem:[#allocation5 + $0x1440] sm:$0xff] }
 0x2d2   :  { %3342 = vmatmul.f32.gmra.mxu3 %v5640_v25  ;;  %3417 = vmatpush.msrb.mxu2 %v1082_v60  ;;  %v902_v2 = vld [vmem:[#allocation5 + $0x1940] sm:$0xff] }
 0x2d3   :  { %3445 = vmatpush.msrb.mxu3 %v1252_v0  ;;  %v5643_v62 = vpop.f32.mrf.mxu3  ;;  %3359 = vmatpush.msrb.mxu0 %v762_v26  ;;  %v5645_v33 = vpop.f32.mrf.mxu0  ;;  %v1222_v60 = vld [vmem:[#allocation5 + $0x2340] sm:$0xff]  ;;  %v573_v0 = vld [vmem:[#allocation5 + $0xef8] sm:$0xff] }
 0x2d4   :  { %6527 = vst [vmem:[#allocation203_spill] sm:$0xff] %v5643_v62  ;;  %3388 = vmatpush.msrb.mxu1 %v922_v4  ;;  %3418 = vmatpush.msrb.mxu2 %v1072_v12  ;;  %v5647_v25 = vpop.f32.mrf.mxu1  ;;  %v253_v26 = vld [vmem:[#allocation5 + $0x4f8] sm:$0xff]  ;;  %v5649_v4 = vld [vmem:[#allocation2 + $0x20] sm:$0xff]  ;;  %v5652_v62 = vld [vmem:[#allocation2 + $0x28] sm:$0xff] }
 0x2d5   :  { %6528 = vst [vmem:[#allocation204_spill] sm:$0xff] %v5645_v33  ;;  %3446 = vmatpush.msrb.mxu3 %v1242_v52  ;;  %3360 = vmatpush.msrb.mxu0 %v752_v45  ;;  %v413_v52 = vld [vmem:[#allocation5 + $0x9f8] sm:$0xff]  ;;  %v5655_v12 = vld [vmem:[#allocation2 + $0x30] sm:$0xff]  ;;  %v563_v45 = vld [vmem:[#allocation5 + $0xea8] sm:$0xff] }
 0x2d6   :  { %3389 = vmatpush.msrb.mxu1 %v912_v55  ;;  %6529 = vst [vmem:[#allocation205_spill] sm:$0xff] %v5647_v25  ;;  %3419 = vmatpush.msrb.mxu2 %v1062_v24  ;;  %v733_v55 = vld [vmem:[#allocation5 + $0x13f8] sm:$0xff]  ;;  %v403_v24 = vld [vmem:[#allocation5 + $0x9a8] sm:$0xff] }
 0x2d7   :  { %3447 = vmatpush.msrb.mxu3 %v1232_v6  ;;  %3361 = vmatpush.msrb.mxu0 %v742_v35  ;;  %6530 = vst [vmem:[#allocation206_spill] sm:$0xff] %v5649_v4  ;;  %v5660_v35 = vld [vmem:[#allocation2 + $0x38] sm:$0xff] }
 0x2d8   :  { %3390 = vmatpush.msrb.mxu1 %v902_v2  ;;  %3362 = vmatmul.f32.vlgmr.msrb.gmra.mxu0 %v5649_v4  ;;  %6531 = vst [vmem:[#allocation207_spill] sm:$0xff] %v5652_v62  ;;  %v243_v2 = vld [vmem:[#allocation5 + $0x4a8] sm:$0xff]  ;;  %v553_v25 = vld [vmem:[#allocation5 + $0xe58] sm:$0xff] }
 0x2d9   :  { %3391 = vmatmul.f32.vlgmr.msrb.gmra.mxu1 %v5652_v62  ;;  %6532 = vst [vmem:[#allocation208_spill] sm:$0xff] %v5655_v12  ;;  %3420 = vmatmul.f32.vlgmr.msrb.gmra.mxu2 %v5655_v12  ;;  %v723_v62 = vld [vmem:[#allocation5 + $0x13a8] sm:$0xff]  ;;  %v233_v4 = vld [vmem:[#allocation5 + $0x458] sm:$0xff] }
 0x2da   :  { %3448 = vmatpush.msrb.mxu3 %v1222_v60  ;;  %3520 = vmatpush.msra.mxu2 %v573_v0  ;;  %v5658_v6 = vpop.f32.mrf.mxu2  ;;  %6534 = vst [vmem:[#allocation210_spill] sm:$0xff] %v5660_v35  ;;  %v393_v12 = vld [vmem:[#allocation5 + $0x958] sm:$0xff]  ;;  %v543_v0 = vld [vmem:[#allocation5 + $0xe08] sm:$0xff] }
 0x2db   :  { %3462 = vmatpush.msra.mxu0 %v253_v26  ;;  %6533 = vst [vmem:[#allocation209_spill] sm:$0xff] %v5658_v6  ;;  %3491 = vmatpush.msra.mxu1 %v413_v52  ;;  %v713_v26 = vld [vmem:[#allocation5 + $0x1358] sm:$0xff]  ;;  %v223_v52 = vld [vmem:[#allocation5 + $0x408] sm:$0xff] }
 0x2dc   :  { %3449 = vmatmul.f32.vlgmr.msrb.gmra.mxu3 %v5660_v35  ;;  %3521 = vmatpush.msra.mxu2 %v563_v45  ;;  %v383_v6 = vld [vmem:[#allocation5 + $0x908] sm:$0xff] }
 0x2dd   :  { %3549 = vmatpush.msra.mxu3 %v733_v55  ;;  %v5663_v60 = vpop.f32.mrf.mxu3  ;;  %3463 = vmatpush.msra.mxu0 %v243_v2  ;;  %v5665_v33 = vpop.f32.mrf.mxu0  ;;  %v703_v45 = vld [vmem:[#allocation5 + $0x1308] sm:$0xff]  ;;  %v533_v55 = vld [vmem:[#allocation5 + $0xdb8] sm:$0xff] }
 0x2de   :  { %6535 = vst [vmem:[#allocation211_spill] sm:$0xff] %v5663_v60  ;;  %3492 = vmatpush.msra.mxu1 %v403_v24  ;;  %3522 = vmatpush.msra.mxu2 %v553_v25  ;;  %v5667_v35 = vpop.f32.mrf.mxu1  ;;  %v213_v2 = vld [vmem:[#allocation5 + $0x3b8] sm:$0xff]  ;;  %v4477_v24 = vld [vmem:[#allocation2 + $0x60] sm:$0xff]  ;;  %v4478_v60 = vld [vmem:[#allocation2 + $0x68] sm:$0xff] }
 0x2df   :  { %3550 = vmatpush.msra.mxu3 %v723_v62  ;;  %3464 = vmatpush.msra.mxu0 %v233_v4  ;;  %v4479_v25 = vld [vmem:[#allocation2 + $0x70] sm:$0xff]  ;;  %v523_v62 = vld [vmem:[#allocation5 + $0xd68] sm:$0xff]  ;;  %v693_v4 = vld [vmem:[#allocation5 + $0x12b8] sm:$0xff] }
 0x2e0   :  { %3493 = vmatpush.msra.mxu1 %v393_v12  ;;  %3523 = vmatpush.msra.mxu2 %v543_v0  ;;  %v203_v12 = vld [vmem:[#allocation5 + $0x368] sm:$0xff] }
 0x2e1   :  { %3551 = vmatpush.msra.mxu3 %v713_v26  ;;  %3465 = vmatpush.msra.mxu0 %v223_v52  ;;  %v363_v0 = vld [vmem:[#allocation5 + $0x868] sm:$0xff]  ;;  %v513_v52 = vld [vmem:[#allocation5 + $0xd18] sm:$0xff] }
 0x2e2   :  { %3494 = vmatpush.msra.mxu1 %v383_v6  ;;  %3365 = vmatmul.f32.gmra.mxu0 %v4477_v24  ;;  %v4480_v6 = vld [vmem:[#allocation2 + $0x78] sm:$0xff] }
 0x2e3   :  { %3394 = vmatmul.f32.gmra.mxu1 %v4478_v60  ;;  %3423 = vmatmul.f32.gmra.mxu2 %v4479_v25  ;;  %v193_v60 = vld [vmem:[#allocation5 + $0x318] sm:$0xff]  ;;  %v183_v25 = vld [vmem:[#allocation5 + $0x2c8] sm:$0xff] }
 0x2e4   :  { %3552 = vmatpush.msra.mxu3 %v703_v45  ;;  %3524 = vmatpush.msra.mxu2 %v533_v55  ;;  %v5669_v26 = vpop.f32.mrf.mxu2  ;;  %v353_v24 = vld [vmem:[#allocation5 + $0x818] sm:$0xff]  ;;  %v503_v45 = vld [vmem:[#allocation5 + $0xcc8] sm:$0xff] }
 0x2e5   :  { %3466 = vmatpush.msra.mxu0 %v213_v2  ;;  %3495 = vmatpush.msra.mxu1 %v373_v43  ;;  %v673_v55 = vld [vmem:[#allocation5 + $0x1218] sm:$0xff]  ;;  %v343_v43 = vld [vmem:[#allocation5 + $0x7c8] sm:$0xff] }
 0x2e6   :  { %3452 = vmatmul.f32.gmra.mxu3 %v4480_v6  ;;  %3525 = vmatpush.msra.mxu2 %v523_v62  ;;  %v663_v62 = vld [vmem:[#allocation5 + $0x11c8] sm:$0xff] }
 0x2e7   :  { %3553 = vmatpush.msra.mxu3 %v693_v4  ;;  %v5671_v29 = vpop.f32.mrf.mxu3  ;;  %3467 = vmatpush.msra.mxu0 %v203_v12  ;;  %v5673_v2 = vpop.f32.mrf.mxu0  ;;  %v1421_v4 = vadd.f32 %v4763_v58, %v4761_v57  ;;  %v493_v12 = vld [vmem:[#allocation5 + $0xc78] sm:$0xff]  ;;  %v483_v57 = vld [vmem:[#allocation5 + $0xc28] sm:$0xff] }
 0x2e8   :  { %3496 = vmatpush.msra.mxu1 %v363_v0  ;;  %3526 = vmatpush.msra.mxu2 %v513_v52  ;;  %v5675_v6 = vpop.f32.mrf.mxu1  ;;  %v173_v0 = vld [vmem:[#allocation5 + $0x278] sm:$0xff]  ;;  %v1424_v52 = vadd.f32 %v4775_v54, %v4773_v16  ;;  %v163_v16 = vld [vmem:[#allocation5 + $0x228] sm:$0xff] }
 0x2e9   :  { %3554 = vmatpush.msra.mxu3 %v683_v39  ;;  %3468 = vmatpush.msra.mxu0 %v193_v60  ;;  %v1427_v39 = vadd.f32 %v4787_v18, %v4785_v34  ;;  %v4481_v60 = vld [vmem:[#allocation2 + $0xa0] sm:$0xff]  ;;  %v653_v58 = vld [vmem:[#allocation5 + $0x1178] sm:$0xff]  ;;  %v323_v54 = vld [vmem:[#allocation5 + $0x728] sm:$0xff] }
 0x2ea   :  { %3497 = vmatpush.msra.mxu1 %v353_v24  ;;  %3527 = vmatpush.msra.mxu2 %v503_v45  ;;  %v4482_v24 = vld [vmem:[#allocation2 + $0xa8] sm:$0xff]  ;;  %v333_v45 = vld [vmem:[#allocation5 + $0x778] sm:$0xff] }
 0x2eb   :  { %3555 = vmatpush.msra.mxu3 %v673_v55  ;;  %3469 = vmatpush.msra.mxu0 %v183_v25  ;;  %v1450_v55 = vadd.f32 %v4768_v9, %v1421_v4  ;;  %v1453_v25 = vadd.f32 %v4780_v63, %v1424_v52  ;;  %v4484_v18 = vld [vmem:[#allocation2 + $0xb8] sm:$0xff]  ;;  %v643_v9 = vld [vmem:[#allocation5 + $0x1128] sm:$0xff] }
 0x2ec   :  { %3498 = vmatpush.msra.mxu1 %v343_v43  ;;  %3368 = vmatmul.f32.gmra.mxu0 %v4481_v60  ;;  %v1456_v43 = vadd.f32 %v4792_v51, %v1427_v39  ;;  %v473_v60 = vld [vmem:[#allocation5 + $0xbd8] sm:$0xff]  ;;  %v1430_v51 = vadd.f32 %v4799_v53, %v4797_v19  ;;  %v6538_v19 = vld [vmem:[#allocation28_spill] sm:$0xff] }
 0x2ed   :  { %3397 = vmatmul.f32.gmra.mxu1 %v4482_v24  ;;  %3426 = vmatmul.f32.gmra.mxu2 %v4483_v23  ;;  %v153_v23 = vld [vmem:[#allocation5 + $0x1d8] sm:$0xff]  ;;  %v1479_v63 = vadd.f32 %v4771_v15, %v1450_v55  ;;  %v1482_v39 = vadd.f32 %v4783_v1, %v1453_v25  ;;  %v1653_v53 = vadd.f32 %v6538_v19, %v4897_v61  ;;  %v6541_v1 = vld [vmem:[#allocation20_spill] sm:$0xff] }
 0x2ee   :  { %3556 = vmatpush.msra.mxu3 %v663_v62  ;;  %3528 = vmatpush.msra.mxu2 %v493_v12  ;;  %v5686_v34 = vpop.f32.mrf.mxu2  ;;  %v313_v62 = vld [vmem:[#allocation5 + $0x6d8] sm:$0xff]  ;;  %v463_v12 = vld [vmem:[#allocation5 + $0xb88] sm:$0xff]  ;;  %v1485_v24 = vadd.f32 %v4795_v56, %v1456_v43  ;;  %v6543_v43 = vld [vmem:[#allocation32_spill] sm:$0xff] }
 0x2ef   :  { %3470 = vmatpush.msra.mxu0 %v173_v0  ;;  %3499 = vmatpush.msra.mxu1 %v333_v45  ;;  %v633_v0 = vld [vmem:[#allocation5 + $0x10d8] sm:$0xff]  ;;  %v143_v45 = vld [vmem:[#allocation5 + $0x188] sm:$0xff]  ;;  %v1508_v15 = vadd.f32 %v4817_v27, %v1479_v63  ;;  %v6546_v63 = vld [vmem:[#allocation36_spill] sm:$0xff] }
 0x2f0   :  { %3455 = vmatmul.f32.gmra.mxu3 %v4484_v18  ;;  %3529 = vmatpush.msra.mxu2 %v483_v57  ;;  %v303_v57 = vld [vmem:[#allocation5 + $0x688] sm:$0xff]  ;;  %v1514_v25 = vadd.f32 %v6541_v1, %v1485_v24  ;;  %v6542_v56 = vld [vmem:[#allocation31_spill] sm:$0xff]  ;;  %v6548_v1 = vld [vmem:[#allocation12_spill] sm:$0xff] }
 0x2f1   :  { %3557 = vmatpush.msra.mxu3 %v653_v58  ;;  %v5688_v4 = vpop.f32.mrf.mxu3  ;;  %3471 = vmatpush.msra.mxu0 %v163_v16  ;;  %v5693_v52 = vpop.f32.mrf.mxu0  ;;  %v1459_v58 = vadd.f32 %v4810_v14, %v1430_v51  ;;  %v6540_v16 = vld [vmem:[#allocation16_spill] sm:$0xff]  ;;  %v1656_v18 = vadd.f32 %v6543_v43, %v6542_v56  ;;  %v6544_v14 = vld [vmem:[#allocation29_spill] sm:$0xff]  ;;  %v6545_v27 = vld [vmem:[#allocation35_spill] sm:$0xff] }
 0x2f2   :  { %6536 = vst [vmem:[#allocation212_spill] sm:$0xff] %v5688_v4  ;;  %3500 = vmatpush.msra.mxu1 %v323_v54  ;;  %3530 = vmatpush.msra.mxu2 %v473_v60  ;;  %v5701_v55 = vpop.f32.mrf.mxu1  ;;  %v1511_v54 = vadd.f32 %v6540_v16, %v1482_v39  ;;  %v623_v60 = vld [vmem:[#allocation5 + $0x1088] sm:$0xff]  ;;  %v1659_v51 = vadd.f32 %v6546_v63, %v6545_v27  ;;  %v453_v61 = vld [vmem:[#allocation5 + $0xb38] sm:$0xff]  ;;  %v4485_v39 = vld [vmem:[#allocation2 + $0xe0] sm:$0xff] }
 0x2f3   :  { %6537 = vst [vmem:[#allocation213_spill] sm:$0xff] %v5693_v52  ;;  %3558 = vmatpush.msra.mxu3 %v643_v9  ;;  %3472 = vmatpush.msra.mxu0 %v153_v23  ;;  %v1682_v9 = vadd.f32 %v6544_v14, %v1653_v53  ;;  %v133_v23 = vld [vmem:[#allocation5 + $0x138] sm:$0xff]  ;;  %v4486_v24 = vld [vmem:[#allocation2 + $0xe8] sm:$0xff]  ;;  %v4487_v14 = vld [vmem:[#allocation2 + $0xf0] sm:$0xff] }
 0x2f4   :  { %3501 = vmatpush.msra.mxu1 %v313_v62  ;;  %6539 = vst [vmem:[#allocation28_spill] sm:$0xff] %v5701_v55  ;;  %3531 = vmatpush.msra.mxu2 %v463_v12  ;;  %v6547_v62 = vld [vmem:[#allocation33_spill] sm:$0xff]  ;;  %v293_v16 = vld [vmem:[#allocation5 + $0x638] sm:$0xff]  ;;  %v1488_v12 = vadd.f32 %v6548_v1, %v1459_v58  ;;  %v6554_v58 = vld [vmem:[#allocation14_spill] sm:$0xff] }
 0x2f5   :  { %3559 = vmatpush.msra.mxu3 %v633_v0  ;;  %3473 = vmatpush.msra.mxu0 %v143_v45  ;;  %v1685_v19 = vadd.f32 %v6547_v62, %v1656_v18  ;;  %v6549_v0 = vld [vmem:[#allocation13_spill] sm:$0xff]  ;;  %v273_v4 = vld [vmem:[#allocation5 + $0x598] sm:$0xff] }
 0x2f6   :  { %3502 = vmatpush.msra.mxu1 %v303_v57  ;;  %3371 = vmatmul.f32.gmra.mxu0 %v4485_v39  ;;  %v1537_v56 = vadd.f32 %v6549_v0, %v1508_v15  ;;  %v6550_v43 = vld [vmem:[#allocation37_spill] sm:$0xff]  ;;  %v613_v57 = vld [vmem:[#allocation5 + $0x1038] sm:$0xff]  ;;  %v6555_v15 = vld [vmem:[#allocation24_spill] sm:$0xff] }
 0x2f7   :  { %3400 = vmatmul.f32.gmra.mxu1 %v4486_v24  ;;  %v1688_v53 = vadd.f32 %v6550_v43, %v1659_v51  ;;  %3429 = vmatmul.f32.gmra.mxu2 %v4487_v14  ;;  %v443_v45 = vld [vmem:[#allocation5 + $0xae8] sm:$0xff]  ;;  %v1517_v0 = vadd.f32 %v6555_v15, %v1488_v12  ;;  %v6556_v51 = vld [vmem:[#allocation30_spill] sm:$0xff]  ;;  %v433_v14 = vld [vmem:[#allocation5 + $0xa98] sm:$0xff] }
 0x2f8   :  { %3560 = vmatpush.msra.mxu3 %v623_v60  ;;  %v6551_v27 = vld [vmem:[#allocation17_spill] sm:$0xff]  ;;  %3532 = vmatpush.msra.mxu2 %v453_v61  ;;  %v5716_v24 = vpop.f32.mrf.mxu2  ;;  %v1566_v1 = vadd.f32 %v6554_v58, %v1537_v56  ;;  %v1711_v43 = vadd.f32 %v6556_v51, %v1682_v9  ;;  %v4488_v60 = vld [vmem:[#allocation2 + $0xf8] sm:$0xff]  ;;  %v6559_v61 = vld [vmem:[#allocation34_spill] sm:$0xff] }
 0x2f9   :  { %v1540_v63 = vadd.f32 %v6551_v27, %v1511_v54  ;;  %v6552_v55 = vld [vmem:[#allocation21_spill] sm:$0xff]  ;;  %3474 = vmatpush.msra.mxu0 %v133_v23  ;;  %6553 = vst [vmem:[#allocation16_spill] sm:$0xff] %v5716_v24  ;;  %3503 = vmatpush.msra.mxu1 %v293_v16  ;;  %v6557_v54 = vld [vmem:[#allocation18_spill] sm:$0xff]  ;;  %v1714_v23 = vadd.f32 %v6559_v61, %v1685_v19  ;;  %v113_v24 = vld [vmem:[#allocation5 + $0x98] sm:$0xff] }
 0x2fa   :  { %v1543_v18 = vadd.f32 %v6552_v55, %v1514_v25  ;;  %v123_v62 = vld [vmem:[#allocation5 + $0xe8] sm:$0xff]  ;;  %3458 = vmatmul.f32.gmra.mxu3 %v4488_v60  ;;  %v6558_v55 = vld [vmem:[#allocation22_spill] sm:$0xff]  ;;  %3533 = vmatpush.msra.mxu2 %v443_v45  ;;  %v6562_v9 = vld [vmem:[#allocation43_spill] sm:$0xff] }
 0x2fb   :  { %v283_v39 = vld [vmem:[#allocation5 + $0x5e8] sm:$0xff]  ;;  %v1569_v27 = vadd.f32 %v6557_v54, %v1540_v63  ;;  %3561 = vmatpush.msra.mxu3 %v613_v57  ;;  %v5724_v56 = vpop.f32.mrf.mxu3  ;;  %v6561_v12 = vld [vmem:[#allocation38_spill] sm:$0xff]  ;;  %v1740_v16 = vadd.f32 %v6562_v9, %v1711_v43  ;;  %v6563_v15 = vld [vmem:[#allocation59_spill] sm:$0xff]  ;;  %3475 = vmatpush.msra.mxu0 %v123_v62 }
 0x2fc   :  { %v603_v52 = vld [vmem:[#allocation5 + $0xfe8] sm:$0xff]  ;;  %v1572_v25 = vadd.f32 %v6558_v55, %v1543_v18  ;;  %6560 = vst [vmem:[#allocation20_spill] sm:$0xff] %v5724_v56  ;;  %v1717_v58 = vadd.f32 %v6561_v12, %v1688_v53  ;;  %v6564_v51 = vld [vmem:[#allocation60_spill] sm:$0xff]  ;;  %3504 = vmatpush.msra.mxu1 %v283_v39  ;;  %v593_v54 = vld [vmem:[#allocation5 + $0xf98] sm:$0xff]  ;;  %v5730_v18 = vpop.f32.mrf.mxu0  ;;  %3534 = vmatpush.msra.mxu2 %v433_v14  ;;  %v5736_v62 = vpop.f32.mrf.mxu1 }
 0x2fd   :  { %v1885_v60 = vadd.f32 %v6564_v51, %v6563_v15  ;;  %v423_v63 = vld [vmem:[#allocation5 + $0xa48] sm:$0xff]  ;;  %6565 = vst [vmem:[#allocation31_spill] sm:$0xff] %v5730_v18  ;;  %v6566_v19 = vld [vmem:[#allocation47_spill] sm:$0xff]  ;;  %3562 = vmatpush.msra.mxu3 %v603_v52  ;;  %3476 = vmatpush.msra.mxu0 %v113_v24 }
 0x2fe   :  { %v1743_v45 = vadd.f32 %v6566_v19, %v1714_v23  ;;  %v103_v57 = vld [vmem:[#allocation5 + $0x48] sm:$0xff]  ;;  %v6568_v53 = vld [vmem:[#allocation51_spill] sm:$0xff]  ;;  %3505 = vmatpush.msra.mxu1 %v273_v4  ;;  %6570 = vst [vmem:[#allocation32_spill] sm:$0xff] %v5736_v62  ;;  %v6574_v23 = vld [vmem:[#allocation40_spill] sm:$0xff]  ;;  %3535 = vmatpush.msra.mxu2 %v423_v63 }
 0x2ff   :  { %v263_v55 = vld [vmem:[#allocation5 + $0x548] sm:$0xff]  ;;  %v1746_v12 = vadd.f32 %v6568_v53, %v1717_v58  ;;  %v6571_v39 = vld [vmem:[#allocation15_spill] sm:$0xff]  ;;  %v1662_v14 = vadd.f32 %v6574_v23, %v6573_v41  ;;  %3563 = vmatpush.msra.mxu3 %v593_v54  ;;  %v6577_v53 = vld [vmem:[#allocation44_spill] sm:$0xff]  ;;  %3477 = vmatpush.msra.mxu0 %v103_v57 }
 0x300   :  { %v6567_v61 = vld [vmem:[#allocation25_spill] sm:$0xff]  ;;  %v1595_v15 = vadd.f32 %v6571_v39, %v1566_v1  ;;  %v6572_v51 = vld [vmem:[#allocation19_spill] sm:$0xff]  ;;  %3506 = vmatpush.msra.mxu1 %v263_v55  ;;  %v6579_v39 = vld [vmem:[#allocation48_spill] sm:$0xff]  ;;  %3478 = vmatmul.f32.vlgmr.msra.gmra.mxu0 %v5569_v7 }
 0x301   :  { %v1546_v56 = vadd.f32 %v6567_v61, %v1517_v0  ;;  %v6569_v43 = vld [vmem:[#allocation61_spill] sm:$0xff]  ;;  %v1598_v18 = vadd.f32 %v6572_v51, %v1569_v27  ;;  %v6575_v19 = vld [vmem:[#allocation23_spill] sm:$0xff]  ;;  %v6576_v61 = vld [vmem:[#allocation26_spill] sm:$0xff]  ;;  %v1772_v27 = vadd.f32 %v6579_v39, %v1743_v45  ;;  %3507 = vmatmul.f32.vlgmr.msra.gmra.mxu1 %v5572_v49  ;;  %3536 = vmatmul.f32.vlgmr.msra.gmra.mxu2 %v5575_v11 }
 0x302   :  { %v1914_v9 = vadd.f32 %v6569_v43, %v1885_v60  ;;  %v583_v52 = vld [vmem:[#allocation5 + $0xf48] sm:$0xff]  ;;  %v1601_v0 = vadd.f32 %v6575_v19, %v1572_v25  ;;  %v1769_v60 = vadd.f32 %v6577_v53, %v1740_v16  ;;  %v1213_v4 = vld [vmem:[#allocation5 + $0x22f8] sm:$0xff]  ;;  %v6581_v62 = vld [vmem:[#allocation64_spill] sm:$0xff]  ;;  %v5759_v39 = vpop.f32.mrf.mxu2 }
 0x303   :  { %v1575_v58 = vadd.f32 %v6576_v61, %v1546_v56  ;;  %v893_v24 = vld [vmem:[#allocation5 + $0x18f8] sm:$0xff]  ;;  %v6578_v43 = vld [vmem:[#allocation41_spill] sm:$0xff]  ;;  %v6583_v54 = vld [vmem:[#allocation52_spill] sm:$0xff]  ;;  %3564 = vmatpush.msra.mxu3 %v583_v52  ;;  %3636 = vmatpush.msrb.mxu2 %v1213_v4 }
 0x304   :  { %v1691_v1 = vadd.f32 %v6578_v43, %v1662_v14  ;;  %v6580_v51 = vld [vmem:[#allocation63_spill] sm:$0xff]  ;;  %v6582_v63 = vld [vmem:[#allocation45_spill] sm:$0xff]  ;;  %v1775_v16 = vadd.f32 %v6583_v54, %v1746_v12  ;;  %v6584_v57 = vld [vmem:[#allocation62_spill] sm:$0xff]  ;;  %3578 = vmatpush.msrb.mxu0 %v893_v24  ;;  %3565 = vmatmul.f32.vlgmr.msra.gmra.mxu3 %v5580_v44 }
 0x305   :  { %v1888_v41 = vadd.f32 %v6581_v62, %v6580_v51  ;;  %v1053_v25 = vld [vmem:[#allocation5 + $0x1df8] sm:$0xff]  ;;  %v1798_v56 = vadd.f32 %v6582_v63, %v1769_v60  ;;  %v1943_v55 = vadd.f32 %v6584_v57, %v1914_v9  ;;  %v1203_v23 = vld [vmem:[#allocation5 + $0x22a8] sm:$0xff]  ;;  %v6588_v7 = vld [vmem:[#allocation156_spill] sm:$0xff]  ;;  %v5764_v63 = vmul.f32 %v1595_v15, %v1595_v15 }
 0x306   :  { %v1373_v14 = vld [vmem:[#allocation5 + $0x27f8] sm:$0xff]  ;;  %v6585_v45 = vld [vmem:[#allocation49_spill] sm:$0xff]  ;;  %3607 = vmatpush.msrb.mxu1 %v1053_v25  ;;  %3637 = vmatpush.msrb.mxu2 %v1203_v23  ;;  %v6594_v44 = vld [vmem:[#allocation42_spill] sm:$0xff] }
 0x307   :  { %v1801_v19 = vadd.f32 %v6585_v45, %v1772_v27  ;;  %v6586_v61 = vld [vmem:[#allocation65_spill] sm:$0xff]  ;;  %v6587_v53 = vld [vmem:[#allocation155_spill] sm:$0xff]  ;;  %3665 = vmatpush.msrb.mxu3 %v1373_v14  ;;  %v5769_v45 = vpop.f32.mrf.mxu3  ;;  %v6596_v14 = vld [vmem:[#allocation50_spill] sm:$0xff] }
 0x308   :  { %v1917_v62 = vadd.f32 %v6586_v61, %v1888_v41  ;;  %v2581_v43 = vadd.f32 %v6588_v7, %v6587_v53  ;;  %v883_v49 = vld [vmem:[#allocation5 + $0x18a8] sm:$0xff]  ;;  %v6590_v51 = vld [vmem:[#allocation75_spill] sm:$0xff]  ;;  %v5766_v41 = vmul.f32 %v1598_v18, %v1598_v18  ;;  %v1720_v61 = vadd.f32 %v6594_v44, %v1691_v1  ;;  %v5777_v53 = vpop.f32.mrf.mxu0  ;;  %v6595_v7 = vld [vmem:[#allocation46_spill] sm:$0xff]  ;;  %3481 = vmatmul.f32.gmra.mxu0 %v5589_v32 }
 0x309   :  { %v1043_v60 = vld [vmem:[#allocation5 + $0x1da8] sm:$0xff]  ;;  %v1972_v11 = vadd.f32 %v6590_v51, %v1943_v55  ;;  %v1193_v52 = vld [vmem:[#allocation5 + $0x2258] sm:$0xff]  ;;  %3579 = vmatpush.msrb.mxu0 %v883_v49  ;;  %v1827_v23 = vadd.f32 %v6595_v7, %v1798_v56  ;;  %v2813_v49 = vadd.f32 %v5531_v37, %v5529_v42  ;;  %v6601_v44 = vld [vmem:[#allocation68_spill] sm:$0xff]  ;;  %v3045_v42 = vadd.f32 %v5667_v35, %v5665_v33 }
 0x30a   :  { %v6589_v12 = vld [vmem:[#allocation53_spill] sm:$0xff]  ;;  %v873_v24 = vld [vmem:[#allocation5 + $0x1858] sm:$0xff]  ;;  %3608 = vmatpush.msrb.mxu1 %v1043_v60  ;;  %3638 = vmatpush.msrb.mxu2 %v1193_v52  ;;  %v5786_v60 = vpop.f32.mrf.mxu1  ;;  %v6603_v52 = vld [vmem:[#allocation158_spill] sm:$0xff] }
 0x30b   :  { %v1804_v9 = vadd.f32 %v6589_v12, %v1775_v16  ;;  %v1363_v27 = vld [vmem:[#allocation5 + $0x27a8] sm:$0xff]  ;;  %v1033_v57 = vld [vmem:[#allocation5 + $0x1d58] sm:$0xff]  ;;  %v5771_v16 = vmul.f32 %v1601_v0, %v1601_v0  ;;  %v6597_v12 = vld [vmem:[#allocation66_spill] sm:$0xff]  ;;  %3580 = vmatpush.msrb.mxu0 %v873_v24  ;;  %3510 = vmatmul.f32.gmra.mxu1 %v5592_v47  ;;  %v3074_v35 = vadd.f32 %v5669_v26, %v3045_v42 }
 0x30c   :  { %v6591_v54 = vld [vmem:[#allocation157_spill] sm:$0xff]  ;;  %v6592_v55 = vld [vmem:[#allocation27_spill] sm:$0xff]  ;;  %v1946_v51 = vadd.f32 %v6597_v12, %v1917_v62  ;;  %3666 = vmatpush.msrb.mxu3 %v1363_v27  ;;  %3609 = vmatpush.msrb.mxu1 %v1033_v57  ;;  %v5796_v57 = vmul.f32 %v1827_v23, %v1827_v23  ;;  %v6609_v32 = vld [vmem:[#allocation80_spill] sm:$0xff] }
 0x30d   :  { %v2610_v4 = vadd.f32 %v6591_v54, %v2581_v43  ;;  %v5774_v25 = vadd.f32 %v6592_v55, %v1575_v58  ;;  %v1183_v15 = vld [vmem:[#allocation5 + $0x2208] sm:$0xff]  ;;  %v1353_v18 = vld [vmem:[#allocation5 + $0x2758] sm:$0xff]  ;;  %v1830_v43 = vadd.f32 %v6596_v14, %v1801_v19  ;;  %v6598_v58 = vld [vmem:[#allocation54_spill] sm:$0xff]  ;;  %3539 = vmatmul.f32.gmra.mxu2 %v5595_v38  ;;  %3568 = vmatmul.f32.gmra.mxu3 %v5600_v40 }
 0x30e   :  { %v863_v0 = vld [vmem:[#allocation5 + $0x1808] sm:$0xff]  ;;  %v1833_v55 = vadd.f32 %v6598_v58, %v1804_v9  ;;  %v6600_v56 = vld [vmem:[#allocation67_spill] sm:$0xff]  ;;  %3639 = vmatpush.msrb.mxu2 %v1183_v15  ;;  %3667 = vmatpush.msrb.mxu3 %v1353_v18  ;;  %v6607_v58 = vld [vmem:[#allocation72_spill] sm:$0xff]  ;;  %v3103_v40 = vadd.f32 %v5671_v29, %v3074_v35  ;;  %v3048_v29 = vadd.f32 %v5675_v6, %v5673_v2 }
 0x30f   :  { %6593 = vst [vmem:[#allocation29_spill] sm:$0xff] %v5774_v25  ;;  %v1023_v54 = vld [vmem:[#allocation5 + $0x1d08] sm:$0xff]  ;;  %v6599_v25 = vld [vmem:[#allocation76_spill] sm:$0xff]  ;;  %v1891_v19 = vadd.f32 %v6601_v44, %v6600_v56  ;;  %v6602_v7 = vld [vmem:[#allocation79_spill] sm:$0xff]  ;;  %v2639_v27 = vadd.f32 %v6603_v52, %v2610_v4  ;;  %3581 = vmatpush.msrb.mxu0 %v863_v0  ;;  %v5814_v56 = vpop.f32.mrf.mxu2 }
 0x310   :  { %v2001_v1 = vadd.f32 %v6599_v25, %v1972_v11  ;;  %v1975_v62 = vadd.f32 %v6602_v7, %v1946_v51  ;;  %v1343_v14 = vld [vmem:[#allocation5 + $0x2708] sm:$0xff]  ;;  %v2842_v11 = vadd.f32 %v5536_v59, %v2813_v49  ;;  %3610 = vmatpush.msrb.mxu1 %v1023_v54  ;;  %v1173_v37 = vld [vmem:[#allocation5 + $0x21b8] sm:$0xff]  ;;  %v5798_v25 = vmul.f32 %v1830_v43, %v1830_v43 }
 0x311   :  { %v6604_v9 = vld [vmem:[#allocation77_spill] sm:$0xff]  ;;  %v853_v24 = vld [vmem:[#allocation5 + $0x17b8] sm:$0xff]  ;;  %v2668_v4 = vadd.f32 %v5481_v30, %v2639_v27  ;;  %3668 = vmatpush.msrb.mxu3 %v1343_v14  ;;  %v5811_v30 = vmul.f32 %v1833_v55, %v1833_v55  ;;  %3640 = vmatpush.msrb.mxu2 %v1173_v37  ;;  %v6614_v14 = vld [vmem:[#allocation160_spill] sm:$0xff]  ;;  %v3132_v35 = vadd.f32 %v5777_v53, %v3103_v40 }
 0x312   :  { %v2030_v12 = vadd.f32 %v6604_v9, %v2001_v1  ;;  %v1013_v15 = vld [vmem:[#allocation5 + $0x1cb8] sm:$0xff]  ;;  %v6605_v18 = vld [vmem:[#allocation69_spill] sm:$0xff]  ;;  %v2004_v47 = vadd.f32 %v6609_v32, %v1975_v62  ;;  %3582 = vmatpush.msrb.mxu0 %v853_v24  ;;  %v2871_v7 = vadd.f32 %v5539_v22, %v2842_v11  ;;  %v5841_v32 = vpop.f32.mrf.mxu1  ;;  %v3077_v6 = vadd.f32 %v5686_v34, %v3048_v29 }
 0x313   :  { %v1920_v59 = vadd.f32 %v6605_v18, %v1891_v19  ;;  %v6606_v51 = vld [vmem:[#allocation71_spill] sm:$0xff]  ;;  %v1163_v23 = vld [vmem:[#allocation5 + $0x2168] sm:$0xff]  ;;  %v6611_v19 = vld [vmem:[#allocation78_spill] sm:$0xff]  ;;  %3611 = vmatpush.msrb.mxu1 %v1013_v15  ;;  %v2697_v42 = vadd.f32 %v5483_v21, %v2668_v4  ;;  %v5824_v18 = vpop.f32.mrf.mxu3  ;;  %3484 = vmatmul.f32.gmra.mxu0 %v5609_v13 }
 0x314   :  { %v1894_v33 = vadd.f32 %v6607_v58, %v6606_v51  ;;  %v1333_v43 = vld [vmem:[#allocation5 + $0x26b8] sm:$0xff]  ;;  %v843_v1 = vld [vmem:[#allocation5 + $0x1768] sm:$0xff]  ;;  %v2059_v38 = vadd.f32 %v6611_v19, %v2030_v12  ;;  %3641 = vmatpush.msrb.mxu2 %v1163_v23  ;;  %v6615_v12 = vld [vmem:[#allocation70_spill] sm:$0xff]  ;;  %v2900_v11 = vadd.f32 %v5585_v50, %v2871_v7  ;;  %v5829_v58 = vpop.f32.mrf.mxu0  ;;  %v2816_v23 = vadd.f32 %v5543_v36, %v5541_v17 }
 0x315   :  { %v6608_v0 = vld [vmem:[#allocation55_spill] sm:$0xff]  ;;  %v1003_v49 = vld [vmem:[#allocation5 + $0x1c68] sm:$0xff]  ;;  %3669 = vmatpush.msrb.mxu3 %v1333_v43  ;;  %v1949_v22 = vadd.f32 %v6615_v12, %v1920_v59  ;;  %3583 = vmatpush.msrb.mxu0 %v843_v1  ;;  %v2726_v4 = vadd.f32 %v5488_v28, %v2697_v42  ;;  %v6617_v50 = vld [vmem:[#allocation74_spill] sm:$0xff] }
 0x316   :  { %v5809_v54 = vadd.f32 %v6608_v0, %v1720_v61  ;;  %v6610_v44 = vld [vmem:[#allocation73_spill] sm:$0xff]  ;;  %v1153_v61 = vld [vmem:[#allocation5 + $0x2118] sm:$0xff]  ;;  %3612 = vmatpush.msrb.mxu1 %v1003_v49  ;;  %v5843_v28 = vmul.f32 %v2059_v38, %v2059_v38  ;;  %v2845_v36 = vadd.f32 %v5548_v48, %v2816_v23  ;;  %v2929_v2 = vadd.f32 %v5587_v5, %v2900_v11  ;;  %v6621_v38 = vld [vmem:[#allocation164_spill] sm:$0xff] }
 0x317   :  { %v1923_v26 = vadd.f32 %v6610_v44, %v1894_v33  ;;  %v1323_v55 = vld [vmem:[#allocation5 + $0x2668] sm:$0xff]  ;;  %v6613_v62 = vld [vmem:[#allocation159_spill] sm:$0xff]  ;;  %3642 = vmatpush.msrb.mxu2 %v1153_v61  ;;  %v6622_v61 = vld [vmem:[#allocation162_spill] sm:$0xff]  ;;  %v2755_v48 = vadd.f32 %v5491_v31, %v2726_v4  ;;  %3513 = vmatmul.f32.gmra.mxu1 %v5612_v3  ;;  %v2590_v5 = vadd.f32 %v5471_v20, %v5469_v46  ;;  %v3192_v46 = vpop.f32.mrf.mxu2 }
 0x318   :  { %v6612_v52 = vld [vmem:[#allocation81_spill] sm:$0xff]  ;;  %v2584_v9 = vadd.f32 %v6614_v14, %v6613_v62  ;;  %v833_v37 = vld [vmem:[#allocation5 + $0x1718] sm:$0xff]  ;;  %3670 = vmatpush.msrb.mxu3 %v1323_v55  ;;  %v2958_v34 = vadd.f32 %v5598_v8, %v2929_v2  ;;  %3542 = vmatmul.f32.gmra.mxu2 %v5615_v10  ;;  %v3161_v14 = vadd.f32 %v5786_v60, %v3132_v35  ;;  %v6628_v11 = vld [vmem:[#allocation194_spill] sm:$0xff] }
 0x319   :  { %v2033_v27 = vadd.f32 %v6612_v52, %v2004_v47  ;;  %v993_v24 = vld [vmem:[#allocation5 + $0x1c18] sm:$0xff]  ;;  %v1143_v15 = vld [vmem:[#allocation5 + $0x20c8] sm:$0xff]  ;;  %v5836_v0 = vadd.f32 %v6617_v50, %v1923_v26  ;;  %3584 = vmatpush.msrb.mxu0 %v833_v37  ;;  %v6618_v47 = vld [vmem:[#allocation82_spill] sm:$0xff]  ;;  %3571 = vmatmul.f32.gmra.mxu3 %v6628_v11 }
 0x31a   :  { %v1313_v51 = vld [vmem:[#allocation5 + $0x2618] sm:$0xff]  ;;  %v6616_v33 = vld [vmem:[#allocation161_spill] sm:$0xff]  ;;  %3613 = vmatpush.msrb.mxu1 %v993_v24  ;;  %3643 = vmatpush.msrb.mxu2 %v1143_v15  ;;  %v3190_v15 = vadd.f32 %v5814_v56, %v3161_v14  ;;  %v6632_v35 = vld [vmem:[#allocation190_spill] sm:$0xff]  ;;  %v5887_v14 = vpop.f32.mrf.mxu1 }
 0x31b   :  { %v2613_v21 = vadd.f32 %v6616_v33, %v2584_v9  ;;  %v823_v59 = vld [vmem:[#allocation5 + $0x16c8] sm:$0xff]  ;;  %v5846_v17 = vadd.f32 %v6618_v47, %v2033_v27  ;;  %3671 = vmatpush.msrb.mxu3 %v1313_v51  ;;  %v6619_v49 = vld [vmem:[#allocation83_spill] sm:$0xff]  ;;  %v3714_v51 = vmul.f32 %v2755_v48, %v2755_v48  ;;  %v6629_v33 = vld [vmem:[#allocation182_spill] sm:$0xff]  ;;  %v5873_v29 = vpop.f32.mrf.mxu3  ;;  %v2987_v47 = vadd.f32 %v6632_v35, %v2958_v34 }
 0x31c   :  { %v983_v43 = vld [vmem:[#allocation5 + $0x1bc8] sm:$0xff]  ;;  %v1978_v44 = vadd.f32 %v6619_v49, %v1949_v22  ;;  %3585 = vmatpush.msrb.mxu0 %v823_v59  ;;  %v1133_v53 = vld [vmem:[#allocation5 + $0x2078] sm:$0xff]  ;;  %v6627_v22 = vld [vmem:[#allocation212_spill] sm:$0xff] }
 0x31d   :  { %v1303_v1 = vld [vmem:[#allocation5 + $0x25c8] sm:$0xff]  ;;  %3614 = vmatpush.msrb.mxu1 %v983_v43  ;;  %v813_v26 = vld [vmem:[#allocation5 + $0x1678] sm:$0xff]  ;;  %v2642_v55 = vadd.f32 %v6622_v61, %v2613_v21  ;;  %3644 = vmatpush.msrb.mxu2 %v1133_v53  ;;  %v3106_v10 = vadd.f32 %v6627_v22, %v3077_v6  ;;  %v3137_v53 = vpop.f32.mrf.mxu0  ;;  %v6637_v61 = vld [vmem:[#allocation184_spill] sm:$0xff] }
 0x31e   :  { %v6620_v19 = vld [vmem:[#allocation163_spill] sm:$0xff]  ;;  %3672 = vmatpush.msrb.mxu3 %v1303_v1  ;;  %v1123_v27 = vld [vmem:[#allocation5 + $0x2028] sm:$0xff]  ;;  %3586 = vmatpush.msrb.mxu0 %v813_v26  ;;  %v6634_v1 = vld [vmem:[#allocation28_spill] sm:$0xff] }
 0x31f   :  { %v2587_v7 = vadd.f32 %v6621_v38, %v6620_v19  ;;  %v973_v52 = vld [vmem:[#allocation5 + $0x1b78] sm:$0xff]  ;;  %v6623_v9 = vld [vmem:[#allocation165_spill] sm:$0xff]  ;;  %3645 = vmatpush.msrb.mxu2 %v1123_v27  ;;  %v3135_v6 = vadd.f32 %v5829_v58, %v3106_v10  ;;  %v6635_v26 = vld [vmem:[#allocation84_spill] sm:$0xff]  ;;  %v3219_v58 = vadd.f32 %v5824_v18, %v3190_v15 }
 0x320   :  { %v1293_v62 = vld [vmem:[#allocation5 + $0x2578] sm:$0xff]  ;;  %v6624_v31 = vld [vmem:[#allocation169_spill] sm:$0xff]  ;;  %3615 = vmatpush.msrb.mxu1 %v973_v52  ;;  %v5880_v19 = vadd.f32 %v6635_v26, %v1978_v44  ;;  %v6636_v38 = vld [vmem:[#allocation170_spill] sm:$0xff] }
 0x321   :  { %v2616_v42 = vadd.f32 %v6623_v9, %v2587_v7  ;;  %v2671_v37 = vadd.f32 %v6624_v31, %v2642_v55  ;;  %v6625_v13 = vld [vmem:[#allocation181_spill] sm:$0xff]  ;;  %v6626_v20 = vld [vmem:[#allocation167_spill] sm:$0xff]  ;;  %3673 = vmatpush.msrb.mxu3 %v1293_v62  ;;  %v6639_v27 = vld [vmem:[#allocation16_spill] sm:$0xff]  ;;  %v3164_v22 = vadd.f32 %v5841_v32, %v3135_v6 }
 0x322   :  { %v2874_v24 = vadd.f32 %v6625_v13, %v2845_v36  ;;  %v803_v3 = vld [vmem:[#allocation5 + $0x1628] sm:$0xff]  ;;  %v2619_v8 = vadd.f32 %v6626_v20, %v2590_v5  ;;  %v1113_v40 = vld [vmem:[#allocation5 + $0x1fd8] sm:$0xff]  ;;  %v6638_v5 = vld [vmem:[#allocation166_spill] sm:$0xff] }
 0x323   :  { %v963_v12 = vld [vmem:[#allocation5 + $0x1b28] sm:$0xff]  ;;  %v6630_v21 = vld [vmem:[#allocation183_spill] sm:$0xff]  ;;  %3587 = vmatpush.msrb.mxu0 %v803_v3  ;;  %v2700_v7 = vadd.f32 %v6636_v38, %v2671_v37  ;;  %3646 = vmatpush.msrb.mxu2 %v1113_v40  ;;  %v2645_v34 = vadd.f32 %v6638_v5, %v2616_v42  ;;  %v6640_v44 = vld [vmem:[#allocation168_spill] sm:$0xff]  ;;  %v5895_v42 = vadd.f32 %v3714_v51, %v5764_v63  ;;  %v3195_v38 = vpop.f32.mrf.mxu2 }
 0x324   :  { %v1283_v60 = vld [vmem:[#allocation5 + $0x2528] sm:$0xff]  ;;  %v2819_v4 = vadd.f32 %v6630_v21, %v6629_v33  ;;  %v6631_v23 = vld [vmem:[#allocation191_spill] sm:$0xff]  ;;  %3616 = vmatpush.msrb.mxu1 %v963_v12  ;;  %v5890_v9 = vadd.f32 %v6640_v44, %v2619_v8  ;;  %v6642_v13 = vld [vmem:[#allocation192_spill] sm:$0xff]  ;;  %v3715_v12 = vmul.f32 %v2987_v47, %v2987_v47  ;;  %v3193_v32 = vadd.f32 %v3192_v46, %v3164_v22 }
 0x325   :  { %v2903_v59 = vadd.f32 %v6631_v23, %v2874_v24  ;;  %v793_v43 = vld [vmem:[#allocation5 + $0x15d8] sm:$0xff]  ;;  %v6633_v36 = vld [vmem:[#allocation213_spill] sm:$0xff]  ;;  %3674 = vmatpush.msrb.mxu3 %v1283_v60  ;;  %v6646_v33 = vld [vmem:[#allocation198_spill] sm:$0xff]  ;;  %v3140_v22 = vpop.f32.mrf.mxu0  ;;  %4313 = vrsqrt.f32 %v5895_v42  ;;  %vm3761_vm0 = vcmp.eq.f32.partialorder %v5895_v42, inf  ;;  %vm3763_vm1 = vcmp.eq.f32.partialorder %v5895_v42, 0.0 }
 0x326   :  { %v953_v50 = vld [vmem:[#allocation5 + $0x1ad8] sm:$0xff]  ;;  %v3051_v49 = vadd.f32 %v6634_v1, %v6633_v36  ;;  %v1103_v56 = vld [vmem:[#allocation5 + $0x1f88] sm:$0xff]  ;;  %v2848_v55 = vadd.f32 %v6637_v61, %v2819_v4  ;;  %3588 = vmatpush.msrb.mxu0 %v793_v43  ;;  %v6648_v63 = vld [vmem:[#allocation20_spill] sm:$0xff] }
 0x327   :  { %v1273_v2 = vld [vmem:[#allocation5 + $0x24d8] sm:$0xff]  ;;  %v783_v48 = vld [vmem:[#allocation5 + $0x1588] sm:$0xff]  ;;  %3617 = vmatpush.msrb.mxu1 %v953_v50  ;;  %v2932_v24 = vadd.f32 %v6642_v13, %v2903_v59  ;;  %3647 = vmatpush.msrb.mxu2 %v1103_v56  ;;  %v6649_v23 = vld [vmem:[#allocation200_spill] sm:$0xff]  ;;  %v3716_v50 = vmul.f32 %v3219_v58, %v3219_v58 }
 0x328   :  { %v943_v52 = vld [vmem:[#allocation5 + $0x1a88] sm:$0xff]  ;;  %v3080_v62 = vadd.f32 %v6639_v27, %v3051_v49  ;;  %v6641_v31 = vld [vmem:[#allocation171_spill] sm:$0xff]  ;;  %3675 = vmatpush.msrb.mxu3 %v1273_v2  ;;  %3589 = vmatpush.msrb.mxu0 %v783_v48  ;;  %v6650_v35 = vld [vmem:[#allocation172_spill] sm:$0xff] }
 0x329   :  { %v2729_v37 = vadd.f32 %v6641_v31, %v2700_v7  ;;  %v1263_v3 = vld [vmem:[#allocation5 + $0x2488] sm:$0xff]  ;;  %3618 = vmatpush.msrb.mxu1 %v943_v52  ;;  %v1093_v20 = vld [vmem:[#allocation5 + $0x1f38] sm:$0xff]  ;;  %3487 = vmatmul.f32.gmra.mxu0 %v6646_v33  ;;  %v6651_v36 = vld [vmem:[#allocation186_spill] sm:$0xff]  ;;  %v5910_v7 = vadd.f32 %v3715_v12, %v5796_v57 }
 0x32a   :  { %v773_v18 = vld [vmem:[#allocation5 + $0x1538] sm:$0xff]  ;;  %v6643_v10 = vld [vmem:[#allocation173_spill] sm:$0xff]  ;;  %v3109_v51 = vadd.f32 %v6648_v63, %v3080_v62  ;;  %3545 = vmatmul.f32.gmra.mxu2 %v6649_v23  ;;  %3676 = vmatpush.msrb.mxu3 %v1263_v3  ;;  %v6653_v56 = vld [vmem:[#allocation196_spill] sm:$0xff] }
 0x32b   :  { %v2674_v8 = vadd.f32 %v6643_v10, %v2645_v34  ;;  %v6644_v11 = vld [vmem:[#allocation185_spill] sm:$0xff]  ;;  %v6647_v21 = vld [vmem:[#allocation199_spill] sm:$0xff]  ;;  %v2758_v47 = vadd.f32 %v6650_v35, %v2729_v37  ;;  %3648 = vmatpush.msrb.mxu2 %v1093_v20  ;;  %3590 = vmatpush.msrb.mxu0 %v773_v18  ;;  %v6656_v46 = vld [vmem:[#allocation202_spill] sm:$0xff]  ;;  %v3222_v18 = vadd.f32 %v5873_v29, %v3193_v32  ;;  %4315 = vrsqrt.f32 %v5910_v7 }
 0x32c   :  { %v2877_v40 = vadd.f32 %v6644_v11, %v2848_v55  ;;  %v6645_v60 = vld [vmem:[#allocation193_spill] sm:$0xff]  ;;  %3516 = vmatmul.f32.gmra.mxu1 %v6647_v21  ;;  %v933_v4 = vld [vmem:[#allocation5 + $0x1a38] sm:$0xff]  ;;  %v6655_v55 = vld [vmem:[#allocation32_spill] sm:$0xff]  ;;  %3574 = vmatmul.f32.gmra.mxu3 %v6656_v46  ;;  %v3138_v34 = vadd.f32 %v3137_v53, %v3109_v51  ;;  %v5922_v53 = vadd.f32 %v3716_v50, %v5843_v28  ;;  %vm3773_vm2 = vcmp.eq.f32.partialorder %v5910_v7, inf }
 0x32d   :  { %v2961_v15 = vadd.f32 %v6645_v60, %v2932_v24  ;;  %v1083_v59 = vld [vmem:[#allocation5 + $0x1ee8] sm:$0xff]  ;;  %v1253_v43 = vld [vmem:[#allocation5 + $0x2438] sm:$0xff]  ;;  %3619 = vmatpush.msrb.mxu1 %v933_v4  ;;  %v6657_v27 = vld [vmem:[#allocation174_spill] sm:$0xff]  ;;  %v5918_v24 = vpop.f32.mrf.mxu3  ;;  %v3719_v11 = vmul.f32 %v2758_v47, %v2758_v47  ;;  %v3721_v47 = vmul.f32 %v3222_v18, %v3222_v18  ;;  %vm3775_vm4 = vcmp.eq.f32.partialorder %v5910_v7, 0.0 }
 0x32e   :  { %v6652_v1 = vld [vmem:[#allocation187_spill] sm:$0xff]  ;;  %v2906_v2 = vadd.f32 %v6653_v56, %v2877_v40  ;;  %v763_v6 = vld [vmem:[#allocation5 + $0x14e8] sm:$0xff]  ;;  %v2703_v62 = vadd.f32 %v6657_v27, %v2674_v8  ;;  %v6658_v58 = vld [vmem:[#allocation188_spill] sm:$0xff]  ;;  %3649 = vmatpush.msrb.mxu2 %v1083_v59  ;;  %3677 = vmatpush.msrb.mxu3 %v1253_v43  ;;  %v3167_v29 = vadd.f32 %v5887_v14, %v3138_v34  ;;  %4317 = vrsqrt.f32 %v5922_v53 }
 0x32f   :  { %v2822_v49 = vadd.f32 %v6652_v1, %v6651_v36  ;;  %v923_v26 = vld [vmem:[#allocation5 + $0x19e8] sm:$0xff]  ;;  %v6654_v61 = vld [vmem:[#allocation31_spill] sm:$0xff]  ;;  %3591 = vmatpush.msrb.mxu0 %v763_v6  ;;  %v6667_v56 = vld [vmem:[#allocation204_spill] sm:$0xff]  ;;  %vm3785_vm3 = vcmp.eq.f32.partialorder %v5922_v53, inf  ;;  %vm3787_vm5 = vcmp.eq.f32.partialorder %v5922_v53, 0.0 }
 0x330   :  { %v3054_v48 = vadd.f32 %v6655_v55, %v6654_v61  ;;  %v1073_v52 = vld [vmem:[#allocation5 + $0x1e98] sm:$0xff]  ;;  %v1243_v5 = vld [vmem:[#allocation5 + $0x23e8] sm:$0xff]  ;;  %3620 = vmatpush.msrb.mxu1 %v923_v26  ;;  %v3196_v36 = vadd.f32 %v3195_v38, %v3167_v29  ;;  %v6668_v6 = vld [vmem:[#allocation206_spill] sm:$0xff]  ;;  %v3701_v61 = vmul.f32 %v5846_v17, %v5846_v17 }
 0x331   :  { %v2851_v44 = vadd.f32 %v6658_v58, %v2822_v49  ;;  %v6659_v31 = vld [vmem:[#allocation195_spill] sm:$0xff]  ;;  %v1063_v12 = vld [vmem:[#allocation5 + $0x1e48] sm:$0xff]  ;;  %3650 = vmatpush.msrb.mxu2 %v1073_v52  ;;  %3678 = vmatpush.msrb.mxu3 %v1243_v5  ;;  %v5941_v49 = vadd.f32 %v3719_v11, %v5766_v41  ;;  %v6670_v55 = vld [vmem:[#allocation176_spill] sm:$0xff]  ;;  %v5950_v41 = vpop.eup %4313 }
 0x332   :  { %v2990_v37 = vadd.f32 %v6659_v31, %v2961_v15  ;;  %v753_v13 = vld [vmem:[#allocation5 + $0x1498] sm:$0xff]  ;;  %v3083_v3 = vadd.f32 %v5759_v39, %v3054_v48  ;;  %v6660_v10 = vld [vmem:[#allocation85_spill] sm:$0xff]  ;;  %v6671_v46 = vld [vmem:[#allocation208_spill] sm:$0xff]  ;;  %v5958_v31 = vpop.eup %4315 }
 0x333   :  { %v913_v57 = vld [vmem:[#allocation5 + $0x1998] sm:$0xff]  ;;  %v2036_v8 = vadd.f32 %v6660_v10, %v5880_v19  ;;  %v6661_v40 = vld [vmem:[#allocation197_spill] sm:$0xff]  ;;  %3592 = vmatpush.msrb.mxu0 %v753_v13  ;;  %v3169_v19 = vpop.f32.mrf.mxu1  ;;  %3651 = vmatpush.msrb.mxu2 %v1063_v12  ;;  %v4008_v38 = vld [vmem:[#allocation7 + $0x70] sm:$0xff]  ;;  %4319 = vrsqrt.f32 %v5941_v49  ;;  %vm3821_vm6 = vcmp.eq.f32.partialorder %v5941_v49, inf  ;;  %vm3823_vm9 = vcmp.eq.f32.partialorder %v5941_v49, 0.0 }
 0x334   :  { %v1233_v20 = vld [vmem:[#allocation5 + $0x2398] sm:$0xff]  ;;  %v2935_v60 = vadd.f32 %v6661_v40, %v2906_v2  ;;  %v743_v39 = vld [vmem:[#allocation5 + $0x1448] sm:$0xff]  ;;  %3621 = vmatpush.msrb.mxu1 %v913_v57  ;;  %v3720_v23 = vmul.f32 %v2990_v37, %v2990_v37  ;;  %v3112_v32 = vadd.f32 %v5769_v45, %v3083_v3  ;;  %3652 = vmatmul.f32.vlgmr.msrb.gmra.mxu2 %v6671_v46  ;;  %v6672_v5 = vld [vmem:[#allocation56_spill] sm:$0xff] }
 0x335   :  { %v903_v15 = vld [vmem:[#allocation5 + $0x1948] sm:$0xff]  ;;  %v6662_v33 = vld [vmem:[#allocation175_spill] sm:$0xff]  ;;  %3679 = vmatpush.msrb.mxu3 %v1233_v20  ;;  %3593 = vmatpush.msrb.mxu0 %v743_v39  ;;  %v1778_v34 = vadd.f32 %v6672_v5, %v5809_v54  ;;  %v4040_v17 = vld [vmem:[#allocation7 + $0x170] sm:$0xff]  ;;  %v5962_v20 = vadd.f32 %v3721_v47, %v3701_v61  ;;  %v3227_v39 = vpop.f32.mrf.mxu3 }
 0x336   :  { %v2732_v21 = vadd.f32 %v6662_v33, %v2703_v62  ;;  %v6663_v28 = vld [vmem:[#allocation177_spill] sm:$0xff]  ;;  %3622 = vmatpush.msrb.mxu1 %v903_v15  ;;  %v4025_v35 = vld [vmem:[#allocation7 + $0xf8] sm:$0xff]  ;;  %3594 = vmatmul.f32.vlgmr.msrb.gmra.mxu0 %v6668_v6  ;;  %v3141_v52 = vadd.f32 %v3140_v22, %v3112_v32  ;;  %v5955_v27 = vadd.f32 %v3720_v23, %v5798_v25  ;;  %v6674_v37 = vld [vmem:[#allocation178_spill] sm:$0xff]  ;;  %v5969_v15 = vpop.eup %4317 }
 0x337   :  { %v2677_v4 = vadd.f32 %v6663_v28, %v5890_v9  ;;  %v6664_v63 = vld [vmem:[#allocation189_spill] sm:$0xff]  ;;  %v4009_v9 = vld [vmem:[#allocation7 + $0x78] sm:$0xff]  ;;  %v6675_v57 = vld [vmem:[#allocation210_spill] sm:$0xff]  ;;  %v3225_v25 = vadd.f32 %v5918_v24, %v3196_v36  ;;  %v3779_v6 = vmul.f32 %v5969_v15, %v5922_v53  ;;  %vm3845_vm8 = vcmp.eq.f32.partialorder %v5962_v20, inf }
 0x338   :  { %v2880_v51 = vadd.f32 %v6664_v63, %v2851_v44  ;;  %v6665_v59 = vld [vmem:[#allocation201_spill] sm:$0xff]  ;;  %v6666_v14 = vld [vmem:[#allocation87_spill] sm:$0xff]  ;;  %v2761_v48 = vadd.f32 %v6670_v55, %v2732_v21  ;;  %4074 = vmatpush.msra.mxu0 %v4009_v9  ;;  %4103 = vmatpush.msra.mxu1 %v4025_v35  ;;  %v3198_v44 = vpop.f32.mrf.mxu2  ;;  %v6676_v54 = vld [vmem:[#allocation88_spill] sm:$0xff]  ;;  %v3170_v29 = vadd.f32 %v3169_v19, %v3141_v52  ;;  %v5972_v63 = vpop.f32.mrf.mxu0  ;;  %4321 = vrsqrt.f32 %v5955_v27 }
 0x339   :  { %v2964_v43 = vadd.f32 %v6665_v59, %v2935_v60  ;;  %v1223_v50 = vld [vmem:[#allocation5 + $0x2348] sm:$0xff]  ;;  %v1981_v1 = vadd.f32 %v6666_v14, %v5836_v0  ;;  %v6669_v26 = vld [vmem:[#allocation207_spill] sm:$0xff]  ;;  %v4024_v0 = vld [vmem:[#allocation7 + $0xf0] sm:$0xff]  ;;  %v2706_v13 = vadd.f32 %v6674_v37, %v2677_v4  ;;  %v3726_v19 = vmul.f32 %v3225_v25, %v3225_v25 }
 0x33a   :  { %v2909_v2 = vadd.f32 %v6667_v56, %v2880_v51  ;;  %3623 = vmatmul.f32.vlgmr.msrb.gmra.mxu1 %v6669_v26  ;;  %v4041_v45 = vld [vmem:[#allocation7 + $0x178] sm:$0xff]  ;;  %3680 = vmatpush.msrb.mxu3 %v1223_v50  ;;  %v4007_v3 = vld [vmem:[#allocation7 + $0x68] sm:$0xff]  ;;  %v6677_v22 = vld [vmem:[#allocation86_spill] sm:$0xff]  ;;  %v3724_v33 = vmul.f32 %v2761_v48, %v2761_v48  ;;  %v3199_v35 = vadd.f32 %v3198_v44, %v3170_v29  ;;  %4323 = vrsqrt.f32 %v5962_v20 }
 0x33b   :  { %v6673_v62 = vld [vmem:[#allocation203_spill] sm:$0xff]  ;;  %3681 = vmatmul.f32.vlgmr.msrb.gmra.mxu3 %v6675_v57  ;;  %4132 = vmatpush.msra.mxu2 %v4041_v45  ;;  %v4023_v12 = vld [vmem:[#allocation7 + $0xe8] sm:$0xff]  ;;  %v2010_v18 = vadd.f32 %v6676_v54, %v1981_v1  ;;  %v2065_v10 = vadd.f32 %v6677_v22, %v2036_v8  ;;  %v4006_v4 = vld [vmem:[#allocation7 + $0x60] sm:$0xff]  ;;  %v3755_v8 = vmul.f32 %v5950_v41, %v5895_v42  ;;  %v5981_v47 = vpop.f32.mrf.mxu1  ;;  %vm3833_vm7 = vcmp.eq.f32.partialorder %v5955_v27, inf }
 0x33c   :  { %v2993_v58 = vadd.f32 %v6673_v62, %v2964_v43  ;;  %v6678_v11 = vld [vmem:[#allocation205_spill] sm:$0xff]  ;;  %4075 = vmatpush.msra.mxu0 %v4008_v38  ;;  %4104 = vmatpush.msra.mxu1 %v4024_v0  ;;  %v6679_v21 = vld [vmem:[#allocation179_spill] sm:$0xff]  ;;  %v4022_v24 = vld [vmem:[#allocation7 + $0xe0] sm:$0xff]  ;;  %v3767_v43 = vmul.f32 %v5958_v31, %v5910_v7  ;;  %v5988_v26 = vadd.f32 %v3724_v33, %v5771_v16  ;;  %v5992_v0 = vpop.eup %4319  ;;  %vm3835_vm10 = vcmp.eq.f32.partialorder %v5955_v27, 0.0 }
 0x33d   :  { %v2938_v40 = vadd.f32 %v6678_v11, %v2909_v2  ;;  %v4039_v60 = vld [vmem:[#allocation7 + $0x168] sm:$0xff]  ;;  %v2735_v28 = vadd.f32 %v6679_v21, %v2706_v13  ;;  %4133 = vmatpush.msra.mxu2 %v4040_v17  ;;  %v4005_v9 = vld [vmem:[#allocation7 + $0x58] sm:$0xff]  ;;  %v3706_v36 = vmul.f32 %v2065_v10, %v2065_v10  ;;  %v4038_v56 = vld [vmem:[#allocation7 + $0x160] sm:$0xff]  ;;  %v3756_v38 = vmul.f32 %v5950_v41, %v3755_v8 }
 0x33e   :  { %v3725_v51 = vmul.f32 %v2993_v58, %v2993_v58  ;;  %v6680_v23 = vld [vmem:[#allocation209_spill] sm:$0xff]  ;;  %4076 = vmatpush.msra.mxu0 %v4007_v3  ;;  %4105 = vmatpush.msra.mxu1 %v4023_v12  ;;  %v4021_v2 = vld [vmem:[#allocation7 + $0xd8] sm:$0xff]  ;;  %v6683_v45 = vld [vmem:[#allocation180_spill] sm:$0xff]  ;;  %v3768_v17 = vmul.f32 %v5958_v31, %v3767_v43  ;;  %v3228_v13 = vadd.f32 %v3227_v39, %v3199_v35  ;;  %v6001_v57 = vpop.eup %4321  ;;  %4325 = vrsqrt.f32 %v5988_v26 }
 0x33f   :  { %v2967_v59 = vadd.f32 %v6680_v23, %v2938_v40  ;;  %v6681_v50 = vld [vmem:[#allocation57_spill] sm:$0xff]  ;;  %4134 = vmatpush.msra.mxu2 %v4039_v60  ;;  %v2764_v61 = vadd.f32 %v6683_v45, %v2735_v28  ;;  %v4489_v55 = vld [vmem:[#allocation2 + $0x60] sm:$0xff]  ;;  %v4004_v46 = vld [vmem:[#allocation7 + $0x50] sm:$0xff]  ;;  %v5999_v37 = vadd.f32 %v3726_v19, %v3706_v36  ;;  %v3780_v10 = vmul.f32 %v5969_v15, %v3779_v6  ;;  %v6015_v23 = vpop.f32.mrf.mxu3 }
 0x340   :  { %v1807_v32 = vadd.f32 %v6681_v50, %v1778_v34  ;;  %v6682_v14 = vld [vmem:[#allocation89_spill] sm:$0xff]  ;;  %4077 = vmatpush.msra.mxu0 %v4006_v4  ;;  %4106 = vmatpush.msra.mxu1 %v4022_v24  ;;  %v5995_v52 = vadd.f32 %v3725_v51, %v5811_v30  ;;  %v6684_v5 = vld [vmem:[#allocation211_spill] sm:$0xff]  ;;  %v4491_v62 = vld [vmem:[#allocation2 + $0x70] sm:$0xff]  ;;  %v6006_v11 = vpop.f32.mrf.mxu2  ;;  %v6008_v40 = vpop.eup %4323  ;;  %v3815_v28 = vmul.f32 %v5992_v0, %v5941_v49  ;;  %v3757_v8 = vmul.f32 0.5, %v3756_v38 }
 0x341   :  { %v2039_v1 = vadd.f32 %v6682_v14, %v2010_v18  ;;  %3597 = vmatmul.f32.gmra.mxu0 %v4489_v55  ;;  %v4490_v48 = vld [vmem:[#allocation2 + $0x68] sm:$0xff]  ;;  %v2996_v34 = vadd.f32 %v6684_v5, %v2967_v59  ;;  %3655 = vmatmul.f32.gmra.mxu2 %v4491_v62  ;;  %v4037_v16 = vld [vmem:[#allocation7 + $0x158] sm:$0xff]  ;;  %v4020_v58 = vld [vmem:[#allocation7 + $0xd0] sm:$0xff]  ;;  %v3729_v33 = vmul.f32 %v2764_v61, %v2764_v61  ;;  %v3769_v51 = vmul.f32 0.5, %v3768_v17 }
 0x342   :  { %3626 = vmatmul.f32.gmra.mxu1 %v4490_v48  ;;  %4078 = vmatpush.msra.mxu0 %v4005_v9  ;;  %v4003_v44 = vld [vmem:[#allocation7 + $0x48] sm:$0xff]  ;;  %v6685_v3 = vld [vmem:[#allocation58_spill] sm:$0xff]  ;;  %v4492_v54 = vld [vmem:[#allocation2 + $0x78] sm:$0xff]  ;;  %4327 = vrsqrt.f32 %v5995_v52  ;;  %v6020_v9 = vpop.f32.mrf.mxu0  ;;  %v3827_v19 = vmul.f32 %v6001_v57, %v5955_v27  ;;  %vm3847_vm11 = vcmp.eq.f32.partialorder %v5962_v20, 0.0  ;;  %vm3881_vm12 = vcmp.eq.f32.partialorder %v5988_v26, inf }
 0x343   :  { %4135 = vmatpush.msra.mxu2 %v4038_v56  ;;  %4107 = vmatpush.msra.mxu1 %v4021_v2  ;;  %v1836_v30 = vadd.f32 %v6685_v3, %v1807_v32  ;;  %v6686_v12 = vld [vmem:[#allocation90_spill] sm:$0xff]  ;;  %v4019_v22 = vld [vmem:[#allocation7 + $0xc8] sm:$0xff]  ;;  %v4002_v21 = vld [vmem:[#allocation7 + $0x40] sm:$0xff]  ;;  %v3730_v4 = vmul.f32 %v2996_v34, %v2996_v34  ;;  %v3731_v32 = vmul.f32 %v3228_v13, %v3228_v13  ;;  %4329 = vrsqrt.f32 %v5999_v37  ;;  %v6030_v48 = vpop.f32.mrf.mxu1 }
 0x344   :  { %v2068_v25 = vadd.f32 %v6686_v12, %v2039_v1  ;;  %3684 = vmatmul.f32.gmra.mxu3 %v4492_v54  ;;  %4079 = vmatpush.msra.mxu0 %v4004_v46  ;;  %v4036_v18 = vld [vmem:[#allocation7 + $0x150] sm:$0xff]  ;;  %v6687_v60 = vld [vmem:[#allocation29_spill] sm:$0xff]  ;;  %v4018_v29 = vld [vmem:[#allocation7 + $0xc0] sm:$0xff]  ;;  %v3781_v1 = vmul.f32 0.5, %v3780_v10  ;;  %v3839_v56 = vmul.f32 %v6008_v40, %v5962_v20  ;;  %v3816_v46 = vmul.f32 %v5992_v0, %v3815_v28  ;;  %v6035_v17 = vpop.eup %4325 }
 0x345   :  { %v3709_v39 = vmul.f32 %v6687_v60, %v6687_v60  ;;  %4136 = vmatpush.msra.mxu2 %v4037_v16  ;;  %4108 = vmatpush.msra.mxu1 %v4020_v58  ;;  %v4035_v24 = vld [vmem:[#allocation7 + $0x148] sm:$0xff]  ;;  %v6688_v59 = vld [vmem:[#allocation91_spill] sm:$0xff]  ;;  %v6689_v43 = vld [vmem:[#allocation92_spill] sm:$0xff]  ;;  %v3710_v35 = vmul.f32 %v1836_v30, %v1836_v30  ;;  %v3758_v16 = vsub.f32 1.5, %v3757_v8  ;;  %v3770_v58 = vsub.f32 1.5, %v3769_v51 }
 0x346   :  { %4080 = vmatpush.msra.mxu0 %v4003_v44  ;;  %v2117_v50 = vadd.f32 %v6689_v43, %v6688_v59  ;;  %v3711_v36 = vmul.f32 %v2068_v25, %v2068_v25  ;;  %v4001_v14 = vld [vmem:[#allocation7 + $0x38] sm:$0xff]  ;;  %v6690_v2 = vld [vmem:[#allocation93_spill] sm:$0xff]  ;;  %v4034_v61 = vld [vmem:[#allocation7 + $0x140] sm:$0xff]  ;;  %v3828_v12 = vmul.f32 %v6001_v57, %v3827_v19  ;;  %v3875_v59 = vmul.f32 %v6035_v17, %v5988_v26 }
 0x347   :  { %4137 = vmatpush.msra.mxu2 %v4036_v18  ;;  %4109 = vmatpush.msra.mxu1 %v4019_v22  ;;  %v6028_v45 = vadd.f32 %v3729_v33, %v3709_v39  ;;  %v4017_v55 = vld [vmem:[#allocation7 + $0xb8] sm:$0xff]  ;;  %v6033_v38 = vadd.f32 %v3730_v4, %v3710_v35  ;;  %v4493_v5 = vld [vmem:[#allocation2 + $0xa0] sm:$0xff]  ;;  %v4494_v34 = vld [vmem:[#allocation2 + $0xa8] sm:$0xff]  ;;  %v3782_v18 = vsub.f32 1.5, %v3781_v1  ;;  %v3840_v22 = vmul.f32 %v6008_v40, %v3839_v56 }
 0x348   :  { %4081 = vmatpush.msra.mxu0 %v4002_v21  ;;  %v2146_v6 = vadd.f32 %v6690_v2, %v2117_v50  ;;  %v4000_v62 = vld [vmem:[#allocation7 + $0x30] sm:$0xff]  ;;  %v4033_v13 = vld [vmem:[#allocation7 + $0x138] sm:$0xff]  ;;  %v6037_v30 = vadd.f32 %v3731_v32, %v3711_v36  ;;  %v6040_v25 = vpop.eup %4327  ;;  %v3999_v54 = vld [vmem:[#allocation7 + $0x28] sm:$0xff]  ;;  %v6046_v4 = vmul.f32 0.5, %v3816_v46  ;;  %v3771_v8 = vmul.f32 %v5958_v31, %v3770_v58  ;;  %v6051_v51 = vpop.f32.mrf.mxu2 }
 0x349   :  { %4138 = vmatpush.msra.mxu2 %v4035_v24  ;;  %4110 = vmatpush.msra.mxu1 %v4018_v29  ;;  %v4495_v44 = vld [vmem:[#allocation2 + $0xb0] sm:$0xff]  ;;  %v6043_v10 = vpop.eup %4329  ;;  %v4496_v33 = vld [vmem:[#allocation2 + $0xb8] sm:$0xff]  ;;  %v4015_v28 = vld [vmem:[#allocation7 + $0xa8] sm:$0xff]  ;;  %4331 = vrsqrt.f32 %v6028_v45  ;;  %v3759_v29 = vmul.f32 %v5950_v41, %v3758_v16  ;;  %v6057_v35 = vmul.f32 0.5, %v3828_v12  ;;  %v3887_v36 = vmul.f32 %v6040_v25, %v5995_v52 }
 0x34a   :  { %3600 = vmatmul.f32.gmra.mxu0 %v4493_v5  ;;  %3629 = vmatmul.f32.gmra.mxu1 %v4494_v34  ;;  %v4016_v3 = vld [vmem:[#allocation7 + $0xb0] sm:$0xff]  ;;  %v3998_v24 = vld [vmem:[#allocation7 + $0x20] sm:$0xff]  ;;  %4333 = vrsqrt.f32 %v6033_v38  ;;  %v6692_v43 = vld [vmem:[#allocation107_spill] sm:$0xff]  ;;  %v3783_v41 = vmul.f32 %v5969_v15, %v3782_v18  ;;  %v6063_v31 = vmul.f32 0.5, %v3840_v22  ;;  %v3899_v1 = vmul.f32 %v6043_v10, %v5999_v37  ;;  %v6072_v46 = vpop.f32.mrf.mxu0 }
 0x34b   :  { %3658 = vmatmul.f32.gmra.mxu2 %v4495_v44  ;;  %4082 = vmatpush.msra.mxu0 %v4001_v14  ;;  %v6691_v60 = vld [vmem:[#allocation94_spill] sm:$0xff]  ;;  %v4031_v32 = vld [vmem:[#allocation7 + $0x128] sm:$0xff]  ;;  %v4014_v19 = vld [vmem:[#allocation7 + $0xa0] sm:$0xff]  ;;  %4335 = vrsqrt.f32 %v6037_v30  ;;  %v6065_v14 = vpop.f32.mrf.mxu3  ;;  %v3760_v34 = vmul.f32 %v3759_v29, %v5895_v42  ;;  %v3876_v16 = vmul.f32 %v6035_v17, %v3875_v59  ;;  %vm3893_vm13 = vcmp.eq.f32.partialorder %v5995_v52, inf }
 0x34c   :  { %4139 = vmatpush.msra.mxu2 %v4034_v61  ;;  %4111 = vmatpush.msra.mxu1 %v4017_v55  ;;  %v2175_v39 = vadd.f32 %v6691_v60, %v2146_v6  ;;  %v4032_v21 = vld [vmem:[#allocation7 + $0x130] sm:$0xff]  ;;  %v6693_v56 = vld [vmem:[#allocation95_spill] sm:$0xff]  ;;  %v6694_v2 = vld [vmem:[#allocation96_spill] sm:$0xff]  ;;  %v3818_v55 = vsub.f32 1.5, %v6046_v4  ;;  %v3830_v60 = vsub.f32 1.5, %v6057_v35  ;;  %v3784_v29 = vmul.f32 %v3783_v41, %v5922_v53 }
 0x34d   :  { %3687 = vmatmul.f32.gmra.mxu3 %v4496_v33  ;;  %4083 = vmatpush.msra.mxu0 %v4000_v62  ;;  %v2120_v6 = vadd.f32 %v6694_v2, %v6693_v56  ;;  %v3997_v61 = vld [vmem:[#allocation7 + $0x18] sm:$0xff]  ;;  %v4030_v5 = vld [vmem:[#allocation7 + $0x120] sm:$0xff]  ;;  %v3772_v62 = vmul.f32 %v3771_v8, %v5910_v7  ;;  %v6695_v44 = vld [vmem:[#allocation97_spill] sm:$0xff]  ;;  %v3888_v33 = vmul.f32 %v6040_v25, %v3887_v36  ;;  %v3842_v8 = vsub.f32 1.5, %v6063_v31 }
 0x34e   :  { %4140 = vmatpush.msra.mxu2 %v4033_v13  ;;  %4112 = vmatpush.msra.mxu1 %v4016_v3  ;;  %v2204_v50 = vadd.f32 %v6692_v43, %v2175_v39  ;;  %v4013_v15 = vld [vmem:[#allocation7 + $0x98] sm:$0xff]  ;;  %v6696_v3 = vld [vmem:[#allocation108_spill] sm:$0xff]  ;;  %v4498_v18 = vld [vmem:[#allocation2 + $0xe8] sm:$0xff]  ;;  %v6086_v39 = vpop.f32.mrf.mxu1  ;;  %v3900_v59 = vmul.f32 %v6043_v10, %v3899_v1  ;;  %v3762_v31 = vsel %vm3761_vm0, %v5895_v42, %v3760_v34  ;;  %v3877_v56 = vmul.f32 0.5, %v3876_v16 }
 0x34f   :  { %4084 = vmatpush.msra.mxu0 %v3999_v54  ;;  %v6077_v58 = vpop.eup %4331  ;;  %v6080_v13 = vadd.f32 %v6695_v44, %v2120_v6  ;;  %v4497_v54 = vld [vmem:[#allocation2 + $0xe0] sm:$0xff]  ;;  %v3996_v22 = vld [vmem:[#allocation7 + $0x10] sm:$0xff]  ;;  %v4029_v4 = vld [vmem:[#allocation7 + $0x118] sm:$0xff]  ;;  %v3774_v1 = vsel %vm3773_vm2, %v5910_v7, %v3772_v62  ;;  %v3786_v16 = vsel %vm3785_vm3, %v5922_v53, %v3784_v29  ;;  %v3843_v44 = vmul.f32 %v6008_v40, %v3842_v8 }
 0x350   :  { %4141 = vmatpush.msra.mxu2 %v4032_v21  ;;  %4113 = vmatpush.msra.mxu1 %v4015_v28  ;;  %v6083_v12 = vadd.f32 %v6696_v3, %v2204_v50  ;;  %v6089_v21 = vpop.eup %4333  ;;  %v4499_v28 = vld [vmem:[#allocation2 + $0xf0] sm:$0xff]  ;;  %v3995_v50 = vld [vmem:[#allocation7 + $0x8] sm:$0xff]  ;;  %v4500_v35 = vld [vmem:[#allocation2 + $0xf8] sm:$0xff]  ;;  %v3935_v2 = vmul.f32 %v6077_v58, %v6028_v45  ;;  %v3901_v3 = vmul.f32 0.5, %v3900_v59  ;;  %vm3905_vm14 = vcmp.eq.f32.partialorder %v5999_v37, inf }
 0x351   :  { %4085 = vmatpush.msra.mxu0 %v3998_v24  ;;  %v4012_v24 = vld [vmem:[#allocation7 + $0x90] sm:$0xff]  ;;  %v6095_v43 = vpop.eup %4335  ;;  %v4011_v41 = vld [vmem:[#allocation7 + $0x88] sm:$0xff]  ;;  %v4057_v6 = vld [vmem:[#allocation7 + $0x1f8] sm:$0xff]  ;;  %vm3883_vm15 = vcmp.eq.f32.partialorder %v5988_v26, 0.0  ;;  %vm3895_vm0 = vcmp.eq.f32.partialorder %v5995_v52, 0.0  ;;  %vm3941_vm2 = vcmp.eq.f32.partialorder %v6028_v45, inf }
 0x352   :  { %4142 = vmatpush.msra.mxu2 %v4031_v32  ;;  %4114 = vmatpush.msra.mxu1 %v4014_v19  ;;  %v3764_v32 = vand.u32 2147483648, %v5895_v42  ;;  %v3819_v19 = vmul.f32 %v5992_v0, %v3818_v55  ;;  %v4028_v36 = vld [vmem:[#allocation7 + $0x110] sm:$0xff]  ;;  %v3831_v0 = vmul.f32 %v6001_v57, %v3830_v60  ;;  %v3889_v55 = vmul.f32 0.5, %v3888_v33  ;;  %v4027_v34 = vld [vmem:[#allocation7 + $0x108] sm:$0xff]  ;;  %v4010_v62 = vld [vmem:[#allocation7 + $0x80] sm:$0xff] }
 0x353   :  { %3603 = vmatmul.f32.gmra.mxu0 %v4497_v54  ;;  %3632 = vmatmul.f32.gmra.mxu1 %v4498_v18  ;;  %v6113_v54 = vpop.f32.mrf.mxu2  ;;  %v3959_v18 = vmul.f32 %v6095_v43, %v6037_v30  ;;  %v3788_v60 = vand.u32 2147483648, %v5922_v53  ;;  %v4026_v40 = vld [vmem:[#allocation7 + $0x100] sm:$0xff]  ;;  %v4055_v42 = vld [vmem:[#allocation7 + $0x1e8] sm:$0xff]  ;;  %v3902_v53 = vsub.f32 1.5, %v3901_v3  ;;  %v3824_v3 = vand.u32 2147483648, %v5941_v49 }
 0x354   :  { %3661 = vmatmul.f32.gmra.mxu2 %v4499_v28  ;;  %4086 = vmatpush.msra.mxu0 %v3997_v61  ;;  %v3994_v61 = vld [vmem:[#allocation7] sm:$0xff]  ;;  %v3765_v57 = vsel %vm3763_vm1, %v3764_v32, %v3762_v31  ;;  %v3820_v33 = vmul.f32 %v3819_v19, %v5941_v49  ;;  %v3878_v28 = vsub.f32 1.5, %v3877_v56  ;;  %v3832_v59 = vmul.f32 %v3831_v0, %v5955_v27  ;;  %v6128_v32 = vpop.f32.mrf.mxu0 }
 0x355   :  { %4143 = vmatpush.msra.mxu2 %v4030_v5  ;;  %4115 = vmatpush.msra.mxu1 %v4013_v15  ;;  %v3947_v5 = vmul.f32 %v6089_v21, %v6033_v38  ;;  %v4056_v15 = vld [vmem:[#allocation7 + $0x1f0] sm:$0xff]  ;;  %v3789_v8 = vsel %vm3787_vm5, %v3788_v60, %v3786_v16  ;;  %vm3907_vm1 = vcmp.eq.f32.partialorder %v5999_v37, 0.0  ;;  %vm3953_vm3 = vcmp.eq.f32.partialorder %v6033_v38, inf }
 0x356   :  { %3690 = vmatmul.f32.gmra.mxu3 %v4500_v35  ;;  %4087 = vmatpush.msra.mxu0 %v3996_v22  ;;  %v3776_v22 = vand.u32 2147483648, %v5910_v7  ;;  %v3844_v7 = vmul.f32 %v3843_v44, %v5962_v20  ;;  %v3960_v35 = vmul.f32 %v6095_v43, %v3959_v18  ;;  %v4052_v44 = vld [vmem:[#allocation7 + $0x1d0] sm:$0xff]  ;;  %v4051_v18 = vld [vmem:[#allocation7 + $0x1c8] sm:$0xff]  ;;  %vm3943_vm5 = vcmp.eq.f32.partialorder %v6028_v45, 0.0 }
 0x357   :  { %4144 = vmatpush.msra.mxu2 %v4029_v4  ;;  %4116 = vmatpush.msra.mxu1 %v4012_v24  ;;  %v6124_v4 = vpop.f32.mrf.mxu3  ;;  %v3936_v24 = vmul.f32 %v6077_v58, %v3935_v2  ;;  %v3948_v19 = vmul.f32 %v6089_v21, %v3947_v5  ;;  %v6138_v2 = vpop.f32.mrf.mxu1 }
 0x358   :  { %4088 = vmatpush.msra.mxu0 %v3995_v50  ;;  %4161 = vmatpush.msra.mxu3 %v4057_v6  ;;  %v3777_v29 = vsel %vm3775_vm4, %v3776_v22, %v3774_v1  ;;  %v3890_v50 = vsub.f32 1.5, %v3889_v55  ;;  %v6698_v1 = vld [vmem:[#allocation109_spill] sm:$0xff]  ;;  %v3822_v6 = vsel %vm3821_vm6, %v5941_v49, %v3820_v33  ;;  %v4053_v55 = vld [vmem:[#allocation7 + $0x1d8] sm:$0xff]  ;;  %v3961_v16 = vmul.f32 0.5, %v3960_v35 }
 0x359   :  { %4145 = vmatpush.msra.mxu2 %v4028_v36  ;;  %4117 = vmatpush.msra.mxu1 %v4011_v41  ;;  %v4054_v36 = vld [vmem:[#allocation7 + $0x1e0] sm:$0xff]  ;;  %v6697_v41 = vld [vmem:[#allocation98_spill] sm:$0xff]  ;;  %v2262_v56 = vadd.f32 %v6698_v1, %v6083_v12  ;;  %v3937_v0 = vmul.f32 0.5, %v3936_v24  ;;  %v3834_v12 = vsel %vm3833_vm7, %v5955_v27, %v3832_v59  ;;  %v6700_v59 = vld [vmem:[#allocation111_spill] sm:$0xff]  ;;  %vm3965_vm4 = vcmp.eq.f32.partialorder %v6037_v30, inf }
 0x35a   :  { %4089 = vmatpush.msra.mxu0 %v3994_v61  ;;  %4162 = vmatpush.msra.mxu3 %v4056_v15  ;;  %v2178_v31 = vadd.f32 %v6697_v41, %v6080_v13  ;;  %v3879_v61 = vmul.f32 %v6035_v17, %v3878_v28  ;;  %v3277_v13 = vadd.f32 %v5981_v47, %v5972_v63  ;;  %v3836_v63 = vand.u32 2147483648, %v5955_v27  ;;  %v6699_v24 = vld [vmem:[#allocation110_spill] sm:$0xff] }
 0x35b   :  { %4146 = vmatpush.msra.mxu2 %v4027_v34  ;;  %4118 = vmatpush.msra.mxu1 %v4010_v62  ;;  %v3891_v5 = vmul.f32 %v6040_v25, %v3890_v50  ;;  %v3846_v15 = vsel %vm3845_vm8, %v5962_v20, %v3844_v7  ;;  %v3903_v34 = vmul.f32 %v6043_v10, %v3902_v53  ;;  %v3949_v62 = vmul.f32 0.5, %v3948_v19  ;;  %v6157_v10 = vpop.f32.mrf.mxu2  ;;  %v4049_v19 = vld [vmem:[#allocation7 + $0x1b8] sm:$0xff] }
 0x35c   :  { %4090 = vmatmul.f32.vlgmr.msra.gmra.mxu0 %v3765_v57  ;;  %4119 = vmatmul.f32.vlgmr.msra.gmra.mxu1 %v3777_v29  ;;  %v3306_v17 = vadd.f32 %v6006_v11, %v3277_v13  ;;  %v3848_v47 = vand.u32 2147483648, %v5962_v20  ;;  %v3938_v25 = vsub.f32 1.5, %v3937_v0  ;;  %v3825_v57 = vsel %vm3823_vm9, %v3824_v3, %v3822_v6  ;;  %v4050_v20 = vld [vmem:[#allocation7 + $0x1c0] sm:$0xff]  ;;  %v4048_v6 = vld [vmem:[#allocation7 + $0x1b0] sm:$0xff]  ;;  %v4047_v13 = vld [vmem:[#allocation7 + $0x1a8] sm:$0xff] }
 0x35d   :  { %4147 = vmatpush.msra.mxu2 %v4026_v40  ;;  %4163 = vmatpush.msra.mxu3 %v4055_v42  ;;  %v3837_v22 = vsel %vm3835_vm10, %v3836_v63, %v3834_v12  ;;  %v3880_v60 = vmul.f32 %v3879_v61, %v5988_v26  ;;  %v3892_v33 = vmul.f32 %v3891_v5, %v5995_v52  ;;  %v3950_v40 = vsub.f32 1.5, %v3949_v62 }
 0x35e   :  { %4148 = vmatmul.f32.vlgmr.msra.gmra.mxu2 %v3789_v8  ;;  %v3849_v11 = vsel %vm3847_vm11, %v3848_v47, %v3846_v15  ;;  %v3904_v49 = vmul.f32 %v3903_v34, %v5999_v37  ;;  %v3962_v27 = vsub.f32 1.5, %v3961_v16  ;;  %v2291_v42 = vadd.f32 %v6699_v24, %v2262_v56  ;;  %v3363_v8 = vpop.f32.mrf.mxu0 }
 0x35f   :  { %4164 = vmatpush.msra.mxu3 %v4054_v36  ;;  %v6162_v28 = vpop.f32.mrf.mxu3  ;;  %v3335_v29 = vadd.f32 %v6015_v23, %v3306_v17  ;;  %v2207_v50 = vadd.f32 %v6700_v59, %v2178_v31  ;;  %v3884_v7 = vand.u32 2147483648, %v5988_v26  ;;  %v3939_v53 = vmul.f32 %v6077_v58, %v3938_v25  ;;  %v3392_v23 = vpop.f32.mrf.mxu1  ;;  %v6704_v17 = vld [vmem:[#allocation112_spill] sm:$0xff] }
 0x360   :  { %v3882_v35 = vsel %vm3881_vm12, %v5988_v26, %v3880_v60  ;;  %v3894_v41 = vsel %vm3893_vm13, %v5995_v52, %v3892_v33  ;;  %v3906_v31 = vsel %vm3905_vm14, %v5999_v37, %v3904_v49  ;;  %v3951_v1 = vmul.f32 %v6089_v21, %v3950_v40  ;;  %v6701_v26 = vld [vmem:[#allocation99_spill] sm:$0xff]  ;;  %v4044_v40 = vld [vmem:[#allocation7 + $0x190] sm:$0xff] }
 0x361   :  { %4165 = vmatpush.msra.mxu3 %v4053_v55  ;;  %v3364_v36 = vadd.f32 %v3363_v8, %v3335_v29  ;;  %v3963_v56 = vmul.f32 %v6095_v43, %v3962_v27  ;;  %v3280_v58 = vadd.f32 %v6030_v48, %v6020_v9  ;;  %v3896_v61 = vand.u32 2147483648, %v5995_v52  ;;  %v6702_v48 = vld [vmem:[#allocation100_spill] sm:$0xff]  ;;  %v6705_v29 = vld [vmem:[#allocation113_spill] sm:$0xff] }
 0x362   :  { %v3908_v0 = vand.u32 2147483648, %v5999_v37  ;;  %v3885_v55 = vsel %vm3883_vm15, %v3884_v7, %v3882_v35  ;;  %v3940_v21 = vmul.f32 %v3939_v53, %v6028_v45  ;;  %v2123_v15 = vadd.f32 %v6702_v48, %v6701_v26  ;;  %v4046_v37 = vld [vmem:[#allocation7 + $0x1a0] sm:$0xff] }
 0x363   :  { %4166 = vmatpush.msra.mxu3 %v4052_v44  ;;  %v3309_v43 = vadd.f32 %v6051_v51, %v3280_v58  ;;  %v3897_v12 = vsel %vm3895_vm0, %v3896_v61, %v3894_v41  ;;  %v3393_v9 = vadd.f32 %v3392_v23, %v3364_v36  ;;  %v3952_v34 = vmul.f32 %v3951_v1, %v6033_v38  ;;  %v3421_v62 = vpop.f32.mrf.mxu2  ;;  %v6703_v51 = vld [vmem:[#allocation101_spill] sm:$0xff]  ;;  %v4042_v35 = vld [vmem:[#allocation7 + $0x180] sm:$0xff]  ;;  %v6706_v36 = vld [vmem:[#allocation102_spill] sm:$0xff] }
 0x364   :  { %4093 = vmatmul.f32.gmra.mxu0 %v3825_v57  ;;  %4122 = vmatmul.f32.gmra.mxu1 %v3837_v22  ;;  %v3909_v5 = vsel %vm3907_vm1, %v3908_v0, %v3906_v31  ;;  %v3964_v52 = vmul.f32 %v3963_v56, %v6037_v30  ;;  %v2152_v44 = vadd.f32 %v6703_v51, %v2123_v15  ;;  %v3944_v60 = vand.u32 2147483648, %v6028_v45  ;;  %v6710_v58 = vld [vmem:[#allocation104_spill] sm:$0xff] }
 0x365   :  { %4167 = vmatpush.msra.mxu3 %v4051_v18  ;;  %v3422_v16 = vadd.f32 %v3421_v62, %v3393_v9  ;;  %v2236_v3 = vadd.f32 %v6704_v17, %v2207_v50  ;;  %v3697_v63 = vmul.f32 %v2291_v42, %v2291_v42  ;;  %v3942_v47 = vsel %vm3941_vm2, %v6028_v45, %v3940_v21  ;;  %v4045_v18 = vld [vmem:[#allocation7 + $0x198] sm:$0xff]  ;;  %v4043_v45 = vld [vmem:[#allocation7 + $0x188] sm:$0xff] }
 0x366   :  { %4151 = vmatmul.f32.gmra.mxu2 %v3849_v11  ;;  %v3338_v57 = vadd.f32 %v6065_v14, %v3309_v43  ;;  %v3366_v22 = vpop.f32.mrf.mxu0  ;;  %v3954_v33 = vsel %vm3953_vm3, %v6033_v38, %v3952_v34  ;;  %v3966_v49 = vsel %vm3965_vm4, %v6037_v30, %v3964_v52  ;;  %v3956_v27 = vand.u32 2147483648, %v6033_v38  ;;  %v6713_v62 = vld [vmem:[#allocation117_spill] sm:$0xff] }
 0x367   :  { %4168 = vmatpush.msra.mxu3 %v4050_v20  ;;  %v3450_v25 = vpop.f32.mrf.mxu3  ;;  %v3968_v14 = vand.u32 2147483648, %v6037_v30  ;;  %v3395_v24 = vpop.f32.mrf.mxu1  ;;  %v2265_v8 = vadd.f32 %v6705_v29, %v2236_v3  ;;  %v3945_v59 = vsel %vm3943_vm5, %v3944_v60, %v3942_v47  ;;  %vm3955_vm6 = vcmp.eq.f32.partialorder %v6033_v38, 0.0 }
 0x368   :  { %v3451_v11 = vadd.f32 %v3450_v25, %v3422_v16  ;;  %v3367_v20 = vadd.f32 %v3366_v22, %v3338_v57  ;;  %vm3967_vm7 = vcmp.eq.f32.partialorder %v6037_v30, 0.0  ;;  %v3283_v50 = vadd.f32 %v6086_v39, %v6072_v46  ;;  %v6707_v30 = vld [vmem:[#allocation115_spill] sm:$0xff]  ;;  %v6708_v39 = vld [vmem:[#allocation114_spill] sm:$0xff] }
 0x369   :  { %4169 = vmatpush.msra.mxu3 %v4049_v19  ;;  %v3957_v7 = vsel %vm3955_vm6, %v3956_v27, %v3954_v33  ;;  %v3969_v53 = vsel %vm3967_vm7, %v3968_v14, %v3966_v49  ;;  %v2181_v23 = vadd.f32 %v6706_v36, %v2152_v44  ;;  %v2294_v1 = vadd.f32 %v6708_v39, %v2265_v8  ;;  %v6714_v44 = vld [vmem:[#allocation106_spill] sm:$0xff] }
 0x36a   :  { %v3717_v42 = vmul.f32 %v3451_v11, %v3451_v11  ;;  %v3312_v41 = vadd.f32 %v6113_v54, %v3283_v50  ;;  %v3396_v31 = vadd.f32 %v3395_v24, %v3367_v20  ;;  %v3286_v16 = vadd.f32 %v6138_v2, %v6128_v32  ;;  %v6716_v22 = vld [vmem:[#allocation118_spill] sm:$0xff]  ;;  %v6717_v20 = vld [vmem:[#allocation120_spill] sm:$0xff]  ;;  %v6718_v50 = vld [vmem:[#allocation121_spill] sm:$0xff] }
 0x36b   :  { %4170 = vmatpush.msra.mxu3 %v4048_v6  ;;  %v3424_v38 = vpop.f32.mrf.mxu2  ;;  %v2210_v46 = vadd.f32 %v6707_v30, %v2181_v23  ;;  %v6709_v6 = vld [vmem:[#allocation103_spill] sm:$0xff]  ;;  %v3702_v26 = vmul.f32 %v2294_v1, %v2294_v1  ;;  %v6719_v30 = vld [vmem:[#allocation122_spill] sm:$0xff] }
 0x36c   :  { %4096 = vmatmul.f32.gmra.mxu0 %v3885_v55  ;;  %4125 = vmatmul.f32.gmra.mxu1 %v3897_v12  ;;  %v6208_v19 = vadd.f32 %v3717_v42, %v3697_v63  ;;  %v3425_v56 = vadd.f32 %v3424_v38, %v3396_v31  ;;  %v2126_v61 = vadd.f32 %v6710_v58, %v6709_v6 }
 0x36d   :  { %4171 = vmatpush.msra.mxu3 %v4047_v13  ;;  %v3341_v55 = vadd.f32 %v6124_v4, %v3312_v41  ;;  %v6711_v13 = vld [vmem:[#allocation105_spill] sm:$0xff]  ;;  %v3315_v3 = vadd.f32 %v6157_v10, %v3286_v16  ;;  %v4073_v16 = vld [vmem:[#allocation7 + $0x278] sm:$0xff] }
 0x36e   :  { %4154 = vmatmul.f32.gmra.mxu2 %v3909_v5  ;;  %4337 = vrsqrt.f32 %v6208_v19  ;;  %v3369_v21 = vpop.f32.mrf.mxu0  ;;  %v2155_v43 = vadd.f32 %v6711_v13, %v2126_v61  ;;  %v6712_v5 = vld [vmem:[#allocation116_spill] sm:$0xff]  ;;  %vm3797_vm8 = vcmp.eq.f32.partialorder %v6208_v19, inf  ;;  %vm3799_vm9 = vcmp.eq.f32.partialorder %v6208_v19, 0.0  ;;  %4190 = vmatpush.msrb.mxu0 %v4073_v16 }
 0x36f   :  { %4172 = vmatpush.msra.mxu3 %v4046_v37  ;;  %v3453_v0 = vpop.f32.mrf.mxu3  ;;  %v2239_v9 = vadd.f32 %v6712_v5, %v2210_v46  ;;  %v3370_v48 = vadd.f32 %v3369_v21, %v3341_v55  ;;  %v3398_v15 = vpop.f32.mrf.mxu1  ;;  %4255 = vmatpush.msrb.mxu1 %v4073_v16 }
 0x370   :  { %v3454_v54 = vadd.f32 %v3453_v0, %v3425_v56  ;;  %v2184_v17 = vadd.f32 %v6714_v44, %v2155_v43  ;;  %4256 = vmatpush.msrb.mxu2 %v4073_v16 }
 0x371   :  { %4173 = vmatpush.msra.mxu3 %v4045_v18  ;;  %v2268_v37 = vadd.f32 %v6713_v62, %v2239_v9  ;;  %v3399_v63 = vadd.f32 %v3398_v15, %v3370_v48  ;;  %v6715_v18 = vld [vmem:[#allocation119_spill] sm:$0xff] }
 0x372   :  { %v3722_v34 = vmul.f32 %v3454_v54, %v3454_v54  ;;  %v2213_v57 = vadd.f32 %v6715_v18, %v2184_v17  ;;  %v4072_v18 = vld [vmem:[#allocation7 + $0x270] sm:$0xff] }
 0x373   :  { %4174 = vmatpush.msra.mxu3 %v4044_v40  ;;  %v3427_v47 = vpop.f32.mrf.mxu2  ;;  %v2297_v11 = vadd.f32 %v6716_v22, %v2268_v37  ;;  %v3344_v40 = vadd.f32 %v6162_v28, %v3315_v3  ;;  %v3800_v28 = vand.u32 2147483648, %v6208_v19  ;;  %4191 = vmatpush.msrb.mxu0 %v4072_v18 }
 0x374   :  { %4099 = vmatmul.f32.gmra.mxu0 %v3945_v59  ;;  %4128 = vmatmul.f32.gmra.mxu1 %v3957_v7  ;;  %v4338_v12 = vpop.eup %4337  ;;  %v3742_v51 = vadd.f32 %v3722_v34, %v3702_v26  ;;  %v3428_v60 = vadd.f32 %v3427_v47, %v3399_v63  ;;  %v2242_v24 = vadd.f32 %v6717_v20, %v2213_v57 }
 0x375   :  { %4175 = vmatpush.msra.mxu3 %v4043_v45  ;;  %v3791_v52 = vmul.f32 %v4338_v12, %v6208_v19  ;;  %v3707_v10 = vmul.f32 %v2297_v11, %v2297_v11  ;;  %4258 = vmatpush.msrb.mxu1 %v4072_v18 }
 0x376   :  { %4157 = vmatmul.f32.gmra.mxu2 %v3969_v53  ;;  %4339 = vrsqrt.f32 %v3742_v51  ;;  %v3372_v32 = vpop.f32.mrf.mxu0  ;;  %v2271_v7 = vadd.f32 %v6718_v50, %v2242_v24  ;;  %vm3857_vm10 = vcmp.eq.f32.partialorder %v3742_v51, inf  ;;  %vm3859_vm11 = vcmp.eq.f32.partialorder %v3742_v51, 0.0  ;;  %v4069_v24 = vld [vmem:[#allocation7 + $0x258] sm:$0xff] }
 0x377   :  { %4176 = vmatpush.msra.mxu3 %v4042_v35  ;;  %v3792_v4 = vmul.f32 %v4338_v12, %v3791_v52  ;;  %v3456_v33 = vpop.f32.mrf.mxu3  ;;  %v3373_v42 = vadd.f32 %v3372_v32, %v3344_v40  ;;  %v3401_v29 = vpop.f32.mrf.mxu1  ;;  %4259 = vmatpush.msrb.mxu2 %v4072_v18  ;;  %v4071_v40 = vld [vmem:[#allocation7 + $0x268] sm:$0xff]  ;;  %v6720_v50 = vld [vmem:[#allocation123_spill] sm:$0xff] }
 0x378   :  { %v3457_v2 = vadd.f32 %v3456_v33, %v3428_v60  ;;  %v2300_v46 = vadd.f32 %v6719_v30, %v2271_v7  ;;  %4192 = vmatpush.msrb.mxu0 %v4071_v40  ;;  %4261 = vmatpush.msrb.mxu1 %v4071_v40  ;;  %v6721_v7 = vld [vmem:[#allocation124_spill] sm:$0xff] }
 0x379   :  { %v3793_v25 = vmul.f32 0.5, %v3792_v4  ;;  %v3402_v23 = vadd.f32 %v3401_v29, %v3373_v42  ;;  %4257 = vmatpush.msrb.mxu3 %v4073_v16  ;;  %4262 = vmatpush.msrb.mxu2 %v4071_v40 }
 0x37a   :  { %v3727_v8 = vmul.f32 %v3457_v2, %v3457_v2  ;;  %v3712_v55 = vmul.f32 %v2300_v46, %v2300_v46  ;;  %v6723_v46 = vld [vmem:[#allocation126_spill] sm:$0xff] }
 0x37b   :  { %v3794_v49 = vsub.f32 1.5, %v3793_v25  ;;  %v3430_v31 = vpop.f32.mrf.mxu2  ;;  %4260 = vmatpush.msrb.mxu3 %v4072_v18 }
 0x37c   :  { %v4340_v14 = vpop.eup %4339  ;;  %v3747_v53 = vadd.f32 %v3727_v8, %v3707_v10  ;;  %v3431_v39 = vadd.f32 %v3430_v31, %v3402_v23  ;;  %v4068_v10 = vld [vmem:[#allocation7 + $0x250] sm:$0xff]  ;;  %v4067_v8 = vld [vmem:[#allocation7 + $0x248] sm:$0xff] }
 0x37d   :  { %v3795_v27 = vmul.f32 %v4338_v12, %v3794_v49  ;;  %v3851_v45 = vmul.f32 %v4340_v14, %v3742_v51  ;;  %v3860_v12 = vand.u32 2147483648, %v3742_v51  ;;  %4263 = vmatpush.msrb.mxu3 %v4071_v40 }
 0x37e   :  { %4341 = vrsqrt.f32 %v3747_v53  ;;  %v6237_v58 = vpop.f32.mrf.mxu0  ;;  %vm3917_vm12 = vcmp.eq.f32.partialorder %v3747_v53, inf  ;;  %v3920_v3 = vand.u32 2147483648, %v3747_v53  ;;  %vm3919_vm13 = vcmp.eq.f32.partialorder %v3747_v53, 0.0 }
 0x37f   :  { %v3796_v59 = vmul.f32 %v3795_v27, %v6208_v19  ;;  %v3852_v36 = vmul.f32 %v4340_v14, %v3851_v45  ;;  %v3459_v1 = vpop.f32.mrf.mxu3  ;;  %v4070_v27 = vld [vmem:[#allocation7 + $0x260] sm:$0xff] }
 0x380   :  { %v3460_v6 = vadd.f32 %v3459_v1, %v3431_v39  ;;  %4193 = vmatpush.msrb.mxu0 %v4070_v27  ;;  %4264 = vmatpush.msrb.mxu1 %v4070_v27 }
 0x381   :  { %v3798_v35 = vsel %vm3797_vm8, %v6208_v19, %v3796_v59  ;;  %v3853_v38 = vmul.f32 0.5, %v3852_v36  ;;  %v6239_v19 = vpop.f32.mrf.mxu1  ;;  %4265 = vmatpush.msrb.mxu2 %v4070_v27  ;;  %4266 = vmatpush.msrb.mxu3 %v4070_v27  ;;  %v6722_v36 = vld [vmem:[#allocation125_spill] sm:$0xff] }
 0x382   :  { %v3801_v41 = vsel %vm3799_vm9, %v3800_v28, %v3798_v35  ;;  %v3732_v21 = vmul.f32 %v3460_v6, %v3460_v6  ;;  %4194 = vmatpush.msrb.mxu0 %v4069_v24  ;;  %4267 = vmatpush.msrb.mxu1 %v4069_v24  ;;  %v4066_v28 = vld [vmem:[#allocation7 + $0x240] sm:$0xff]  ;;  %v3509_v31 = vadd.f32 %v6239_v19, %v6237_v58  ;;  %v6724_v6 = vld [vmem:[#allocation139_spill] sm:$0xff] }
 0x383   :  { %4177 = vmatmul.f32.vlgmr.msra.gmra.mxu3 %v3801_v41  ;;  %v3854_v56 = vsub.f32 1.5, %v3853_v38  ;;  %4268 = vmatpush.msrb.mxu2 %v4069_v24  ;;  %v4065_v41 = vld [vmem:[#allocation7 + $0x238] sm:$0xff]  ;;  %v4064_v38 = vld [vmem:[#allocation7 + $0x230] sm:$0xff] }
 0x384   :  { %v4342_v0 = vpop.eup %4341  ;;  %v3752_v43 = vadd.f32 %v3732_v21, %v3712_v55  ;;  %v6241_v48 = vpop.f32.mrf.mxu2  ;;  %4195 = vmatpush.msrb.mxu0 %v4068_v10  ;;  %4270 = vmatpush.msrb.mxu1 %v4068_v10  ;;  %v6726_v55 = vld [vmem:[#allocation128_spill] sm:$0xff] }
 0x385   :  { %v3855_v61 = vmul.f32 %v4340_v14, %v3854_v56  ;;  %v3911_v13 = vmul.f32 %v4342_v0, %v3747_v53  ;;  %4271 = vmatpush.msrb.mxu2 %v4068_v10  ;;  %4269 = vmatpush.msrb.mxu3 %v4069_v24  ;;  %v3538_v30 = vadd.f32 %v6241_v48, %v3509_v31  ;;  %v4063_v56 = vld [vmem:[#allocation7 + $0x228] sm:$0xff]  ;;  %v6728_v48 = vld [vmem:[#allocation140_spill] sm:$0xff]  ;;  %v6738_v31 = vld [vmem:[#allocation134_spill] sm:$0xff] }
 0x386   :  { %4343 = vrsqrt.f32 %v3752_v43  ;;  %v6243_v52 = vpop.f32.mrf.mxu0  ;;  %vm3977_vm14 = vcmp.eq.f32.partialorder %v3752_v43, inf  ;;  %v3980_v14 = vand.u32 2147483648, %v3752_v43  ;;  %vm3979_vm15 = vcmp.eq.f32.partialorder %v3752_v43, 0.0  ;;  %4196 = vmatpush.msrb.mxu0 %v4067_v8  ;;  %4273 = vmatpush.msrb.mxu1 %v4067_v8 }
 0x387   :  { %v3856_v54 = vmul.f32 %v3855_v61, %v3742_v51  ;;  %v3912_v9 = vmul.f32 %v4342_v0, %v3911_v13  ;;  %v6245_v62 = vpop.f32.mrf.mxu3  ;;  %4274 = vmatpush.msrb.mxu2 %v4067_v8  ;;  %4272 = vmatpush.msrb.mxu3 %v4068_v10  ;;  %v4062_v61 = vld [vmem:[#allocation7 + $0x220] sm:$0xff] }
 0x388   :  { %4197 = vmatpush.msrb.mxu0 %v4066_v28  ;;  %4276 = vmatpush.msrb.mxu1 %v4066_v28  ;;  %v3567_v19 = vadd.f32 %v6245_v62, %v3538_v30  ;;  %v4060_v62 = vld [vmem:[#allocation7 + $0x210] sm:$0xff] }
 0x389   :  { %v3858_v5 = vsel %vm3857_vm10, %v3742_v51, %v3856_v54  ;;  %v3913_v15 = vmul.f32 0.5, %v3912_v9  ;;  %v6247_v44 = vpop.f32.mrf.mxu1  ;;  %4277 = vmatpush.msrb.mxu2 %v4066_v28  ;;  %4275 = vmatpush.msrb.mxu3 %v4067_v8  ;;  %v6736_v8 = vld [vmem:[#allocation144_spill] sm:$0xff] }
 0x38a   :  { %v3861_v26 = vsel %vm3859_vm11, %v3860_v12, %v3858_v5  ;;  %4198 = vmatpush.msrb.mxu0 %v4065_v41  ;;  %4279 = vmatpush.msrb.mxu1 %v4065_v41  ;;  %v6727_v12 = vld [vmem:[#allocation129_spill] sm:$0xff] }
 0x38b   :  { %4180 = vmatmul.f32.gmra.mxu3 %v3861_v26  ;;  %v3914_v34 = vsub.f32 1.5, %v3913_v15  ;;  %4280 = vmatpush.msrb.mxu2 %v4065_v41 }
 0x38c   :  { %v4344_v4 = vpop.eup %4343  ;;  %4278 = vmatpush.msrb.mxu3 %v4066_v28  ;;  %4199 = vmatpush.msrb.mxu0 %v4064_v38 }
 0x38d   :  { %v3915_v37 = vmul.f32 %v4342_v0, %v3914_v34  ;;  %v3971_v17 = vmul.f32 %v4344_v4, %v3752_v43  ;;  %4282 = vmatpush.msrb.mxu1 %v4064_v38  ;;  %4283 = vmatpush.msrb.mxu2 %v4064_v38  ;;  %v6725_v0 = vld [vmem:[#allocation127_spill] sm:$0xff]  ;;  %v3512_v34 = vadd.f32 %v6247_v44, %v6243_v52 }
 0x38e   :  { %4281 = vmatpush.msrb.mxu3 %v4065_v41  ;;  %4200 = vmatpush.msrb.mxu0 %v4063_v56  ;;  %v2352_v21 = vadd.f32 %v6726_v55, %v6725_v0  ;;  %v6731_v52 = vld [vmem:[#allocation143_spill] sm:$0xff] }
 0x38f   :  { %v3916_v51 = vmul.f32 %v3915_v37, %v3747_v53  ;;  %v3972_v47 = vmul.f32 %v4344_v4, %v3971_v17  ;;  %4285 = vmatpush.msrb.mxu1 %v4063_v56  ;;  %4286 = vmatpush.msrb.mxu2 %v4063_v56  ;;  %v6729_v37 = vld [vmem:[#allocation141_spill] sm:$0xff]  ;;  %v6730_v17 = vld [vmem:[#allocation130_spill] sm:$0xff] }
 0x390   :  { %v6249_v57 = vpop.f32.mrf.mxu2  ;;  %v6251_v60 = vpop.f32.mrf.mxu0  ;;  %4284 = vmatpush.msrb.mxu3 %v4064_v38  ;;  %4201 = vmatpush.msrb.mxu0 %v4062_v61  ;;  %v2381_v5 = vadd.f32 %v6727_v12, %v2352_v21  ;;  %v6743_v21 = vld [vmem:[#allocation146_spill] sm:$0xff] }
 0x391   :  { %v3918_v63 = vsel %vm3917_vm12, %v3747_v53, %v3916_v51  ;;  %v3973_v22 = vmul.f32 0.5, %v3972_v47  ;;  %v6253_v33 = vpop.f32.mrf.mxu3  ;;  %v2349_v53 = vadd.f32 %v6721_v7, %v6720_v50  ;;  %4288 = vmatpush.msrb.mxu1 %v4062_v61  ;;  %4289 = vmatpush.msrb.mxu2 %v4062_v61  ;;  %v4059_v51 = vld [vmem:[#allocation7 + $0x208] sm:$0xff] }
 0x392   :  { %v3921_v25 = vsel %vm3919_vm13, %v3920_v3, %v3918_v63  ;;  %4287 = vmatpush.msrb.mxu3 %v4063_v56  ;;  %v2410_v3 = vadd.f32 %v6730_v17, %v2381_v5  ;;  %v6740_v56 = vld [vmem:[#allocation136_spill] sm:$0xff] }
 0x393   :  { %4183 = vmatmul.f32.gmra.mxu3 %v3921_v25  ;;  %v3974_v11 = vsub.f32 1.5, %v3973_v22  ;;  %v2378_v23 = vadd.f32 %v6722_v36, %v2349_v53  ;;  %v4058_v25 = vld [vmem:[#allocation7 + $0x200] sm:$0xff]  ;;  %v6732_v22 = vld [vmem:[#allocation131_spill] sm:$0xff] }
 0x394   :  { %v6255_v32 = vpop.f32.mrf.mxu1  ;;  %4290 = vmatpush.msrb.mxu3 %v4062_v61  ;;  %v2439_v44 = vadd.f32 %v6731_v52, %v2410_v3  ;;  %v6741_v61 = vld [vmem:[#allocation147_spill] sm:$0xff] }
 0x395   :  { %v3975_v49 = vmul.f32 %v4344_v4, %v3974_v11  ;;  %v2407_v39 = vadd.f32 %v6723_v46, %v2378_v23  ;;  %v3541_v4 = vadd.f32 %v6249_v57, %v3512_v34  ;;  %v6733_v11 = vld [vmem:[#allocation132_spill] sm:$0xff]  ;;  %v3515_v7 = vadd.f32 %v6255_v32, %v6251_v60  ;;  %v6737_v23 = vld [vmem:[#allocation145_spill] sm:$0xff] }
 0x396   :  { %v2355_v57 = vadd.f32 %v6733_v11, %v6732_v22  ;;  %v2468_v50 = vadd.f32 %v6736_v8, %v2439_v44  ;;  %v6742_v60 = vld [vmem:[#allocation137_spill] sm:$0xff] }
 0x397   :  { %v3976_v2 = vmul.f32 %v3975_v49, %v3752_v43  ;;  %v2436_v58 = vadd.f32 %v6724_v6, %v2407_v39  ;;  %v6734_v49 = vld [vmem:[#allocation142_spill] sm:$0xff]  ;;  %v6739_v39 = vld [vmem:[#allocation135_spill] sm:$0xff] }
 0x398   :  { %v2497_v41 = vadd.f32 %v6737_v23, %v2468_v50  ;;  %v2358_v6 = vadd.f32 %v6740_v56, %v6739_v39 }
 0x399   :  { %v3978_v20 = vsel %vm3977_vm14, %v3752_v43, %v3976_v2  ;;  %v4061_v43 = vld [vmem:[#allocation7 + $0x218] sm:$0xff]  ;;  %v2465_v15 = vadd.f32 %v6728_v48, %v2436_v58  ;;  %v3570_v2 = vadd.f32 %v6253_v33, %v3541_v4 }
 0x39a   :  { %v3981_v42 = vsel %vm3979_vm15, %v3980_v14, %v3978_v20  ;;  %4202 = vmatpush.msrb.mxu0 %v4061_v43  ;;  %4291 = vmatpush.msrb.mxu1 %v4061_v43  ;;  %v6735_v20 = vld [vmem:[#allocation133_spill] sm:$0xff]  ;;  %v2387_v32 = vadd.f32 %v6742_v60, %v2358_v6 }
 0x39b   :  { %v6257_v29 = vpop.f32.mrf.mxu2  ;;  %4186 = vmatmul.f32.gmra.mxu3 %v3981_v42  ;;  %4292 = vmatpush.msrb.mxu2 %v4061_v43  ;;  %v2494_v16 = vadd.f32 %v6729_v37, %v2465_v15  ;;  %v2384_v24 = vadd.f32 %v6735_v20, %v2355_v57  ;;  %v6745_v15 = vld [vmem:[#allocation138_spill] sm:$0xff]  ;;  %v6750_v20 = vld [vmem:[#allocation153_spill] sm:$0xff] }
 0x39c   :  { %v6261_v45 = vpop.f32.mrf.mxu3  ;;  %4203 = vmatpush.msrb.mxu0 %v4060_v62  ;;  %4294 = vmatpush.msrb.mxu1 %v4060_v62  ;;  %v3544_v33 = vadd.f32 %v6257_v29, %v3515_v7  ;;  %v2416_v34 = vadd.f32 %v6745_v15, %v2387_v32 }
 0x39d   :  { %4295 = vmatpush.msrb.mxu2 %v4060_v62  ;;  %4293 = vmatpush.msrb.mxu3 %v4061_v43  ;;  %v2523_v40 = vadd.f32 %v6734_v49, %v2494_v16  ;;  %v2413_v38 = vadd.f32 %v6738_v31, %v2384_v24  ;;  %v6749_v49 = vld [vmem:[#allocation152_spill] sm:$0xff] }
 0x39e   :  { %4204 = vmatpush.msrb.mxu0 %v4059_v51  ;;  %4297 = vmatpush.msrb.mxu1 %v4059_v51 }
 0x39f   :  { %4298 = vmatpush.msrb.mxu2 %v4059_v51  ;;  %4296 = vmatpush.msrb.mxu3 %v4060_v62  ;;  %v3698_v28 = vmul.f32 %v2523_v40, %v2523_v40  ;;  %v2442_v0 = vadd.f32 %v6741_v61, %v2413_v38 }
 0x3a0   :  { %4205 = vmatpush.msrb.mxu0 %v4058_v25  ;;  %4300 = vmatpush.msrb.mxu1 %v4058_v25 }
 0x3a1   :  { %4301 = vmatpush.msrb.mxu2 %v4058_v25  ;;  %4299 = vmatpush.msrb.mxu3 %v4059_v51  ;;  %v6746_v51 = vld [vmem:[#allocation149_spill] sm:$0xff] }
 0x3a3   :  { %4302 = vmatpush.msrb.mxu3 %v4058_v25 }
 0x3a6   :  { %v6259_v59 = vpop.f32.mrf.mxu0 }
 0x3a9   :  { %v6265_v35 = vpop.f32.mrf.mxu1 }
 0x3aa   :  { %v3518_v48 = vadd.f32 %v6265_v35, %v6259_v59  ;;  %v6748_v59 = vld [vmem:[#allocation150_spill] sm:$0xff] }
 0x3ad   :  { %v6272_v1 = vpop.f32.mrf.mxu2 }
 0x3ae   :  { %v3547_v3 = vadd.f32 %v6272_v1, %v3518_v48 }
 0x3af   :  { %v6278_v54 = vpop.f32.mrf.mxu3 }
 0x3b0   :  { %v3576_v11 = vadd.f32 %v6278_v54, %v3547_v3 }
 0x3b3   :  { %v3595_v13 = vpop.f32.mrf.mxu0 }
 0x3b4   :  { %v3596_v9 = vadd.f32 %v3595_v13, %v3567_v19  ;;  %v2526_v19 = vadd.f32 %v6743_v21, %v2497_v41  ;;  %v3573_v13 = vadd.f32 %v6261_v45, %v3544_v33  ;;  %v6747_v45 = vld [vmem:[#allocation151_spill] sm:$0xff]  ;;  %v6751_v41 = vld [vmem:[#allocation154_spill] sm:$0xff] }
 0x3b6   :  { %v3703_v62 = vmul.f32 %v2526_v19, %v2526_v19 }
 0x3b7   :  { %v3624_v26 = vpop.f32.mrf.mxu1  ;;  %v3653_v47 = vpop.f32.mrf.mxu2 }
 0x3b8   :  { %v3625_v63 = vadd.f32 %v3624_v26, %v3596_v9  ;;  %v6744_v9 = vld [vmem:[#allocation148_spill] sm:$0xff] }
 0x3b9   :  { %v2471_v26 = vadd.f32 %v6744_v9, %v2442_v0 }
 0x3ba   :  { %v3654_v18 = vadd.f32 %v3653_v47, %v3625_v63  ;;  %v2445_v63 = vadd.f32 %v6747_v45, %v2416_v34 }
 0x3bb   :  { %v2500_v17 = vadd.f32 %v6746_v51, %v2471_v26 }
 0x3bc   :  { %v2474_v40 = vadd.f32 %v6749_v49, %v2445_v63 }
 0x3bd   :  { %v2529_v35 = vadd.f32 %v6748_v59, %v2500_v17 }
 0x3be   :  { %v3598_v27 = vpop.f32.mrf.mxu0  ;;  %v3682_v14 = vpop.f32.mrf.mxu3  ;;  %v2503_v24 = vadd.f32 %v6750_v20, %v2474_v40 }
 0x3bf   :  { %v3599_v10 = vadd.f32 %v3598_v27, %v3570_v2  ;;  %v3683_v42 = vadd.f32 %v3682_v14, %v3654_v18  ;;  %v3627_v53 = vpop.f32.mrf.mxu1 }
 0x3c0   :  { %v2532_v54 = vadd.f32 %v6751_v41, %v2503_v24 }
 0x3c1   :  { %v3718_v36 = vmul.f32 %v3683_v42, %v3683_v42  ;;  %v3628_v30 = vadd.f32 %v3627_v53, %v3599_v10  ;;  %v3708_v42 = vmul.f32 %v2529_v35, %v2529_v35 }
 0x3c3   :  { %v3738_v46 = vadd.f32 %v3718_v36, %v3698_v28 }
 0x3c4   :  { %v3656_v58 = vpop.f32.mrf.mxu2 }
 0x3c5   :  { %4345 = vrsqrt.f32 %v3738_v46  ;;  %v3657_v55 = vadd.f32 %v3656_v58, %v3628_v30  ;;  %vm3809_vm0 = vcmp.eq.f32.partialorder %v3738_v46, inf  ;;  %v3812_v30 = vand.u32 2147483648, %v3738_v46 }
 0x3c6   :  { %vm3811_vm1 = vcmp.eq.f32.partialorder %v3738_v46, 0.0 }
 0x3c7   :  { %v3601_v43 = vpop.f32.mrf.mxu0  ;;  %v3685_v29 = vpop.f32.mrf.mxu3 }
 0x3c8   :  { %v3602_v12 = vadd.f32 %v3601_v43, %v3573_v13  ;;  %v3686_v5 = vadd.f32 %v3685_v29, %v3657_v55  ;;  %v3630_v37 = vpop.f32.mrf.mxu1  ;;  %v3713_v55 = vmul.f32 %v2532_v54, %v2532_v54 }
 0x3ca   :  { %v3723_v16 = vmul.f32 %v3686_v5, %v3686_v5  ;;  %v3631_v47 = vadd.f32 %v3630_v37, %v3602_v12 }
 0x3cb   :  { %v4346_v4 = vpop.eup %4345 }
 0x3cc   :  { %v3743_v25 = vadd.f32 %v3723_v16, %v3703_v62  ;;  %v3803_v52 = vmul.f32 %v4346_v4, %v3738_v46 }
 0x3ce   :  { %v3659_v44 = vpop.f32.mrf.mxu2  ;;  %4347 = vrsqrt.f32 %v3743_v25  ;;  %v3804_v22 = vmul.f32 %v4346_v4, %v3803_v52  ;;  %vm3869_vm2 = vcmp.eq.f32.partialorder %v3743_v25, inf  ;;  %v3872_v12 = vand.u32 2147483648, %v3743_v25 }
 0x3cf   :  { %v3660_v18 = vadd.f32 %v3659_v44, %v3631_v47  ;;  %vm3871_vm3 = vcmp.eq.f32.partialorder %v3743_v25, 0.0 }
 0x3d0   :  { %v3604_v57 = vpop.f32.mrf.mxu0  ;;  %v3688_v2 = vpop.f32.mrf.mxu3  ;;  %v3805_v27 = vmul.f32 0.5, %v3804_v22 }
 0x3d1   :  { %v3605_v14 = vadd.f32 %v3604_v57, %v3576_v11  ;;  %v3689_v1 = vadd.f32 %v3688_v2, %v3660_v18  ;;  %v3633_v7 = vpop.f32.mrf.mxu1 }
 0x3d2   :  { %v3806_v10 = vsub.f32 1.5, %v3805_v27 }
 0x3d3   :  { %v3728_v8 = vmul.f32 %v3689_v1, %v3689_v1  ;;  %v3634_v28 = vadd.f32 %v3633_v7, %v3605_v14 }
 0x3d4   :  { %v4348_v50 = vpop.eup %4347  ;;  %v3807_v53 = vmul.f32 %v4346_v4, %v3806_v10 }
 0x3d5   :  { %v3748_v36 = vadd.f32 %v3728_v8, %v3708_v42  ;;  %v3863_v23 = vmul.f32 %v4348_v50, %v3743_v25 }
 0x3d6   :  { %v3808_v31 = vmul.f32 %v3807_v53, %v3738_v46 }
 0x3d7   :  { %v3662_v33 = vpop.f32.mrf.mxu2  ;;  %4349 = vrsqrt.f32 %v3748_v36  ;;  %v3864_v39 = vmul.f32 %v4348_v50, %v3863_v23  ;;  %vm3929_vm4 = vcmp.eq.f32.partialorder %v3748_v36, inf  ;;  %v3932_v4 = vand.u32 2147483648, %v3748_v36 }
 0x3d8   :  { %v3663_v38 = vadd.f32 %v3662_v33, %v3634_v28  ;;  %v3810_v6 = vsel %vm3809_vm0, %v3738_v46, %v3808_v31  ;;  %vm3931_vm5 = vcmp.eq.f32.partialorder %v3748_v36, 0.0 }
 0x3d9   :  { %v3691_v56 = vpop.f32.mrf.mxu3  ;;  %v3813_v61 = vsel %vm3811_vm1, %v3812_v30, %v3810_v6  ;;  %v3865_v0 = vmul.f32 0.5, %v3864_v39  ;;  %v4091_v18 = vpop.f32.mrf.mxu0 }
 0x3da   :  { %v3692_v58 = vadd.f32 %v3691_v56, %v3663_v38  ;;  %4206 = vmatmul.f32.vlgmr.msrb.gmra.mxu0 %v3813_v61  ;;  %v4120_v22 = vpop.f32.mrf.mxu1 }
 0x3db   :  { %v3866_v32 = vsub.f32 1.5, %v3865_v0  ;;  %v4121_v27 = vadd.f32 %v4120_v22, %v4091_v18 }
 0x3dc   :  { %v3733_v60 = vmul.f32 %v3692_v58, %v3692_v58 }
 0x3dd   :  { %v4350_v21 = vpop.eup %4349  ;;  %v3867_v13 = vmul.f32 %v4348_v50, %v3866_v32 }
 0x3de   :  { %v3753_v19 = vadd.f32 %v3733_v60, %v3713_v55  ;;  %v3923_v43 = vmul.f32 %v4350_v21, %v3748_v36 }
 0x3df   :  { %v3868_v29 = vmul.f32 %v3867_v13, %v3743_v25 }
 0x3e0   :  { %4351 = vrsqrt.f32 %v3753_v19  ;;  %v3924_v5 = vmul.f32 %v4350_v21, %v3923_v43  ;;  %vm3989_vm6 = vcmp.eq.f32.partialorder %v3753_v19, inf  ;;  %vm3991_vm7 = vcmp.eq.f32.partialorder %v3753_v19, 0.0 }
 0x3e1   :  { %v3870_v9 = vsel %vm3869_vm2, %v3743_v25, %v3868_v29  ;;  %v3992_v25 = vand.u32 2147483648, %v3753_v19  ;;  %v4094_v59 = vpop.f32.mrf.mxu0  ;;  %v4149_v57 = vpop.f32.mrf.mxu2 }
 0x3e2   :  { %v3873_v26 = vsel %vm3871_vm3, %v3872_v12, %v3870_v9  ;;  %v3925_v46 = vmul.f32 0.5, %v3924_v5  ;;  %v4123_v35 = vpop.f32.mrf.mxu1  ;;  %v4150_v1 = vadd.f32 %v4149_v57, %v4121_v27 }
 0x3e3   :  { %4209 = vmatmul.f32.vlgmr.msrb.gmra.mxu1 %v3873_v26  ;;  %v4124_v50 = vadd.f32 %v4123_v35, %v4094_v59 }
 0x3e4   :  { %v3926_v48 = vsub.f32 1.5, %v3925_v46 }
 0x3e6   :  { %v4352_v15 = vpop.eup %4351  ;;  %v3927_v34 = vmul.f32 %v4350_v21, %v3926_v48 }
 0x3e7   :  { %v3983_v62 = vmul.f32 %v4352_v15, %v3753_v19 }
 0x3e8   :  { %v3928_v37 = vmul.f32 %v3927_v34, %v3748_v36 }
 0x3e9   :  { %v3984_v16 = vmul.f32 %v4352_v15, %v3983_v62  ;;  %v4097_v11 = vpop.f32.mrf.mxu0  ;;  %v4152_v14 = vpop.f32.mrf.mxu2 }
 0x3ea   :  { %v3930_v51 = vsel %vm3929_vm4, %v3748_v36, %v3928_v37  ;;  %v4126_v49 = vpop.f32.mrf.mxu1  ;;  %v4153_v53 = vadd.f32 %v4152_v14, %v4124_v50 }
 0x3eb   :  { %v3985_v17 = vmul.f32 0.5, %v3984_v16  ;;  %v3933_v3 = vsel %vm3931_vm5, %v3932_v4, %v3930_v51  ;;  %v4127_v39 = vadd.f32 %v4126_v49, %v4097_v11 }
 0x3ec   :  { %4212 = vmatmul.f32.vlgmr.msrb.gmra.mxu2 %v3933_v3 }
 0x3ed   :  { %v3986_v45 = vsub.f32 1.5, %v3985_v17 }
 0x3ef   :  { %v3987_v63 = vmul.f32 %v4352_v15, %v3986_v45 }
 0x3f1   :  { %v3988_v47 = vmul.f32 %v3987_v63, %v3753_v19  ;;  %v4100_v40 = vpop.f32.mrf.mxu0  ;;  %v4155_v28 = vpop.f32.mrf.mxu2 }
 0x3f2   :  { %v4129_v10 = vpop.f32.mrf.mxu1  ;;  %v4156_v6 = vadd.f32 %v4155_v28, %v4127_v39 }
 0x3f3   :  { %v3990_v52 = vsel %vm3989_vm6, %v3753_v19, %v3988_v47  ;;  %v4130_v32 = vadd.f32 %v4129_v10, %v4100_v40 }
 0x3f4   :  { %v3993_v44 = vsel %vm3991_vm7, %v3992_v25, %v3990_v52 }
 0x3f5   :  { %4215 = vmatmul.f32.vlgmr.msrb.gmra.mxu3 %v3993_v44 }
 0x3f9   :  { %v4158_v30 = vpop.f32.mrf.mxu2 }
 0x3fa   :  { %v4159_v19 = vadd.f32 %v4158_v30, %v4130_v32 }
 0x406   :  { %v4178_v2 = vpop.f32.mrf.mxu3 }
 0x407   :  { %v4179_v20 = vadd.f32 %v4178_v2, %v4150_v1 }
 0x40e   :  { %v4181_v7 = vpop.f32.mrf.mxu3 }
 0x40f   :  { %v4182_v36 = vadd.f32 %v4181_v7, %v4153_v53 }
 0x416   :  { %v4184_v38 = vpop.f32.mrf.mxu3 }
 0x417   :  { %v4185_v61 = vadd.f32 %v4184_v38, %v4156_v6 }
 0x41e   :  { %v4187_v0 = vpop.f32.mrf.mxu3 }
 0x41f   :  { %v4188_v13 = vadd.f32 %v4187_v0, %v4159_v19 }
 0x457   :  { %v4207_v24 = vpop.f32.mrf.mxu0 }
 0x458   :  { %v4208_v42 = vadd.f32 %v4207_v24, %v4179_v20 }
 0x45a   :  { %v4219_v8 = vmax.f32 %v4208_v42, 1e-05 }
 0x45c   :  { %4353 = vlog2.f32 %v4219_v8 }
 0x460   :  { %v4210_v23 = vpop.f32.mrf.mxu1 }
 0x461   :  { %v4211_v41 = vadd.f32 %v4210_v23, %v4182_v36 }
 0x462   :  { %v4354_v54 = vpop.eup %4353 }
 0x463   :  { %v4224_v33 = vmul.f32 0.6931472, %v4354_v54  ;;  %v4220_v31 = vmax.f32 %v4211_v41, 1e-05 }
 0x465   :  { %4231 = vst [vmem:[#allocation8] sm:$0xff] %v4224_v33  ;;  %4355 = vlog2.f32 %v4220_v31 }
 0x46b   :  { %v4356_v56 = vpop.eup %4355 }
 0x46c   :  { %v4226_v58 = vmul.f32 0.6931472, %v4356_v56 }
 0x46e   :  { %4232 = vst [vmem:[#allocation8 + $0x8] sm:$0xff] %v4226_v58 }
 0x46f   :  { %v4213_v55 = vpop.f32.mrf.mxu2 }
 0x470   :  { %v4214_v60 = vadd.f32 %v4213_v55, %v4185_v61 }
 0x472   :  { %v4221_v21 = vmax.f32 %v4214_v60, 1e-05 }
 0x474   :  { %4357 = vlog2.f32 %v4221_v21 }
 0x478   :  { %v4216_v43 = vpop.f32.mrf.mxu3 }
 0x479   :  { %v4217_v29 = vadd.f32 %v4216_v43, %v4188_v13 }
 0x47a   :  { %v4358_v12 = vpop.eup %4357 }
 0x47b   :  { %v4222_v5 = vmax.f32 %v4217_v29, 1e-05  ;;  %v4228_v9 = vmul.f32 0.6931472, %v4358_v12 }
 0x47d   :  { %4359 = vlog2.f32 %v4222_v5  ;;  %4233 = vst [vmem:[#allocation8 + $0x10] sm:$0xff] %v4228_v9 }
 0x483   :  { %v4360_v26 = vpop.eup %4359 }
 0x484   :  { %v4230_v46 = vmul.f32 0.6931472, %v4360_v26 }
 0x486   :  { %4234 = vst [vmem:[#allocation8 + $0x18] sm:$0xff] %v4230_v46 }
 0x487   :  { %4247 = dma.vmem_to_hbm [thread:$0]  %s4240_s4, 512, %s4242_s7, [#allocation4], %s4610_s30, %s4610_s30, %s4611_s0  }
 0x488   :  { %4601 = dma.done.wait [#allocation4], 512  }
 0x489   :  { %4602 = vsyncadd [#allocation4], 4294966784 }
 0x48a   :  { %4252 = vsyncpa [#allocation3], 1 }
 0x48b   :  { %4253 = vsyncpa [#allocation6], 1 }
 0x48c   :  { %4254 = vsyncpa [#allocation4], 1 }

</bundles_post_ra>
